<compile_context>
chip_gen: v7x
topology: tpu7x:2x2x1
jax: 0.10.0
libtpu: 0.0.40
codegen_flags: <defaults>
</compile_context>

<pallas_src>
import math
import numpy as np
import jax
import jax.numpy as jnp
from jax import lax
from jax.experimental import pallas as pl
from jax.experimental.pallas import tpu as pltpu

WINDOW_SIZE = 11
SIGMA = 1.5
C1 = 0.01 ** 2
C2 = 0.03 ** 2


def gaussian_1d(window_size, sigma):
    # deterministic "parameter" init, exactly mirroring gaussian() in the module
    g = np.array(
        [math.exp(-((x - window_size // 2) ** 2) / float(2 * sigma ** 2))
         for x in range(window_size)],
        dtype=np.float64,
    )
    g = g / g.sum()
    return g.astype(np.float32)


def _round_up(x, m):
    return ((x + m - 1) // m) * m


def _choose_tb(B, H8, W, Wo_pad, budget_bytes=24 * 1024 * 1024):
    """Pick slices-per-grid-step so the working set fits a v7x-safe VMEM budget."""
    per_slice = 4 * (4 * H8 * W          # 2 inputs x 2 pipeline buffers
                     + 3 * H8 * W        # elementwise moment products
                     + 2 * H8 * Wo_pad   # column-pass temporaries
                     + 12 * H8 * Wo_pad  # blurred moments + ssim temps
                     + H8 * H8           # per-slice rows of G_row
                     + 2 * Wo_pad)       # output double buffer
    fixed = 4 * W * Wo_pad + (2 << 20)   # G_col + slack
    tb = max(1, (budget_bytes - fixed) // max(per_slice, 1))
    tb = int(min(tb, B))
    if tb >= B:
        return B, 1
    tb = max(8, (tb // 8) * 8)           # keep output sublane dim 8-aligned
    if tb >= B:
        return B, 1
    nblk = -(-B // tb)
    return tb, nblk


def _make_ssim_kernel(H, W, TB, H8, Wo_pad):
    mask_rows = H8 > H
    mask_cols = Wo_pad > W

    def kernel(i1_ref, i2_ref, gcol_ref, growb_ref, out_ref):
        p1 = i1_ref[...]            # (TB, H8, W) f32 (rows >= H are zero)
        p2 = i2_ref[...]
        gcol = gcol_ref[...]        # (W, Wo_pad)   clipped banded Gaussian (cols)
        growb = growb_ref[...]      # (TB, H8, H8)  clipped banded Gaussian (rows)

        def blur(m):
            # separable "same" Gaussian conv on the MXU:
            #   column pass as one flat 2D matmul, row pass batched over slices.
            r = jnp.dot(m.reshape(TB * H8, W), gcol,
                        preferred_element_type=jnp.float32,
                        precision=lax.Precision.HIGHEST)
            r = r.reshape(TB, H8, Wo_pad)
            return jnp.einsum('brh,bhw->brw', growb, r,
                              preferred_element_type=jnp.float32,
                              precision=lax.Precision.HIGHEST)

        mu1 = blur(p1)
        mu2 = blur(p2)
        m11 = blur(p1 * p1)
        m22 = blur(p2 * p2)
        m12 = blur(p1 * p2)

        mu1_sq = mu1 * mu1
        mu2_sq = mu2 * mu2
        mu1_mu2 = mu1 * mu2
        sigma1_sq = m11 - mu1_sq
        sigma2_sq = m22 - mu2_sq
        sigma12 = m12 - mu1_mu2

        num = (2.0 * mu1_mu2 + C1) * (2.0 * sigma12 + C2)
        den = (mu1_sq + mu2_sq + C1) * (sigma1_sq + sigma2_sq + C2)
        ssim_map = num * pl.reciprocal(den, approx=False)   # (TB, H8, Wo_pad)

        # padded rows/cols produce SSIM == 1; exclude them from the sum.
        if mask_cols or mask_rows:
            ok = None
            if mask_cols:
                cidx = lax.broadcasted_iota(jnp.int32, ssim_map.shape, 2)
                ok = cidx < W
            if mask_rows:
                ridx = lax.broadcasted_iota(jnp.int32, ssim_map.shape, 1)
                rok = ridx < H
                ok = rok if ok is None else (ok & rok)
            ssim_map = jnp.where(ok, ssim_map, 0.0)

        # per-slice partial sums, lane-dense store; final reduction in wrapper.
        out_ref[...] = jnp.sum(ssim_map, axis=1)             # (TB, Wo_pad)

    return kernel


def ssim_rgb(img1, img2, window_size=WINDOW_SIZE, size_average=True):
    """SSIM_rgb.forward equivalent. img1, img2: (N, C, H, W) float32."""
    N, C, H, W = img1.shape
    P = window_size // 2
    B = N * C

    H8 = _round_up(H, 8)            # sublane-aligned row count (input & output)
    Wo_pad = _round_up(W, 128)      # lane-dense output width

    TB, nblk = _choose_tb(B, H8, W, Wo_pad)
    Bp = TB * nblk

    g = gaussian_1d(window_size, SIGMA)

    # Clipped banded separable-conv matrices (compile-time constants).  The
    # clipping at the image border reproduces F.conv2d's zero padding exactly,
    # so the inputs need no spatial padding.
    G_col = np.zeros((W, Wo_pad), np.float32)
    for w in range(W):
        lo, hi = max(0, w - P), min(W, w + P + 1)
        G_col[lo:hi, w] = g[lo - w + P: hi - w + P]
    G_row = np.zeros((H8, H8), np.float32)
    for r in range(H):
        lo, hi = max(0, r - P), min(H, r + P + 1)
        G_row[r, lo:hi] = g[lo - r + P: hi - r + P]
    G_row_b = np.broadcast_to(G_row[None], (TB, H8, H8)).copy()

    x1 = img1.reshape(B, H, W).astype(jnp.float32)
    x2 = img2.reshape(B, H, W).astype(jnp.float32)
    if Bp > B or H8 > H:            # tiny pad only when strictly necessary
        pad = ((0, Bp - B), (0, H8 - H), (0, 0))
        x1 = jnp.pad(x1, pad)
        x2 = jnp.pad(x2, pad)

    kernel = _make_ssim_kernel(H, W, TB, H8, Wo_pad)

    partials = pl.pallas_call(
        kernel,
        out_shape=jax.ShapeDtypeStruct((Bp, Wo_pad), jnp.float32),
        grid_spec=pltpu.PrefetchScalarGridSpec(
            num_scalar_prefetch=0,
            grid=(nblk,),
            in_specs=[
                pl.BlockSpec((TB, H8, W), lambda b: (b, 0, 0)),
                pl.BlockSpec((TB, H8, W), lambda b: (b, 0, 0)),
                pl.BlockSpec((W, Wo_pad), lambda b: (0, 0)),        # resident
                pl.BlockSpec((TB, H8, H8), lambda b: (0, 0, 0)),    # resident
            ],
            out_specs=pl.BlockSpec((TB, Wo_pad), lambda b: (b, 0)),
        ),
        compiler_params=pltpu.CompilerParams(
            dimension_semantics=("parallel",),
            vmem_limit_bytes=48 * 1024 * 1024,
        ),
    )(x1, x2, jnp.asarray(G_col), jnp.asarray(G_row_b))

    per_slice = jnp.sum(partials[:B], axis=1)        # (B,) sums over H*W pixels
    if size_average:
        return jnp.sum(per_slice) / jnp.float32(B * H * W)
    # per-sample means: ssim_map.mean(1).mean(1).mean(1)
    return jnp.sum(per_slice.reshape(N, C), axis=1) / jnp.float32(C * H * W)


def _ssim_numpy_map(img1, img2, window_size=WINDOW_SIZE, sigma=SIGMA):
    """Independent NumPy reference (direct 2D conv, float64). Returns ssim map."""
    g = gaussian_1d(window_size, sigma).astype(np.float64)
    w2d = np.outer(g, g)
    N, C, H, W = img1.shape
    P = window_size // 2

    def conv(x):
        xp = np.pad(x.astype(np.float64), ((0, 0), (0, 0), (P, P), (P, P)))
        out = np.zeros((N, C, H, W), dtype=np.float64)
        for i in range(window_size):
            for j in range(window_size):
                out += w2d[i, j] * xp[:, :, i:i + H, j:j + W]
        return out

    mu1 = conv(img1)
    mu2 = conv(img2)
    mu1_sq, mu2_sq, mu1_mu2 = mu1 ** 2, mu2 ** 2, mu1 * mu2
    sigma1_sq = conv(img1 * img1) - mu1_sq
    sigma2_sq = conv(img2 * img2) - mu2_sq
    sigma12 = conv(img1 * img2) - mu1_mu2
    return ((2 * mu1_mu2 + C1) * (2 * sigma12 + C2)) / (
        (mu1_sq + mu2_sq + C1) * (sigma1_sq + sigma2_sq + C2)
    )


if __name__ == "__main__":
    key = jax.random.PRNGKey(0)
    k1, k2 = jax.random.split(key)
    shape = (2, 4, 16, 16)  # (N, C, H, W)
    img1 = jax.random.uniform(k1, shape, dtype=jnp.float32)
    img2 = jax.random.uniform(k2, shape, dtype=jnp.float32)

    ref_map = _ssim_numpy_map(np.asarray(img1), np.asarray(img2))

    # size_average=True (module default)
    out = jax.block_until_ready(ssim_rgb(img1, img2))
    ref = float(ref_map.mean())
    assert abs(float(out) - ref) < 5e-4, (float(out), ref)

    # size_average=False (per-sample means)
    out_ps = jax.block_until_ready(ssim_rgb(img1, img2, size_average=False))
    ref_ps = ref_map.mean(axis=(1, 2, 3))
    assert np.allclose(np.asarray(out_ps), ref_ps, atol=5e-4), (out_ps, ref_ps)

    print("KERNEL_OK")
</pallas_src>

<mosaic_0001>
module attributes {stable_mosaic.version = 11 : i64} {
  func.func @kernel(%arg0: i32, %arg1: memref<8x16x16xf32, #tpu.memory_space<vmem>>, %arg2: memref<8x16x16xf32, #tpu.memory_space<vmem>>, %arg3: memref<16x128xf32, #tpu.memory_space<vmem>>, %arg4: memref<8x16x16xf32, #tpu.memory_space<vmem>>, %arg5: memref<8x128xf32, #tpu.memory_space<vmem>>) attributes {dimension_semantics = [#tpu.dimension_semantics<parallel>], iteration_bounds = array<i64: 1>, scalar_prefetch = 0 : i64, scratch_operands = 0 : i64, tpu.core_type = #tpu.core_type<tc>, window_params = [{transform_indices = @transform_0, window_bounds = array<i64: 8, 16, 16>}, {transform_indices = @transform_1, window_bounds = array<i64: 8, 16, 16>}, {pipeline_mode = #tpu.pipeline_mode<synchronous>, transform_indices = @transform_2, window_bounds = array<i64: 16, 128>}, {pipeline_mode = #tpu.pipeline_mode<synchronous>, transform_indices = @transform_3, window_bounds = array<i64: 8, 16, 16>}, {transform_indices = @transform_4, window_bounds = array<i64: 8, 128>}]} {
    %c0 = arith.constant 0 : index
    %c0_0 = arith.constant 0 : index
    %c0_1 = arith.constant 0 : index
    %0 = vector.load %arg1[%c0, %c0_0, %c0_1] : memref<8x16x16xf32, #tpu.memory_space<vmem>>, vector<8x16x16xf32>
    %c0_2 = arith.constant 0 : index
    %c0_3 = arith.constant 0 : index
    %c0_4 = arith.constant 0 : index
    %1 = vector.load %arg2[%c0_2, %c0_3, %c0_4] : memref<8x16x16xf32, #tpu.memory_space<vmem>>, vector<8x16x16xf32>
    %c0_5 = arith.constant 0 : index
    %c0_6 = arith.constant 0 : index
    %2 = vector.load %arg3[%c0_5, %c0_6] : memref<16x128xf32, #tpu.memory_space<vmem>>, vector<16x128xf32>
    %c0_7 = arith.constant 0 : index
    %c0_8 = arith.constant 0 : index
    %c0_9 = arith.constant 0 : index
    %3 = vector.load %arg4[%c0_7, %c0_8, %c0_9] : memref<8x16x16xf32, #tpu.memory_space<vmem>>, vector<8x16x16xf32>
    %4 = vector.shape_cast %0 : vector<8x16x16xf32> to vector<128x16xf32>
    %cst = arith.constant dense<0.000000e+00> : vector<128x128xf32>
    %5 = tpu.matmul %4, %2, %cst {dimension_numbers = #tpu.dot_dimension_numbers<[1], [0], [0], [1], [0, 0, 1, 1], [], []>, precision = #tpu.contract_precision<fp32>} : vector<128x16xf32>, vector<16x128xf32>, vector<128x128xf32> -> vector<128x128xf32>
    %6 = vector.shape_cast %5 : vector<128x128xf32> to vector<8x16x128xf32>
    "tpu.trace_start"() <{level = 10 : i32, message = "brh,bhw->brw"}> : () -> ()
    %cst_10 = arith.constant dense<0.000000e+00> : vector<8x16x128xf32>
    %7 = tpu.matmul %3, %6, %cst_10 {dimension_numbers = #tpu.dot_dimension_numbers<[2], [1], [1], [2], [0, 0, 0, 1, 1, 2], [0], [0]>, precision = #tpu.contract_precision<fp32>} : vector<8x16x16xf32>, vector<8x16x128xf32>, vector<8x16x128xf32> -> vector<8x16x128xf32>
    "tpu.trace_stop"() : () -> ()
    %8 = vector.shape_cast %1 : vector<8x16x16xf32> to vector<128x16xf32>
    %cst_11 = arith.constant dense<0.000000e+00> : vector<128x128xf32>
    %9 = tpu.matmul %8, %2, %cst_11 {dimension_numbers = #tpu.dot_dimension_numbers<[1], [0], [0], [1], [0, 0, 1, 1], [], []>, precision = #tpu.contract_precision<fp32>} : vector<128x16xf32>, vector<16x128xf32>, vector<128x128xf32> -> vector<128x128xf32>
    %10 = vector.shape_cast %9 : vector<128x128xf32> to vector<8x16x128xf32>
    "tpu.trace_start"() <{level = 10 : i32, message = "brh,bhw->brw"}> : () -> ()
    %cst_12 = arith.constant dense<0.000000e+00> : vector<8x16x128xf32>
    %11 = tpu.matmul %3, %10, %cst_12 {dimension_numbers = #tpu.dot_dimension_numbers<[2], [1], [1], [2], [0, 0, 0, 1, 1, 2], [0], [0]>, precision = #tpu.contract_precision<fp32>} : vector<8x16x16xf32>, vector<8x16x128xf32>, vector<8x16x128xf32> -> vector<8x16x128xf32>
    "tpu.trace_stop"() : () -> ()
    %12 = arith.mulf %0, %0 : vector<8x16x16xf32>
    %13 = vector.shape_cast %12 : vector<8x16x16xf32> to vector<128x16xf32>
    %cst_13 = arith.constant dense<0.000000e+00> : vector<128x128xf32>
    %14 = tpu.matmul %13, %2, %cst_13 {dimension_numbers = #tpu.dot_dimension_numbers<[1], [0], [0], [1], [0, 0, 1, 1], [], []>, precision = #tpu.contract_precision<fp32>} : vector<128x16xf32>, vector<16x128xf32>, vector<128x128xf32> -> vector<128x128xf32>
    %15 = vector.shape_cast %14 : vector<128x128xf32> to vector<8x16x128xf32>
    "tpu.trace_start"() <{level = 10 : i32, message = "brh,bhw->brw"}> : () -> ()
    %cst_14 = arith.constant dense<0.000000e+00> : vector<8x16x128xf32>
    %16 = tpu.matmul %3, %15, %cst_14 {dimension_numbers = #tpu.dot_dimension_numbers<[2], [1], [1], [2], [0, 0, 0, 1, 1, 2], [0], [0]>, precision = #tpu.contract_precision<fp32>} : vector<8x16x16xf32>, vector<8x16x128xf32>, vector<8x16x128xf32> -> vector<8x16x128xf32>
    "tpu.trace_stop"() : () -> ()
    %17 = arith.mulf %1, %1 : vector<8x16x16xf32>
    %18 = vector.shape_cast %17 : vector<8x16x16xf32> to vector<128x16xf32>
    %cst_15 = arith.constant dense<0.000000e+00> : vector<128x128xf32>
    %19 = tpu.matmul %18, %2, %cst_15 {dimension_numbers = #tpu.dot_dimension_numbers<[1], [0], [0], [1], [0, 0, 1, 1], [], []>, precision = #tpu.contract_precision<fp32>} : vector<128x16xf32>, vector<16x128xf32>, vector<128x128xf32> -> vector<128x128xf32>
    %20 = vector.shape_cast %19 : vector<128x128xf32> to vector<8x16x128xf32>
    "tpu.trace_start"() <{level = 10 : i32, message = "brh,bhw->brw"}> : () -> ()
    %cst_16 = arith.constant dense<0.000000e+00> : vector<8x16x128xf32>
    %21 = tpu.matmul %3, %20, %cst_16 {dimension_numbers = #tpu.dot_dimension_numbers<[2], [1], [1], [2], [0, 0, 0, 1, 1, 2], [0], [0]>, precision = #tpu.contract_precision<fp32>} : vector<8x16x16xf32>, vector<8x16x128xf32>, vector<8x16x128xf32> -> vector<8x16x128xf32>
    "tpu.trace_stop"() : () -> ()
    %22 = arith.mulf %0, %1 : vector<8x16x16xf32>
    %23 = vector.shape_cast %22 : vector<8x16x16xf32> to vector<128x16xf32>
    %cst_17 = arith.constant dense<0.000000e+00> : vector<128x128xf32>
    %24 = tpu.matmul %23, %2, %cst_17 {dimension_numbers = #tpu.dot_dimension_numbers<[1], [0], [0], [1], [0, 0, 1, 1], [], []>, precision = #tpu.contract_precision<fp32>} : vector<128x16xf32>, vector<16x128xf32>, vector<128x128xf32> -> vector<128x128xf32>
    %25 = vector.shape_cast %24 : vector<128x128xf32> to vector<8x16x128xf32>
    "tpu.trace_start"() <{level = 10 : i32, message = "brh,bhw->brw"}> : () -> ()
    %cst_18 = arith.constant dense<0.000000e+00> : vector<8x16x128xf32>
    %26 = tpu.matmul %3, %25, %cst_18 {dimension_numbers = #tpu.dot_dimension_numbers<[2], [1], [1], [2], [0, 0, 0, 1, 1, 2], [0], [0]>, precision = #tpu.contract_precision<fp32>} : vector<8x16x16xf32>, vector<8x16x128xf32>, vector<8x16x128xf32> -> vector<8x16x128xf32>
    "tpu.trace_stop"() : () -> ()
    %27 = arith.mulf %7, %7 : vector<8x16x128xf32>
    %28 = arith.mulf %11, %11 : vector<8x16x128xf32>
    %29 = arith.mulf %7, %11 : vector<8x16x128xf32>
    %30 = arith.subf %16, %27 : vector<8x16x128xf32>
    %31 = arith.subf %21, %28 : vector<8x16x128xf32>
    %32 = arith.subf %26, %29 : vector<8x16x128xf32>
    %cst_19 = arith.constant 2.000000e+00 : f32
    %33 = vector.broadcast %cst_19 : f32 to vector<8x16x128xf32>
    %34 = arith.mulf %33, %29 : vector<8x16x128xf32>
    %cst_20 = arith.constant 9.99999974E-5 : f32
    %35 = vector.broadcast %cst_20 : f32 to vector<8x16x128xf32>
    %36 = arith.addf %34, %35 : vector<8x16x128xf32>
    %cst_21 = arith.constant 2.000000e+00 : f32
    %37 = vector.broadcast %cst_21 : f32 to vector<8x16x128xf32>
    %38 = arith.mulf %37, %32 : vector<8x16x128xf32>
    %cst_22 = arith.constant 8.99999984E-4 : f32
    %39 = vector.broadcast %cst_22 : f32 to vector<8x16x128xf32>
    %40 = arith.addf %38, %39 : vector<8x16x128xf32>
    %41 = arith.mulf %36, %40 : vector<8x16x128xf32>
    %42 = arith.addf %27, %28 : vector<8x16x128xf32>
    %cst_23 = arith.constant 9.99999974E-5 : f32
    %43 = vector.broadcast %cst_23 : f32 to vector<8x16x128xf32>
    %44 = arith.addf %42, %43 : vector<8x16x128xf32>
    %45 = arith.addf %30, %31 : vector<8x16x128xf32>
    %cst_24 = arith.constant 8.99999984E-4 : f32
    %46 = vector.broadcast %cst_24 : f32 to vector<8x16x128xf32>
    %47 = arith.addf %45, %46 : vector<8x16x128xf32>
    %48 = arith.mulf %44, %47 : vector<8x16x128xf32>
    %49 = tpu.reciprocal %48 : vector<8x16x128xf32> -> vector<8x16x128xf32>
    %50 = arith.mulf %41, %49 : vector<8x16x128xf32>
    %51 = tpu.iota {dimensions = array<i32: 2>} : vector<8x16x128xi32>
    %c16_i32 = arith.constant 16 : i32
    %52 = vector.broadcast %c16_i32 : i32 to vector<8x16x128xi32>
    %53 = arith.cmpi slt, %51, %52 : vector<8x16x128xi32>
    %cst_25 = arith.constant 0.000000e+00 : f32
    %54 = vector.broadcast %cst_25 : f32 to vector<8x16x128xf32>
    %55 = arith.select %53, %50, %54 : vector<8x16x128xi1>, vector<8x16x128xf32>
    %cst_26 = arith.constant dense<0.000000e+00> : vector<8x128xf32>
    %56 = vector.multi_reduction <add>, %55, %cst_26 [1] : vector<8x16x128xf32> to vector<8x128xf32>
    %c0_27 = arith.constant 0 : index
    %c0_28 = arith.constant 0 : index
    %57 = vector.load %arg5[%c0_27, %c0_28] : memref<8x128xf32, #tpu.memory_space<vmem>>, vector<8x128xf32>
    tpu.vector_store %arg5[%c0_27, %c0_28], %56 {strides = array<i32>} : memref<8x128xf32, #tpu.memory_space<vmem>>, vector<8x128xf32>,
    return
  }
  func.func @transform_0(%arg0: i32) -> (i32, i32, i32) {
    %c0_i32 = arith.constant 0 : i32
    %c0_i32_0 = arith.constant 0 : i32
    %c0_i32_1 = arith.constant 0 : i32
    return %arg0, %c0_i32, %c0_i32_0 : i32, i32, i32
  }
  func.func @transform_1(%arg0: i32) -> (i32, i32, i32) {
    %c0_i32 = arith.constant 0 : i32
    %c0_i32_0 = arith.constant 0 : i32
    %c0_i32_1 = arith.constant 0 : i32
    return %arg0, %c0_i32, %c0_i32_0 : i32, i32, i32
  }
  func.func @transform_2(%arg0: i32) -> (i32, i32) {
    %c0_i32 = arith.constant 0 : i32
    %c0_i32_0 = arith.constant 0 : i32
    %c0_i32_1 = arith.constant 0 : i32
    return %c0_i32, %c0_i32_0 : i32, i32
  }
  func.func @transform_3(%arg0: i32) -> (i32, i32, i32) {
    %c0_i32 = arith.constant 0 : i32
    %c0_i32_0 = arith.constant 0 : i32
    %c0_i32_1 = arith.constant 0 : i32
    %c0_i32_2 = arith.constant 0 : i32
    return %c0_i32, %c0_i32_0, %c0_i32_1 : i32, i32, i32
  }
  func.func @transform_4(%arg0: i32) -> (i32, i32) {
    %c0_i32 = arith.constant 0 : i32
    %c0_i32_0 = arith.constant 0 : i32
    return %arg0, %c0_i32 : i32, i32
  }
}

</mosaic_0001>

<bundles_post_ra>
// kernel: tpu_custom_call.1
= control target key start
LH: loop header
LB: loop body
LE: loop exit
PB: predicated region body
PF: predicated region fallthrough
CT: control target
= control target key end

     0   :  { %9 = vsyncpa [#allocation3], 0  ;;  %s36296_s0 = inlined_call_operand.hbm [shape: f32[8,16,16], index: 0, kind: input, shape index: {}]   ;;  %s36297_s1 = inlined_call_operand.hbm [shape: f32[8,16,16], index: 1, kind: input, shape index: {}]   ;;  %s36298_s2 = inlined_call_operand.hbm [shape: f32[16,128], index: 2, kind: input, shape index: {}]   ;;  %s36299_s3 = inlined_call_operand.hbm [shape: f32[8,16,16], index: 3, kind: input, shape index: {}]   ;;  %s36300_s4 = inlined_call_operand.hbm [shape: f32[8,128], index: 4, kind: output, shape index: {}]  }
   0x1   :  { %10 = vsyncpa [#allocation6], 0 }
   0x2   :  { %11 = vsyncpa [#allocation9], 0 }
   0x3   :  { %12 = vsyncpa [#allocation4], 0  ;;  %s32581_s15 = smov [#allocation5]   ;;  %s32582_s17 = smov [#allocation2]  }
   0x4   :  { %s30_s16 = sshll.u32 %s32581_s15, 4  ;;  %s18_s18 = sshll.u32 %s32582_s17, 4  ;;  %s31_s16 = int_to_ptr.vmem [resolvable:$true] %s30_s16  ;;  %s32613_s18 = int_to_ptr.vmem [resolvable:$true] %s18_s18 }
   0x5   :  { %s32463_s21 = scalar_lea.hbm %s36297_s1, 2048 }
   0x6   :  { %p32464_p0 = scmp.ne.s32.totalorder %s36297_s1, %s32463_s21  ;;  %p32467_p1 = scmp.lt.u32.totalorder %s32463_s21, %s36297_s1 }
   0x8   :  { %p32469_p2 = pnand %p32467_p1, %p32464_p0 }
   0xa   :  { %32472 = shalt.err (!%p32469_p2)
}
   0xb   :  { %s32473_s26 = scalar_lea.vmem %s31_s16, 2048  ;;  %p32478_p4 = scmp.lt.s32.totalorder %s31_s16, %s31_s16 }
   0xc   :  { %p32474_p3 = scmp.ne.s32.totalorder %s31_s16, %s32473_s26  ;;  %p32479_p5 = scmp.lt.s32.totalorder %s32473_s26, %s32473_s26 }
   0xe   :  { %p32480_p6 = por %p32479_p5, %p32478_p4 }
  0x10   :  { %p32481_p7 = pnand %p32480_p6, %p32474_p3 }
  0x12   :  { %32484 = shalt.err (!%p32481_p7)
}
  0x13   :  { %s32583_s27 = smov 128   ;;  %s32584_s28 = smov 8  }
  0x14   :  { %36 = dma.hbm_to_vmem [thread:$0]  %s36297_s1, 2048, %s31_s16, [#allocation6], %s32583_s27, %s32583_s27, %s32584_s28  }
  0x15   :  { %s32485_s7 = scalar_lea.hbm %s36296_s0, 2048 }
  0x16   :  { %p32486_p8 = scmp.ne.s32.totalorder %s36296_s0, %s32485_s7  ;;  %p32489_p9 = scmp.lt.u32.totalorder %s32485_s7, %s36296_s0 }
  0x18   :  { %p32491_p10 = pnand %p32489_p9, %p32486_p8 }
  0x1a   :  { %32494 = shalt.err (!%p32491_p10)
}
  0x1b   :  { %s32495_s12 = scalar_lea.vmem %s32613_s18, 2048  ;;  %p32500_p12 = scmp.lt.s32.totalorder %s32613_s18, %s32613_s18 }
  0x1c   :  { %p32496_p11 = scmp.ne.s32.totalorder %s32613_s18, %s32495_s12  ;;  %p32501_p13 = scmp.lt.s32.totalorder %s32495_s12, %s32495_s12 }
  0x1e   :  { %p32502_p0 = por %p32501_p13, %p32500_p12 }
  0x20   :  { %p32503_p1 = pnand %p32502_p0, %p32496_p11 }
  0x22   :  { %32506 = shalt.err (!%p32503_p1)
}
  0x23   :  { %24 = dma.hbm_to_vmem [thread:$0]  %s36296_s0, 2048, %s32613_s18, [#allocation3], %s32583_s27, %s32583_s27, %s32584_s28  }
  0x24   :  { %s32585_s14 = smov [#allocation7]   ;;  %s32586_s16 = smov [#allocation8]  }
  0x25   :  { %s42_s15 = sshll.u32 %s32585_s14, 4  ;;  %s54_s17 = sshll.u32 %s32586_s16, 4  ;;  %s43_s15 = int_to_ptr.vmem [resolvable:$true] %s42_s15  ;;  %s32650_s17 = int_to_ptr.vmem [resolvable:$true] %s54_s17 }
  0x26   :  { %s32507_s21 = scalar_lea.hbm %s36298_s2, 256 }
  0x27   :  { %p32508_p2 = scmp.ne.s32.totalorder %s36298_s2, %s32507_s21  ;;  %p32511_p3 = scmp.lt.u32.totalorder %s32507_s21, %s36298_s2 }
  0x29   :  { %p32513_p4 = pnand %p32511_p3, %p32508_p2 }
  0x2b   :  { %32516 = shalt.err (!%p32513_p4)
}
  0x2c   :  { %s32517_s0 = scalar_lea.vmem %s43_s15, 256  ;;  %p32522_p6 = scmp.lt.s32.totalorder %s43_s15, %s43_s15 }
  0x2d   :  { %p32518_p5 = scmp.ne.s32.totalorder %s43_s15, %s32517_s0  ;;  %p32523_p7 = scmp.lt.s32.totalorder %s32517_s0, %s32517_s0 }
  0x2f   :  { %p32524_p8 = por %p32523_p7, %p32522_p6 }
  0x31   :  { %p32525_p9 = pnand %p32524_p8, %p32518_p5 }
  0x33   :  { %32528 = shalt.err (!%p32525_p9)
}
  0x34   :  { %48 = dma.hbm_to_vmem [thread:$0]  %s36298_s2, 256, %s43_s15, [#allocation6], %s32583_s27, %s32583_s27, %s32584_s28  }
  0x35   :  { %s32529_s5 = scalar_lea.hbm %s36299_s3, 2048 }
  0x36   :  { %p32530_p10 = scmp.ne.s32.totalorder %s36299_s3, %s32529_s5  ;;  %p32533_p11 = scmp.lt.u32.totalorder %s32529_s5, %s36299_s3 }
  0x38   :  { %p32535_p12 = pnand %p32533_p11, %p32530_p10 }
  0x3a   :  { %32538 = shalt.err (!%p32535_p12)
}
  0x3b   :  { %s32539_s10 = scalar_lea.vmem %s32650_s17, 2048  ;;  %p32544_p0 = scmp.lt.s32.totalorder %s32650_s17, %s32650_s17 }
  0x3c   :  { %p32540_p13 = scmp.ne.s32.totalorder %s32650_s17, %s32539_s10  ;;  %p32545_p1 = scmp.lt.s32.totalorder %s32539_s10, %s32539_s10 }
  0x3e   :  { %p32546_p2 = por %p32545_p1, %p32544_p0 }
  0x40   :  { %p32547_p3 = pnand %p32546_p2, %p32540_p13 }
  0x42   :  { %32550 = shalt.err (!%p32547_p3)
}
  0x43   :  { %60 = dma.hbm_to_vmem [thread:$0]  %s36299_s3, 2048, %s32650_s17, [#allocation9], %s32583_s27, %s32583_s27, %s32584_s28  }
  0x44   :  { %32573 = dma.done.wait [#allocation3], 2048  }
  0x45   :  { %32574 = vsyncadd [#allocation3], 4294965248 }
  0x46   :  { %32575 = dma.done.wait [#allocation6], 2304  }
  0x47   :  { %32576 = vsyncadd [#allocation6], 4294964992 }
  0x48   :  { %32577 = dma.done.wait [#allocation9], 2048  }
  0x49   :  { %32578 = vsyncadd [#allocation9], 4294965248  ;;  %vm123_vm0 = vcmask 130048   ;;  %v105_v0 = vld [vmem:[#allocation7] sm:$0xff]  ;;  %v106_v1 = vld [vmem:[#allocation7 + $0x8] sm:$0xff]  ;;  %vm26431_vm2 = vcmask 1041409  }
  0x4a   :  { %v32687_v2 = vld [vmem:[#allocation2] sm:$0xff]  ;;  %v173_v3 = vand.u32 4294901760, %v105_v0  ;;  %v176_v4 = vand.u32 4294901760, %v106_v1  ;;  %v32691_v6 = vld [vmem:[#allocation2 + $0x8] sm:$0xff]  ;;  %v75_v10 = vld [vmem:[#allocation2 + $0x10] sm:$0xff]  ;;  %vm26433_vm3 = vcmask 1042434  }
  0x4b   :  { %v125_v5 = vsel %vm123_vm0, %v32687_v2, 0  ;;  %v32695_v8 = vld [vmem:[#allocation5 + $0x8] sm:$0xff]  ;;  %v128_v9 = vsel %vm123_vm0, %v32691_v6, 0  ;;  %v76_v11 = vld [vmem:[#allocation2 + $0x18] sm:$0xff]  ;;  %v131_v16 = vsel %vm123_vm0, %v75_v10, 0  ;;  %v77_v18 = vld [vmem:[#allocation2 + $0x20] sm:$0xff] }
  0x4c   :  { %v32693_v7 = vand.u32 4294901760, %v125_v5  ;;  %v32699_v12 = vpack.c.bf16 %v176_v4, %v173_v3  ;;  %v32701_v13 = vand.u32 4294901760, %v128_v9  ;;  %v32705_v14 = vmul.f32 %v32695_v8, %v32691_v6  ;;  %v78_v24 = vld [vmem:[#allocation2 + $0x28] sm:$0xff]  ;;  %v79_v37 = vld [vmem:[#allocation2 + $0x30] sm:$0xff]  ;;  %v80_v46 = vld [vmem:[#allocation2 + $0x38] sm:$0xff]  ;;  %s32587_s3 = smov [#allocation10]  }
  0x4d   :  { %v134_v17 = vsel %vm123_vm0, %v76_v11, 0  ;;  %v32716_v20 = vand.u32 4294901760, %v131_v16  ;;  %v32722_v23 = vsub.f32 %v105_v0, %v173_v3  ;;  %v32728_v27 = vsub.f32 %v106_v1, %v176_v4  ;;  %v81_v47 = vld [vmem:[#allocation2 + $0x40] sm:$0xff]  ;;  %v82_v56 = vld [vmem:[#allocation2 + $0x48] sm:$0xff]  ;;  %v83_v57 = vld [vmem:[#allocation2 + $0x50] sm:$0xff]  ;;  %s26453_s27 = sshll.u32 %s32587_s3, 4  ;;  %s26454_s27 = int_to_ptr.vmem [resolvable:$true] %s26453_s27 }
  0x4e   :  { %36770 = vst [vmem:[#allocation15_spill] sm:$0xff] %v32705_v14  ;;  %v32708_v15 = vsub.f32 %v125_v5, %v32693_v7  ;;  %30485 = vmatprep.subr.bf16.mxu0 %v32699_v12  ;;  %v32714_v19 = vsub.f32 %v128_v9, %v32701_v13  ;;  %v32720_v22 = vand.u32 4294901760, %v134_v17  ;;  %v137_v28 = vsel %vm123_vm0, %v77_v18, 0  ;;  %v84_v3 = vld [vmem:[#allocation2 + $0x58] sm:$0xff]  ;;  %v85_v4 = vld [vmem:[#allocation2 + $0x60] sm:$0xff]  ;;  %s32551_s28 = scalar_lea.vmem %s26454_s27, 128  ;;  %p32556_p5 = scmp.lt.s32.totalorder %s26454_s27, %s26454_s27 }
  0x4f   :  { %30487 = vmatpush3.bf16.msra.mxu0 %v32699_v12  ;;  %v32726_v26 = vsub.f32 %v131_v16, %v32716_v20  ;;  %v402_v31 = vand.u32 4294901760, %v32722_v23  ;;  %v32738_v32 = vand.u32 4294901760, %v137_v28  ;;  %v409_v35 = vand.u32 4294901760, %v32728_v27  ;;  %v32405_v14 = vld [vmem:[#allocation2 + $0x20] sm:$0xff]  ;;  %p32552_p4 = scmp.ne.s32.totalorder %s26454_s27, %s32551_s28  ;;  %p32557_p6 = scmp.lt.s32.totalorder %s32551_s28, %s32551_s28 }
  0x50   :  { %v241_v21 = vand.u32 4294901760, %v32708_v15  ;;  %v251_v25 = vand.u32 4294901760, %v32714_v19  ;;  %v32735_v30 = vsub.f32 %v134_v17, %v32720_v22  ;;  %v140_v36 = vsel %vm123_vm0, %v78_v24, 0 }
  0x51   :  { %v261_v34 = vand.u32 4294901760, %v32726_v26  ;;  %v403_v40 = vsub.f32 %v32722_v23, %v402_v31  ;;  %v32751_v41 = vsub.f32 %v137_v28, %v32738_v32  ;;  %v410_v44 = vsub.f32 %v32728_v27, %v409_v35  ;;  %p32558_p7 = por %p32557_p6, %p32556_p5 }
  0x52   :  { %v242_v29 = vsub.f32 %v32708_v15, %v241_v21  ;;  %v252_v33 = vsub.f32 %v32714_v19, %v251_v25  ;;  %v271_v39 = vand.u32 4294901760, %v32735_v30  ;;  %v32759_v45 = vand.u32 4294901760, %v140_v36 }
  0x53   :  { %v262_v43 = vsub.f32 %v32726_v26, %v261_v34  ;;  %v404_v49 = vand.u32 4294901760, %v403_v40  ;;  %v281_v50 = vand.u32 4294901760, %v32751_v41  ;;  %v143_v51 = vsel %vm123_vm0, %v79_v37, 0  ;;  %v86_v37 = vld [vmem:[#allocation2 + $0x68] sm:$0xff]  ;;  %p32559_p8 = pnand %p32558_p7, %p32552_p4 }
  0x54   :  { %v243_v38 = vand.u32 4294901760, %v242_v29  ;;  %v253_v42 = vand.u32 4294901760, %v252_v33  ;;  %v272_v48 = vsub.f32 %v32735_v30, %v271_v39  ;;  %v411_v53 = vand.u32 4294901760, %v410_v44 }
  0x55   :  { %v263_v52 = vand.u32 4294901760, %v262_v43  ;;  %v32767_v54 = vsub.f32 %v140_v36, %v32759_v45  ;;  %v32769_v55 = vand.u32 4294901760, %v143_v51  ;;  %v282_v59 = vsub.f32 %v32751_v41, %v281_v50 }
  0x56   :  { %27968 = vmatprep.mubr.f32.mxu0 %v243_v38  ;;  %v273_v58 = vand.u32 4294901760, %v272_v48  ;;  %v146_v60 = vsel %vm123_vm0, %v80_v46, 0  ;;  %v149_v61 = vsel %vm123_vm0, %v81_v47, 0  ;;  %v32776_v62 = vpack.c.bf16 %v411_v53, %v404_v49  ;;  %v87_v49 = vld [vmem:[#allocation2 + $0x70] sm:$0xff] }
  0x57   :  { %27969 = vmatmul.mubr.f32.vlgmr.msra.gmra.mrb[0].mxu0 %v253_v42  ;;  %v291_v63 = vand.u32 4294901760, %v32767_v54  ;;  %v32780_v0 = vsub.f32 %v143_v51, %v32769_v55  ;;  %v32782_v1 = vand.u32 4294901760, %v146_v60  ;;  %v283_v5 = vand.u32 4294901760, %v282_v59 }
  0x58   :  { %27971 = vmatprep.mubr.f32.mxu0 %v263_v52  ;;  %36771 = vst [vmem:[#allocation16_spill] sm:$0xff] %v32776_v62  ;;  %v32784_v9 = vand.u32 4294901760, %v149_v61  ;;  %v152_v10 = vsel %vm123_vm0, %v82_v56, 0  ;;  %v155_v11 = vsel %vm123_vm0, %v83_v57, 0  ;;  %30489 = vmatprep.subr.bf16.mxu0 %v32776_v62  ;;  %v158_v33 = vsel %vm123_vm0, %v84_v3, 0 }
  0x59   :  { %v292_v16 = vsub.f32 %v32767_v54, %v291_v63  ;;  %v301_v17 = vand.u32 4294901760, %v32780_v0  ;;  %v32794_v18 = vsub.f32 %v146_v60, %v32782_v1  ;;  %v32796_v24 = vand.u32 4294901760, %v152_v10  ;;  %30491 = vmatpush3.bf16.msra.mxu0 %v32776_v62 }
  0x5a   :  { %v32800_v28 = vsub.f32 %v149_v61, %v32784_v9  ;;  %v32802_v29 = vand.u32 4294901760, %v155_v11  ;;  %v161_v36 = vsel %vm123_vm0, %v85_v4, 0  ;;  %v32817_v47 = vand.u32 4294901760, %v158_v33  ;;  %v88_v61 = vld [vmem:[#allocation2 + $0x78] sm:$0xff] }
  0x5b   :  { %27972 = vmatmul.mubr.f32.gmra.mrb[2].mxu0 %v273_v58  ;;  %v293_v38 = vand.u32 4294901760, %v292_v16  ;;  %v302_v40 = vsub.f32 %v32780_v0, %v301_v17  ;;  %v311_v42 = vand.u32 4294901760, %v32794_v18  ;;  %v32811_v43 = vsub.f32 %v152_v10, %v32796_v24 }
  0x5c   :  { %27974 = vmatprep.mubr.f32.mxu0 %v283_v5  ;;  %v321_v44 = vand.u32 4294901760, %v32800_v28  ;;  %v32815_v46 = vsub.f32 %v155_v11, %v32802_v29  ;;  %v32819_v48 = vand.u32 4294901760, %v161_v36  ;;  %v164_v56 = vsel %vm123_vm0, %v86_v37, 0 }
  0x5d   :  { %v303_v51 = vand.u32 4294901760, %v302_v40  ;;  %v312_v52 = vsub.f32 %v32794_v18, %v311_v42  ;;  %v331_v53 = vand.u32 4294901760, %v32811_v43  ;;  %v32831_v59 = vsub.f32 %v158_v33, %v32817_v47 }
  0x5e   :  { %v322_v57 = vsub.f32 %v32800_v28, %v321_v44  ;;  %v36301_v58 = vand.u32 4294901760, %v32815_v46  ;;  %v32834_v60 = vsub.f32 %v161_v36, %v32819_v48  ;;  %v32839_v5 = vand.u32 4294901760, %v164_v56 }
  0x5f   :  { %27975 = vmatmul.mubr.f32.gmra.mrb[4].mxu0 %v293_v38  ;;  %v313_v3 = vand.u32 4294901760, %v312_v52  ;;  %v332_v4 = vsub.f32 %v32811_v43, %v331_v53  ;;  %v167_v10 = vsel %vm123_vm0, %v87_v49, 0  ;;  %v36303_v33 = vand.u32 4294901760, %v32831_v59 }
  0x60   :  { %27977 = vmatprep.mubr.f32.mxu0 %v303_v51  ;;  %v323_v11 = vand.u32 4294901760, %v322_v57  ;;  %v342_v16 = vsub.f32 %v32815_v46, %v36301_v58  ;;  %v36302_v36 = vand.u32 4294901760, %v32834_v60  ;;  %v32848_v38 = vsub.f32 %v164_v56, %v32839_v5 }
  0x61   :  { %v333_v37 = vand.u32 4294901760, %v332_v4  ;;  %v32850_v40 = vand.u32 4294901760, %v167_v10  ;;  %v170_v51 = vsel %vm123_vm0, %v88_v61, 0  ;;  %v352_v52 = vsub.f32 %v32831_v59, %v36303_v33 }
  0x62   :  { %v343_v49 = vand.u32 4294901760, %v342_v16  ;;  %v362_v57 = vsub.f32 %v32834_v60, %v36302_v36  ;;  %v32859_v58 = vand.u32 4294901760, %v170_v51  ;;  %v32867_v61 = vpack.c.bf16 %v32728_v27, %v32722_v23 }
  0x63   :  { %27978 = vmatmul.mubr.f32.gmra.mrb[6].mxu0 %v313_v3  ;;  %v371_v3 = vand.u32 4294901760, %v32848_v38  ;;  %v32863_v56 = vsub.f32 %v167_v10, %v32850_v40  ;;  %v32873_v4 = vpack.c.bf16 %v409_v35, %v402_v31  ;;  %v353_v16 = vand.u32 4294901760, %v352_v52 }
  0x64   :  { %27980 = vmatprep.mubr.f32.mxu0 %v323_v11  ;;  %36772 = vst [vmem:[#allocation17_spill] sm:$0xff] %v32867_v61  ;;  %v32876_v11 = vsub.f32 %v170_v51, %v32859_v58  ;;  %30493 = vmatprep.subr.bf16.mxu0 %v32867_v61  ;;  %v363_v33 = vand.u32 4294901760, %v362_v57  ;;  %vm26435_vm4 = vcmask 1043459   ;;  %vm26437_vm5 = vcmask 1044484  }
  0x65   :  { %36773 = vst [vmem:[#allocation18_spill] sm:$0xff] %v32873_v4  ;;  %v372_v10 = vsub.f32 %v32848_v38, %v371_v3  ;;  %v381_v36 = vand.u32 4294901760, %v32863_v56  ;;  %vm26439_vm6 = vcmask 1045509   ;;  %vm26441_vm7 = vcmask 1046534  }
  0x66   :  { %v391_v23 = vand.u32 4294901760, %v32876_v11  ;;  %vm26443_vm8 = vcmask 1047559  }
  0x67   :  { %27981 = vmatmul.mubr.f32.gmra.mrb[8].mxu0 %v333_v37  ;;  %v382_v27 = vsub.f32 %v32863_v56, %v381_v36  ;;  %v373_v31 = vand.u32 4294901760, %v372_v10 }
  0x68   :  { %27983 = vmatprep.mubr.f32.mxu0 %v343_v49  ;;  %v392_v35 = vsub.f32 %v32876_v11, %v391_v23 }
  0x69   :  { %v383_v37 = vand.u32 4294901760, %v382_v27 }
  0x6a   :  { %v393_v51 = vand.u32 4294901760, %v392_v35 }
  0x6b   :  { %27984 = vmatmul.mubr.f32.gmra.mrb[10].mxu0 %v353_v16 }
  0x6c   :  { %27986 = vmatprep.mubr.f32.mxu0 %v363_v33  ;;  %v98_v33 = vld [vmem:[#allocation5 + $0x48] sm:$0xff] }
  0x6d   :  { %v5368_v10 = vsel %vm123_vm0, %v98_v33, 0 }
  0x6f   :  { %27987 = vmatmul.mubr.f32.gmra.mrb[12].mxu0 %v373_v31 }
  0x70   :  { %27989 = vmatprep.mubr.f32.mxu0 %v383_v37 }
  0x73   :  { %27990 = vmatmul.mubr.f32.gmra.mrb[14].mxu0 %v393_v51 }
  0x74   :  { %27996 = vmatprep.mubr.f32.mxu0 %v32693_v7 }
  0x77   :  { %27997 = vmatmul.mubr.f32.vlgmr.msra.gmra.mrb[0].mxu0 %v32701_v13 }
  0x78   :  { %27999 = vmatprep.mubr.f32.mxu0 %v32716_v20  ;;  %30495 = vmatpush3.bf16.msra.mxu0 %v32867_v61 }
  0x79   :  { %30497 = vmatprep.subr.bf16.mxu0 %v32699_v12 }
  0x7b   :  { %28000 = vmatmul.mubr.f32.gmra.mrb[2].mxu0 %v32720_v22 }
  0x7c   :  { %28002 = vmatprep.mubr.f32.mxu0 %v32738_v32 }
  0x7f   :  { %28003 = vmatmul.mubr.f32.gmra.mrb[4].mxu0 %v32759_v45 }
  0x80   :  { %28005 = vmatprep.mubr.f32.mxu0 %v32769_v55 }
  0x83   :  { %28006 = vmatmul.mubr.f32.gmra.mrb[6].mxu0 %v32782_v1 }
  0x84   :  { %28008 = vmatprep.mubr.f32.mxu0 %v32784_v9 }
  0x87   :  { %28009 = vmatmul.mubr.f32.gmra.mrb[8].mxu0 %v32796_v24 }
  0x88   :  { %28011 = vmatprep.mubr.f32.mxu0 %v32802_v29 }
  0x8b   :  { %28012 = vmatmul.mubr.f32.gmra.mrb[10].mxu0 %v32817_v47 }
  0x8c   :  { %28014 = vmatprep.mubr.f32.mxu0 %v32819_v48 }
  0x8f   :  { %28015 = vmatmul.mubr.f32.gmra.mrb[12].mxu0 %v32839_v5 }
  0x90   :  { %28017 = vmatprep.mubr.f32.mxu0 %v32850_v40 }
  0x93   :  { %28018 = vmatmul.mubr.f32.gmra.mrb[14].mxu0 %v32859_v58 }
  0x94   :  { %28024 = vmatprep.mubr.f32.mxu0 %v32708_v15  ;;  %v36774_v15 = vand.u32 4294901760, %v32815_v46 }
  0x97   :  { %28025 = vmatmul.mubr.f32.vlgmr.msra.gmra.mrb[0].mxu0 %v32714_v19  ;;  %v36775_v19 = vand.u32 4294901760, %v32831_v59 }
  0x98   :  { %28027 = vmatprep.mubr.f32.mxu0 %v32726_v26  ;;  %30499 = vmatpush3.bf16.msra.mxu0 %v32699_v12 }
  0x99   :  { %30501 = vmatprep.subr.bf16.mxu0 %v32873_v4 }
  0x9b   :  { %28028 = vmatmul.mubr.f32.gmra.mrb[2].mxu0 %v32735_v30  ;;  %v91_v30 = vld [vmem:[#allocation5 + $0x10] sm:$0xff] }
  0x9c   :  { %28030 = vmatprep.mubr.f32.mxu0 %v32751_v41 }
  0x9f   :  { %28031 = vmatmul.mubr.f32.gmra.mrb[4].mxu0 %v32767_v54  ;;  %v95_v54 = vld [vmem:[#allocation5 + $0x30] sm:$0xff] }
  0xa0   :  { %28033 = vmatprep.mubr.f32.mxu0 %v32780_v0 }
  0xa3   :  { %28034 = vmatmul.mubr.f32.gmra.mrb[6].mxu0 %v32794_v18 }
  0xa4   :  { %28036 = vmatprep.mubr.f32.mxu0 %v32800_v28  ;;  %v96_v28 = vld [vmem:[#allocation5 + $0x38] sm:$0xff] }
  0xa7   :  { %28037 = vmatmul.mubr.f32.gmra.mrb[8].mxu0 %v32811_v43 }
  0xa8   :  { %28039 = vmatprep.mubr.f32.mxu0 %v32815_v46 }
  0xab   :  { %28040 = vmatmul.mubr.f32.gmra.mrb[10].mxu0 %v32831_v59 }
  0xac   :  { %28042 = vmatprep.mubr.f32.mxu0 %v32834_v60 }
  0xaf   :  { %28043 = vmatmul.mubr.f32.gmra.mrb[12].mxu0 %v32848_v38 }
  0xb0   :  { %28045 = vmatprep.mubr.f32.mxu0 %v32863_v56 }
  0xb3   :  { %28046 = vmatmul.mubr.f32.gmra.mrb[14].mxu0 %v32876_v11 }
  0xb4   :  { %28052 = vmatprep.mubr.f32.mxu0 %v241_v21  ;;  %v36776_v21 = vand.u32 4294901760, %v32834_v60 }
  0xb7   :  { %28053 = vmatmul.mubr.f32.vlgmr.msra.gmra.mrb[0].mxu0 %v251_v25  ;;  %v89_v25 = vld [vmem:[#allocation5] sm:$0xff] }
  0xb8   :  { %28055 = vmatprep.mubr.f32.mxu0 %v261_v34  ;;  %30503 = vmatpush3.bf16.msra.mxu0 %v32873_v4  ;;  %v5341_v26 = vsel %vm123_vm0, %v89_v25, 0  ;;  %v92_v34 = vld [vmem:[#allocation5 + $0x18] sm:$0xff] }
  0xb9   :  { %30505 = vmatprep.subr.bf16.mxu0 %v32699_v12 }
  0xbb   :  { %28056 = vmatmul.mubr.f32.gmra.mrb[2].mxu0 %v271_v39  ;;  %v93_v39 = vld [vmem:[#allocation5 + $0x20] sm:$0xff] }
  0xbc   :  { %28058 = vmatprep.mubr.f32.mxu0 %v281_v50  ;;  %v94_v50 = vld [vmem:[#allocation5 + $0x28] sm:$0xff] }
  0xbd   :  { %v5356_v0 = vsel %vm123_vm0, %v94_v50, 0 }
  0xbf   :  { %28059 = vmatmul.mubr.f32.gmra.mrb[4].mxu0 %v291_v63 }
  0xc0   :  { %28061 = vmatprep.mubr.f32.mxu0 %v301_v17 }
  0xc3   :  { %28062 = vmatmul.mubr.f32.gmra.mrb[6].mxu0 %v311_v42  ;;  %v33019_v42 = vand.u32 4294901760, %v5356_v0 }
  0xc4   :  { %28064 = vmatprep.mubr.f32.mxu0 %v321_v44 }
  0xc7   :  { %28065 = vmatmul.mubr.f32.gmra.mrb[8].mxu0 %v331_v53 }
  0xc8   :  { %28067 = vmatprep.mubr.f32.mxu0 %v36774_v15 }
  0xcb   :  { %28068 = vmatmul.mubr.f32.gmra.mrb[10].mxu0 %v36775_v19  ;;  %v33072_v19 = vand.u32 4294901760, %v5368_v10 }
  0xcc   :  { %28070 = vmatprep.mubr.f32.mxu0 %v36776_v21 }
  0xcf   :  { %28071 = vmatmul.mubr.f32.gmra.mrb[12].mxu0 %v371_v3 }
  0xd0   :  { %28073 = vmatprep.mubr.f32.mxu0 %v381_v36  ;;  %v33039_v36 = vsub.f32 %v5356_v0, %v33019_v42 }
  0xd2   :  { %v5507_v27 = vand.u32 4294901760, %v33039_v36 }
  0xd3   :  { %28074 = vmatmul.mubr.f32.gmra.mrb[14].mxu0 %v391_v23  ;;  %v100_v23 = vld [vmem:[#allocation5 + $0x58] sm:$0xff] }
  0xd4   :  { %28080 = vmatprep.mubr.f32.mxu0 %v32693_v7 }
  0xd7   :  { %28081 = vmatmul.mubr.f32.vlgmr.msra.gmra.mrb[0].mxu0 %v32701_v13 }
  0xd8   :  { %28083 = vmatprep.mubr.f32.mxu0 %v32716_v20  ;;  %30507 = vmatpush3.bf16.msra.mxu0 %v32699_v12 }
  0xd9   :  { %30701 = vmatprep.subr.bf16.mxu0 %v32699_v12 }
  0xdb   :  { %28084 = vmatmul.mubr.f32.gmra.mrb[2].mxu0 %v32720_v22 }
  0xdc   :  { %28086 = vmatprep.mubr.f32.mxu0 %v32738_v32 }
  0xdf   :  { %28087 = vmatmul.mubr.f32.gmra.mrb[4].mxu0 %v32759_v45 }
  0xe0   :  { %28089 = vmatprep.mubr.f32.mxu0 %v32769_v55 }
  0xe3   :  { %28090 = vmatmul.mubr.f32.gmra.mrb[6].mxu0 %v32782_v1 }
  0xe4   :  { %28092 = vmatprep.mubr.f32.mxu0 %v32784_v9 }
  0xe7   :  { %28093 = vmatmul.mubr.f32.gmra.mrb[8].mxu0 %v32796_v24 }
  0xe8   :  { %28095 = vmatprep.mubr.f32.mxu0 %v32802_v29 }
  0xeb   :  { %28096 = vmatmul.mubr.f32.gmra.mrb[10].mxu0 %v32817_v47 }
  0xec   :  { %28098 = vmatprep.mubr.f32.mxu0 %v32819_v48 }
  0xef   :  { %28099 = vmatmul.mubr.f32.gmra.mrb[12].mxu0 %v32839_v5 }
  0xf0   :  { %28101 = vmatprep.mubr.f32.mxu0 %v32850_v40 }
  0xf3   :  { %28102 = vmatmul.mubr.f32.gmra.mrb[14].mxu0 %v32859_v58 }
  0xf4   :  { %28108 = vmatprep.mubr.f32.mxu0 %v32693_v7  ;;  %v32988_v7 = vand.u32 4294901760, %v5341_v26 }
  0xf7   :  { %28109 = vmatmul.mubr.f32.vlgmr.msra.gmra.mrb[0].mxu0 %v32701_v13  ;;  %v5344_v13 = vsel %vm123_vm0, %v32695_v8, 0  ;;  %v5353_v8 = vsel %vm123_vm0, %v93_v39, 0 }
  0xf8   :  { %28111 = vmatprep.mubr.f32.mxu0 %v32716_v20  ;;  %30703 = vmatpush3.bf16.msra.mxu0 %v32699_v12  ;;  %v5347_v20 = vsel %vm123_vm0, %v91_v30, 0  ;;  %v33017_v18 = vand.u32 4294901760, %v5353_v8 }
  0xf9   :  { %30705 = vmatprep.subr.bf16.mxu0 %v32776_v62  ;;  %v33000_v41 = vand.u32 4294901760, %v5347_v20 }
  0xfa   :  { %v33035_v60 = vsub.f32 %v5353_v8, %v33017_v18  ;;  %v33090_v8 = vsub.f32 %v5368_v10, %v33072_v19 }
  0xfb   :  { %28112 = vmatmul.mubr.f32.gmra.mrb[2].mxu0 %v32720_v22  ;;  %v32994_v22 = vand.u32 4294901760, %v5344_v13  ;;  %v33015_v17 = vsub.f32 %v5347_v20, %v33000_v41  ;;  %v5508_v20 = vsub.f32 %v33039_v36, %v5507_v27 }
  0xfc   :  { %28114 = vmatprep.mubr.f32.mxu0 %v32738_v32  ;;  %v32998_v32 = vsub.f32 %v5341_v26, %v32988_v7  ;;  %v5497_v16 = vand.u32 4294901760, %v33035_v60 }
  0xfd   :  { %v5477_v59 = vand.u32 4294901760, %v33015_v17  ;;  %v5509_v33 = vand.u32 4294901760, %v5508_v20 }
  0xfe   :  { %v5498_v25 = vsub.f32 %v33035_v60, %v5497_v16 }
  0xff   :  { %28115 = vmatmul.mubr.f32.gmra.mrb[4].mxu0 %v32759_v45  ;;  %v5350_v45 = vsel %vm123_vm0, %v92_v34, 0  ;;  %v5478_v11 = vsub.f32 %v33015_v17, %v5477_v59 }
 0x100   :  { %28117 = vmatprep.mubr.f32.mxu0 %v32769_v55  ;;  %v33006_v55 = vsub.f32 %v5344_v13, %v32994_v22  ;;  %v33008_v63 = vand.u32 4294901760, %v5350_v45  ;;  %v102_v13 = vld [vmem:[#allocation5 + $0x68] sm:$0xff] }
 0x101   :  { %v5479_v21 = vand.u32 4294901760, %v5478_v11  ;;  %v5547_v11 = vand.u32 4294901760, %v33090_v8 }
 0x102   :  { %v5467_v44 = vand.u32 4294901760, %v33006_v55  ;;  %v33026_v46 = vsub.f32 %v5350_v45, %v33008_v63  ;;  %v103_v45 = vld [vmem:[#allocation5 + $0x70] sm:$0xff] }
 0x103   :  { %28118 = vmatmul.mubr.f32.gmra.mrb[6].mxu0 %v32782_v1  ;;  %v5359_v1 = vsel %vm123_vm0, %v95_v54, 0 }
 0x104   :  { %28120 = vmatprep.mubr.f32.mxu0 %v32784_v9  ;;  %v5457_v9 = vand.u32 4294901760, %v32998_v32  ;;  %v33021_v43 = vand.u32 4294901760, %v5359_v1  ;;  %v5468_v52 = vsub.f32 %v33006_v55, %v5467_v44  ;;  %v5487_v57 = vand.u32 4294901760, %v33026_v46 }
 0x106   :  { %v5458_v53 = vsub.f32 %v32998_v32, %v5457_v9  ;;  %v33042_v38 = vsub.f32 %v5359_v1, %v33021_v43  ;;  %v5469_v37 = vand.u32 4294901760, %v5468_v52  ;;  %v5488_v51 = vsub.f32 %v33026_v46, %v5487_v57 }
 0x107   :  { %28121 = vmatmul.mubr.f32.gmra.mrb[8].mxu0 %v32796_v24  ;;  %v97_v24 = vld [vmem:[#allocation5 + $0x40] sm:$0xff]  ;;  %v5499_v1 = vand.u32 4294901760, %v5498_v25  ;;  %v5548_v25 = vsub.f32 %v33090_v8, %v5547_v11 }
 0x108   :  { %28123 = vmatprep.mubr.f32.mxu0 %v32802_v29  ;;  %v5362_v29 = vsel %vm123_vm0, %v96_v28, 0  ;;  %v5459_v56 = vand.u32 4294901760, %v5458_v53  ;;  %v5517_v31 = vand.u32 4294901760, %v33042_v38  ;;  %v5489_v50 = vand.u32 4294901760, %v5488_v51 }
 0x109   :  { %v33044_v49 = vand.u32 4294901760, %v5362_v29  ;;  %v5383_v53 = vsel %vm123_vm0, %v103_v45, 0 }
 0x10a   :  { %v5518_v34 = vsub.f32 %v33042_v38, %v5517_v31 }
 0x10b   :  { %28124 = vmatmul.mubr.f32.gmra.mrb[10].mxu0 %v32817_v47  ;;  %v5365_v47 = vsel %vm123_vm0, %v97_v24, 0  ;;  %v33063_v35 = vsub.f32 %v5362_v29, %v33044_v49  ;;  %v5380_v29 = vsel %vm123_vm0, %v102_v13, 0 }
 0x10c   :  { %28126 = vmatprep.mubr.f32.mxu0 %v32819_v48  ;;  %v99_v48 = vld [vmem:[#allocation5 + $0x50] sm:$0xff]  ;;  %v33051_v3 = vand.u32 4294901760, %v5365_v47 }
 0x10d   :  { %v5527_v39 = vand.u32 4294901760, %v33063_v35 }
 0x10e   :  { %v33070_v15 = vsub.f32 %v5365_v47, %v33051_v3  ;;  %v104_v47 = vld [vmem:[#allocation5 + $0x78] sm:$0xff] }
 0x10f   :  { %28127 = vmatmul.mubr.f32.gmra.mrb[12].mxu0 %v32839_v5  ;;  %v5371_v5 = vsel %vm123_vm0, %v99_v48, 0  ;;  %v5519_v48 = vand.u32 4294901760, %v5518_v34  ;;  %v5528_v52 = vsub.f32 %v33063_v35, %v5527_v39  ;;  %v5386_v51 = vsel %vm123_vm0, %v104_v47, 0 }
 0x110   :  { %28129 = vmatprep.mubr.f32.mxu0 %v32850_v40  ;;  %v101_v40 = vld [vmem:[#allocation5 + $0x60] sm:$0xff]  ;;  %v33077_v26 = vand.u32 4294901760, %v5371_v5  ;;  %v5537_v54 = vand.u32 4294901760, %v33070_v15  ;;  %v33129_v20 = vand.u32 4294901760, %v5386_v51 }
 0x111   :  { %v5377_v30 = vsel %vm123_vm0, %v101_v40, 0 }
 0x112   :  { %v33095_v28 = vsub.f32 %v5371_v5, %v33077_v26  ;;  %v33097_v24 = vand.u32 4294901760, %v5377_v30  ;;  %v33113_v5 = vand.u32 4294901760, %v5380_v29 }
 0x113   :  { %28130 = vmatmul.mubr.f32.gmra.mrb[14].mxu0 %v32859_v58  ;;  %v5374_v58 = vsel %vm123_vm0, %v100_v23, 0 }
 0x114   :  { %28472 = vmatprep.mubr.f32.mxu0 %v5459_v56  ;;  %v33092_v0 = vand.u32 4294901760, %v5374_v58  ;;  %v5538_v56 = vsub.f32 %v33070_v15, %v5537_v54  ;;  %v5557_v23 = vand.u32 4294901760, %v33095_v28  ;;  %v33117_v40 = vsub.f32 %v5377_v30, %v33097_v24 }
 0x115   :  { %v33127_v13 = vsub.f32 %v5380_v29, %v33113_v5 }
 0x116   :  { %v33111_v10 = vsub.f32 %v5374_v58, %v33092_v0  ;;  %v5539_v30 = vand.u32 4294901760, %v5538_v56  ;;  %v5558_v34 = vsub.f32 %v33095_v28, %v5557_v23  ;;  %v5577_v45 = vand.u32 4294901760, %v33117_v40 }
 0x117   :  { %28473 = vmatmul.mubr.f32.vlgmr.msra.gmra.mrb[16].mxu0 %v5469_v37  ;;  %v33119_v37 = vand.u32 4294901760, %v5383_v53  ;;  %v5587_v47 = vand.u32 4294901760, %v33127_v13 }
 0x118   :  { %28475 = vmatprep.mubr.f32.mxu0 %v5479_v21  ;;  %30707 = vmatpush3.bf16.msra.mxu0 %v32776_v62  ;;  %v5529_v21 = vand.u32 4294901760, %v5528_v52  ;;  %v36304_v58 = vand.u32 4294901760, %v33111_v10  ;;  %v5578_v52 = vsub.f32 %v33117_v40, %v5577_v45 }
 0x119   :  { %30709 = vmatprep.subr.bf16.mxu0 %v32867_v61 }
 0x11a   :  { %v5568_v29 = vsub.f32 %v33111_v10, %v36304_v58  ;;  %v5579_v58 = vand.u32 4294901760, %v5578_v52 }
 0x11b   :  { %28476 = vmatmul.mubr.f32.gmra.mrb[18].mxu0 %v5489_v50  ;;  %v33136_v50 = vsub.f32 %v5383_v53, %v33119_v37 }
 0x11c   :  { %28478 = vmatprep.mubr.f32.mxu0 %v5499_v1  ;;  %v5549_v1 = vand.u32 4294901760, %v5548_v25  ;;  %v5569_v56 = vand.u32 4294901760, %v5568_v29 }
 0x11d   :  { %v5597_v53 = vand.u32 4294901760, %v33136_v50 }
 0x11f   :  { %28479 = vmatmul.mubr.f32.gmra.mrb[20].mxu0 %v5509_v33  ;;  %v33143_v33 = vsub.f32 %v5386_v51, %v33129_v20  ;;  %v5598_v51 = vsub.f32 %v33136_v50, %v5597_v53 }
 0x120   :  { %28481 = vmatprep.mubr.f32.mxu0 %v5519_v48  ;;  %v5559_v48 = vand.u32 4294901760, %v5558_v34 }
 0x121   :  { %v5607_v25 = vand.u32 4294901760, %v33143_v33 }
 0x123   :  { %28482 = vmatmul.mubr.f32.gmra.mrb[22].mxu0 %v5529_v21  ;;  %v5588_v21 = vsub.f32 %v33127_v13, %v5587_v47  ;;  %v5608_v34 = vsub.f32 %v33143_v33, %v5607_v25 }
 0x124   :  { %28484 = vmatprep.mubr.f32.mxu0 %v5539_v30 }
 0x125   :  { %v5589_v30 = vand.u32 4294901760, %v5588_v21  ;;  %v5609_v29 = vand.u32 4294901760, %v5608_v34  ;;  %v110_v34 = vld [vmem:[#allocation8 + $0x18] sm:$0xff] }
 0x127   :  { %28485 = vmatmul.mubr.f32.gmra.mrb[24].mxu0 %v5549_v1  ;;  %v5599_v1 = vand.u32 4294901760, %v5598_v51 }
 0x128   :  { %28487 = vmatprep.mubr.f32.mxu0 %v5559_v48 }
 0x12b   :  { %28488 = vmatmul.mubr.f32.gmra.mrb[26].mxu0 %v5569_v56 }
 0x12c   :  { %28490 = vmatprep.mubr.f32.mxu0 %v5579_v58  ;;  %v107_v58 = vld [vmem:[#allocation8] sm:$0xff] }
 0x12d   :  { %v1277_v48 = vsel %vm123_vm0, %v107_v58, 0 }
 0x12e   :  { %v33173_v52 = vand.u32 4294901760, %v1277_v48 }
 0x12f   :  { %28491 = vmatmul.mubr.f32.gmra.mrb[28].mxu0 %v5589_v30 }
 0x130   :  { %28493 = vmatprep.mubr.f32.mxu0 %v5599_v1  ;;  %36777 = vst [vmem:[#allocation19_spill] sm:$0xff] %v33173_v52  ;;  %v33177_v56 = vsub.f32 %v1277_v48, %v33173_v52 }
 0x132   :  { %36778 = vst [vmem:[#allocation20_spill] sm:$0xff] %v33177_v56  ;;  %v33181_v21 = vand.u32 4294901760, %v33177_v56 }
 0x133   :  { %28494 = vmatmul.mubr.f32.gmra.mrb[30].mxu0 %v5609_v29 }
 0x134   :  { %28500 = vmatprep.mubr.f32.mxu0 %v32988_v7  ;;  %36779 = vst [vmem:[#allocation21_spill] sm:$0xff] %v33181_v21  ;;  %v1352_v51 = vsub.f32 %v33177_v56, %v33181_v21 }
 0x136   :  { %v33187_v30 = vand.u32 4294901760, %v1352_v51 }
 0x137   :  { %28501 = vmatmul.mubr.f32.vlgmr.msra.gmra.mrb[16].mxu0 %v32994_v22 }
 0x138   :  { %28503 = vmatprep.mubr.f32.mxu0 %v33000_v41  ;;  %30711 = vmatpush3.bf16.msra.mxu0 %v32867_v61  ;;  %36780 = vst [vmem:[#allocation22_spill] sm:$0xff] %v33187_v30 }
 0x139   :  { %30713 = vmatprep.subr.bf16.mxu0 %v32699_v12  ;;  %28136 = vmatprep.mubr.f32.mxu1 %v33187_v30 }
 0x13b   :  { %28504 = vmatmul.mubr.f32.gmra.mrb[18].mxu0 %v33008_v63 }
 0x13c   :  { %28506 = vmatprep.mubr.f32.mxu0 %v33017_v18 }
 0x13f   :  { %28507 = vmatmul.mubr.f32.gmra.mrb[20].mxu0 %v33019_v42 }
 0x140   :  { %28509 = vmatprep.mubr.f32.mxu0 %v33021_v43 }
 0x143   :  { %28510 = vmatmul.mubr.f32.gmra.mrb[22].mxu0 %v33044_v49 }
 0x144   :  { %28512 = vmatprep.mubr.f32.mxu0 %v33051_v3 }
 0x147   :  { %28513 = vmatmul.mubr.f32.gmra.mrb[24].mxu0 %v33072_v19 }
 0x148   :  { %28515 = vmatprep.mubr.f32.mxu0 %v33077_v26 }
 0x14b   :  { %28516 = vmatmul.mubr.f32.gmra.mrb[26].mxu0 %v33092_v0 }
 0x14c   :  { %28518 = vmatprep.mubr.f32.mxu0 %v33097_v24 }
 0x14f   :  { %28519 = vmatmul.mubr.f32.gmra.mrb[28].mxu0 %v33113_v5 }
 0x150   :  { %28521 = vmatprep.mubr.f32.mxu0 %v33119_v37 }
 0x153   :  { %28522 = vmatmul.mubr.f32.gmra.mrb[30].mxu0 %v33129_v20 }
 0x154   :  { %28528 = vmatprep.mubr.f32.mxu0 %v32998_v32  ;;  %v36781_v32 = vand.u32 4294901760, %v33111_v10 }
 0x157   :  { %28529 = vmatmul.mubr.f32.vlgmr.msra.gmra.mrb[16].mxu0 %v33006_v55  ;;  %v108_v55 = vld [vmem:[#allocation8 + $0x8] sm:$0xff] }
 0x158   :  { %28531 = vmatprep.mubr.f32.mxu0 %v33015_v17  ;;  %30715 = vmatpush3.bf16.msra.mxu0 %v32699_v12 }
 0x159   :  { %30717 = vmatprep.subr.bf16.mxu0 %v32873_v4 }
 0x15b   :  { %28532 = vmatmul.mubr.f32.gmra.mrb[18].mxu0 %v33026_v46 }
 0x15c   :  { %28534 = vmatprep.mubr.f32.mxu0 %v33035_v60 }
 0x15f   :  { %28535 = vmatmul.mubr.f32.gmra.mrb[20].mxu0 %v33039_v36 }
 0x160   :  { %28537 = vmatprep.mubr.f32.mxu0 %v33042_v38 }
 0x163   :  { %28538 = vmatmul.mubr.f32.gmra.mrb[22].mxu0 %v33063_v35 }
 0x164   :  { %28540 = vmatprep.mubr.f32.mxu0 %v33070_v15 }
 0x167   :  { %28541 = vmatmul.mubr.f32.gmra.mrb[24].mxu0 %v33090_v8 }
 0x168   :  { %28543 = vmatprep.mubr.f32.mxu0 %v33095_v28 }
 0x16b   :  { %28544 = vmatmul.mubr.f32.gmra.mrb[26].mxu0 %v33111_v10 }
 0x16c   :  { %28546 = vmatprep.mubr.f32.mxu0 %v33117_v40  ;;  %v33309_v40 = vmul.f32 %v32687_v2, %v32687_v2 }
 0x16f   :  { %28547 = vmatmul.mubr.f32.gmra.mrb[28].mxu0 %v33127_v13 }
 0x170   :  { %28549 = vmatprep.mubr.f32.mxu0 %v33136_v50 }
 0x173   :  { %28550 = vmatmul.mubr.f32.gmra.mrb[30].mxu0 %v33143_v33 }
 0x174   :  { %28556 = vmatprep.mubr.f32.mxu0 %v5457_v9  ;;  %v1280_v9 = vsel %vm123_vm0, %v108_v55, 0 }
 0x177   :  { %28557 = vmatmul.mubr.f32.vlgmr.msra.gmra.mrb[16].mxu0 %v5467_v44 }
 0x178   :  { %28559 = vmatprep.mubr.f32.mxu0 %v5477_v59  ;;  %30719 = vmatpush3.bf16.msra.mxu0 %v32873_v4 }
 0x179   :  { %30721 = vmatprep.subr.bf16.mxu0 %v32699_v12 }
 0x17b   :  { %28560 = vmatmul.mubr.f32.gmra.mrb[18].mxu0 %v5487_v57 }
 0x17c   :  { %28562 = vmatprep.mubr.f32.mxu0 %v5497_v16 }
 0x17f   :  { %28563 = vmatmul.mubr.f32.gmra.mrb[20].mxu0 %v5507_v27 }
 0x180   :  { %28565 = vmatprep.mubr.f32.mxu0 %v5517_v31  ;;  %v10509_v31 = vmul.f32 %v32691_v6, %v32691_v6 }
 0x183   :  { %28566 = vmatmul.mubr.f32.gmra.mrb[22].mxu0 %v5527_v39 }
 0x184   :  { %28568 = vmatprep.mubr.f32.mxu0 %v5537_v54 }
 0x187   :  { %28569 = vmatmul.mubr.f32.gmra.mrb[24].mxu0 %v5547_v11 }
 0x188   :  { %28571 = vmatprep.mubr.f32.mxu0 %v5557_v23 }
 0x18b   :  { %28572 = vmatmul.mubr.f32.gmra.mrb[26].mxu0 %v36781_v32 }
 0x18c   :  { %28574 = vmatprep.mubr.f32.mxu0 %v5577_v45 }
 0x18f   :  { %28575 = vmatmul.mubr.f32.gmra.mrb[28].mxu0 %v5587_v47 }
 0x190   :  { %28577 = vmatprep.mubr.f32.mxu0 %v5597_v53 }
 0x193   :  { %28578 = vmatmul.mubr.f32.gmra.mrb[30].mxu0 %v5607_v25  ;;  %v109_v25 = vld [vmem:[#allocation8 + $0x10] sm:$0xff] }
 0x194   :  { %28584 = vmatprep.mubr.f32.mxu0 %v32988_v7 }
 0x197   :  { %28585 = vmatmul.mubr.f32.vlgmr.msra.gmra.mrb[16].mxu0 %v32994_v22 }
 0x198   :  { %28587 = vmatprep.mubr.f32.mxu0 %v33000_v41  ;;  %30723 = vmatpush3.bf16.msra.mxu0 %v32699_v12 }
 0x199   :  { %30917 = vmatprep.subr.bf16.mxu0 %v32699_v12 }
 0x19b   :  { %28588 = vmatmul.mubr.f32.gmra.mrb[18].mxu0 %v33008_v63 }
 0x19c   :  { %28590 = vmatprep.mubr.f32.mxu0 %v33017_v18 }
 0x19f   :  { %28591 = vmatmul.mubr.f32.gmra.mrb[20].mxu0 %v33019_v42 }
 0x1a0   :  { %28593 = vmatprep.mubr.f32.mxu0 %v33021_v43 }
 0x1a3   :  { %28594 = vmatmul.mubr.f32.gmra.mrb[22].mxu0 %v33044_v49 }
 0x1a4   :  { %28596 = vmatprep.mubr.f32.mxu0 %v33051_v3 }
 0x1a7   :  { %28597 = vmatmul.mubr.f32.gmra.mrb[24].mxu0 %v33072_v19 }
 0x1a8   :  { %28599 = vmatprep.mubr.f32.mxu0 %v33077_v26 }
 0x1ab   :  { %28600 = vmatmul.mubr.f32.gmra.mrb[26].mxu0 %v33092_v0 }
 0x1ac   :  { %28602 = vmatprep.mubr.f32.mxu0 %v33097_v24 }
 0x1af   :  { %28603 = vmatmul.mubr.f32.gmra.mrb[28].mxu0 %v33113_v5 }
 0x1b0   :  { %28605 = vmatprep.mubr.f32.mxu0 %v33119_v37 }
 0x1b3   :  { %28606 = vmatmul.mubr.f32.gmra.mrb[30].mxu0 %v33129_v20 }
 0x1b4   :  { %28612 = vmatprep.mubr.f32.mxu0 %v32988_v7  ;;  %v33271_v7 = vand.u32 4294901760, %v1280_v9 }
 0x1b6   :  { %36782 = vst [vmem:[#allocation23_spill] sm:$0xff] %v33271_v7 }
 0x1b7   :  { %28613 = vmatmul.mubr.f32.vlgmr.msra.gmra.mrb[16].mxu0 %v32994_v22  ;;  %v33276_v22 = vsub.f32 %v1280_v9, %v33271_v7 }
 0x1b8   :  { %28615 = vmatprep.mubr.f32.mxu0 %v33000_v41  ;;  %30919 = vmatpush3.bf16.msra.mxu0 %v32699_v12 }
 0x1b9   :  { %30921 = vmatprep.subr.bf16.mxu0 %v32776_v62  ;;  %36783 = vst [vmem:[#allocation24_spill] sm:$0xff] %v33276_v22  ;;  %v33281_v41 = vand.u32 4294901760, %v33276_v22 }
 0x1bb   :  { %28616 = vmatmul.mubr.f32.gmra.mrb[18].mxu0 %v33008_v63  ;;  %36784 = vst [vmem:[#allocation25_spill] sm:$0xff] %v33281_v41 }
 0x1bc   :  { %28618 = vmatprep.mubr.f32.mxu0 %v33017_v18 }
 0x1bf   :  { %28619 = vmatmul.mubr.f32.gmra.mrb[20].mxu0 %v33019_v42 }
 0x1c0   :  { %28621 = vmatprep.mubr.f32.mxu0 %v33021_v43  ;;  %v1362_v43 = vsub.f32 %v33276_v22, %v33281_v41 }
 0x1c2   :  { %v33292_v16 = vand.u32 4294901760, %v1362_v43 }
 0x1c3   :  { %28622 = vmatmul.mubr.f32.gmra.mrb[22].mxu0 %v33044_v49 }
 0x1c4   :  { %28624 = vmatprep.mubr.f32.mxu0 %v33051_v3  ;;  %36785 = vst [vmem:[#allocation26_spill] sm:$0xff] %v33292_v16 }
 0x1c7   :  { %28625 = vmatmul.mubr.f32.gmra.mrb[24].mxu0 %v33072_v19 }
 0x1c8   :  { %28627 = vmatprep.mubr.f32.mxu0 %v33077_v26 }
 0x1ca   :  { %v28110_v63 = vpop.f32.mrb[0].mxu0 }
 0x1cb   :  { %v1286_v17 = vand.u32 4294901760, %v28110_v63  ;;  %v1182_v18 = vpop.f32.mrb[1].mxu0  ;;  %28628 = vmatmul.mubr.f32.gmra.mrb[26].mxu0 %v33092_v0 }
 0x1cc   :  { %v1283_v42 = vand.u32 4294901760, %v1182_v18  ;;  %28630 = vmatprep.mubr.f32.mxu0 %v33097_v24 }
 0x1cd   :  { %v1378_v44 = vsub.f32 %v28110_v63, %v1286_v17 }
 0x1ce   :  { %v33287_v46 = vpack.c.bf16 %v1286_v17, %v1283_v42  ;;  %v1371_v59 = vsub.f32 %v1182_v18, %v1283_v42  ;;  %v28113_v60 = vpop.f32.mrb[2].mxu0  ;;  %v1785_v18 = vsel %vm123_vm0, %v109_v25, 0  ;;  %v1788_v42 = vsel %vm123_vm0, %v110_v34, 0 }
 0x1cf   :  { %v1379_v36 = vand.u32 4294901760, %v1378_v44  ;;  %v1794_v38 = vand.u32 4294901760, %v28113_v60  ;;  %v1194_v49 = vpop.f32.mrb[3].mxu0  ;;  %28631 = vmatmul.mubr.f32.gmra.mrb[28].mxu0 %v33113_v5 }
 0x1d0   :  { %v1372_v57 = vand.u32 4294901760, %v1371_v59  ;;  %v1791_v3 = vand.u32 4294901760, %v1194_v49  ;;  %30509 = vmatprep.subr.bf16.mxu1 %v33287_v46  ;;  %28633 = vmatprep.mubr.f32.mxu0 %v33119_v37  ;;  %v33294_v27 = vpack.c.bf16 %v1378_v44, %v1371_v59  ;;  %v33312_v37 = vsel %vm123_vm0, %v10509_v31, 0 }
 0x1d1   :  { %v1380_v35 = vsub.f32 %v1378_v44, %v1379_v36  ;;  %v1886_v15 = vsub.f32 %v28113_v60, %v1794_v38  ;;  %30511 = vmatpush3.bf16.msra.mxu1 %v33287_v46 }
 0x1d2   :  { %v1373_v19 = vsub.f32 %v1371_v59, %v1372_v57  ;;  %v33299_v26 = vpack.c.bf16 %v1794_v38, %v1791_v3  ;;  %v1879_v39 = vsub.f32 %v1194_v49, %v1791_v3  ;;  %v28116_v54 = vpop.f32.mrb[4].mxu0  ;;  %v33301_v8 = vpack.c.bf16 %v1379_v36, %v1372_v57 }
 0x1d3   :  { %v1887_v0 = vand.u32 4294901760, %v1886_v15  ;;  %v2302_v28 = vand.u32 4294901760, %v28116_v54  ;;  %v1206_v24 = vpop.f32.mrb[5].mxu0  ;;  %28634 = vmatmul.mubr.f32.gmra.mrb[30].mxu0 %v33129_v20  ;;  %v1381_v11 = vand.u32 4294901760, %v1380_v35 }
 0x1d4   :  { %v1880_v10 = vand.u32 4294901760, %v1879_v39  ;;  %v2299_v5 = vand.u32 4294901760, %v1206_v24  ;;  %28137 = vmatmul.mubr.f32.vlgmr.msra.gmra.mrb[0].mxu1 %v33292_v16  ;;  %v1374_v6 = vand.u32 4294901760, %v1373_v19  ;;  %v33305_v23 = vpack.c.bf16 %v1886_v15, %v1879_v39 }
 0x1d5   :  { %v1888_v13 = vsub.f32 %v1886_v15, %v1887_v0  ;;  %v2394_v45 = vsub.f32 %v28116_v54, %v2302_v28  ;;  %28143 = vmatprep.mubr.f32.mxu1 %v33173_v52  ;;  %v33331_v19 = vand.u32 4294901760, %v1785_v18 }
 0x1d6   :  { %v1881_v20 = vsub.f32 %v1879_v39, %v1880_v10  ;;  %v33315_v50 = vpack.c.bf16 %v2302_v28, %v2299_v5  ;;  %v2387_v47 = vsub.f32 %v1206_v24, %v2299_v5  ;;  %v28119_v33 = vpop.f32.mrb[6].mxu0  ;;  %v30512_v53 = vpack.c.bf16 %v1381_v11, %v1374_v6 }
 0x1d7   :  { %v2395_v1 = vand.u32 4294901760, %v2394_v45  ;;  %v2810_v29 = vand.u32 4294901760, %v28119_v33  ;;  %v1218_v58 = vpop.f32.mrb[7].mxu0  ;;  %v1889_v2 = vand.u32 4294901760, %v1888_v13  ;;  %v33317_v48 = vpack.c.bf16 %v1887_v0, %v1880_v10  ;;  %36786 = vst [vmem:[#allocation27_spill] sm:$0xff] %v33331_v19 }
 0x1d8   :  { %v2388_v51 = vand.u32 4294901760, %v2387_v47  ;;  %v2807_v32 = vand.u32 4294901760, %v1218_v58  ;;  %30513 = vmatprep.subr.bf16.mxu1 %v30512_v53  ;;  %v1882_v55 = vand.u32 4294901760, %v1881_v20  ;;  %v33319_v9 = vpack.c.bf16 %v2394_v45, %v2387_v47 }
 0x1d9   :  { %v2396_v63 = vsub.f32 %v2394_v45, %v2395_v1  ;;  %v2902_v17 = vsub.f32 %v28119_v33, %v2810_v29  ;;  %30515 = vmatpush3.bf16.msra.mxu1 %v30512_v53  ;;  %v33335_v28 = vand.u32 4294901760, %v1788_v42 }
 0x1da   :  { %v2389_v43 = vsub.f32 %v2387_v47, %v2388_v51  ;;  %v33323_v44 = vpack.c.bf16 %v2810_v29, %v2807_v32  ;;  %v2895_v59 = vsub.f32 %v1218_v58, %v2807_v32  ;;  %v28122_v60 = vpop.f32.mrb[8].mxu0  ;;  %30517 = vmatprep.subr.bf16.mxu1 %v33294_v27  ;;  %v33326_v36 = vpack.c.bf16 %v1889_v2, %v1882_v55 }
 0x1db   :  { %v2903_v38 = vand.u32 4294901760, %v2902_v17  ;;  %v3318_v49 = vand.u32 4294901760, %v28122_v60  ;;  %v1230_v57 = vpop.f32.mrb[9].mxu0  ;;  %v2397_v3 = vand.u32 4294901760, %v2396_v63  ;;  %v33328_v31 = vpack.c.bf16 %v2395_v1, %v2388_v51  ;;  %36787 = vst [vmem:[#allocation28_spill] sm:$0xff] %v33335_v28 }
 0x1dc   :  { %v2896_v35 = vand.u32 4294901760, %v2895_v59  ;;  %v3315_v15 = vand.u32 4294901760, %v1230_v57  ;;  %28144 = vmatmul.mubr.f32.vlgmr.msra.gmra.mrb[0].mxu1 %v33271_v7  ;;  %v2390_v39 = vand.u32 4294901760, %v2389_v43  ;;  %v33337_v24 = vpack.c.bf16 %v2902_v17, %v2895_v59 }
 0x1dd   :  { %v2904_v54 = vsub.f32 %v2902_v17, %v2903_v38  ;;  %v3410_v0 = vsub.f32 %v28122_v60, %v3318_v49  ;;  %30519 = vmatpush3.bf16.msra.mxu1 %v33294_v27  ;;  %28150 = vmatprep.mubr.f32.mxu1 %v33177_v56  ;;  %v33349_v2 = vsub.f32 %v1785_v18, %v33331_v19 }
 0x1de   :  { %36788 = vst [vmem:[#allocation29_spill] sm:$0xff] %v33337_v24  ;;  %v2897_v11 = vsub.f32 %v2895_v59, %v2896_v35  ;;  %v33339_v10 = vpack.c.bf16 %v3318_v49, %v3315_v15  ;;  %v3403_v5 = vsub.f32 %v1230_v57, %v3315_v15  ;;  %v28125_v6 = vpop.f32.mrb[10].mxu0  ;;  %30521 = vmatprep.subr.bf16.mxu1 %v33287_v46  ;;  %v33364_v15 = vand.u32 4294901760, %v33312_v37 }
 0x1df   :  { %v33342_v13 = vpack.c.bf16 %v2397_v3, %v2390_v39  ;;  %v3411_v45 = vand.u32 4294901760, %v3410_v0  ;;  %v3826_v20 = vand.u32 4294901760, %v28125_v6  ;;  %v1242_v47 = vpop.f32.mrb[11].mxu0  ;;  %v2905_v33 = vand.u32 4294901760, %v2904_v54  ;;  %36792 = vst [vmem:[#allocation33_spill] sm:$0xff] %v33349_v2 }
 0x1e0   :  { %36789 = vst [vmem:[#allocation30_spill] sm:$0xff] %v33339_v10  ;;  %v33344_v27 = vpack.c.bf16 %v2903_v38, %v2896_v35  ;;  %v3404_v53 = vand.u32 4294901760, %v3403_v5  ;;  %v3823_v25 = vand.u32 4294901760, %v1242_v47  ;;  %v2898_v34 = vand.u32 4294901760, %v2897_v11 }
 0x1e1   :  { %v33346_v1 = vpack.c.bf16 %v3410_v0, %v3403_v5  ;;  %v3412_v29 = vsub.f32 %v3410_v0, %v3411_v45  ;;  %v3918_v58 = vsub.f32 %v28125_v6, %v3826_v20  ;;  %v33352_v51 = vsub.f32 %v1788_v42, %v33335_v28 }
 0x1e2   :  { %36790 = vst [vmem:[#allocation31_spill] sm:$0xff] %v33344_v27  ;;  %v3405_v32 = vsub.f32 %v3403_v5, %v3404_v53  ;;  %v33354_v55 = vpack.c.bf16 %v3826_v20, %v3823_v25  ;;  %v3911_v63 = vsub.f32 %v1242_v47, %v3823_v25  ;;  %v28128_v17 = vpop.f32.mrb[12].mxu0  ;;  %v33356_v43 = vpack.c.bf16 %v2905_v33, %v2898_v34  ;;  %v32416_v27 = vld [vmem:[#allocation2 + $0x78] sm:$0xff] }
 0x1e3   :  { %36791 = vst [vmem:[#allocation32_spill] sm:$0xff] %v33346_v1  ;;  %36793 = vst [vmem:[#allocation34_spill] sm:$0xff] %v33352_v51  ;;  %v3919_v59 = vand.u32 4294901760, %v3918_v58  ;;  %v4334_v60 = vand.u32 4294901760, %v28128_v17  ;;  %v1254_v38 = vpop.f32.mrb[13].mxu0  ;;  %v3413_v49 = vand.u32 4294901760, %v3412_v29  ;;  %v33358_v57 = vpack.c.bf16 %v3411_v45, %v3404_v53 }
 0x1e4   :  { %36794 = vst [vmem:[#allocation35_spill] sm:$0xff] %v33354_v55  ;;  %36795 = vst [vmem:[#allocation36_spill] sm:$0xff] %v33356_v43  ;;  %v3912_v3 = vand.u32 4294901760, %v3911_v63  ;;  %v4331_v35 = vand.u32 4294901760, %v1254_v38  ;;  %28151 = vmatmul.mubr.f32.vlgmr.msra.gmra.mrb[0].mxu1 %v33276_v22  ;;  %v3406_v18 = vand.u32 4294901760, %v3405_v32  ;;  %v33361_v42 = vpack.c.bf16 %v3918_v58, %v3911_v63  ;;  %v32415_v1 = vld [vmem:[#allocation2 + $0x70] sm:$0xff] }
 0x1e5   :  { %36796 = vst [vmem:[#allocation37_spill] sm:$0xff] %v33358_v57  ;;  %v3920_v39 = vsub.f32 %v3918_v58, %v3919_v59  ;;  %v33366_v54 = vsub.f32 %v28128_v17, %v4334_v60  ;;  %30523 = vmatpush3.bf16.msra.mxu1 %v33287_v46  ;;  %28157 = vmatprep.mubr.f32.mxu1 %v33181_v21  ;;  %v33371_v0 = vand.u32 4294901760, %v33349_v2  ;;  %v33386_v53 = vand.u32 4294901760, %v33352_v51 }
 0x1e6   :  { %36797 = vst [vmem:[#allocation38_spill] sm:$0xff] %v33361_v42  ;;  %v3913_v11 = vsub.f32 %v3911_v63, %v3912_v3  ;;  %v33373_v5 = vpack.c.bf16 %v4334_v60, %v4331_v35  ;;  %v33375_v6 = vsub.f32 %v1254_v38, %v4331_v35  ;;  %30525 = vmatprep.subr.bf16.mxu1 %v33301_v8  ;;  %v33378_v45 = vpop.f32.mrb[14].mxu0  ;;  %v10525_v25 = vsel %vm123_vm0, %v33309_v40, 0  ;;  %v32403_v60 = vld [vmem:[#allocation2 + $0x10] sm:$0xff] }
 0x1e7   :  { %36798 = vst [vmem:[#allocation39_spill] sm:$0xff] %v33371_v0  ;;  %v33380_v20 = vpack.c.bf16 %v3413_v49, %v3406_v18  ;;  %v36305_v47 = vand.u32 4294901760, %v33378_v45  ;;  %v33383_v33 = vpop.f32.mrb[15].mxu0  ;;  %36801 = vst [vmem:[#allocation42_spill] sm:$0xff] %v33386_v53  ;;  %v3921_v34 = vand.u32 4294901760, %v3920_v39  ;;  %v33392_v32 = vand.u32 4294901760, %v10525_v25 }
 0x1e8   :  { %36799 = vst [vmem:[#allocation40_spill] sm:$0xff] %v33373_v5  ;;  %v36307_v29 = vand.u32 4294901760, %v33375_v6  ;;  %v36306_v58 = vand.u32 4294901760, %v33383_v33  ;;  %v3914_v63 = vand.u32 4294901760, %v3913_v11  ;;  %v10510_v38 = vmul.f32 %v32403_v60, %v32403_v60  ;;  %v32404_v11 = vld [vmem:[#allocation2 + $0x18] sm:$0xff] }
 0x1e9   :  { %36800 = vst [vmem:[#allocation41_spill] sm:$0xff] %v33380_v20  ;;  %v33395_v49 = vpack.c.bf16 %v3919_v59, %v3912_v3  ;;  %v1860_v40 = vsub.f32 %v33349_v2, %v33371_v0  ;;  %v33406_v18 = vsub.f32 %v10525_v25, %v33392_v32  ;;  %v33413_v59 = vsub.f32 %v33312_v37, %v33364_v15 }
 0x1ea   :  { %v33401_v35 = vpack.c.bf16 %v36305_v47, %v36306_v58  ;;  %v4421_v39 = vsub.f32 %v33375_v6, %v36307_v29  ;;  %v10531_v3 = vsel %vm123_vm0, %v10510_v38, 0  ;;  %v10511_v60 = vmul.f32 %v32404_v11, %v32404_v11 }
 0x1eb   :  { %36802 = vst [vmem:[#allocation43_spill] sm:$0xff] %v33395_v49  ;;  %v33420_v58 = vand.u32 4294901760, %v10531_v3  ;;  %v33422_v17 = vpack.c.bf16 %v3921_v34, %v3914_v63  ;;  %v36805_v29 = vand.u32 4294901760, %v33366_v54  ;;  %v36323_v38 = vand.u32 4294901760, %v33413_v59 }
 0x1ec   :  { %36803 = vst [vmem:[#allocation44_spill] sm:$0xff] %v33401_v35  ;;  %28158 = vmatmul.mubr.f32.vlgmr.msra.gmra.mrb[0].mxu1 %v33281_v41  ;;  %v10534_v11 = vsel %vm123_vm0, %v10511_v60, 0  ;;  %v10512_v47 = vmul.f32 %v32405_v14, %v32405_v14  ;;  %v33432_v25 = vand.u32 4294901760, %v1860_v40  ;;  %v36807_v34 = vand.u32 4294901760, %v33406_v18  ;;  %v32406_v14 = vld [vmem:[#allocation2 + $0x28] sm:$0xff]  ;;  %v32407_v35 = vld [vmem:[#allocation2 + $0x30] sm:$0xff] }
 0x1ed   :  { %36804 = vst [vmem:[#allocation45_spill] sm:$0xff] %v33422_v17  ;;  %v4428_v37 = vsub.f32 %v33366_v54, %v36805_v29  ;;  %30527 = vmatpush3.bf16.msra.mxu1 %v33301_v8  ;;  %28164 = vmatprep.mubr.f32.mxu1 %v33173_v52  ;;  %v33438_v29 = vsub.f32 %v10531_v3, %v33420_v58  ;;  %v33440_v8 = vand.u32 4294901760, %v10534_v11  ;;  %v4422_v22 = vand.u32 4294901760, %v4421_v39 }
 0x1ee   :  { %30529 = vmatprep.subr.bf16.mxu1 %v33287_v46  ;;  %36806 = vst [vmem:[#allocation46_spill] sm:$0xff] %v33432_v25  ;;  %v10642_v63 = vsub.f32 %v33406_v18, %v36807_v34  ;;  %v10652_v41 = vsub.f32 %v33413_v59, %v36323_v38  ;;  %v10537_v60 = vsel %vm123_vm0, %v10512_v47, 0  ;;  %v10513_v21 = vmul.f32 %v32406_v14, %v32406_v14  ;;  %v32408_v14 = vld [vmem:[#allocation2 + $0x38] sm:$0xff] }
 0x1ef   :  { %v36325_v56 = vand.u32 4294901760, %v33438_v29  ;;  %v33448_v16 = vsub.f32 %v10534_v11, %v33440_v8  ;;  %v33450_v34 = vand.u32 4294901760, %v10537_v60  ;;  %v10514_v5 = vmul.f32 %v32407_v35, %v32407_v35 }
 0x1f0   :  { %v10643_v40 = vand.u32 4294901760, %v10642_v63  ;;  %v10653_v3 = vand.u32 4294901760, %v10652_v41  ;;  %v10540_v30 = vsel %vm123_vm0, %v10513_v21, 0  ;;  %v4429_v49 = vand.u32 4294901760, %v4428_v37 }
 0x1f1   :  { %v10662_v47 = vsub.f32 %v33438_v29, %v36325_v56  ;;  %v36324_v39 = vand.u32 4294901760, %v33448_v16  ;;  %v33458_v63 = vsub.f32 %v10537_v60, %v33450_v34  ;;  %v33460_v11 = vand.u32 4294901760, %v10540_v30 }
 0x1f2   :  { %28976 = vmatprep.mubr.f32.mxu0 %v10643_v40  ;;  %v10543_v41 = vsel %vm123_vm0, %v10514_v5, 0  ;;  %v10515_v21 = vmul.f32 %v32408_v14, %v32408_v14  ;;  %v33463_v38 = vpack.c.bf16 %v4429_v49, %v4422_v22  ;;  %v33467_v35 = vpack.c.bf16 %v33366_v54, %v33375_v6  ;;  %v32409_v49 = vld [vmem:[#allocation2 + $0x40] sm:$0xff] }
 0x1f3   :  { %28977 = vmatmul.mubr.f32.vlgmr.msra.gmra.mrb[32].mxu0 %v10653_v3  ;;  %v10663_v37 = vand.u32 4294901760, %v10662_v47  ;;  %v10672_v60 = vsub.f32 %v33448_v16, %v36324_v39  ;;  %v36329_v40 = vand.u32 4294901760, %v33458_v63  ;;  %v33475_v3 = vsub.f32 %v10540_v30, %v33460_v11 }
 0x1f4   :  { %36808 = vst [vmem:[#allocation47_spill] sm:$0xff] %v33463_v38  ;;  %36809 = vst [vmem:[#allocation48_spill] sm:$0xff] %v33467_v35  ;;  %28165 = vmatmul.mubr.f32.vlgmr.msra.gmra.mrb[0].mxu1 %v33271_v7  ;;  %30923 = vmatpush3.bf16.msra.mxu0 %v32776_v62  ;;  %v33480_v22 = vand.u32 4294901760, %v10543_v41  ;;  %v10546_v5 = vsel %vm123_vm0, %v10515_v21, 0  ;;  %v10516_v47 = vmul.f32 %v32409_v49, %v32409_v49  ;;  %v36810_v14 = vand.u32 4294901760, %v33375_v6 }
 0x1f5   :  { %30531 = vmatpush3.bf16.msra.mxu1 %v33287_v46  ;;  %28171 = vmatprep.mubr.f32.mxu1 %v33173_v52  ;;  %v36811_v39 = vand.u32 4294901760, %v33366_v54  ;;  %v10673_v30 = vand.u32 4294901760, %v10672_v60  ;;  %v10682_v46 = vsub.f32 %v33458_v63, %v36329_v40  ;;  %v36331_v52 = vand.u32 4294901760, %v33475_v3 }
 0x1f6   :  { %30533 = vmatprep.subr.bf16.mxu1 %v33299_v26  ;;  %28979 = vmatprep.mubr.f32.mxu0 %v10663_v37  ;;  %v33494_v35 = vand.u32 4294901760, %v10546_v5  ;;  %v36813_v21 = vand.u32 4294901760, %v33383_v33  ;;  %v33502_v54 = vsub.f32 %v10543_v41, %v33480_v22  ;;  %v32410_v37 = vld [vmem:[#allocation2 + $0x48] sm:$0xff]  ;;  %v36814_v41 = vand.u32 4294901760, %v33378_v45 }
 0x1f7   :  { %v33487_v56 = vpack.c.bf16 %v36811_v39, %v36810_v14  ;;  %v10549_v39 = vsel %vm123_vm0, %v10516_v47, 0  ;;  %v10517_v60 = vmul.f32 %v32410_v37, %v32410_v37  ;;  %30925 = vmatprep.subr.bf16.mxu0 %v32867_v61  ;;  %28980 = vmatmul.mubr.f32.gmra.mrb[34].mxu0 %v10673_v30  ;;  %v10683_v49 = vand.u32 4294901760, %v10682_v46  ;;  %v32411_v30 = vld [vmem:[#allocation2 + $0x50] sm:$0xff] }
 0x1f8   :  { %v33499_v6 = vsub.f32 %v33383_v33, %v36813_v21  ;;  %v10692_v14 = vsub.f32 %v33475_v3, %v36331_v52  ;;  %v33510_v40 = vsub.f32 %v10546_v5, %v33494_v35  ;;  %v33512_v33 = vand.u32 4294901760, %v10549_v39 }
 0x1f9   :  { %36812 = vst [vmem:[#allocation49_spill] sm:$0xff] %v33487_v56  ;;  %v33517_v21 = vsub.f32 %v33378_v45, %v36814_v41  ;;  %v36334_v47 = vand.u32 4294901760, %v33502_v54  ;;  %v10552_v37 = vsel %vm123_vm0, %v10517_v60, 0  ;;  %v10518_v46 = vmul.f32 %v32411_v30, %v32411_v30  ;;  %28982 = vmatprep.mubr.f32.mxu0 %v10683_v49 }
 0x1fa   :  { %v10693_v56 = vand.u32 4294901760, %v10692_v14  ;;  %v36337_v52 = vand.u32 4294901760, %v33510_v40  ;;  %v33523_v5 = vsub.f32 %v10549_v39, %v33512_v33  ;;  %v33525_v38 = vand.u32 4294901760, %v10552_v37 }
 0x1fb   :  { %v10702_v45 = vsub.f32 %v33502_v54, %v36334_v47  ;;  %v10555_v41 = vsel %vm123_vm0, %v10518_v46, 0  ;;  %v36815_v60 = vsub.f32 %v33352_v51, %v33386_v53  ;;  %v4935_v47 = vand.u32 4294901760, %v33517_v21 }
 0x1fc   :  { %28172 = vmatmul.mubr.f32.vlgmr.msra.gmra.mrb[0].mxu1 %v33271_v7  ;;  %28983 = vmatmul.mubr.f32.gmra.mrb[36].mxu0 %v10693_v56  ;;  %v10712_v39 = vsub.f32 %v33510_v40, %v36337_v52  ;;  %v36344_v14 = vand.u32 4294901760, %v33523_v5  ;;  %v33543_v30 = vsub.f32 %v10552_v37, %v33525_v38  ;;  %v33548_v42 = vand.u32 4294901760, %v10555_v41 }
 0x1fd   :  { %v33536_v49 = vand.u32 4294901760, %v36815_v60  ;;  %30535 = vmatpush3.bf16.msra.mxu1 %v33299_v26  ;;  %28178 = vmatprep.mubr.f32.mxu1 %v33432_v25  ;;  %v10703_v46 = vand.u32 4294901760, %v10702_v45  ;;  %v32412_v60 = vld [vmem:[#allocation2 + $0x58] sm:$0xff]  ;;  %v36817_v17 = vand.u32 4294901760, %v33499_v6  ;;  %v10522_v20 = vmul.f32 %v32415_v1, %v32415_v1 }
 0x1fe   :  { %v10519_v56 = vmul.f32 %v32412_v60, %v32412_v60  ;;  %30537 = vmatprep.subr.bf16.mxu1 %v33326_v36  ;;  %v10713_v7 = vand.u32 4294901760, %v10712_v39  ;;  %v10722_v52 = vsub.f32 %v33523_v5, %v36344_v14  ;;  %v36346_v37 = vand.u32 4294901760, %v33543_v30  ;;  %v32413_v60 = vld [vmem:[#allocation2 + $0x60] sm:$0xff] }
 0x1ff   :  { %36816 = vst [vmem:[#allocation50_spill] sm:$0xff] %v33536_v49  ;;  %v4929_v55 = vsub.f32 %v33499_v6, %v36817_v17  ;;  %28985 = vmatprep.mubr.f32.mxu0 %v10703_v46  ;;  %v33559_v45 = vsub.f32 %v10555_v41, %v33548_v42  ;;  %v10520_v62 = vmul.f32 %v32413_v60, %v32413_v60  ;;  %v10567_v10 = vsel %vm123_vm0, %v10522_v20, 0 }
 0x200   :  { %v10558_v25 = vsel %vm123_vm0, %v10519_v56, 0  ;;  %28179 = vmatmul.mubr.f32.vlgmr.msra.gmra.mrb[2].mxu1 %v33536_v49  ;;  %28986 = vmatmul.mubr.f32.gmra.mrb[38].mxu0 %v10713_v7  ;;  %v10723_v39 = vand.u32 4294901760, %v10722_v52  ;;  %v10732_v14 = vsub.f32 %v33543_v30, %v36346_v37  ;;  %v4936_v17 = vsub.f32 %v33517_v21, %v4935_v47  ;;  %v32414_v56 = vld [vmem:[#allocation2 + $0x68] sm:$0xff] }
 0x201   :  { %v33566_v57 = vand.u32 4294901760, %v10558_v25  ;;  %30539 = vmatpush3.bf16.msra.mxu1 %v33326_v36  ;;  %28185 = vmatprep.mubr.f32.mxu1 %v33331_v19  ;;  %v36360_v41 = vand.u32 4294901760, %v33559_v45  ;;  %v10561_v46 = vsel %vm123_vm0, %v10520_v62, 0  ;;  %v10521_v60 = vmul.f32 %v32414_v56, %v32414_v56 }
 0x202   :  { %30541 = vmatprep.subr.bf16.mxu1 %v33305_v23  ;;  %28988 = vmatprep.mubr.f32.mxu0 %v10723_v39  ;;  %v10733_v52 = vand.u32 4294901760, %v10732_v14  ;;  %v33577_v37 = vand.u32 4294901760, %v10561_v46  ;;  %v4930_v62 = vand.u32 4294901760, %v4929_v55  ;;  %v10523_v24 = vmul.f32 %v32416_v27, %v32416_v27 }
 0x203   :  { %v33575_v7 = vsub.f32 %v10558_v25, %v33566_v57  ;;  %v10742_v36 = vsub.f32 %v33559_v45, %v36360_v41  ;;  %v10564_v49 = vsel %vm123_vm0, %v10521_v60, 0  ;;  %v4937_v43 = vand.u32 4294901760, %v4936_v17 }
 0x204   :  { %28989 = vmatmul.mubr.f32.gmra.mrb[40].mxu0 %v10733_v52  ;;  %v33585_v39 = vsub.f32 %v10561_v46, %v33577_v37  ;;  %v33587_v14 = vand.u32 4294901760, %v10564_v49  ;;  %v33597_v52 = vand.u32 4294901760, %v10567_v10  ;;  %v10570_v46 = vsel %vm123_vm0, %v10523_v24, 0 }
 0x205   :  { %v36355_v56 = vand.u32 4294901760, %v33575_v7  ;;  %v10743_v25 = vand.u32 4294901760, %v10742_v36  ;;  %v33600_v36 = vpack.c.bf16 %v4937_v43, %v4930_v62  ;;  %v33604_v27 = vpack.c.bf16 %v33517_v21, %v33499_v6 }
 0x206   :  { %v36359_v1 = vand.u32 4294901760, %v33585_v39  ;;  %v33595_v55 = vsub.f32 %v10564_v49, %v33587_v14  ;;  %v36818_v20 = vand.u32 4294901760, %v33499_v6  ;;  %v33616_v24 = vsub.f32 %v10567_v10, %v33597_v52 }
 0x207   :  { %v10752_v60 = vsub.f32 %v33575_v7, %v36355_v56  ;;  %28991 = vmatprep.mubr.f32.mxu0 %v10743_v25  ;;  %v33620_v43 = vand.u32 4294901760, %v10570_v46  ;;  %v36835_v41 = vand.u32 4294901760, %v33406_v18 }
 0x208   :  { %v33608_v17 = vpack.c.bf16 %v4935_v47, %v36818_v20  ;;  %28186 = vmatmul.mubr.f32.vlgmr.msra.gmra.mrb[2].mxu1 %v33335_v28  ;;  %v10762_v49 = vsub.f32 %v33585_v39, %v36359_v1  ;;  %v36358_v25 = vand.u32 4294901760, %v33595_v55  ;;  %v36357_v47 = vand.u32 4294901760, %v33616_v24  ;;  %v111_v20 = vld [vmem:[#allocation8 + $0x20] sm:$0xff] }
 0x209   :  { %v10753_v56 = vand.u32 4294901760, %v10752_v60  ;;  %30543 = vmatpush3.bf16.msra.mxu1 %v33305_v23  ;;  %28192 = vmatprep.mubr.f32.mxu1 %v33349_v2  ;;  %v33628_v62 = vsub.f32 %v10570_v46, %v33620_v43 }
 0x20a   :  { %30545 = vmatprep.subr.bf16.mxu1 %v33299_v26  ;;  %v10763_v6 = vand.u32 4294901760, %v10762_v49  ;;  %v10772_v21 = vsub.f32 %v33595_v55, %v36358_v25  ;;  %v10782_v23 = vsub.f32 %v33616_v24, %v36357_v47 }
 0x20b   :  { %28992 = vmatmul.mubr.f32.gmra.mrb[42].mxu0 %v10753_v56  ;;  %v36356_v60 = vand.u32 4294901760, %v33628_v62 }
 0x20c   :  { %28994 = vmatprep.mubr.f32.mxu0 %v10763_v6  ;;  %v10773_v10 = vand.u32 4294901760, %v10772_v21  ;;  %v10783_v56 = vand.u32 4294901760, %v10782_v23  ;;  %v2293_v6 = vsel %vm123_vm0, %v111_v20, 0  ;;  %v112_v21 = vld [vmem:[#allocation8 + $0x28] sm:$0xff] }
 0x20d   :  { %v10792_v49 = vsub.f32 %v33628_v62, %v36356_v60  ;;  %v2296_v23 = vsel %vm123_vm0, %v112_v21, 0 }
 0x20f   :  { %28995 = vmatmul.mubr.f32.gmra.mrb[44].mxu0 %v10773_v10  ;;  %v10793_v46 = vand.u32 4294901760, %v10792_v49  ;;  %v33643_v10 = vand.u32 4294901760, %v2293_v6 }
 0x210   :  { %28193 = vmatmul.mubr.f32.vlgmr.msra.gmra.mrb[2].mxu1 %v33352_v51  ;;  %28997 = vmatprep.mubr.f32.mxu0 %v10783_v56  ;;  %v33648_v56 = vand.u32 4294901760, %v2296_v23 }
 0x211   :  { %30547 = vmatpush3.bf16.msra.mxu1 %v33299_v26  ;;  %28199 = vmatprep.mubr.f32.mxu1 %v33371_v0  ;;  %36819 = vst [vmem:[#allocation51_spill] sm:$0xff] %v33643_v10  ;;  %v33654_v20 = vsub.f32 %v2293_v6, %v33643_v10 }
 0x212   :  { %30549 = vmatprep.subr.bf16.mxu1 %v33317_v48  ;;  %36820 = vst [vmem:[#allocation52_spill] sm:$0xff] %v33648_v56  ;;  %v33661_v49 = vsub.f32 %v2296_v23, %v33648_v56 }
 0x213   :  { %28998 = vmatmul.mubr.f32.gmra.mrb[46].mxu0 %v10793_v46  ;;  %36821 = vst [vmem:[#allocation53_spill] sm:$0xff] %v33654_v20 }
 0x214   :  { %29004 = vmatprep.mubr.f32.mxu0 %v33392_v32  ;;  %36822 = vst [vmem:[#allocation54_spill] sm:$0xff] %v33661_v49  ;;  %v33670_v46 = vand.u32 4294901760, %v33661_v49 }
 0x216   :  { %36824 = vst [vmem:[#allocation56_spill] sm:$0xff] %v33670_v46  ;;  %v2378_v21 = vsub.f32 %v33661_v49, %v33670_v46 }
 0x217   :  { %29005 = vmatmul.mubr.f32.vlgmr.msra.gmra.mrb[32].mxu0 %v33364_v15 }
 0x218   :  { %28200 = vmatmul.mubr.f32.vlgmr.msra.gmra.mrb[2].mxu1 %v33386_v53  ;;  %29007 = vmatprep.mubr.f32.mxu0 %v33420_v58 }
 0x219   :  { %30551 = vmatpush3.bf16.msra.mxu1 %v33317_v48  ;;  %28206 = vmatprep.mubr.f32.mxu1 %v33331_v19  ;;  %v33665_v48 = vand.u32 4294901760, %v33654_v20 }
 0x21a   :  { %30553 = vmatprep.subr.bf16.mxu1 %v33299_v26  ;;  %30927 = vmatpush3.bf16.msra.mxu0 %v32867_v61 }
 0x21b   :  { %29008 = vmatmul.mubr.f32.gmra.mrb[34].mxu0 %v33440_v8  ;;  %30929 = vmatprep.subr.bf16.mxu0 %v32699_v12  ;;  %36823 = vst [vmem:[#allocation55_spill] sm:$0xff] %v33665_v48  ;;  %v2368_v6 = vsub.f32 %v33654_v20, %v33665_v48 }
 0x21c   :  { %29010 = vmatprep.mubr.f32.mxu0 %v33450_v34 }
 0x21d   :  { %v33682_v23 = vand.u32 4294901760, %v2368_v6  ;;  %v114_v6 = vld [vmem:[#allocation8 + $0x38] sm:$0xff] }
 0x21e   :  { %v2804_v60 = vsel %vm123_vm0, %v114_v6, 0 }
 0x21f   :  { %29011 = vmatmul.mubr.f32.gmra.mrb[36].mxu0 %v33460_v11  ;;  %36825 = vst [vmem:[#allocation57_spill] sm:$0xff] %v33682_v23  ;;  %v33724_v47 = vand.u32 4294901760, %v2804_v60 }
 0x220   :  { %28207 = vmatmul.mubr.f32.vlgmr.msra.gmra.mrb[2].mxu1 %v33335_v28  ;;  %29013 = vmatprep.mubr.f32.mxu0 %v33480_v22 }
 0x221   :  { %30555 = vmatpush3.bf16.msra.mxu1 %v33299_v26  ;;  %28213 = vmatprep.mubr.f32.mxu1 %v33331_v19  ;;  %v33686_v26 = vand.u32 4294901760, %v2378_v21  ;;  %36828 = vst [vmem:[#allocation60_spill] sm:$0xff] %v33724_v47  ;;  %v33735_v6 = vsub.f32 %v2804_v60, %v33724_v47 }
 0x222   :  { %30557 = vmatprep.subr.bf16.mxu1 %v33315_v50 }
 0x223   :  { %29014 = vmatmul.mubr.f32.gmra.mrb[38].mxu0 %v33494_v35  ;;  %36826 = vst [vmem:[#allocation58_spill] sm:$0xff] %v33686_v26  ;;  %36830 = vst [vmem:[#allocation62_spill] sm:$0xff] %v33735_v6 }
 0x224   :  { %29016 = vmatprep.mubr.f32.mxu0 %v33512_v33 }
 0x227   :  { %29017 = vmatmul.mubr.f32.gmra.mrb[40].mxu0 %v33525_v38 }
 0x228   :  { %28214 = vmatmul.mubr.f32.vlgmr.msra.gmra.mrb[2].mxu1 %v33335_v28  ;;  %29019 = vmatprep.mubr.f32.mxu0 %v33548_v42 }
 0x229   :  { %30559 = vmatpush3.bf16.msra.mxu1 %v33315_v50  ;;  %28220 = vmatprep.mubr.f32.mxu1 %v33682_v23 }
 0x22a   :  { %30561 = vmatprep.subr.bf16.mxu1 %v33342_v13 }
 0x22b   :  { %29020 = vmatmul.mubr.f32.gmra.mrb[42].mxu0 %v33566_v57 }
 0x22c   :  { %28221 = vmatmul.mubr.f32.vlgmr.msra.gmra.mrb[4].mxu1 %v33686_v26  ;;  %29022 = vmatprep.mubr.f32.mxu0 %v33577_v37 }
 0x22d   :  { %30563 = vmatpush3.bf16.msra.mxu1 %v33342_v13  ;;  %28227 = vmatprep.mubr.f32.mxu1 %v33643_v10  ;;  %v113_v13 = vld [vmem:[#allocation8 + $0x30] sm:$0xff] }
 0x22e   :  { %30565 = vmatprep.subr.bf16.mxu1 %v33319_v9 }
 0x22f   :  { %29023 = vmatmul.mubr.f32.gmra.mrb[44].mxu0 %v33587_v14 }
 0x230   :  { %29025 = vmatprep.mubr.f32.mxu0 %v33597_v52 }
 0x233   :  { %29026 = vmatmul.mubr.f32.gmra.mrb[46].mxu0 %v33620_v43 }
 0x234   :  { %28228 = vmatmul.mubr.f32.vlgmr.msra.gmra.mrb[4].mxu1 %v33648_v56  ;;  %29032 = vmatprep.mubr.f32.mxu0 %v33406_v18  ;;  %v36839_v18 = vld [vmem:[#allocation29_spill] sm:$0xff] }
 0x235   :  { %30567 = vmatpush3.bf16.msra.mxu1 %v33319_v9  ;;  %28234 = vmatprep.mubr.f32.mxu1 %v33654_v20  ;;  %v2801_v9 = vsel %vm123_vm0, %v113_v13, 0 }
 0x236   :  { %30569 = vmatprep.subr.bf16.mxu1 %v33315_v50  ;;  %v33719_v21 = vand.u32 4294901760, %v2801_v9 }
 0x237   :  { %29033 = vmatmul.mubr.f32.vlgmr.msra.gmra.mrb[32].mxu0 %v33413_v59 }
 0x238   :  { %29035 = vmatprep.mubr.f32.mxu0 %v33438_v29  ;;  %30931 = vmatpush3.bf16.msra.mxu0 %v32699_v12  ;;  %36827 = vst [vmem:[#allocation59_spill] sm:$0xff] %v33719_v21  ;;  %v33730_v13 = vsub.f32 %v2801_v9, %v33719_v21 }
 0x239   :  { %30933 = vmatprep.subr.bf16.mxu0 %v32873_v4 }
 0x23a   :  { %36829 = vst [vmem:[#allocation61_spill] sm:$0xff] %v33730_v13  ;;  %v33739_v25 = vand.u32 4294901760, %v33730_v13 }
 0x23b   :  { %29036 = vmatmul.mubr.f32.gmra.mrb[34].mxu0 %v33448_v16 }
 0x23c   :  { %28235 = vmatmul.mubr.f32.vlgmr.msra.gmra.mrb[4].mxu1 %v33661_v49  ;;  %29038 = vmatprep.mubr.f32.mxu0 %v33458_v63  ;;  %36831 = vst [vmem:[#allocation63_spill] sm:$0xff] %v33739_v25  ;;  %v2876_v60 = vsub.f32 %v33730_v13, %v33739_v25 }
 0x23d   :  { %30571 = vmatpush3.bf16.msra.mxu1 %v33315_v50  ;;  %28241 = vmatprep.mubr.f32.mxu1 %v33665_v48  ;;  %v36837_v48 = vand.u32 4294901760, %v33413_v59  ;;  %v36841_v59 = vand.u32 4294901760, %v33458_v63  ;;  %v36845_v63 = vand.u32 4294901760, %v33523_v5 }
 0x23e   :  { %30573 = vmatprep.subr.bf16.mxu1 %v33328_v31  ;;  %v33756_v1 = vand.u32 4294901760, %v2876_v60  ;;  %v36838_v60 = vand.u32 4294901760, %v33438_v29  ;;  %v36843_v29 = vand.u32 4294901760, %v33502_v54 }
 0x23f   :  { %29039 = vmatmul.mubr.f32.gmra.mrb[36].mxu0 %v33475_v3 }
 0x240   :  { %29041 = vmatprep.mubr.f32.mxu0 %v33502_v54  ;;  %36833 = vst [vmem:[#allocation65_spill] sm:$0xff] %v33756_v1  ;;  %v36847_v54 = vand.u32 4294901760, %v33559_v45 }
 0x243   :  { %29042 = vmatmul.mubr.f32.gmra.mrb[38].mxu0 %v33510_v40 }
 0x244   :  { %28242 = vmatmul.mubr.f32.vlgmr.msra.gmra.mrb[4].mxu1 %v33670_v46  ;;  %29044 = vmatprep.mubr.f32.mxu0 %v33523_v5  ;;  %v36836_v46 = vld [vmem:[#allocation36_spill] sm:$0xff]  ;;  %v36849_v5 = vand.u32 4294901760, %v33575_v7 }
 0x245   :  { %30575 = vmatpush3.bf16.msra.mxu1 %v33328_v31  ;;  %28248 = vmatprep.mubr.f32.mxu1 %v33643_v10  ;;  %v33744_v31 = vand.u32 4294901760, %v33735_v6 }
 0x246   :  { %30577 = vmatprep.subr.bf16.mxu1 %v33315_v50 }
 0x247   :  { %29045 = vmatmul.mubr.f32.gmra.mrb[40].mxu0 %v33543_v30  ;;  %36832 = vst [vmem:[#allocation64_spill] sm:$0xff] %v33744_v31  ;;  %v2886_v9 = vsub.f32 %v33735_v6, %v33744_v31 }
 0x248   :  { %29047 = vmatprep.mubr.f32.mxu0 %v33559_v45 }
 0x24b   :  { %29048 = vmatmul.mubr.f32.gmra.mrb[42].mxu0 %v33575_v7 }
 0x24c   :  { %28249 = vmatmul.mubr.f32.vlgmr.msra.gmra.mrb[4].mxu1 %v33648_v56  ;;  %29050 = vmatprep.mubr.f32.mxu0 %v33585_v39 }
 0x24d   :  { %30579 = vmatpush3.bf16.msra.mxu1 %v33315_v50  ;;  %28255 = vmatprep.mubr.f32.mxu1 %v33643_v10  ;;  %v33760_v50 = vand.u32 4294901760, %v2886_v9  ;;  %v36848_v9 = vld [vmem:[#allocation31_spill] sm:$0xff] }
 0x24e   :  { %30581 = vmatprep.subr.bf16.mxu1 %v33323_v44 }
 0x24f   :  { %29051 = vmatmul.mubr.f32.gmra.mrb[44].mxu0 %v33595_v55  ;;  %36834 = vst [vmem:[#allocation66_spill] sm:$0xff] %v33760_v50 }
 0x250   :  { %29053 = vmatprep.mubr.f32.mxu0 %v33616_v24 }
 0x253   :  { %29054 = vmatmul.mubr.f32.gmra.mrb[46].mxu0 %v33628_v62 }
 0x254   :  { %28256 = vmatmul.mubr.f32.vlgmr.msra.gmra.mrb[4].mxu1 %v33648_v56  ;;  %29060 = vmatprep.mubr.f32.mxu0 %v36835_v41  ;;  %v36840_v41 = vand.u32 4294901760, %v33448_v16  ;;  %v36844_v16 = vand.u32 4294901760, %v33510_v40 }
 0x255   :  { %30583 = vmatpush3.bf16.msra.mxu1 %v33323_v44  ;;  %28262 = vmatprep.mubr.f32.mxu1 %v33756_v1 }
 0x256   :  { %30585 = vmatprep.subr.bf16.mxu1 %v36836_v46 }
 0x257   :  { %29061 = vmatmul.mubr.f32.vlgmr.msra.gmra.mrb[32].mxu0 %v36837_v48  ;;  %v36842_v48 = vand.u32 4294901760, %v33475_v3  ;;  %v36846_v3 = vand.u32 4294901760, %v33543_v30  ;;  %v36850_v30 = vand.u32 4294901760, %v33585_v39  ;;  %v36856_v39 = vand.u32 4294901760, %v33628_v62 }
 0x258   :  { %28263 = vmatmul.mubr.f32.vlgmr.msra.gmra.mrb[6].mxu1 %v33760_v50  ;;  %29063 = vmatprep.mubr.f32.mxu0 %v36838_v60  ;;  %v116_v60 = vld [vmem:[#allocation8 + $0x48] sm:$0xff] }
 0x259   :  { %30587 = vmatpush3.bf16.msra.mxu1 %v36836_v46  ;;  %28269 = vmatprep.mubr.f32.mxu1 %v33719_v21  ;;  %v115_v46 = vld [vmem:[#allocation8 + $0x40] sm:$0xff]  ;;  %v3312_v45 = vsel %vm123_vm0, %v116_v60, 0 }
 0x25a   :  { %30589 = vmatprep.subr.bf16.mxu1 %v36839_v18  ;;  %30935 = vmatpush3.bf16.msra.mxu0 %v32873_v4  ;;  %v3309_v40 = vsel %vm123_vm0, %v115_v46, 0 }
 0x25b   :  { %29064 = vmatmul.mubr.f32.gmra.mrb[34].mxu0 %v36840_v41  ;;  %30937 = vmatprep.subr.bf16.mxu0 %v32699_v12  ;;  %v36852_v41 = vand.u32 4294901760, %v33595_v55 }
 0x25c   :  { %29066 = vmatprep.mubr.f32.mxu0 %v36841_v59  ;;  %v33812_v59 = vand.u32 4294901760, %v3312_v45 }
 0x25e   :  { %36853 = vst [vmem:[#allocation29_spill] sm:$0xff] %v33812_v59  ;;  %v33825_v55 = vsub.f32 %v3312_v45, %v33812_v59 }
 0x25f   :  { %29067 = vmatmul.mubr.f32.gmra.mrb[36].mxu0 %v36842_v48  ;;  %v36854_v48 = vand.u32 4294901760, %v33616_v24 }
 0x260   :  { %28270 = vmatmul.mubr.f32.vlgmr.msra.gmra.mrb[6].mxu1 %v33724_v47  ;;  %29069 = vmatprep.mubr.f32.mxu0 %v36843_v29  ;;  %36857 = vst [vmem:[#allocation67_spill] sm:$0xff] %v33825_v55  ;;  %v33834_v29 = vand.u32 4294901760, %v33825_v55 }
 0x261   :  { %30591 = vmatpush3.bf16.msra.mxu1 %v36839_v18  ;;  %28276 = vmatprep.mubr.f32.mxu1 %v33730_v13  ;;  %v33806_v18 = vand.u32 4294901760, %v3309_v40 }
 0x262   :  { %30593 = vmatprep.subr.bf16.mxu1 %v33323_v44  ;;  %36859 = vst [vmem:[#allocation69_spill] sm:$0xff] %v33834_v29 }
 0x263   :  { %29070 = vmatmul.mubr.f32.gmra.mrb[38].mxu0 %v36844_v16  ;;  %36851 = vst [vmem:[#allocation36_spill] sm:$0xff] %v33806_v18  ;;  %v33819_v7 = vsub.f32 %v3309_v40, %v33806_v18  ;;  %v36860_v16 = vld [vmem:[#allocation30_spill] sm:$0xff] }
 0x264   :  { %29072 = vmatprep.mubr.f32.mxu0 %v36845_v63  ;;  %v3394_v63 = vsub.f32 %v33825_v55, %v33834_v29 }
 0x265   :  { %36855 = vst [vmem:[#allocation31_spill] sm:$0xff] %v33819_v7  ;;  %v33829_v24 = vand.u32 4294901760, %v33819_v7 }
 0x267   :  { %29073 = vmatmul.mubr.f32.gmra.mrb[40].mxu0 %v36846_v3  ;;  %36858 = vst [vmem:[#allocation68_spill] sm:$0xff] %v33829_v24  ;;  %v3384_v62 = vsub.f32 %v33819_v7, %v33829_v24  ;;  %v36863_v3 = vld [vmem:[#allocation41_spill] sm:$0xff] }
 0x268   :  { %28277 = vmatmul.mubr.f32.vlgmr.msra.gmra.mrb[6].mxu1 %v33735_v6  ;;  %29075 = vmatprep.mubr.f32.mxu0 %v36847_v54  ;;  %v36864_v54 = vld [vmem:[#allocation32_spill] sm:$0xff]  ;;  %v118_v6 = vld [vmem:[#allocation8 + $0x58] sm:$0xff] }
 0x269   :  { %30595 = vmatpush3.bf16.msra.mxu1 %v33323_v44  ;;  %28283 = vmatprep.mubr.f32.mxu1 %v33739_v25  ;;  %v33848_v46 = vand.u32 4294901760, %v3384_v62 }
 0x26a   :  { %30597 = vmatprep.subr.bf16.mxu1 %v36848_v9 }
 0x26b   :  { %29076 = vmatmul.mubr.f32.gmra.mrb[42].mxu0 %v36849_v5  ;;  %36861 = vst [vmem:[#allocation30_spill] sm:$0xff] %v33848_v46 }
 0x26c   :  { %29078 = vmatprep.mubr.f32.mxu0 %v36850_v30 }
 0x26f   :  { %29079 = vmatmul.mubr.f32.gmra.mrb[44].mxu0 %v36852_v41 }
 0x270   :  { %28284 = vmatmul.mubr.f32.vlgmr.msra.gmra.mrb[6].mxu1 %v33744_v31  ;;  %29081 = vmatprep.mubr.f32.mxu0 %v36854_v48 }
 0x271   :  { %30599 = vmatpush3.bf16.msra.mxu1 %v36848_v9  ;;  %28290 = vmatprep.mubr.f32.mxu1 %v33719_v21 }
 0x272   :  { %30601 = vmatprep.subr.bf16.mxu1 %v33323_v44 }
 0x273   :  { %29082 = vmatmul.mubr.f32.gmra.mrb[46].mxu0 %v36856_v39  ;;  %v117_v39 = vld [vmem:[#allocation8 + $0x50] sm:$0xff] }
 0x274   :  { %29088 = vmatprep.mubr.f32.mxu0 %v33392_v32 }
 0x277   :  { %29089 = vmatmul.mubr.f32.vlgmr.msra.gmra.mrb[32].mxu0 %v33364_v15 }
 0x278   :  { %28291 = vmatmul.mubr.f32.vlgmr.msra.gmra.mrb[6].mxu1 %v33724_v47  ;;  %29091 = vmatprep.mubr.f32.mxu0 %v33420_v58 }
 0x279   :  { %30603 = vmatpush3.bf16.msra.mxu1 %v33323_v44  ;;  %28297 = vmatprep.mubr.f32.mxu1 %v33719_v21  ;;  %v33852_v44 = vand.u32 4294901760, %v3394_v63 }
 0x27a   :  { %30605 = vmatprep.subr.bf16.mxu1 %v36860_v16  ;;  %30939 = vmatpush3.bf16.msra.mxu0 %v32699_v12 }
 0x27b   :  { %29092 = vmatmul.mubr.f32.gmra.mrb[34].mxu0 %v33440_v8  ;;  %31133 = vmatprep.subr.bf16.mxu0 %v32699_v12  ;;  %36862 = vst [vmem:[#allocation70_spill] sm:$0xff] %v33852_v44 }
 0x27c   :  { %29094 = vmatprep.mubr.f32.mxu0 %v33450_v34 }
 0x27f   :  { %29095 = vmatmul.mubr.f32.gmra.mrb[36].mxu0 %v33460_v11 }
 0x280   :  { %28298 = vmatmul.mubr.f32.vlgmr.msra.gmra.mrb[6].mxu1 %v33724_v47  ;;  %29097 = vmatprep.mubr.f32.mxu0 %v33480_v22 }
 0x281   :  { %30607 = vmatpush3.bf16.msra.mxu1 %v36860_v16  ;;  %28304 = vmatprep.mubr.f32.mxu1 %v33848_v46 }
 0x282   :  { %30609 = vmatprep.subr.bf16.mxu1 %v36863_v3 }
 0x283   :  { %29098 = vmatmul.mubr.f32.gmra.mrb[38].mxu0 %v33494_v35 }
 0x284   :  { %28305 = vmatmul.mubr.f32.vlgmr.msra.gmra.mrb[8].mxu1 %v33852_v44  ;;  %29100 = vmatprep.mubr.f32.mxu0 %v33512_v33 }
 0x285   :  { %30611 = vmatpush3.bf16.msra.mxu1 %v36863_v3  ;;  %28311 = vmatprep.mubr.f32.mxu1 %v33806_v18 }
 0x286   :  { %30613 = vmatprep.subr.bf16.mxu1 %v36864_v54 }
 0x287   :  { %29101 = vmatmul.mubr.f32.gmra.mrb[40].mxu0 %v33525_v38 }
 0x288   :  { %29103 = vmatprep.mubr.f32.mxu0 %v33548_v42 }
 0x28a   :  { %v28614_v9 = vpop.f32.mrb[16].mxu0 }
 0x28b   :  { %v6496_v40 = vand.u32 4294901760, %v28614_v9  ;;  %v6398_v60 = vpop.f32.mrb[17].mxu0  ;;  %29104 = vmatmul.mubr.f32.gmra.mrb[42].mxu0 %v33566_v57 }
 0x28c   :  { %v6493_v5 = vand.u32 4294901760, %v6398_v60  ;;  %28312 = vmatmul.mubr.f32.vlgmr.msra.gmra.mrb[8].mxu1 %v33812_v59  ;;  %29106 = vmatprep.mubr.f32.mxu0 %v33577_v37 }
 0x28d   :  { %v6588_v30 = vsub.f32 %v28614_v9, %v6496_v40  ;;  %30615 = vmatpush3.bf16.msra.mxu1 %v36864_v54  ;;  %28318 = vmatprep.mubr.f32.mxu1 %v33819_v7  ;;  %v3817_v7 = vsel %vm123_vm0, %v117_v39, 0 }
 0x28e   :  { %v33871_v45 = vpack.c.bf16 %v6496_v40, %v6493_v5  ;;  %v6581_v41 = vsub.f32 %v6398_v60, %v6493_v5  ;;  %30617 = vmatprep.subr.bf16.mxu1 %v36860_v16  ;;  %v28617_v48 = vpop.f32.mrb[18].mxu0 }
 0x28f   :  { %v6589_v62 = vand.u32 4294901760, %v6588_v30  ;;  %v6998_v63 = vand.u32 4294901760, %v28617_v48  ;;  %v6410_v3 = vpop.f32.mrb[19].mxu0  ;;  %29107 = vmatmul.mubr.f32.gmra.mrb[44].mxu0 %v33587_v14 }
 0x290   :  { %v6582_v44 = vand.u32 4294901760, %v6581_v41  ;;  %v6995_v46 = vand.u32 4294901760, %v6410_v3  ;;  %29109 = vmatprep.mubr.f32.mxu0 %v33597_v52  ;;  %v33877_v40 = vpack.c.bf16 %v6588_v30, %v6581_v41 }
 0x291   :  { %v6590_v9 = vsub.f32 %v6588_v30, %v6589_v62  ;;  %v7090_v54 = vsub.f32 %v28617_v48, %v6998_v63 }
 0x292   :  { %v6583_v60 = vsub.f32 %v6581_v41, %v6582_v44  ;;  %v33879_v5 = vpack.c.bf16 %v6998_v63, %v6995_v46  ;;  %v7083_v31 = vsub.f32 %v6410_v3, %v6995_v46  ;;  %v28620_v25 = vpop.f32.mrb[20].mxu0  ;;  %v33881_v13 = vpack.c.bf16 %v6589_v62, %v6582_v44 }
 0x293   :  { %v7091_v47 = vand.u32 4294901760, %v7090_v54  ;;  %v7500_v21 = vand.u32 4294901760, %v28620_v25  ;;  %v6422_v50 = vpop.f32.mrb[21].mxu0  ;;  %29110 = vmatmul.mubr.f32.gmra.mrb[46].mxu0 %v33620_v43  ;;  %v6591_v1 = vand.u32 4294901760, %v6590_v9  ;;  %v33890_v44 = vand.u32 4294901760, %v3817_v7 }
 0x294   :  { %v7084_v4 = vand.u32 4294901760, %v7083_v31  ;;  %v7497_v48 = vand.u32 4294901760, %v6422_v50  ;;  %28319 = vmatmul.mubr.f32.vlgmr.msra.gmra.mrb[8].mxu1 %v33825_v55  ;;  %29116 = vmatprep.mubr.f32.mxu0 %v33392_v32  ;;  %v6584_v30 = vand.u32 4294901760, %v6583_v60  ;;  %v33886_v41 = vpack.c.bf16 %v7090_v54, %v7083_v31  ;;  %v36866_v55 = vld [vmem:[#allocation37_spill] sm:$0xff] }
 0x295   :  { %v7092_v46 = vsub.f32 %v7090_v54, %v7091_v47  ;;  %v7592_v39 = vsub.f32 %v28620_v25, %v7500_v21  ;;  %30619 = vmatpush3.bf16.msra.mxu1 %v36860_v16  ;;  %28325 = vmatprep.mubr.f32.mxu1 %v33829_v24  ;;  %36865 = vst [vmem:[#allocation41_spill] sm:$0xff] %v33890_v44  ;;  %v3820_v62 = vsel %vm123_vm0, %v118_v6, 0 }
 0x296   :  { %v7085_v63 = vsub.f32 %v7083_v31, %v7084_v4  ;;  %v33893_v3 = vpack.c.bf16 %v7500_v21, %v7497_v48  ;;  %v7585_v9 = vsub.f32 %v6422_v50, %v7497_v48  ;;  %30621 = vmatprep.subr.bf16.mxu1 %v36866_v55  ;;  %v28623_v32 = vpop.f32.mrb[22].mxu0  ;;  %v33896_v60 = vpack.c.bf16 %v6591_v1, %v6584_v30 }
 0x297   :  { %v7593_v49 = vand.u32 4294901760, %v7592_v39  ;;  %v8002_v54 = vand.u32 4294901760, %v28623_v32  ;;  %v6434_v25 = vpop.f32.mrb[23].mxu0  ;;  %29117 = vmatmul.mubr.f32.vlgmr.msra.gmra.mrb[32].mxu0 %v33364_v15  ;;  %v7093_v20 = vand.u32 4294901760, %v7092_v46  ;;  %v33899_v24 = vpack.c.bf16 %v7091_v47, %v7084_v4  ;;  %v36870_v15 = vld [vmem:[#allocation16_spill] sm:$0xff] }
 0x298   :  { %v7586_v56 = vand.u32 4294901760, %v7585_v9  ;;  %v7999_v10 = vand.u32 4294901760, %v6434_v25  ;;  %29119 = vmatprep.mubr.f32.mxu0 %v33420_v58  ;;  %v7086_v21 = vand.u32 4294901760, %v7085_v63  ;;  %v33902_v6 = vpack.c.bf16 %v7592_v39, %v7585_v9  ;;  %31135 = vmatpush3.bf16.msra.mxu0 %v32699_v12 }
 0x299   :  { %v7594_v31 = vsub.f32 %v7592_v39, %v7593_v49  ;;  %v8094_v1 = vsub.f32 %v28623_v32, %v8002_v54  ;;  %v33906_v50 = vsub.f32 %v3817_v7, %v33890_v44  ;;  %v33908_v48 = vand.u32 4294901760, %v3820_v62  ;;  %31137 = vmatprep.subr.bf16.mxu0 %v36870_v15 }
 0x29a   :  { %36867 = vst [vmem:[#allocation32_spill] sm:$0xff] %v33902_v6  ;;  %v7587_v4 = vsub.f32 %v7585_v9, %v7586_v56  ;;  %v33911_v47 = vpack.c.bf16 %v8002_v54, %v7999_v10  ;;  %v8087_v30 = vsub.f32 %v6434_v25, %v7999_v10  ;;  %v28626_v46 = vpop.f32.mrb[24].mxu0  ;;  %v33913_v58 = vpack.c.bf16 %v7093_v20, %v7086_v21 }
 0x29b   :  { %36868 = vst [vmem:[#allocation37_spill] sm:$0xff] %v33906_v50  ;;  %36869 = vst [vmem:[#allocation71_spill] sm:$0xff] %v33908_v48  ;;  %v8095_v63 = vand.u32 4294901760, %v8094_v1  ;;  %v8504_v6 = vand.u32 4294901760, %v28626_v46  ;;  %v6446_v26 = vpop.f32.mrb[25].mxu0  ;;  %29120 = vmatmul.mubr.f32.gmra.mrb[34].mxu0 %v33440_v8  ;;  %v7595_v39 = vand.u32 4294901760, %v7594_v31  ;;  %v33916_v32 = vpack.c.bf16 %v7593_v49, %v7586_v56 }
 0x29c   :  { %36871 = vst [vmem:[#allocation72_spill] sm:$0xff] %v33911_v47  ;;  %v8088_v7 = vand.u32 4294901760, %v8087_v30  ;;  %v8501_v23 = vand.u32 4294901760, %v6446_v26  ;;  %28326 = vmatmul.mubr.f32.vlgmr.msra.gmra.mrb[8].mxu1 %v33834_v29  ;;  %29122 = vmatprep.mubr.f32.mxu0 %v33450_v34  ;;  %v7588_v9 = vand.u32 4294901760, %v7587_v4  ;;  %v33920_v54 = vpack.c.bf16 %v8094_v1, %v8087_v30 }
 0x29d   :  { %v8096_v10 = vsub.f32 %v8094_v1, %v8095_v63  ;;  %v8596_v20 = vsub.f32 %v28626_v46, %v8504_v6  ;;  %30623 = vmatpush3.bf16.msra.mxu1 %v36866_v55  ;;  %28332 = vmatprep.mubr.f32.mxu1 %v33806_v18  ;;  %v33925_v8 = vand.u32 4294901760, %v33906_v50  ;;  %v33928_v56 = vsub.f32 %v3820_v62, %v33908_v48 }
 0x29e   :  { %36872 = vst [vmem:[#allocation73_spill] sm:$0xff] %v33920_v54  ;;  %v8089_v49 = vsub.f32 %v8087_v30, %v8088_v7  ;;  %v33930_v25 = vpack.c.bf16 %v8504_v6, %v8501_v23  ;;  %v8589_v21 = vsub.f32 %v6446_v26, %v8501_v23  ;;  %30625 = vmatprep.subr.bf16.mxu1 %v36860_v16  ;;  %v28629_v34 = vpop.f32.mrb[26].mxu0 }
 0x29f   :  { %36873 = vst [vmem:[#allocation74_spill] sm:$0xff] %v33925_v8  ;;  %36874 = vst [vmem:[#allocation75_spill] sm:$0xff] %v33928_v56  ;;  %v33933_v31 = vpack.c.bf16 %v7595_v39, %v7588_v9  ;;  %v8597_v1 = vand.u32 4294901760, %v8596_v20  ;;  %v9006_v4 = vand.u32 4294901760, %v28629_v34  ;;  %v6458_v55 = vpop.f32.mrb[27].mxu0  ;;  %29123 = vmatmul.mubr.f32.gmra.mrb[36].mxu0 %v33460_v11  ;;  %v8097_v46 = vand.u32 4294901760, %v8096_v10 }
 0x2a0   :  { %36875 = vst [vmem:[#allocation76_spill] sm:$0xff] %v33930_v25  ;;  %v33936_v29 = vpack.c.bf16 %v8095_v63, %v8088_v7  ;;  %v8590_v54 = vand.u32 4294901760, %v8589_v21  ;;  %v9003_v62 = vand.u32 4294901760, %v6458_v55  ;;  %29125 = vmatprep.mubr.f32.mxu0 %v33480_v22  ;;  %v8090_v6 = vand.u32 4294901760, %v8089_v49 }
 0x2a1   :  { %v33939_v30 = vpack.c.bf16 %v8596_v20, %v8589_v21  ;;  %v8598_v23 = vsub.f32 %v8596_v20, %v8597_v1  ;;  %v9098_v26 = vsub.f32 %v28629_v34, %v9006_v4  ;;  %v3892_v39 = vsub.f32 %v33906_v50, %v33925_v8 }
 0x2a2   :  { %36876 = vst [vmem:[#allocation77_spill] sm:$0xff] %v33936_v29  ;;  %v33944_v9 = vand.u32 4294901760, %v33928_v56  ;;  %v8591_v25 = vsub.f32 %v8589_v21, %v8590_v54  ;;  %v33946_v11 = vpack.c.bf16 %v9006_v4, %v9003_v62  ;;  %v9091_v63 = vsub.f32 %v6458_v55, %v9003_v62  ;;  %v28632_v7 = vpop.f32.mrb[28].mxu0 }
 0x2a3   :  { %36877 = vst [vmem:[#allocation78_spill] sm:$0xff] %v33939_v30  ;;  %v33948_v10 = vpack.c.bf16 %v8097_v46, %v8090_v6  ;;  %v9099_v29 = vand.u32 4294901760, %v9098_v26  ;;  %v9508_v22 = vand.u32 4294901760, %v28632_v7  ;;  %v6470_v49 = vpop.f32.mrb[29].mxu0  ;;  %29126 = vmatmul.mubr.f32.gmra.mrb[38].mxu0 %v33494_v35  ;;  %v8599_v20 = vand.u32 4294901760, %v8598_v23  ;;  %v36883_v6 = vld [vmem:[#allocation35_spill] sm:$0xff] }
 0x2a4   :  { %36878 = vst [vmem:[#allocation79_spill] sm:$0xff] %v33944_v9  ;;  %36879 = vst [vmem:[#allocation80_spill] sm:$0xff] %v33946_v11  ;;  %v33951_v34 = vpack.c.bf16 %v8597_v1, %v8590_v54  ;;  %v9092_v30 = vand.u32 4294901760, %v9091_v63  ;;  %v9505_v47 = vand.u32 4294901760, %v6470_v49  ;;  %28333 = vmatmul.mubr.f32.vlgmr.msra.gmra.mrb[8].mxu1 %v33812_v59  ;;  %29128 = vmatprep.mubr.f32.mxu0 %v33512_v33  ;;  %v8592_v21 = vand.u32 4294901760, %v8591_v25 }
 0x2a5   :  { %v33955_v4 = vpack.c.bf16 %v9098_v26, %v9091_v63  ;;  %v9100_v55 = vsub.f32 %v9098_v26, %v9099_v29  ;;  %v9600_v46 = vsub.f32 %v28632_v7, %v9508_v22  ;;  %30627 = vmatpush3.bf16.msra.mxu1 %v36860_v16  ;;  %28339 = vmatprep.mubr.f32.mxu1 %v33806_v18 }
 0x2a6   :  { %36880 = vst [vmem:[#allocation81_spill] sm:$0xff] %v33951_v34  ;;  %v3902_v35 = vsub.f32 %v33928_v56, %v33944_v9  ;;  %v9093_v54 = vsub.f32 %v9091_v63, %v9092_v30  ;;  %v33961_v1 = vpack.c.bf16 %v9508_v22, %v9505_v47  ;;  %v9593_v62 = vsub.f32 %v6470_v49, %v9505_v47  ;;  %v28635_v23 = vpop.f32.mrb[30].mxu0 }
 0x2a7   :  { %36881 = vst [vmem:[#allocation82_spill] sm:$0xff] %v33955_v4  ;;  %30629 = vmatprep.subr.bf16.mxu1 %v36883_v6  ;;  %v33964_v33 = vpack.c.bf16 %v8599_v20, %v8592_v21  ;;  %v9601_v25 = vand.u32 4294901760, %v9600_v46  ;;  %v10010_v4 = vand.u32 4294901760, %v28635_v23  ;;  %v6482_v26 = vpop.f32.mrb[31].mxu0  ;;  %29129 = vmatmul.mubr.f32.gmra.mrb[40].mxu0 %v33525_v38  ;;  %v9101_v16 = vand.u32 4294901760, %v9100_v55 }
 0x2a8   :  { %36882 = vst [vmem:[#allocation83_spill] sm:$0xff] %v33961_v1  ;;  %v33967_v7 = vpack.c.bf16 %v9099_v29, %v9092_v30  ;;  %v9594_v11 = vand.u32 4294901760, %v9593_v62  ;;  %v10007_v34 = vand.u32 4294901760, %v6482_v26  ;;  %29131 = vmatprep.mubr.f32.mxu0 %v33548_v42  ;;  %v9094_v63 = vand.u32 4294901760, %v9093_v54 }
 0x2a9   :  { %36884 = vst [vmem:[#allocation35_spill] sm:$0xff] %v33964_v33  ;;  %v33970_v22 = vpack.c.bf16 %v9600_v46, %v9593_v62  ;;  %v9602_v47 = vsub.f32 %v9600_v46, %v9601_v25  ;;  %v10102_v49 = vsub.f32 %v28635_v23, %v10010_v4  ;;  %v33972_v1 = vand.u32 4294901760, %v3892_v39 }
 0x2aa   :  { %36885 = vst [vmem:[#allocation84_spill] sm:$0xff] %v33967_v7  ;;  %v9595_v20 = vsub.f32 %v9593_v62, %v9594_v11  ;;  %v33974_v21 = vpack.c.bf16 %v10010_v4, %v10007_v34  ;;  %v10095_v18 = vsub.f32 %v6482_v26, %v10007_v34  ;;  %v33976_v33 = vpack.c.bf16 %v9101_v16, %v9094_v63  ;;  %v36896_v62 = vld [vmem:[#allocation38_spill] sm:$0xff] }
 0x2ab   :  { %36886 = vst [vmem:[#allocation85_spill] sm:$0xff] %v33970_v22  ;;  %36887 = vst [vmem:[#allocation86_spill] sm:$0xff] %v33972_v1  ;;  %v10103_v38 = vand.u32 4294901760, %v10102_v49  ;;  %29132 = vmatmul.mubr.f32.gmra.mrb[42].mxu0 %v33566_v57  ;;  %v9603_v29 = vand.u32 4294901760, %v9602_v47  ;;  %v33979_v30 = vpack.c.bf16 %v9601_v25, %v9594_v11  ;;  %v33982_v55 = vand.u32 4294901760, %v3902_v35  ;;  %v36893_v57 = vld [vmem:[#allocation45_spill] sm:$0xff] }
 0x2ac   :  { %36888 = vst [vmem:[#allocation87_spill] sm:$0xff] %v33974_v21  ;;  %36889 = vst [vmem:[#allocation88_spill] sm:$0xff] %v33976_v33  ;;  %v10096_v42 = vand.u32 4294901760, %v10095_v18  ;;  %28340 = vmatmul.mubr.f32.vlgmr.msra.gmra.mrb[8].mxu1 %v33812_v59  ;;  %29134 = vmatprep.mubr.f32.mxu0 %v33577_v37  ;;  %v9596_v39 = vand.u32 4294901760, %v9595_v20  ;;  %v33985_v46 = vpack.c.bf16 %v10102_v49, %v10095_v18  ;;  %v32423_v21 = vld [vmem:[#allocation5 + $0x30] sm:$0xff] }
 0x2ad   :  { %36890 = vst [vmem:[#allocation89_spill] sm:$0xff] %v33979_v30  ;;  %36891 = vst [vmem:[#allocation90_spill] sm:$0xff] %v33982_v55  ;;  %v10104_v4 = vsub.f32 %v10102_v49, %v10103_v38  ;;  %30631 = vmatpush3.bf16.msra.mxu1 %v36883_v6  ;;  %28346 = vmatprep.mubr.f32.mxu1 %v33972_v1 }
 0x2ae   :  { %36892 = vst [vmem:[#allocation91_spill] sm:$0xff] %v33985_v46  ;;  %v10097_v34 = vsub.f32 %v10095_v18, %v10096_v42  ;;  %30633 = vmatprep.subr.bf16.mxu1 %v36893_v57  ;;  %v33990_v11 = vpack.c.bf16 %v9603_v29, %v9596_v39  ;;  %v33992_v54 = vpack.c.bf16 %v10103_v38, %v10096_v42  ;;  %v36907_v39 = vld [vmem:[#allocation40_spill] sm:$0xff] }
 0x2af   :  { %29135 = vmatmul.mubr.f32.gmra.mrb[44].mxu0 %v33587_v14  ;;  %v10105_v35 = vand.u32 4294901760, %v10104_v4  ;;  %v119_v14 = vld [vmem:[#allocation8 + $0x60] sm:$0xff] }
 0x2b0   :  { %36894 = vst [vmem:[#allocation45_spill] sm:$0xff] %v33990_v11  ;;  %36895 = vst [vmem:[#allocation92_spill] sm:$0xff] %v33992_v54  ;;  %28347 = vmatmul.mubr.f32.vlgmr.msra.gmra.mrb[10].mxu1 %v33982_v55  ;;  %29137 = vmatprep.mubr.f32.mxu0 %v33597_v52  ;;  %v10098_v37 = vand.u32 4294901760, %v10097_v34  ;;  %v36898_v52 = vld [vmem:[#allocation43_spill] sm:$0xff]  ;;  %v4325_v23 = vsel %vm123_vm0, %v119_v14, 0 }
 0x2b1   :  { %30635 = vmatpush3.bf16.msra.mxu1 %v36893_v57  ;;  %28353 = vmatprep.mubr.f32.mxu1 %v33890_v44  ;;  %v34012_v25 = vand.u32 4294901760, %v4325_v23 }
 0x2b2   :  { %30637 = vmatprep.subr.bf16.mxu1 %v36896_v62  ;;  %v34000_v18 = vpack.c.bf16 %v10105_v35, %v10098_v37  ;;  %v36911_v35 = vld [vmem:[#allocation48_spill] sm:$0xff] }
 0x2b3   :  { %29138 = vmatmul.mubr.f32.gmra.mrb[46].mxu0 %v33620_v43  ;;  %v120_v43 = vld [vmem:[#allocation8 + $0x68] sm:$0xff]  ;;  %36899 = vst [vmem:[#allocation43_spill] sm:$0xff] %v34012_v25  ;;  %v34021_v63 = vsub.f32 %v4325_v23, %v34012_v25  ;;  %v121_v37 = vld [vmem:[#allocation8 + $0x70] sm:$0xff] }
 0x2b4   :  { %36897 = vst [vmem:[#allocation38_spill] sm:$0xff] %v34000_v18  ;;  %v4328_v26 = vsel %vm123_vm0, %v120_v43, 0  ;;  %v4833_v14 = vsel %vm123_vm0, %v121_v37, 0  ;;  %v32422_v18 = vld [vmem:[#allocation5 + $0x28] sm:$0xff] }
 0x2b5   :  { %v34016_v16 = vand.u32 4294901760, %v4328_v26  ;;  %36901 = vst [vmem:[#allocation94_spill] sm:$0xff] %v34021_v63  ;;  %v34028_v49 = vand.u32 4294901760, %v34021_v63  ;;  %v34066_v23 = vand.u32 4294901760, %v4833_v14 }
 0x2b7   :  { %36900 = vst [vmem:[#allocation93_spill] sm:$0xff] %v34016_v16  ;;  %v34025_v47 = vsub.f32 %v4328_v26, %v34016_v16  ;;  %36903 = vst [vmem:[#allocation96_spill] sm:$0xff] %v34028_v49  ;;  %v4400_v42 = vsub.f32 %v34021_v63, %v34028_v49 }
 0x2b8   :  { %28354 = vmatmul.mubr.f32.vlgmr.msra.gmra.mrb[10].mxu1 %v33908_v48 }
 0x2b9   :  { %30639 = vmatpush3.bf16.msra.mxu1 %v36896_v62  ;;  %28360 = vmatprep.mubr.f32.mxu1 %v33906_v50  ;;  %36902 = vst [vmem:[#allocation95_spill] sm:$0xff] %v34025_v47  ;;  %v34036_v29 = vand.u32 4294901760, %v34025_v47  ;;  %v34045_v34 = vand.u32 4294901760, %v4400_v42  ;;  %v36912_v62 = vld [vmem:[#allocation49_spill] sm:$0xff]  ;;  %v34075_v42 = vsub.f32 %v4833_v14, %v34066_v23 }
 0x2ba   :  { %30641 = vmatprep.subr.bf16.mxu1 %v36883_v6 }
 0x2bb   :  { %36906 = vst [vmem:[#allocation99_spill] sm:$0xff] %v34036_v29  ;;  %v4410_v4 = vsub.f32 %v34025_v47, %v34036_v29  ;;  %36908 = vst [vmem:[#allocation40_spill] sm:$0xff] %v34045_v34 }
 0x2bc   :  { %36915 = vst [vmem:[#allocation49_spill] sm:$0xff] %v34075_v42 }
 0x2bd   :  { %v34048_v57 = vand.u32 4294901760, %v4410_v4 }
 0x2bf   :  { %36909 = vst [vmem:[#allocation100_spill] sm:$0xff] %v34048_v57 }
 0x2c0   :  { %28361 = vmatmul.mubr.f32.vlgmr.msra.gmra.mrb[10].mxu1 %v33928_v56  ;;  %v32431_v56 = vld [vmem:[#allocation5 + $0x70] sm:$0xff] }
 0x2c1   :  { %30643 = vmatpush3.bf16.msra.mxu1 %v36883_v6  ;;  %28367 = vmatprep.mubr.f32.mxu1 %v33925_v8  ;;  %v15706_v50 = vmul.f32 %v32431_v56, %v32431_v56 }
 0x2c2   :  { %30645 = vmatprep.subr.bf16.mxu1 %v36898_v52 }
 0x2c8   :  { %28368 = vmatmul.mubr.f32.vlgmr.msra.gmra.mrb[10].mxu1 %v33944_v9 }
 0x2c9   :  { %30647 = vmatpush3.bf16.msra.mxu1 %v36898_v52  ;;  %28374 = vmatprep.mubr.f32.mxu1 %v33890_v44  ;;  %v122_v52 = vld [vmem:[#allocation8 + $0x78] sm:$0xff] }
 0x2ca   :  { %30649 = vmatprep.subr.bf16.mxu1 %v36883_v6  ;;  %v4836_v43 = vsel %vm123_vm0, %v122_v52, 0  ;;  %v36921_v52 = vld [vmem:[#allocation44_spill] sm:$0xff] }
 0x2cb   :  { %v34070_v26 = vand.u32 4294901760, %v4836_v43 }
 0x2cd   :  { %36914 = vst [vmem:[#allocation48_spill] sm:$0xff] %v34070_v26  ;;  %v34079_v4 = vsub.f32 %v4836_v43, %v34070_v26 }
 0x2cf   :  { %v34030_v20 = vpop.f32.mrb[0].mxu1  ;;  %36916 = vst [vmem:[#allocation101_spill] sm:$0xff] %v34079_v4 }
 0x2d0   :  { %36904 = vst [vmem:[#allocation97_spill] sm:$0xff] %v34030_v20  ;;  %v34032_v38 = vpop.f32.mrb[1].mxu1  ;;  %28375 = vmatmul.mubr.f32.vlgmr.msra.gmra.mrb[10].mxu1 %v33908_v48 }
 0x2d1   :  { %36905 = vst [vmem:[#allocation98_spill] sm:$0xff] %v34032_v38  ;;  %30651 = vmatpush3.bf16.msra.mxu1 %v36883_v6  ;;  %28381 = vmatprep.mubr.f32.mxu1 %v33890_v44  ;;  %v36910_v6 = vld [vmem:[#allocation47_spill] sm:$0xff] }
 0x2d2   :  { %30653 = vmatprep.subr.bf16.mxu1 %v36907_v39  ;;  %36913 = vst [vmem:[#allocation47_spill] sm:$0xff] %v34066_v23 }
 0x2d8   :  { %28382 = vmatmul.mubr.f32.vlgmr.msra.gmra.mrb[10].mxu1 %v33908_v48 }
 0x2d9   :  { %30655 = vmatpush3.bf16.msra.mxu1 %v36907_v39  ;;  %28388 = vmatprep.mubr.f32.mxu1 %v34045_v34 }
 0x2da   :  { %30657 = vmatprep.subr.bf16.mxu1 %v36910_v6 }
 0x2dc   :  { %28389 = vmatmul.mubr.f32.vlgmr.msra.gmra.mrb[12].mxu1 %v34048_v57 }
 0x2dd   :  { %30659 = vmatpush3.bf16.msra.mxu1 %v36910_v6  ;;  %28395 = vmatprep.mubr.f32.mxu1 %v34012_v25  ;;  %v34082_v6 = vand.u32 4294901760, %v34075_v42 }
 0x2de   :  { %30661 = vmatprep.subr.bf16.mxu1 %v36911_v35 }
 0x2df   :  { %36917 = vst [vmem:[#allocation102_spill] sm:$0xff] %v34082_v6  ;;  %v4908_v14 = vsub.f32 %v34075_v42, %v34082_v6 }
 0x2e1   :  { %v34099_v54 = vand.u32 4294901760, %v4908_v14  ;;  %v36928_v14 = vld [vmem:[#allocation19_spill] sm:$0xff] }
 0x2e3   :  { %36922 = vst [vmem:[#allocation44_spill] sm:$0xff] %v34099_v54 }
 0x2e4   :  { %28396 = vmatmul.mubr.f32.vlgmr.msra.gmra.mrb[12].mxu1 %v34016_v16 }
 0x2e5   :  { %30663 = vmatpush3.bf16.msra.mxu1 %v36911_v35  ;;  %28402 = vmatprep.mubr.f32.mxu1 %v34021_v63 }
 0x2e6   :  { %30665 = vmatprep.subr.bf16.mxu1 %v36907_v39 }
 0x2ec   :  { %28403 = vmatmul.mubr.f32.vlgmr.msra.gmra.mrb[12].mxu1 %v34025_v47 }
 0x2ed   :  { %30667 = vmatpush3.bf16.msra.mxu1 %v36907_v39  ;;  %28409 = vmatprep.mubr.f32.mxu1 %v34028_v49 }
 0x2ee   :  { %30669 = vmatprep.subr.bf16.mxu1 %v36912_v62 }
 0x2f4   :  { %28410 = vmatmul.mubr.f32.vlgmr.msra.gmra.mrb[12].mxu1 %v34036_v29 }
 0x2f5   :  { %30671 = vmatpush3.bf16.msra.mxu1 %v36912_v62  ;;  %28416 = vmatprep.mubr.f32.mxu1 %v34012_v25  ;;  %v34090_v62 = vand.u32 4294901760, %v34079_v4 }
 0x2f6   :  { %30673 = vmatprep.subr.bf16.mxu1 %v36907_v39 }
 0x2f7   :  { %36920 = vst [vmem:[#allocation105_spill] sm:$0xff] %v34090_v62  ;;  %v4918_v43 = vsub.f32 %v34079_v4, %v34090_v62 }
 0x2f9   :  { %v34102_v46 = vand.u32 4294901760, %v4918_v43  ;;  %v36930_v43 = vld [vmem:[#allocation20_spill] sm:$0xff] }
 0x2fb   :  { %v34084_v35 = vpop.f32.mrb[2].mxu1  ;;  %36923 = vst [vmem:[#allocation106_spill] sm:$0xff] %v34102_v46 }
 0x2fc   :  { %36918 = vst [vmem:[#allocation103_spill] sm:$0xff] %v34084_v35  ;;  %v34086_v37 = vpop.f32.mrb[3].mxu1  ;;  %28417 = vmatmul.mubr.f32.vlgmr.msra.gmra.mrb[12].mxu1 %v34016_v16 }
 0x2fd   :  { %36919 = vst [vmem:[#allocation104_spill] sm:$0xff] %v34086_v37  ;;  %30675 = vmatpush3.bf16.msra.mxu1 %v36907_v39  ;;  %28423 = vmatprep.mubr.f32.mxu1 %v34012_v25  ;;  %v36927_v39 = vld [vmem:[#allocation26_spill] sm:$0xff] }
 0x2fe   :  { %30677 = vmatprep.subr.bf16.mxu1 %v36921_v52  ;;  %v32427_v25 = vld [vmem:[#allocation5 + $0x50] sm:$0xff] }
 0x2ff   :  { %v15702_v57 = vmul.f32 %v32427_v25, %v32427_v25 }
 0x301   :  { %v15739_v38 = vsel %vm123_vm0, %v15702_v57, 0 }
 0x304   :  { %28424 = vmatmul.mubr.f32.vlgmr.msra.gmra.mrb[12].mxu1 %v34016_v16 }
 0x305   :  { %30679 = vmatpush3.bf16.msra.mxu1 %v36921_v52  ;;  %28430 = vmatprep.mubr.f32.mxu1 %v34099_v54  ;;  %v15697_v54 = vmul.f32 %v32422_v18, %v32422_v18 }
 0x306   :  { %30681 = vmatprep.subr.bf16.mxu1 %v33600_v36 }
 0x308   :  { %28431 = vmatmul.mubr.f32.vlgmr.msra.gmra.mrb[14].mxu1 %v34102_v46 }
 0x309   :  { %30683 = vmatpush3.bf16.msra.mxu1 %v33600_v36  ;;  %28437 = vmatprep.mubr.f32.mxu1 %v34066_v23 }
 0x30a   :  { %30685 = vmatprep.subr.bf16.mxu1 %v33604_v27 }
 0x310   :  { %28438 = vmatmul.mubr.f32.vlgmr.msra.gmra.mrb[14].mxu1 %v34070_v26 }
 0x311   :  { %30687 = vmatpush3.bf16.msra.mxu1 %v33604_v27  ;;  %28444 = vmatprep.mubr.f32.mxu1 %v34075_v42 }
 0x312   :  { %30689 = vmatprep.subr.bf16.mxu1 %v36921_v52 }
 0x318   :  { %28445 = vmatmul.mubr.f32.vlgmr.msra.gmra.mrb[14].mxu1 %v34079_v4  ;;  %v32420_v4 = vld [vmem:[#allocation5 + $0x18] sm:$0xff] }
 0x319   :  { %30691 = vmatpush3.bf16.msra.mxu1 %v36921_v52  ;;  %28451 = vmatprep.mubr.f32.mxu1 %v34082_v6 }
 0x31a   :  { %30693 = vmatprep.subr.bf16.mxu1 %v33608_v17 }
 0x320   :  { %28452 = vmatmul.mubr.f32.vlgmr.msra.gmra.mrb[14].mxu1 %v34090_v62  ;;  %v32419_v62 = vld [vmem:[#allocation5 + $0x10] sm:$0xff] }
 0x321   :  { %30695 = vmatpush3.bf16.msra.mxu1 %v33608_v17  ;;  %28458 = vmatprep.mubr.f32.mxu1 %v34066_v23  ;;  %v36926_v17 = vld [vmem:[#allocation22_spill] sm:$0xff]  ;;  %v15694_v6 = vmul.f32 %v32419_v62, %v32419_v62 }
 0x322   :  { %30697 = vmatprep.subr.bf16.mxu1 %v36921_v52 }
 0x327   :  { %v34123_v36 = vpop.f32.mrb[4].mxu1 }
 0x328   :  { %36924 = vst [vmem:[#allocation107_spill] sm:$0xff] %v34123_v36  ;;  %v34125_v27 = vpop.f32.mrb[5].mxu1  ;;  %28459 = vmatmul.mubr.f32.vlgmr.msra.gmra.mrb[14].mxu1 %v34070_v26 }
 0x329   :  { %36925 = vst [vmem:[#allocation108_spill] sm:$0xff] %v34125_v27  ;;  %30699 = vmatpush3.bf16.msra.mxu1 %v36921_v52  ;;  %28465 = vmatprep.mubr.f32.mxu1 %v34066_v23  ;;  %v36929_v52 = vld [vmem:[#allocation23_spill] sm:$0xff]  ;;  %v36931_v27 = vld [vmem:[#allocation24_spill] sm:$0xff] }
 0x32a   :  { %30725 = vmatprep.subr.bf16.mxu1 %v33871_v45 }
 0x330   :  { %28466 = vmatmul.mubr.f32.vlgmr.msra.gmra.mrb[14].mxu1 %v34070_v26 }
 0x331   :  { %30727 = vmatpush3.bf16.msra.mxu1 %v33871_v45  ;;  %28640 = vmatprep.mubr.f32.mxu1 %v36926_v17  ;;  %v36932_v17 = vld [vmem:[#allocation21_spill] sm:$0xff] }
 0x332   :  { %30729 = vmatprep.subr.bf16.mxu1 %v33896_v60 }
 0x334   :  { %28641 = vmatmul.mubr.f32.vlgmr.msra.gmra.mrb[16].mxu1 %v36927_v39  ;;  %v32417_v39 = vld [vmem:[#allocation5 + $0x8] sm:$0xff] }
 0x335   :  { %30731 = vmatpush3.bf16.msra.mxu1 %v33896_v60  ;;  %28647 = vmatprep.mubr.f32.mxu1 %v36928_v14  ;;  %v36933_v60 = vld [vmem:[#allocation25_spill] sm:$0xff] }
 0x336   :  { %30733 = vmatprep.subr.bf16.mxu1 %v33877_v40 }
 0x33c   :  { %28648 = vmatmul.mubr.f32.vlgmr.msra.gmra.mrb[16].mxu1 %v36929_v52 }
 0x33d   :  { %30735 = vmatpush3.bf16.msra.mxu1 %v33877_v40  ;;  %28654 = vmatprep.mubr.f32.mxu1 %v36930_v43  ;;  %v15693_v40 = vmul.f32 %v32417_v39, %v32417_v39  ;;  %v32418_v43 = vld [vmem:[#allocation5] sm:$0xff]  ;;  %v15715_v39 = vsel %vm123_vm0, %v15694_v6, 0 }
 0x33e   :  { %30737 = vmatprep.subr.bf16.mxu1 %v33871_v45  ;;  %v15692_v36 = vmul.f32 %v32418_v43, %v32418_v43 }
 0x344   :  { %28655 = vmatmul.mubr.f32.vlgmr.msra.gmra.mrb[16].mxu1 %v36931_v27  ;;  %v15712_v27 = vsel %vm123_vm0, %v15693_v40, 0  ;;  %v34169_v40 = vand.u32 4294901760, %v15715_v39 }
 0x345   :  { %30739 = vmatpush3.bf16.msra.mxu1 %v33871_v45  ;;  %28661 = vmatprep.mubr.f32.mxu1 %v36932_v17  ;;  %v15695_v17 = vmul.f32 %v32420_v4, %v32420_v4  ;;  %v34154_v26 = vand.u32 4294901760, %v15712_v27 }
 0x346   :  { %30741 = vmatprep.subr.bf16.mxu1 %v33881_v13  ;;  %36938 = vst [vmem:[#allocation113_spill] sm:$0xff] %v34169_v40 }
 0x347   :  { %36935 = vst [vmem:[#allocation110_spill] sm:$0xff] %v34154_v26  ;;  %v15718_v43 = vsel %vm123_vm0, %v15695_v17, 0  ;;  %v34167_v4 = vsub.f32 %v15712_v27, %v34154_v26 }
 0x349   :  { %v36447_v6 = vand.u32 4294901760, %v34167_v4 }
 0x34c   :  { %28662 = vmatmul.mubr.f32.vlgmr.msra.gmra.mrb[16].mxu1 %v36933_v60 }
 0x34d   :  { %30743 = vmatpush3.bf16.msra.mxu1 %v33881_v13  ;;  %28668 = vmatprep.mubr.f32.mxu1 %v36928_v14  ;;  %v15709_v13 = vsel %vm123_vm0, %v15692_v36, 0 }
 0x34e   :  { %30745 = vmatprep.subr.bf16.mxu1 %v33871_v45  ;;  %v34164_v62 = vand.u32 4294901760, %v15709_v13 }
 0x350   :  { %36937 = vst [vmem:[#allocation112_spill] sm:$0xff] %v34164_v62  ;;  %v34175_v36 = vsub.f32 %v15709_v13, %v34164_v62  ;;  %v32421_v13 = vld [vmem:[#allocation5 + $0x20] sm:$0xff] }
 0x351   :  { %v15696_v46 = vmul.f32 %v32421_v13, %v32421_v13 }
 0x352   :  { %v36451_v27 = vand.u32 4294901760, %v34175_v36 }
 0x353   :  { %v34152_v42 = vpop.f32.mrb[6].mxu1  ;;  %v15721_v18 = vsel %vm123_vm0, %v15696_v46, 0 }
 0x354   :  { %36934 = vst [vmem:[#allocation109_spill] sm:$0xff] %v34152_v42  ;;  %v34156_v60 = vpop.f32.mrb[7].mxu1  ;;  %28669 = vmatmul.mubr.f32.vlgmr.msra.gmra.mrb[16].mxu1 %v36929_v52  ;;  %v15836_v42 = vsub.f32 %v34167_v4, %v36447_v6  ;;  %v32424_v6 = vld [vmem:[#allocation5 + $0x38] sm:$0xff] }
 0x355   :  { %36936 = vst [vmem:[#allocation111_spill] sm:$0xff] %v34156_v60  ;;  %30747 = vmatpush3.bf16.msra.mxu1 %v33871_v45  ;;  %28675 = vmatprep.mubr.f32.mxu1 %v36928_v14  ;;  %v34172_v60 = vand.u32 4294901760, %v15718_v43  ;;  %v34179_v45 = vsub.f32 %v15715_v39, %v34169_v40  ;;  %v15698_v39 = vmul.f32 %v32423_v21, %v32423_v21  ;;  %v15724_v21 = vsel %vm123_vm0, %v15697_v54, 0 }
 0x356   :  { %30749 = vmatprep.subr.bf16.mxu1 %v33879_v5  ;;  %v15837_v37 = vand.u32 4294901760, %v15836_v42  ;;  %v15699_v29 = vmul.f32 %v32424_v6, %v32424_v6  ;;  %v36940_v42 = vld [vmem:[#allocation46_spill] sm:$0xff]  ;;  %v34207_v6 = vand.u32 4294901760, %v15724_v21 }
 0x357   :  { %36939 = vst [vmem:[#allocation114_spill] sm:$0xff] %v34172_v60  ;;  %v34182_v17 = vsub.f32 %v15718_v43, %v34172_v60  ;;  %v36452_v14 = vand.u32 4294901760, %v34179_v45  ;;  %v15826_v43 = vsub.f32 %v34175_v36, %v36451_v27  ;;  %v15727_v30 = vsel %vm123_vm0, %v15698_v39, 0 }
 0x358   :  { %v34210_v49 = vand.u32 4294901760, %v15727_v30  ;;  %v15730_v46 = vsel %vm123_vm0, %v15699_v29, 0  ;;  %v34217_v39 = vsub.f32 %v15724_v21, %v34207_v6 }
 0x359   :  { %v36456_v23 = vand.u32 4294901760, %v34182_v17  ;;  %v15846_v35 = vsub.f32 %v34179_v45, %v36452_v14  ;;  %v15827_v27 = vand.u32 4294901760, %v15826_v43  ;;  %v34205_v14 = vand.u32 4294901760, %v15721_v18  ;;  %v36941_v43 = vld [vmem:[#allocation50_spill] sm:$0xff] }
 0x35a   :  { %v34223_v47 = vsub.f32 %v15727_v30, %v34210_v49  ;;  %v32426_v30 = vld [vmem:[#allocation5 + $0x48] sm:$0xff] }
 0x35b   :  { %v15856_v13 = vsub.f32 %v34182_v17, %v36456_v23  ;;  %29480 = vmatprep.mubr.f32.mxu0 %v15827_v27  ;;  %v34214_v54 = vsub.f32 %v15721_v18, %v34205_v14  ;;  %v34219_v23 = vand.u32 4294901760, %v15730_v46  ;;  %v15701_v21 = vmul.f32 %v32426_v30, %v32426_v30 }
 0x35c   :  { %28676 = vmatmul.mubr.f32.vlgmr.msra.gmra.mrb[16].mxu1 %v36929_v52  ;;  %v15847_v52 = vand.u32 4294901760, %v15846_v35  ;;  %29481 = vmatmul.mubr.f32.vlgmr.msra.gmra.mrb[48].mxu0 %v15837_v37  ;;  %v36462_v35 = vand.u32 4294901760, %v34217_v39  ;;  %v36470_v37 = vand.u32 4294901760, %v34223_v47 }
 0x35d   :  { %30751 = vmatpush3.bf16.msra.mxu1 %v33879_v5  ;;  %28682 = vmatprep.mubr.f32.mxu1 %v36940_v42  ;;  %v15857_v42 = vand.u32 4294901760, %v15856_v13  ;;  %v36459_v29 = vand.u32 4294901760, %v34214_v54  ;;  %v34230_v27 = vsub.f32 %v15730_v46, %v34219_v23  ;;  %v32425_v13 = vld [vmem:[#allocation5 + $0x40] sm:$0xff]  ;;  %v15736_v30 = vsel %vm123_vm0, %v15701_v21, 0 }
 0x35e   :  { %30753 = vmatprep.subr.bf16.mxu1 %v33913_v58  ;;  %29483 = vmatprep.mubr.f32.mxu0 %v15847_v52  ;;  %v15700_v18 = vmul.f32 %v32425_v13, %v32425_v13  ;;  %v15886_v52 = vsub.f32 %v34223_v47, %v36470_v37  ;;  %v32428_v37 = vld [vmem:[#allocation5 + $0x58] sm:$0xff]  ;;  %v32429_v21 = vld [vmem:[#allocation5 + $0x60] sm:$0xff] }
 0x35f   :  { %v36474_v46 = vand.u32 4294901760, %v34230_v27  ;;  %31139 = vmatpush3.bf16.msra.mxu0 %v36870_v15  ;;  %v15703_v11 = vmul.f32 %v32428_v37, %v32428_v37  ;;  %v34267_v37 = vand.u32 4294901760, %v15739_v38 }
 0x360   :  { %28683 = vmatmul.mubr.f32.vlgmr.msra.gmra.mrb[18].mxu1 %v36941_v43  ;;  %v15876_v43 = vsub.f32 %v34217_v39, %v36462_v35  ;;  %29484 = vmatmul.mubr.f32.gmra.mrb[50].mxu0 %v15857_v42  ;;  %v15733_v13 = vsel %vm123_vm0, %v15700_v18, 0  ;;  %v15887_v22 = vand.u32 4294901760, %v15886_v52  ;;  %v34253_v42 = vand.u32 4294901760, %v15736_v30 }
 0x361   :  { %30755 = vmatpush3.bf16.msra.mxu1 %v33913_v58  ;;  %28689 = vmatprep.mubr.f32.mxu1 %v33331_v19  ;;  %v15866_v58 = vsub.f32 %v34214_v54, %v36459_v29  ;;  %v15896_v35 = vsub.f32 %v34230_v27, %v36474_v46  ;;  %v34251_v16 = vand.u32 4294901760, %v15733_v13  ;;  %v15742_v25 = vsel %vm123_vm0, %v15703_v11, 0 }
 0x362   :  { %30757 = vmatprep.subr.bf16.mxu1 %v33886_v41  ;;  %31141 = vmatprep.subr.bf16.mxu0 %v32867_v61  ;;  %v15877_v63 = vand.u32 4294901760, %v15876_v43  ;;  %v32430_v43 = vld [vmem:[#allocation5 + $0x68] sm:$0xff]  ;;  %v34260_v52 = vsub.f32 %v15736_v30, %v34253_v42 }
 0x363   :  { %v15867_v29 = vand.u32 4294901760, %v15866_v58  ;;  %v34256_v18 = vsub.f32 %v15733_v13, %v34251_v16  ;;  %v15704_v58 = vmul.f32 %v32429_v21, %v32429_v21  ;;  %v15705_v34 = vmul.f32 %v32430_v43, %v32430_v43 }
 0x364   :  { %v15897_v46 = vand.u32 4294901760, %v15896_v35  ;;  %v34269_v13 = vand.u32 4294901760, %v15742_v25  ;;  %v36483_v35 = vand.u32 4294901760, %v34260_v52  ;;  %v34284_v43 = vsub.f32 %v15739_v38, %v34267_v37 }
 0x365   :  { %29486 = vmatprep.mubr.f32.mxu0 %v15867_v29  ;;  %v36479_v29 = vand.u32 4294901760, %v34256_v18 }
 0x366   :  { %29487 = vmatmul.mubr.f32.gmra.mrb[52].mxu0 %v15877_v63  ;;  %v15745_v63 = vsel %vm123_vm0, %v15704_v58, 0  ;;  %v36489_v38 = vand.u32 4294901760, %v34284_v43 }
 0x367   :  { %29489 = vmatprep.mubr.f32.mxu0 %v15887_v22  ;;  %v34276_v11 = vand.u32 4294901760, %v15745_v63  ;;  %v15906_v30 = vsub.f32 %v34256_v18, %v36479_v29  ;;  %v34289_v22 = vsub.f32 %v15742_v25, %v34269_v13 }
 0x368   :  { %28690 = vmatmul.mubr.f32.vlgmr.msra.gmra.mrb[18].mxu1 %v33335_v28 }
 0x369   :  { %30759 = vmatpush3.bf16.msra.mxu1 %v33886_v41  ;;  %28696 = vmatprep.mubr.f32.mxu1 %v33349_v2  ;;  %v15748_v41 = vsel %vm123_vm0, %v15705_v34, 0  ;;  %36942 = vst [vmem:[#allocation115_spill] sm:$0xff] %v34289_v22  ;;  %v15916_v2 = vsub.f32 %v34260_v52, %v36483_v35  ;;  %v34296_v20 = vsub.f32 %v15745_v63, %v34276_v11  ;;  %v15907_v21 = vand.u32 4294901760, %v15906_v30 }
 0x36a   :  { %30761 = vmatprep.subr.bf16.mxu1 %v33879_v5  ;;  %v34274_v57 = vpop.f32.mrb[32].mxu0  ;;  %29490 = vmatmul.mubr.f32.gmra.mrb[54].mxu0 %v15897_v46  ;;  %v34298_v29 = vand.u32 4294901760, %v15748_v41  ;;  %v36488_v9 = vand.u32 4294901760, %v34289_v22  ;;  %v15926_v63 = vsub.f32 %v34284_v43, %v36489_v38 }
 0x36b   :  { %v34286_v58 = vpop.f32.mrb[33].mxu0  ;;  %36943 = vst [vmem:[#allocation116_spill] sm:$0xff] %v34296_v20  ;;  %v15917_v7 = vand.u32 4294901760, %v15916_v2  ;;  %v36944_v46 = vand.u32 4294901760, %v34274_v57  ;;  %v36492_v8 = vand.u32 4294901760, %v34296_v20  ;;  %29492 = vmatprep.mubr.f32.mxu0 %v15907_v21 }
 0x36c   :  { %v36486_v34 = vand.u32 4294901760, %v34286_v58  ;;  %v15936_v30 = vsub.f32 %v34289_v22, %v36488_v9  ;;  %v15927_v9 = vand.u32 4294901760, %v15926_v63  ;;  %v36952_v1 = vand.u32 4294901760, %v34286_v58 }
 0x36e   :  { %v34306_v25 = vpack.c.bf16 %v36944_v46, %v36486_v34  ;;  %v34308_v35 = vpop.f32.mrb[34].mxu0  ;;  %29493 = vmatmul.mubr.f32.gmra.mrb[56].mxu0 %v15917_v7  ;;  %v15946_v34 = vsub.f32 %v34296_v20, %v36492_v8  ;;  %v15937_v38 = vand.u32 4294901760, %v15936_v30  ;;  %v32432_v30 = vld [vmem:[#allocation5 + $0x78] sm:$0xff]  ;;  %v11765_v15 = vsub.f32 %v34286_v58, %v36952_v1 }
 0x36f   :  { %v34317_v2 = vpop.f32.mrb[35].mxu0  ;;  %v36504_v46 = vand.u32 4294901760, %v34308_v35  ;;  %29495 = vmatprep.mubr.f32.mxu0 %v15927_v9  ;;  %v15707_v44 = vmul.f32 %v32432_v30, %v32432_v30 }
 0x370   :  { %36945 = vst [vmem:[#allocation117_spill] sm:$0xff] %v34306_v25  ;;  %28697 = vmatmul.mubr.f32.vlgmr.msra.gmra.mrb[18].mxu1 %v33352_v51  ;;  %v36503_v21 = vand.u32 4294901760, %v34317_v2  ;;  %v34326_v25 = vsub.f32 %v15748_v41, %v34298_v29  ;;  %v15947_v7 = vand.u32 4294901760, %v15946_v34 }
 0x371   :  { %30763 = vmatpush3.bf16.msra.mxu1 %v33879_v5  ;;  %28703 = vmatprep.mubr.f32.mxu1 %v33371_v0 }
 0x372   :  { %36946 = vst [vmem:[#allocation118_spill] sm:$0xff] %v34326_v25  ;;  %30765 = vmatprep.subr.bf16.mxu1 %v33899_v24  ;;  %v34335_v51 = vpack.c.bf16 %v36504_v46, %v36503_v21  ;;  %v29124_v8 = vpop.f32.mrb[36].mxu0  ;;  %v36508_v41 = vand.u32 4294901760, %v34326_v25  ;;  %29496 = vmatmul.mubr.f32.gmra.mrb[58].mxu0 %v15937_v38  ;;  %v15751_v21 = vsel %vm123_vm0, %v15706_v50, 0  ;;  %v15754_v38 = vsel %vm123_vm0, %v15707_v44, 0 }
 0x373   :  { %v11606_v48 = vpop.f32.mrb[37].mxu0  ;;  %v12684_v0 = vand.u32 4294901760, %v29124_v8  ;;  %29498 = vmatprep.mubr.f32.mxu0 %v15947_v7  ;;  %v34342_v46 = vand.u32 4294901760, %v15751_v21  ;;  %v34355_v30 = vand.u32 4294901760, %v15754_v38 }
 0x374   :  { %36947 = vst [vmem:[#allocation119_spill] sm:$0xff] %v34335_v51  ;;  %v12681_v63 = vand.u32 4294901760, %v11606_v48  ;;  %v15956_v34 = vsub.f32 %v34326_v25, %v36508_v41 }
 0x375   :  { %v34353_v7 = vsub.f32 %v15751_v21, %v34342_v46 }
 0x376   :  { %v34344_v9 = vpack.c.bf16 %v12684_v0, %v12681_v63  ;;  %v34346_v51 = vpop.f32.mrb[38].mxu0  ;;  %v15957_v56 = vand.u32 4294901760, %v15956_v34  ;;  %v34364_v34 = vsub.f32 %v15754_v38, %v34355_v30 }
 0x377   :  { %v34349_v55 = vpop.f32.mrb[39].mxu0  ;;  %36949 = vst [vmem:[#allocation121_spill] sm:$0xff] %v34353_v7  ;;  %v36517_v50 = vand.u32 4294901760, %v34346_v51  ;;  %v36518_v44 = vand.u32 4294901760, %v34353_v7 }
 0x378   :  { %36948 = vst [vmem:[#allocation120_spill] sm:$0xff] %v34344_v9  ;;  %28704 = vmatmul.mubr.f32.vlgmr.msra.gmra.mrb[18].mxu1 %v33386_v53  ;;  %v36516_v41 = vand.u32 4294901760, %v34349_v55  ;;  %29499 = vmatmul.mubr.f32.gmra.mrb[60].mxu0 %v15957_v56  ;;  %36950 = vst [vmem:[#allocation122_spill] sm:$0xff] %v34364_v34  ;;  %v36526_v56 = vand.u32 4294901760, %v34364_v34 }
 0x379   :  { %30767 = vmatpush3.bf16.msra.mxu1 %v33899_v24  ;;  %28710 = vmatprep.mubr.f32.mxu1 %v33331_v19  ;;  %v15966_v24 = vsub.f32 %v34353_v7, %v36518_v44  ;;  %v36955_v7 = vand.u32 4294901760, %v34274_v57 }
 0x37a   :  { %30769 = vmatprep.subr.bf16.mxu1 %v33879_v5  ;;  %v34370_v21 = vpack.c.bf16 %v36517_v50, %v36516_v41  ;;  %v34372_v9 = vpop.f32.mrb[40].mxu0  ;;  %v15976_v50 = vsub.f32 %v34364_v34, %v36526_v56 }
 0x37b   :  { %v34374_v53 = vpop.f32.mrb[41].mxu0  ;;  %v36528_v33 = vand.u32 4294901760, %v34372_v9  ;;  %v15967_v41 = vand.u32 4294901760, %v15966_v24  ;;  %v11772_v25 = vsub.f32 %v34274_v57, %v36955_v7  ;;  %v36957_v57 = vand.u32 4294901760, %v34308_v35 }
 0x37c   :  { %36951 = vst [vmem:[#allocation123_spill] sm:$0xff] %v34370_v21  ;;  %v36527_v38 = vand.u32 4294901760, %v34374_v53  ;;  %v15977_v24 = vand.u32 4294901760, %v15976_v50 }
 0x37d   :  { %29501 = vmatprep.mubr.f32.mxu0 %v15967_v41  ;;  %v12274_v7 = vsub.f32 %v34308_v35, %v36957_v57  ;;  %v12769_v35 = vsub.f32 %v11606_v48, %v12681_v63 }
 0x37e   :  { %v34392_v44 = vpack.c.bf16 %v36528_v33, %v36527_v38  ;;  %v34394_v21 = vpop.f32.mrb[42].mxu0  ;;  %v11766_v33 = vand.u32 4294901760, %v11765_v15  ;;  %29502 = vmatmul.mubr.f32.gmra.mrb[62].mxu0 %v15977_v24 }
 0x37f   :  { %v34396_v59 = vpop.f32.mrb[8].mxu1  ;;  %v34401_v1 = vpop.f32.mrb[43].mxu0  ;;  %v36537_v56 = vand.u32 4294901760, %v34394_v21  ;;  %29508 = vmatprep.mubr.f32.mxu0 %v34164_v62  ;;  %v12275_v24 = vand.u32 4294901760, %v12274_v7  ;;  %v36968_v62 = vld [vmem:[#allocation58_spill] sm:$0xff] }
 0x380   :  { %36953 = vst [vmem:[#allocation124_spill] sm:$0xff] %v34392_v44  ;;  %36954 = vst [vmem:[#allocation125_spill] sm:$0xff] %v34396_v59  ;;  %v34403_v58 = vpop.f32.mrb[9].mxu1  ;;  %28711 = vmatmul.mubr.f32.vlgmr.msra.gmra.mrb[18].mxu1 %v33335_v28  ;;  %v36536_v38 = vand.u32 4294901760, %v34401_v1  ;;  %v36958_v44 = vand.u32 4294901760, %v34317_v2  ;;  %v34425_v59 = vsub.f32 %v29124_v8, %v12684_v0 }
 0x381   :  { %36956 = vst [vmem:[#allocation126_spill] sm:$0xff] %v34403_v58  ;;  %30771 = vmatpush3.bf16.msra.mxu1 %v33879_v5  ;;  %28717 = vmatprep.mubr.f32.mxu1 %v33331_v19  ;;  %v11773_v58 = vand.u32 4294901760, %v11772_v25 }
 0x382   :  { %30773 = vmatprep.subr.bf16.mxu1 %v33893_v3  ;;  %v12267_v41 = vsub.f32 %v34317_v2, %v36958_v44  ;;  %v34421_v50 = vpack.c.bf16 %v36537_v56, %v36536_v38  ;;  %v34423_v5 = vpop.f32.mrb[44].mxu0  ;;  %v11767_v44 = vsub.f32 %v11765_v15, %v11766_v33  ;;  %29509 = vmatmul.mubr.f32.vlgmr.msra.gmra.mrb[48].mxu0 %v34154_v26  ;;  %v12777_v48 = vand.u32 4294901760, %v34425_v59 }
 0x383   :  { %v34428_v19 = vpop.f32.mrb[45].mxu0  ;;  %v36542_v57 = vand.u32 4294901760, %v34423_v5  ;;  %v11774_v38 = vsub.f32 %v11772_v25, %v11773_v58  ;;  %29511 = vmatprep.mubr.f32.mxu0 %v34169_v40  ;;  %31143 = vmatpush3.bf16.msra.mxu0 %v32867_v61  ;;  %v12770_v56 = vand.u32 4294901760, %v12769_v35  ;;  %v36964_v61 = vand.u32 4294901760, %v34349_v55 }
 0x384   :  { %36959 = vst [vmem:[#allocation127_spill] sm:$0xff] %v34421_v50  ;;  %v36541_v2 = vand.u32 4294901760, %v34428_v19  ;;  %v12268_v34 = vand.u32 4294901760, %v12267_v41  ;;  %31145 = vmatprep.subr.bf16.mxu0 %v32699_v12  ;;  %v12276_v50 = vsub.f32 %v12274_v7, %v12275_v24  ;;  %v34473_v20 = vpack.c.bf16 %v12274_v7, %v12267_v41 }
 0x386   :  { %v34437_v0 = vpack.c.bf16 %v36542_v57, %v36541_v2  ;;  %v34439_v8 = vpop.f32.mrb[46].mxu0  ;;  %v34450_v2 = vpack.c.bf16 %v11772_v25, %v11765_v15  ;;  %v36962_v57 = vld [vmem:[#allocation57_spill] sm:$0xff]  ;;  %v12269_v26 = vsub.f32 %v12267_v41, %v12268_v34  ;;  %29512 = vmatmul.mubr.f32.gmra.mrb[50].mxu0 %v34172_v60  ;;  %36969 = vst [vmem:[#allocation131_spill] sm:$0xff] %v34473_v20  ;;  %v36970_v60 = vld [vmem:[#allocation51_spill] sm:$0xff] }
 0x387   :  { %v34443_v63 = vpop.f32.mrb[47].mxu0  ;;  %v36966_v25 = vand.u32 4294901760, %v34439_v8  ;;  %29514 = vmatprep.mubr.f32.mxu0 %v34205_v14  ;;  %v34487_v41 = vpack.c.bf16 %v12275_v24, %v12268_v34 }
 0x388   :  { %36960 = vst [vmem:[#allocation128_spill] sm:$0xff] %v34437_v0  ;;  %28718 = vmatmul.mubr.f32.vlgmr.msra.gmra.mrb[18].mxu1 %v33335_v28  ;;  %36961 = vst [vmem:[#allocation129_spill] sm:$0xff] %v34450_v2  ;;  %v36963_v0 = vand.u32 4294901760, %v34346_v51  ;;  %v13271_v28 = vsub.f32 %v34349_v55, %v36964_v61  ;;  %v36965_v15 = vand.u32 4294901760, %v34443_v63  ;;  %v12778_v61 = vsub.f32 %v34425_v59, %v12777_v48 }
 0x389   :  { %30775 = vmatpush3.bf16.msra.mxu1 %v33893_v3  ;;  %28724 = vmatprep.mubr.f32.mxu1 %v36962_v57  ;;  %v11768_v57 = vand.u32 4294901760, %v11767_v44  ;;  %v12771_v55 = vsub.f32 %v12769_v35, %v12770_v56  ;;  %v36971_v44 = vand.u32 4294901760, %v34372_v9  ;;  %v12270_v7 = vand.u32 4294901760, %v12269_v26  ;;  %36974 = vst [vmem:[#allocation51_spill] sm:$0xff] %v34487_v41 }
 0x38a   :  { %v13278_v40 = vsub.f32 %v34346_v51, %v36963_v0  ;;  %30777 = vmatprep.subr.bf16.mxu1 %v33933_v31  ;;  %v34466_v2 = vpack.c.bf16 %v36966_v25, %v36965_v15  ;;  %v11775_v51 = vand.u32 4294901760, %v11774_v38  ;;  %v34469_v0 = vpack.c.bf16 %v11773_v58, %v11766_v33  ;;  %v36972_v33 = vld [vmem:[#allocation32_spill] sm:$0xff]  ;;  %29515 = vmatmul.mubr.f32.gmra.mrb[52].mxu0 %v34207_v6 }
 0x38b   :  { %v13272_v15 = vand.u32 4294901760, %v13271_v28  ;;  %v13780_v25 = vsub.f32 %v34372_v9, %v36971_v44  ;;  %v36973_v58 = vand.u32 4294901760, %v34374_v53  ;;  %29517 = vmatprep.mubr.f32.mxu0 %v34210_v49  ;;  %v12779_v24 = vand.u32 4294901760, %v12778_v61 }
 0x38c   :  { %36967 = vst [vmem:[#allocation130_spill] sm:$0xff] %v34466_v2  ;;  %28725 = vmatmul.mubr.f32.vlgmr.msra.gmra.mrb[20].mxu1 %v36968_v62  ;;  %v13279_v22 = vand.u32 4294901760, %v13278_v40  ;;  %v34480_v38 = vpack.c.bf16 %v11775_v51, %v11768_v57  ;;  %v36975_v62 = vand.u32 4294901760, %v34394_v21  ;;  %v34496_v51 = vpack.c.bf16 %v34425_v59, %v12769_v35 }
 0x38d   :  { %30779 = vmatpush3.bf16.msra.mxu1 %v33933_v31  ;;  %28731 = vmatprep.mubr.f32.mxu1 %v36970_v60  ;;  %v13773_v2 = vsub.f32 %v34374_v53, %v36973_v58  ;;  %v12277_v31 = vand.u32 4294901760, %v12276_v50  ;;  %v13273_v20 = vsub.f32 %v13271_v28, %v13272_v15  ;;  %v13781_v53 = vand.u32 4294901760, %v13780_v25 }
 0x38e   :  { %30781 = vmatprep.subr.bf16.mxu1 %v36972_v33  ;;  %v14282_v9 = vsub.f32 %v34394_v21, %v36975_v62  ;;  %v13280_v44 = vsub.f32 %v13278_v40, %v13279_v22  ;;  %v36976_v58 = vand.u32 4294901760, %v34401_v1  ;;  %29518 = vmatmul.mubr.f32.gmra.mrb[54].mxu0 %v34219_v23  ;;  %v12772_v50 = vand.u32 4294901760, %v12771_v55  ;;  %v36978_v62 = vld [vmem:[#allocation52_spill] sm:$0xff] }
 0x38f   :  { %v34493_v57 = vpack.c.bf16 %v12277_v31, %v12270_v7  ;;  %v13774_v34 = vand.u32 4294901760, %v13773_v2  ;;  %v34502_v41 = vpack.c.bf16 %v12777_v48, %v12770_v56  ;;  %29520 = vmatprep.mubr.f32.mxu0 %v34251_v16  ;;  %v34508_v35 = vpack.c.bf16 %v13278_v40, %v13271_v28  ;;  %v36980_v7 = vld [vmem:[#allocation53_spill] sm:$0xff] }
 0x390   :  { %v14275_v26 = vsub.f32 %v34401_v1, %v36976_v58  ;;  %v14283_v59 = vand.u32 4294901760, %v14282_v9  ;;  %v34506_v21 = vpack.c.bf16 %v12779_v24, %v12772_v50  ;;  %v13782_v1 = vsub.f32 %v13780_v25, %v13781_v53 }
 0x391   :  { %36977 = vst [vmem:[#allocation32_spill] sm:$0xff] %v34502_v41  ;;  %36979 = vst [vmem:[#allocation52_spill] sm:$0xff] %v34508_v35  ;;  %v36981_v55 = vand.u32 4294901760, %v34423_v5  ;;  %v36982_v48 = vand.u32 4294901760, %v34428_v19  ;;  %v13775_v58 = vsub.f32 %v13773_v2, %v13774_v34  ;;  %v13274_v28 = vand.u32 4294901760, %v13273_v20 }
 0x392   :  { %v14276_v31 = vand.u32 4294901760, %v14275_v26  ;;  %29521 = vmatmul.mubr.f32.gmra.mrb[56].mxu0 %v34253_v42  ;;  %v13281_v40 = vand.u32 4294901760, %v13280_v44  ;;  %v14284_v50 = vsub.f32 %v14282_v9, %v14283_v59  ;;  %v34525_v35 = vpack.c.bf16 %v13780_v25, %v13773_v2  ;;  %v36988_v2 = vld [vmem:[#allocation54_spill] sm:$0xff] }
 0x393   :  { %v14784_v56 = vsub.f32 %v34423_v5, %v36981_v55  ;;  %v14777_v61 = vsub.f32 %v34428_v19, %v36982_v48  ;;  %29523 = vmatprep.mubr.f32.mxu0 %v34267_v37  ;;  %v36985_v19 = vand.u32 4294901760, %v34439_v8  ;;  %v34534_v44 = vpack.c.bf16 %v13781_v53, %v13774_v34 }
 0x394   :  { %28732 = vmatmul.mubr.f32.vlgmr.msra.gmra.mrb[20].mxu1 %v36978_v62  ;;  %v34523_v24 = vpack.c.bf16 %v13281_v40, %v13274_v28  ;;  %36984 = vst [vmem:[#allocation133_spill] sm:$0xff] %v34525_v35  ;;  %v14277_v5 = vsub.f32 %v14275_v26, %v14276_v31  ;;  %v34540_v28 = vpack.c.bf16 %v14282_v9, %v14275_v26  ;;  %v14285_v34 = vand.u32 4294901760, %v14284_v50  ;;  %v37000_v50 = vld [vmem:[#allocation18_spill] sm:$0xff]  ;;  %v37158_v35 = vld [vmem:[#allocation28_spill] sm:$0xff] }
 0x395   :  { %30783 = vmatpush3.bf16.msra.mxu1 %v36972_v33  ;;  %28738 = vmatprep.mubr.f32.mxu1 %v36980_v7  ;;  %v34520_v33 = vpack.c.bf16 %v13279_v22, %v13272_v15  ;;  %v14785_v55 = vand.u32 4294901760, %v14784_v56  ;;  %v14778_v41 = vand.u32 4294901760, %v14777_v61  ;;  %v15286_v48 = vsub.f32 %v34439_v8, %v36985_v19  ;;  %36987 = vst [vmem:[#allocation134_spill] sm:$0xff] %v34534_v44  ;;  %v36991_v8 = vld [vmem:[#allocation55_spill] sm:$0xff] }
 0x396   :  { %30785 = vmatprep.subr.bf16.mxu1 %v33893_v3  ;;  %v36986_v7 = vand.u32 4294901760, %v34443_v63  ;;  %29524 = vmatmul.mubr.f32.gmra.mrb[58].mxu0 %v34269_v13  ;;  %v13776_v22 = vand.u32 4294901760, %v13775_v58  ;;  %v13783_v15 = vand.u32 4294901760, %v13782_v1  ;;  %36990 = vst [vmem:[#allocation135_spill] sm:$0xff] %v34540_v28  ;;  %v14278_v53 = vand.u32 4294901760, %v14277_v5  ;;  %v36996_v5 = vld [vmem:[#allocation56_spill] sm:$0xff] }
 0x397   :  { %36983 = vst [vmem:[#allocation132_spill] sm:$0xff] %v34520_v33  ;;  %29526 = vmatprep.mubr.f32.mxu0 %v34276_v11  ;;  %v14786_v40 = vsub.f32 %v14784_v56, %v14785_v55  ;;  %v34546_v58 = vpack.c.bf16 %v14283_v59, %v14276_v31  ;;  %v34551_v26 = vpack.c.bf16 %v14784_v56, %v14777_v61 }
 0x398   :  { %v15279_v20 = vsub.f32 %v34443_v63, %v36986_v7  ;;  %v34538_v25 = vpack.c.bf16 %v13783_v15, %v13776_v22  ;;  %v14779_v63 = vsub.f32 %v14777_v61, %v14778_v41  ;;  %v15287_v7 = vand.u32 4294901760, %v15286_v48 }
 0x399   :  { %36992 = vst [vmem:[#allocation55_spill] sm:$0xff] %v34546_v58  ;;  %v34549_v9 = vpack.c.bf16 %v14285_v34, %v14278_v53  ;;  %36994 = vst [vmem:[#allocation137_spill] sm:$0xff] %v34551_v26  ;;  %v14787_v28 = vand.u32 4294901760, %v14786_v40  ;;  %v34554_v44 = vpack.c.bf16 %v14785_v55, %v14778_v41  ;;  %v37005_v40 = vld [vmem:[#allocation59_spill] sm:$0xff]  ;;  %v37009_v53 = vld [vmem:[#allocation118_spill] sm:$0xff] }
 0x39a   :  { %36989 = vst [vmem:[#allocation54_spill] sm:$0xff] %v34538_v25  ;;  %v15280_v1 = vand.u32 4294901760, %v15279_v20  ;;  %29527 = vmatmul.mubr.f32.gmra.mrb[60].mxu0 %v34298_v29  ;;  %v15288_v19 = vsub.f32 %v15286_v48, %v15287_v7  ;;  %v14780_v15 = vand.u32 4294901760, %v14779_v63  ;;  %v34560_v31 = vpack.c.bf16 %v15286_v48, %v15279_v20  ;;  %v37006_v63 = vld [vmem:[#allocation73_spill] sm:$0xff] }
 0x39b   :  { %29529 = vmatprep.mubr.f32.mxu0 %v34342_v46  ;;  %36993 = vst [vmem:[#allocation136_spill] sm:$0xff] %v34549_v9  ;;  %36995 = vst [vmem:[#allocation138_spill] sm:$0xff] %v34554_v44  ;;  %v37010_v34 = vld [vmem:[#allocation121_spill] sm:$0xff] }
 0x39c   :  { %28739 = vmatmul.mubr.f32.vlgmr.msra.gmra.mrb[20].mxu1 %v36988_v2  ;;  %v15281_v22 = vsub.f32 %v15279_v20, %v15280_v1  ;;  %v34558_v59 = vpack.c.bf16 %v14787_v28, %v14780_v15  ;;  %36998 = vst [vmem:[#allocation139_spill] sm:$0xff] %v34560_v31  ;;  %v15289_v61 = vand.u32 4294901760, %v15288_v19  ;;  %v34566_v41 = vpack.c.bf16 %v15287_v7, %v15280_v1  ;;  %v37002_v20 = vld [vmem:[#allocation72_spill] sm:$0xff]  ;;  %v37003_v28 = vld [vmem:[#allocation65_spill] sm:$0xff]  ;;  %v37007_v7 = vld [vmem:[#allocation115_spill] sm:$0xff] }
 0x39d   :  { %30787 = vmatpush3.bf16.msra.mxu1 %v33893_v3  ;;  %28745 = vmatprep.mubr.f32.mxu1 %v36991_v8  ;;  %v37008_v1 = vld [vmem:[#allocation116_spill] sm:$0xff]  ;;  %v37014_v15 = vand.u32 4294901760, %v34175_v36  ;;  %v37019_v31 = vld [vmem:[#allocation77_spill] sm:$0xff] }
 0x39e   :  { %30789 = vmatprep.subr.bf16.mxu1 %v33916_v32  ;;  %29530 = vmatmul.mubr.f32.gmra.mrb[62].mxu0 %v34355_v30  ;;  %36997 = vst [vmem:[#allocation56_spill] sm:$0xff] %v34558_v59  ;;  %v15282_v56 = vand.u32 4294901760, %v15281_v22  ;;  %36999 = vst [vmem:[#allocation140_spill] sm:$0xff] %v34566_v41  ;;  %v37011_v19 = vld [vmem:[#allocation60_spill] sm:$0xff]  ;;  %v37012_v22 = vld [vmem:[#allocation61_spill] sm:$0xff] }
 0x39f   :  { %29536 = vmatprep.mubr.f32.mxu0 %v34175_v36  ;;  %v37017_v41 = vld [vmem:[#allocation62_spill] sm:$0xff]  ;;  %v37020_v36 = vand.u32 4294901760, %v34182_v17  ;;  %v37087_v44 = vld [vmem:[#allocation89_spill] sm:$0xff] }
 0x3a0   :  { %v34571_v55 = vpack.c.bf16 %v15289_v61, %v15282_v56  ;;  %v37015_v56 = vand.u32 4294901760, %v34167_v4  ;;  %v37016_v61 = vand.u32 4294901760, %v34179_v45  ;;  %v37159_v25 = vld [vmem:[#allocation33_spill] sm:$0xff] }
 0x3a2   :  { %29537 = vmatmul.mubr.f32.vlgmr.msra.gmra.mrb[48].mxu0 %v34167_v4  ;;  %37001 = vst [vmem:[#allocation18_spill] sm:$0xff] %v34571_v55  ;;  %v37021_v4 = vand.u32 4294901760, %v34214_v54  ;;  %v37086_v55 = vld [vmem:[#allocation96_spill] sm:$0xff] }
 0x3a3   :  { %29539 = vmatprep.mubr.f32.mxu0 %v34179_v45  ;;  %31147 = vmatpush3.bf16.msra.mxu0 %v32699_v12  ;;  %v37022_v45 = vand.u32 4294901760, %v34217_v39 }
 0x3a4   :  { %28746 = vmatmul.mubr.f32.vlgmr.msra.gmra.mrb[20].mxu1 %v36996_v5  ;;  %31149 = vmatprep.subr.bf16.mxu0 %v37000_v50 }
 0x3a5   :  { %30791 = vmatpush3.bf16.msra.mxu1 %v33916_v32  ;;  %28752 = vmatprep.mubr.f32.mxu1 %v36970_v60 }
 0x3a6   :  { %30793 = vmatprep.subr.bf16.mxu1 %v33893_v3  ;;  %29540 = vmatmul.mubr.f32.gmra.mrb[50].mxu0 %v34182_v17  ;;  %v37025_v17 = vand.u32 4294901760, %v34230_v27 }
 0x3a7   :  { %29542 = vmatprep.mubr.f32.mxu0 %v34214_v54  ;;  %v37026_v54 = vand.u32 4294901760, %v34256_v18 }
 0x3aa   :  { %29543 = vmatmul.mubr.f32.gmra.mrb[52].mxu0 %v34217_v39  ;;  %v37027_v39 = vand.u32 4294901760, %v34260_v52 }
 0x3ab   :  { %v34574_v32 = vpop.f32.mrb[10].mxu1  ;;  %29545 = vmatprep.mubr.f32.mxu0 %v34223_v47 }
 0x3ac   :  { %v34577_v48 = vpop.f32.mrb[11].mxu1  ;;  %28753 = vmatmul.mubr.f32.vlgmr.msra.gmra.mrb[20].mxu1 %v36978_v62 }
 0x3ad   :  { %30795 = vmatpush3.bf16.msra.mxu1 %v33893_v3  ;;  %28759 = vmatprep.mubr.f32.mxu1 %v36970_v60  ;;  %v37004_v3 = vld [vmem:[#allocation66_spill] sm:$0xff] }
 0x3ae   :  { %30797 = vmatprep.subr.bf16.mxu1 %v37002_v20  ;;  %29546 = vmatmul.mubr.f32.gmra.mrb[54].mxu0 %v34230_v27  ;;  %v37031_v27 = vld [vmem:[#allocation76_spill] sm:$0xff] }
 0x3af   :  { %29548 = vmatprep.mubr.f32.mxu0 %v34256_v18  ;;  %v37032_v18 = vand.u32 4294901760, %v37007_v7 }
 0x3b2   :  { %29549 = vmatmul.mubr.f32.gmra.mrb[56].mxu0 %v34260_v52  ;;  %v37033_v52 = vand.u32 4294901760, %v37008_v1 }
 0x3b3   :  { %29551 = vmatprep.mubr.f32.mxu0 %v34284_v43 }
 0x3b4   :  { %28760 = vmatmul.mubr.f32.vlgmr.msra.gmra.mrb[20].mxu1 %v36978_v62 }
 0x3b5   :  { %30799 = vmatpush3.bf16.msra.mxu1 %v37002_v20  ;;  %28766 = vmatprep.mubr.f32.mxu1 %v37003_v28 }
 0x3b6   :  { %30801 = vmatprep.subr.bf16.mxu1 %v33948_v10  ;;  %29552 = vmatmul.mubr.f32.gmra.mrb[58].mxu0 %v37007_v7 }
 0x3b7   :  { %29554 = vmatprep.mubr.f32.mxu0 %v37008_v1  ;;  %v37040_v1 = vld [vmem:[#allocation70_spill] sm:$0xff] }
 0x3b8   :  { %28767 = vmatmul.mubr.f32.vlgmr.msra.gmra.mrb[22].mxu1 %v37004_v3 }
 0x3b9   :  { %30803 = vmatpush3.bf16.msra.mxu1 %v33948_v10  ;;  %28773 = vmatprep.mubr.f32.mxu1 %v37005_v40  ;;  %v37013_v10 = vld [vmem:[#allocation122_spill] sm:$0xff] }
 0x3ba   :  { %30805 = vmatprep.subr.bf16.mxu1 %v37006_v63  ;;  %29555 = vmatmul.mubr.f32.gmra.mrb[60].mxu0 %v37009_v53  ;;  %v37038_v7 = vand.u32 4294901760, %v37013_v10 }
 0x3bb   :  { %29557 = vmatprep.mubr.f32.mxu0 %v37010_v34 }
 0x3be   :  { %29558 = vmatmul.mubr.f32.gmra.mrb[62].mxu0 %v37013_v10  ;;  %v37045_v10 = vld [vmem:[#allocation114_spill] sm:$0xff] }
 0x3bf   :  { %29564 = vmatprep.mubr.f32.mxu0 %v37014_v15  ;;  %v37023_v15 = vand.u32 4294901760, %v34223_v47  ;;  %v37029_v47 = vand.u32 4294901760, %v34284_v43  ;;  %v37035_v43 = vand.u32 4294901760, %v37010_v34  ;;  %v37042_v34 = vld [vmem:[#allocation78_spill] sm:$0xff] }
 0x3c0   :  { %28774 = vmatmul.mubr.f32.vlgmr.msra.gmra.mrb[22].mxu1 %v37011_v19 }
 0x3c1   :  { %30807 = vmatpush3.bf16.msra.mxu1 %v37006_v63  ;;  %28780 = vmatprep.mubr.f32.mxu1 %v37012_v22  ;;  %v37018_v63 = vld [vmem:[#allocation63_spill] sm:$0xff]  ;;  %v37162_v22 = vld [vmem:[#allocation34_spill] sm:$0xff] }
 0x3c2   :  { %30809 = vmatprep.subr.bf16.mxu1 %v37002_v20  ;;  %29565 = vmatmul.mubr.f32.vlgmr.msra.gmra.mrb[48].mxu0 %v37015_v56  ;;  %v37024_v56 = vld [vmem:[#allocation64_spill] sm:$0xff] }
 0x3c3   :  { %29567 = vmatprep.mubr.f32.mxu0 %v37016_v61  ;;  %31151 = vmatpush3.bf16.msra.mxu0 %v37000_v50 }
 0x3c4   :  { %31153 = vmatprep.subr.bf16.mxu0 %v32699_v12 }
 0x3c6   :  { %29568 = vmatmul.mubr.f32.gmra.mrb[50].mxu0 %v37020_v36 }
 0x3c7   :  { %29570 = vmatprep.mubr.f32.mxu0 %v37021_v4  ;;  %v37037_v4 = vld [vmem:[#allocation35_spill] sm:$0xff] }
 0x3c8   :  { %28781 = vmatmul.mubr.f32.vlgmr.msra.gmra.mrb[22].mxu1 %v37017_v41 }
 0x3c9   :  { %30811 = vmatpush3.bf16.msra.mxu1 %v37002_v20  ;;  %28787 = vmatprep.mubr.f32.mxu1 %v37018_v63  ;;  %v32462_v63 = vld [vmem:[#allocation5 + $0x78] sm:$0xff] }
 0x3ca   :  { %30813 = vmatprep.subr.bf16.mxu1 %v37019_v31  ;;  %29571 = vmatmul.mubr.f32.gmra.mrb[52].mxu0 %v37022_v45  ;;  %v37039_v45 = vld [vmem:[#allocation112_spill] sm:$0xff] }
 0x3cb   :  { %29573 = vmatprep.mubr.f32.mxu0 %v37023_v15  ;;  %v37043_v15 = vld [vmem:[#allocation110_spill] sm:$0xff] }
 0x3ce   :  { %29574 = vmatmul.mubr.f32.gmra.mrb[54].mxu0 %v37025_v17  ;;  %v37044_v17 = vld [vmem:[#allocation113_spill] sm:$0xff] }
 0x3cf   :  { %29576 = vmatprep.mubr.f32.mxu0 %v37026_v54  ;;  %v37046_v54 = vld [vmem:[#allocation29_spill] sm:$0xff] }
 0x3d0   :  { %28788 = vmatmul.mubr.f32.vlgmr.msra.gmra.mrb[22].mxu1 %v37024_v56 }
 0x3d1   :  { %30815 = vmatpush3.bf16.msra.mxu1 %v37019_v31  ;;  %28794 = vmatprep.mubr.f32.mxu1 %v37005_v40  ;;  %v37034_v31 = vand.u32 4294901760, %v37009_v53  ;;  %v37041_v53 = vld [vmem:[#allocation36_spill] sm:$0xff] }
 0x3d2   :  { %30817 = vmatprep.subr.bf16.mxu1 %v37002_v20  ;;  %29577 = vmatmul.mubr.f32.gmra.mrb[56].mxu0 %v37027_v39  ;;  %v37047_v39 = vld [vmem:[#allocation31_spill] sm:$0xff] }
 0x3d3   :  { %29579 = vmatprep.mubr.f32.mxu0 %v37029_v47  ;;  %v37048_v47 = vld [vmem:[#allocation67_spill] sm:$0xff] }
 0x3d6   :  { %29580 = vmatmul.mubr.f32.gmra.mrb[58].mxu0 %v37032_v18  ;;  %v37049_v18 = vld [vmem:[#allocation68_spill] sm:$0xff] }
 0x3d7   :  { %v34636_v61 = vpop.f32.mrb[12].mxu1  ;;  %29582 = vmatprep.mubr.f32.mxu0 %v37033_v52  ;;  %v37050_v52 = vld [vmem:[#allocation81_spill] sm:$0xff] }
 0x3d8   :  { %37028 = vst [vmem:[#allocation72_spill] sm:$0xff] %v34636_v61  ;;  %v34640_v36 = vpop.f32.mrb[13].mxu1  ;;  %28795 = vmatmul.mubr.f32.vlgmr.msra.gmra.mrb[22].mxu1 %v37011_v19 }
 0x3d9   :  { %37030 = vst [vmem:[#allocation65_spill] sm:$0xff] %v34640_v36  ;;  %30819 = vmatpush3.bf16.msra.mxu1 %v37002_v20  ;;  %28801 = vmatprep.mubr.f32.mxu1 %v37005_v40  ;;  %v37036_v20 = vld [vmem:[#allocation30_spill] sm:$0xff] }
 0x3da   :  { %30821 = vmatprep.subr.bf16.mxu1 %v37031_v27  ;;  %29583 = vmatmul.mubr.f32.gmra.mrb[60].mxu0 %v37034_v31  ;;  %v37051_v31 = vld [vmem:[#allocation69_spill] sm:$0xff] }
 0x3db   :  { %29585 = vmatprep.mubr.f32.mxu0 %v37035_v43 }
 0x3de   :  { %29586 = vmatmul.mubr.f32.gmra.mrb[62].mxu0 %v37038_v7  ;;  %v37054_v7 = vld [vmem:[#allocation80_spill] sm:$0xff] }
 0x3df   :  { %29592 = vmatprep.mubr.f32.mxu0 %v37039_v45 }
 0x3e0   :  { %28802 = vmatmul.mubr.f32.vlgmr.msra.gmra.mrb[22].mxu1 %v37011_v19 }
 0x3e1   :  { %30823 = vmatpush3.bf16.msra.mxu1 %v37031_v27  ;;  %28808 = vmatprep.mubr.f32.mxu1 %v37036_v20 }
 0x3e2   :  { %30825 = vmatprep.subr.bf16.mxu1 %v37037_v4  ;;  %29593 = vmatmul.mubr.f32.vlgmr.msra.gmra.mrb[48].mxu0 %v37043_v15 }
 0x3e3   :  { %29595 = vmatprep.mubr.f32.mxu0 %v37044_v17  ;;  %31155 = vmatpush3.bf16.msra.mxu0 %v32699_v12 }
 0x3e4   :  { %28809 = vmatmul.mubr.f32.vlgmr.msra.gmra.mrb[24].mxu1 %v37040_v1  ;;  %31349 = vmatprep.subr.bf16.mxu0 %v32699_v12 }
 0x3e5   :  { %30827 = vmatpush3.bf16.msra.mxu1 %v37037_v4  ;;  %28815 = vmatprep.mubr.f32.mxu1 %v37041_v53 }
 0x3e6   :  { %30829 = vmatprep.subr.bf16.mxu1 %v37042_v34  ;;  %29596 = vmatmul.mubr.f32.gmra.mrb[50].mxu0 %v37045_v10 }
 0x3e7   :  { %29598 = vmatprep.mubr.f32.mxu0 %v34205_v14 }
 0x3ea   :  { %29599 = vmatmul.mubr.f32.gmra.mrb[52].mxu0 %v34207_v6 }
 0x3eb   :  { %29601 = vmatprep.mubr.f32.mxu0 %v34210_v49 }
 0x3ec   :  { %28816 = vmatmul.mubr.f32.vlgmr.msra.gmra.mrb[24].mxu1 %v37046_v54 }
 0x3ed   :  { %30831 = vmatpush3.bf16.msra.mxu1 %v37042_v34  ;;  %28822 = vmatprep.mubr.f32.mxu1 %v37047_v39  ;;  %v37055_v34 = vld [vmem:[#allocation16_spill] sm:$0xff]  ;;  %v32453_v39 = vld [vmem:[#allocation2 + $0x58] sm:$0xff] }
 0x3ee   :  { %30833 = vmatprep.subr.bf16.mxu1 %v37031_v27  ;;  %29602 = vmatmul.mubr.f32.gmra.mrb[54].mxu0 %v34219_v23 }
 0x3ef   :  { %29604 = vmatprep.mubr.f32.mxu0 %v34251_v16 }
 0x3f2   :  { %29605 = vmatmul.mubr.f32.gmra.mrb[56].mxu0 %v34253_v42 }
 0x3f3   :  { %29607 = vmatprep.mubr.f32.mxu0 %v34267_v37 }
 0x3f4   :  { %28823 = vmatmul.mubr.f32.vlgmr.msra.gmra.mrb[24].mxu1 %v37048_v47 }
 0x3f5   :  { %30835 = vmatpush3.bf16.msra.mxu1 %v37031_v27  ;;  %28829 = vmatprep.mubr.f32.mxu1 %v37049_v18 }
 0x3f6   :  { %30837 = vmatprep.subr.bf16.mxu1 %v37050_v52  ;;  %29608 = vmatmul.mubr.f32.gmra.mrb[58].mxu0 %v34269_v13 }
 0x3f7   :  { %29610 = vmatprep.mubr.f32.mxu0 %v34276_v11 }
 0x3fa   :  { %29611 = vmatmul.mubr.f32.gmra.mrb[60].mxu0 %v34298_v29 }
 0x3fb   :  { %29613 = vmatprep.mubr.f32.mxu0 %v34342_v46 }
 0x3fc   :  { %28830 = vmatmul.mubr.f32.vlgmr.msra.gmra.mrb[24].mxu1 %v37051_v31 }
 0x3fd   :  { %30839 = vmatpush3.bf16.msra.mxu1 %v37050_v52  ;;  %28836 = vmatprep.mubr.f32.mxu1 %v37041_v53 }
 0x3fe   :  { %30841 = vmatprep.subr.bf16.mxu1 %v37031_v27  ;;  %29614 = vmatmul.mubr.f32.gmra.mrb[62].mxu0 %v34355_v30 }
 0x3ff   :  { %29620 = vmatprep.mubr.f32.mxu0 %v37039_v45  ;;  %v37057_v45 = vld [vmem:[#allocation88_spill] sm:$0xff] }
 0x402   :  { %29621 = vmatmul.mubr.f32.vlgmr.msra.gmra.mrb[48].mxu0 %v37043_v15  ;;  %v37058_v15 = vld [vmem:[#allocation90_spill] sm:$0xff] }
 0x403   :  { %v34694_v43 = vpop.f32.mrb[14].mxu1  ;;  %29623 = vmatprep.mubr.f32.mxu0 %v37044_v17  ;;  %31351 = vmatpush3.bf16.msra.mxu0 %v32699_v12  ;;  %v37059_v17 = vld [vmem:[#allocation41_spill] sm:$0xff] }
 0x404   :  { %37052 = vst [vmem:[#allocation73_spill] sm:$0xff] %v34694_v43  ;;  %v34697_v4 = vpop.f32.mrb[15].mxu1  ;;  %28837 = vmatmul.mubr.f32.vlgmr.msra.gmra.mrb[24].mxu1 %v37046_v54  ;;  %31353 = vmatprep.subr.bf16.mxu0 %v37055_v34  ;;  %v37156_v43 = vld [vmem:[#allocation17_spill] sm:$0xff] }
 0x405   :  { %37053 = vst [vmem:[#allocation115_spill] sm:$0xff] %v34697_v4  ;;  %30843 = vmatpush3.bf16.msra.mxu1 %v37031_v27  ;;  %28843 = vmatprep.mubr.f32.mxu1 %v37041_v53  ;;  %v37056_v27 = vld [vmem:[#allocation86_spill] sm:$0xff] }
 0x406   :  { %30845 = vmatprep.subr.bf16.mxu1 %v37054_v7  ;;  %29624 = vmatmul.mubr.f32.gmra.mrb[50].mxu0 %v37045_v10  ;;  %v37060_v10 = vld [vmem:[#allocation82_spill] sm:$0xff] }
 0x407   :  { %29626 = vmatprep.mubr.f32.mxu0 %v34205_v14  ;;  %v37061_v14 = vld [vmem:[#allocation71_spill] sm:$0xff] }
 0x40a   :  { %29627 = vmatmul.mubr.f32.gmra.mrb[52].mxu0 %v34207_v6  ;;  %v37065_v6 = vld [vmem:[#allocation84_spill] sm:$0xff] }
 0x40b   :  { %29629 = vmatprep.mubr.f32.mxu0 %v34210_v49  ;;  %v37062_v49 = vld [vmem:[#allocation37_spill] sm:$0xff] }
 0x40c   :  { %28844 = vmatmul.mubr.f32.vlgmr.msra.gmra.mrb[24].mxu1 %v37046_v54  ;;  %v32454_v54 = vld [vmem:[#allocation5 + $0x58] sm:$0xff] }
 0x40d   :  { %30847 = vmatpush3.bf16.msra.mxu1 %v37054_v7  ;;  %28850 = vmatprep.mubr.f32.mxu1 %v37056_v27  ;;  %v32446_v27 = vld [vmem:[#allocation5 + $0x38] sm:$0xff] }
 0x40e   :  { %30849 = vmatprep.subr.bf16.mxu1 %v37057_v45  ;;  %29630 = vmatmul.mubr.f32.gmra.mrb[54].mxu0 %v34219_v23  ;;  %v37064_v23 = vld [vmem:[#allocation74_spill] sm:$0xff] }
 0x40f   :  { %29632 = vmatprep.mubr.f32.mxu0 %v34251_v16  ;;  %v37063_v16 = vld [vmem:[#allocation75_spill] sm:$0xff] }
 0x410   :  { %28851 = vmatmul.mubr.f32.vlgmr.msra.gmra.mrb[26].mxu1 %v37058_v15  ;;  %v32444_v15 = vld [vmem:[#allocation5 + $0x30] sm:$0xff] }
 0x411   :  { %30851 = vmatpush3.bf16.msra.mxu1 %v37057_v45  ;;  %28857 = vmatprep.mubr.f32.mxu1 %v37059_v17 }
 0x412   :  { %30853 = vmatprep.subr.bf16.mxu1 %v37060_v10  ;;  %29633 = vmatmul.mubr.f32.gmra.mrb[56].mxu0 %v34253_v42  ;;  %v37066_v42 = vld [vmem:[#allocation79_spill] sm:$0xff] }
 0x413   :  { %29635 = vmatprep.mubr.f32.mxu0 %v34267_v37  ;;  %v37067_v37 = vld [vmem:[#allocation97_spill] sm:$0xff] }
 0x416   :  { %29636 = vmatmul.mubr.f32.gmra.mrb[58].mxu0 %v34269_v13  ;;  %v34742_v13 = vmul.f32 %v37067_v37, %v37067_v37 }
 0x417   :  { %29638 = vmatprep.mubr.f32.mxu0 %v34276_v11 }
 0x418   :  { %28858 = vmatmul.mubr.f32.vlgmr.msra.gmra.mrb[26].mxu1 %v37061_v14  ;;  %37068 = vst [vmem:[#allocation116_spill] sm:$0xff] %v34742_v13 }
 0x419   :  { %30855 = vmatpush3.bf16.msra.mxu1 %v37060_v10  ;;  %28864 = vmatprep.mubr.f32.mxu1 %v37062_v49 }
 0x41a   :  { %30857 = vmatprep.subr.bf16.mxu1 %v37054_v7  ;;  %29639 = vmatmul.mubr.f32.gmra.mrb[60].mxu0 %v34298_v29 }
 0x41b   :  { %29641 = vmatprep.mubr.f32.mxu0 %v34342_v46 }
 0x41e   :  { %29642 = vmatmul.mubr.f32.gmra.mrb[62].mxu0 %v34355_v30  ;;  %v37071_v30 = vld [vmem:[#allocation98_spill] sm:$0xff] }
 0x41f   :  { %v34752_v45 = vmul.f32 %v37071_v30, %v37071_v30 }
 0x420   :  { %28865 = vmatmul.mubr.f32.vlgmr.msra.gmra.mrb[26].mxu1 %v37063_v16 }
 0x421   :  { %30859 = vmatpush3.bf16.msra.mxu1 %v37054_v7  ;;  %28871 = vmatprep.mubr.f32.mxu1 %v37064_v23  ;;  %37072 = vst [vmem:[#allocation122_spill] sm:$0xff] %v34752_v45 }
 0x422   :  { %30861 = vmatprep.subr.bf16.mxu1 %v37065_v6 }
 0x428   :  { %28872 = vmatmul.mubr.f32.vlgmr.msra.gmra.mrb[26].mxu1 %v37066_v42 }
 0x429   :  { %30863 = vmatpush3.bf16.msra.mxu1 %v37065_v6  ;;  %28878 = vmatprep.mubr.f32.mxu1 %v37059_v17 }
 0x42a   :  { %30865 = vmatprep.subr.bf16.mxu1 %v37054_v7 }
 0x42f   :  { %v28677_v29 = vpop.f32.mrb[16].mxu1 }
 0x430   :  { %v34744_v11 = vmul.f32 %v28677_v29, %v28677_v29  ;;  %v34747_v46 = vmul.f32 %v28677_v29, %v37067_v37  ;;  %v6984_v52 = vpop.f32.mrb[17].mxu1  ;;  %28879 = vmatmul.mubr.f32.vlgmr.msra.gmra.mrb[26].mxu1 %v37061_v14  ;;  %v37076_v37 = vld [vmem:[#allocation83_spill] sm:$0xff] }
 0x431   :  { %v34754_v10 = vmul.f32 %v6984_v52, %v6984_v52  ;;  %v34757_v6 = vmul.f32 %v6984_v52, %v37071_v30  ;;  %30867 = vmatpush3.bf16.msra.mxu1 %v37054_v7  ;;  %28885 = vmatprep.mubr.f32.mxu1 %v37059_v17  ;;  %v37078_v52 = vld [vmem:[#allocation40_spill] sm:$0xff]  ;;  %v37079_v30 = vld [vmem:[#allocation45_spill] sm:$0xff] }
 0x432   :  { %37069 = vst [vmem:[#allocation118_spill] sm:$0xff] %v34744_v11  ;;  %37070 = vst [vmem:[#allocation121_spill] sm:$0xff] %v34747_v46  ;;  %v34763_v29 = vadd.f32 %v34744_v11, %v34742_v13  ;;  %30869 = vmatprep.subr.bf16.mxu1 %v37076_v37  ;;  %v37080_v7 = vld [vmem:[#allocation100_spill] sm:$0xff]  ;;  %v37083_v11 = vld [vmem:[#allocation93_spill] sm:$0xff] }
 0x433   :  { %37073 = vst [vmem:[#allocation77_spill] sm:$0xff] %v34754_v10  ;;  %37074 = vst [vmem:[#allocation76_spill] sm:$0xff] %v34757_v6  ;;  %v34768_v46 = vadd.f32 %v34754_v10, %v34752_v45  ;;  %v37081_v6 = vld [vmem:[#allocation43_spill] sm:$0xff]  ;;  %v37133_v13 = vld [vmem:[#allocation109_spill] sm:$0xff] }
 0x434   :  { %37075 = vst [vmem:[#allocation35_spill] sm:$0xff] %v34763_v29  ;;  %v37082_v29 = vld [vmem:[#allocation85_spill] sm:$0xff]  ;;  %v37085_v10 = vld [vmem:[#allocation95_spill] sm:$0xff]  ;;  %v34900_v42 = vmul.f32 %v37133_v13, %v37133_v13 }
 0x435   :  { %37077 = vst [vmem:[#allocation112_spill] sm:$0xff] %v34768_v46  ;;  %v37084_v46 = vld [vmem:[#allocation94_spill] sm:$0xff]  ;;  %v32438_v45 = vld [vmem:[#allocation5 + $0x18] sm:$0xff]  ;;  %v32442_v17 = vld [vmem:[#allocation5 + $0x28] sm:$0xff] }
 0x438   :  { %28886 = vmatmul.mubr.f32.vlgmr.msra.gmra.mrb[26].mxu1 %v37061_v14 }
 0x439   :  { %30871 = vmatpush3.bf16.msra.mxu1 %v37076_v37  ;;  %28892 = vmatprep.mubr.f32.mxu1 %v37078_v52 }
 0x43a   :  { %30873 = vmatprep.subr.bf16.mxu1 %v37079_v30 }
 0x43c   :  { %28893 = vmatmul.mubr.f32.vlgmr.msra.gmra.mrb[28].mxu1 %v37080_v7 }
 0x43d   :  { %30875 = vmatpush3.bf16.msra.mxu1 %v37079_v30  ;;  %28899 = vmatprep.mubr.f32.mxu1 %v37081_v6  ;;  %v37088_v30 = vld [vmem:[#allocation99_spill] sm:$0xff] }
 0x43e   :  { %30877 = vmatprep.subr.bf16.mxu1 %v37082_v29 }
 0x444   :  { %28900 = vmatmul.mubr.f32.vlgmr.msra.gmra.mrb[28].mxu1 %v37083_v11 }
 0x445   :  { %30879 = vmatpush3.bf16.msra.mxu1 %v37082_v29  ;;  %28906 = vmatprep.mubr.f32.mxu1 %v37084_v46  ;;  %v37089_v46 = vld [vmem:[#allocation103_spill] sm:$0xff] }
 0x446   :  { %30881 = vmatprep.subr.bf16.mxu1 %v37076_v37  ;;  %v34792_v26 = vmul.f32 %v37089_v46, %v37089_v46 }
 0x448   :  { %37090 = vst [vmem:[#allocation78_spill] sm:$0xff] %v34792_v26 }
 0x44c   :  { %28907 = vmatmul.mubr.f32.vlgmr.msra.gmra.mrb[28].mxu1 %v37085_v10 }
 0x44d   :  { %30883 = vmatpush3.bf16.msra.mxu1 %v37076_v37  ;;  %28913 = vmatprep.mubr.f32.mxu1 %v37086_v55 }
 0x44e   :  { %30885 = vmatprep.subr.bf16.mxu1 %v37087_v44 }
 0x454   :  { %28914 = vmatmul.mubr.f32.vlgmr.msra.gmra.mrb[28].mxu1 %v37088_v30  ;;  %v37093_v30 = vld [vmem:[#allocation104_spill] sm:$0xff] }
 0x455   :  { %30887 = vmatpush3.bf16.msra.mxu1 %v37087_v44  ;;  %28920 = vmatprep.mubr.f32.mxu1 %v37081_v6  ;;  %v34802_v44 = vmul.f32 %v37093_v30, %v37093_v30  ;;  %37134 = vst [vmem:[#allocation104_spill] sm:$0xff] %v34900_v42 }
 0x456   :  { %30889 = vmatprep.subr.bf16.mxu1 %v37076_v37 }
 0x457   :  { %37094 = vst [vmem:[#allocation114_spill] sm:$0xff] %v34802_v44 }
 0x45b   :  { %v28719_v29 = vpop.f32.mrb[18].mxu1 }
 0x45c   :  { %v34794_v10 = vmul.f32 %v28719_v29, %v28719_v29  ;;  %v34797_v7 = vmul.f32 %v28719_v29, %v37089_v46  ;;  %v7486_v55 = vpop.f32.mrb[19].mxu1  ;;  %28921 = vmatmul.mubr.f32.vlgmr.msra.gmra.mrb[28].mxu1 %v37083_v11  ;;  %v37098_v29 = vld [vmem:[#allocation87_spill] sm:$0xff] }
 0x45d   :  { %v34804_v59 = vmul.f32 %v7486_v55, %v7486_v55  ;;  %v34807_v52 = vmul.f32 %v7486_v55, %v37093_v30  ;;  %30891 = vmatpush3.bf16.msra.mxu1 %v37076_v37  ;;  %28927 = vmatprep.mubr.f32.mxu1 %v37081_v6  ;;  %v37100_v55 = vld [vmem:[#allocation44_spill] sm:$0xff]  ;;  %v37101_v30 = vld [vmem:[#allocation38_spill] sm:$0xff] }
 0x45e   :  { %37091 = vst [vmem:[#allocation110_spill] sm:$0xff] %v34794_v10  ;;  %37092 = vst [vmem:[#allocation113_spill] sm:$0xff] %v34797_v7  ;;  %v34813_v46 = vadd.f32 %v34794_v10, %v34792_v26  ;;  %30893 = vmatprep.subr.bf16.mxu1 %v37098_v29  ;;  %v37102_v37 = vld [vmem:[#allocation106_spill] sm:$0xff]  ;;  %v37105_v10 = vld [vmem:[#allocation48_spill] sm:$0xff] }
 0x45f   :  { %37095 = vst [vmem:[#allocation81_spill] sm:$0xff] %v34804_v59  ;;  %37096 = vst [vmem:[#allocation80_spill] sm:$0xff] %v34807_v52  ;;  %v34818_v7 = vadd.f32 %v34804_v59, %v34802_v44  ;;  %v37103_v52 = vld [vmem:[#allocation47_spill] sm:$0xff]  ;;  %v37107_v59 = vld [vmem:[#allocation101_spill] sm:$0xff] }
 0x460   :  { %37097 = vst [vmem:[#allocation16_spill] sm:$0xff] %v34813_v46  ;;  %v37104_v46 = vld [vmem:[#allocation91_spill] sm:$0xff] }
 0x461   :  { %37099 = vst [vmem:[#allocation88_spill] sm:$0xff] %v34818_v7  ;;  %v37106_v7 = vld [vmem:[#allocation49_spill] sm:$0xff] }
 0x464   :  { %28928 = vmatmul.mubr.f32.vlgmr.msra.gmra.mrb[28].mxu1 %v37083_v11 }
 0x465   :  { %30895 = vmatpush3.bf16.msra.mxu1 %v37098_v29  ;;  %28934 = vmatprep.mubr.f32.mxu1 %v37100_v55  ;;  %v37108_v55 = vld [vmem:[#allocation102_spill] sm:$0xff] }
 0x466   :  { %30897 = vmatprep.subr.bf16.mxu1 %v37101_v30 }
 0x468   :  { %28935 = vmatmul.mubr.f32.vlgmr.msra.gmra.mrb[30].mxu1 %v37102_v37  ;;  %v37109_v37 = vld [vmem:[#allocation92_spill] sm:$0xff] }
 0x469   :  { %30899 = vmatpush3.bf16.msra.mxu1 %v37101_v30  ;;  %28941 = vmatprep.mubr.f32.mxu1 %v37103_v52  ;;  %v37110_v30 = vld [vmem:[#allocation105_spill] sm:$0xff] }
 0x46a   :  { %30901 = vmatprep.subr.bf16.mxu1 %v37104_v46 }
 0x470   :  { %28942 = vmatmul.mubr.f32.vlgmr.msra.gmra.mrb[30].mxu1 %v37105_v10 }
 0x471   :  { %30903 = vmatpush3.bf16.msra.mxu1 %v37104_v46  ;;  %28948 = vmatprep.mubr.f32.mxu1 %v37106_v7  ;;  %v37111_v7 = vld [vmem:[#allocation107_spill] sm:$0xff] }
 0x472   :  { %30905 = vmatprep.subr.bf16.mxu1 %v37098_v29  ;;  %v34842_v44 = vmul.f32 %v37111_v7, %v37111_v7 }
 0x474   :  { %37112 = vst [vmem:[#allocation82_spill] sm:$0xff] %v34842_v44 }
 0x478   :  { %28949 = vmatmul.mubr.f32.vlgmr.msra.gmra.mrb[30].mxu1 %v37107_v59 }
 0x479   :  { %30907 = vmatpush3.bf16.msra.mxu1 %v37098_v29  ;;  %28955 = vmatprep.mubr.f32.mxu1 %v37108_v55 }
 0x47a   :  { %30909 = vmatprep.subr.bf16.mxu1 %v37109_v37 }
 0x480   :  { %28956 = vmatmul.mubr.f32.vlgmr.msra.gmra.mrb[30].mxu1 %v37110_v30  ;;  %v37115_v30 = vld [vmem:[#allocation108_spill] sm:$0xff] }
 0x481   :  { %30911 = vmatpush3.bf16.msra.mxu1 %v37109_v37  ;;  %28962 = vmatprep.mubr.f32.mxu1 %v37103_v52  ;;  %v34852_v37 = vmul.f32 %v37115_v30, %v37115_v30 }
 0x482   :  { %30913 = vmatprep.subr.bf16.mxu1 %v37098_v29 }
 0x483   :  { %37116 = vst [vmem:[#allocation98_spill] sm:$0xff] %v34852_v37 }
 0x487   :  { %v28761_v46 = vpop.f32.mrb[20].mxu1 }
 0x488   :  { %v34844_v59 = vmul.f32 %v28761_v46, %v28761_v46  ;;  %v34847_v26 = vmul.f32 %v28761_v46, %v37111_v7  ;;  %v7988_v55 = vpop.f32.mrb[21].mxu1  ;;  %28963 = vmatmul.mubr.f32.vlgmr.msra.gmra.mrb[30].mxu1 %v37105_v10  ;;  %v37120_v46 = vld [vmem:[#allocation117_spill] sm:$0xff] }
 0x489   :  { %v34854_v11 = vmul.f32 %v7988_v55, %v7988_v55  ;;  %v34857_v6 = vmul.f32 %v7988_v55, %v37115_v30  ;;  %30915 = vmatpush3.bf16.msra.mxu1 %v37098_v29  ;;  %28969 = vmatprep.mubr.f32.mxu1 %v37103_v52  ;;  %v37122_v55 = vld [vmem:[#allocation22_spill] sm:$0xff]  ;;  %v37124_v30 = vld [vmem:[#allocation19_spill] sm:$0xff] }
 0x48a   :  { %37113 = vst [vmem:[#allocation84_spill] sm:$0xff] %v34844_v59  ;;  %37114 = vst [vmem:[#allocation97_spill] sm:$0xff] %v34847_v26  ;;  %v34863_v7 = vadd.f32 %v34844_v59, %v34842_v44  ;;  %30941 = vmatprep.subr.bf16.mxu1 %v37120_v46  ;;  %v37123_v29 = vld [vmem:[#allocation26_spill] sm:$0xff]  ;;  %v37129_v59 = vld [vmem:[#allocation21_spill] sm:$0xff] }
 0x48b   :  { %37117 = vst [vmem:[#allocation83_spill] sm:$0xff] %v34854_v11  ;;  %37118 = vst [vmem:[#allocation45_spill] sm:$0xff] %v34857_v6  ;;  %v34868_v26 = vadd.f32 %v34854_v11, %v34852_v37  ;;  %v37125_v6 = vld [vmem:[#allocation129_spill] sm:$0xff]  ;;  %v37128_v11 = vld [vmem:[#allocation24_spill] sm:$0xff] }
 0x48c   :  { %37119 = vst [vmem:[#allocation85_spill] sm:$0xff] %v34863_v7  ;;  %v37126_v7 = vld [vmem:[#allocation23_spill] sm:$0xff] }
 0x48d   :  { %37121 = vst [vmem:[#allocation89_spill] sm:$0xff] %v34868_v26  ;;  %v37127_v26 = vld [vmem:[#allocation20_spill] sm:$0xff] }
 0x490   :  { %28970 = vmatmul.mubr.f32.vlgmr.msra.gmra.mrb[30].mxu1 %v37105_v10  ;;  %v32435_v10 = vld [vmem:[#allocation2 + $0x10] sm:$0xff] }
 0x491   :  { %30943 = vmatpush3.bf16.msra.mxu1 %v37120_v46  ;;  %29144 = vmatprep.mubr.f32.mxu1 %v37122_v55  ;;  %v37131_v55 = vld [vmem:[#allocation25_spill] sm:$0xff] }
 0x492   :  { %30945 = vmatprep.subr.bf16.mxu1 %v34480_v38 }
 0x494   :  { %29145 = vmatmul.mubr.f32.vlgmr.msra.gmra.mrb[32].mxu1 %v37123_v29 }
 0x495   :  { %30947 = vmatpush3.bf16.msra.mxu1 %v34480_v38  ;;  %29151 = vmatprep.mubr.f32.mxu1 %v37124_v30  ;;  %v37130_v38 = vld [vmem:[#allocation15_spill] sm:$0xff] }
 0x496   :  { %30949 = vmatprep.subr.bf16.mxu1 %v37125_v6  ;;  %v20896_v29 = vsel %vm123_vm0, %v37130_v38, 0  ;;  %v32436_v38 = vld [vmem:[#allocation5 + $0x10] sm:$0xff] }
 0x497   :  { %v34891_v44 = vand.u32 4294901760, %v20896_v29  ;;  %v20878_v52 = vmul.f32 %v32436_v38, %v32435_v10 }
 0x499   :  { %37132 = vst [vmem:[#allocation103_spill] sm:$0xff] %v34891_v44 }
 0x49c   :  { %29152 = vmatmul.mubr.f32.vlgmr.msra.gmra.mrb[32].mxu1 %v37126_v7 }
 0x49d   :  { %30951 = vmatpush3.bf16.msra.mxu1 %v37125_v6  ;;  %29158 = vmatprep.mubr.f32.mxu1 %v37127_v26  ;;  %v32433_v6 = vld [vmem:[#allocation2] sm:$0xff] }
 0x49e   :  { %30953 = vmatprep.subr.bf16.mxu1 %v37120_v46  ;;  %v32434_v26 = vld [vmem:[#allocation5] sm:$0xff] }
 0x49f   :  { %v20876_v37 = vmul.f32 %v32434_v26, %v32433_v6  ;;  %v37135_v26 = vld [vmem:[#allocation111_spill] sm:$0xff] }
 0x4a0   :  { %v34904_v6 = vmul.f32 %v37135_v26, %v37135_v26 }
 0x4a2   :  { %37136 = vst [vmem:[#allocation87_spill] sm:$0xff] %v34904_v6 }
 0x4a4   :  { %29159 = vmatmul.mubr.f32.vlgmr.msra.gmra.mrb[32].mxu1 %v37128_v11  ;;  %v34896_v11 = vsub.f32 %v20896_v29, %v34891_v44 }
 0x4a5   :  { %30955 = vmatpush3.bf16.msra.mxu1 %v37120_v46  ;;  %29165 = vmatprep.mubr.f32.mxu1 %v37129_v59  ;;  %v20893_v59 = vsel %vm123_vm0, %v20876_v37, 0 }
 0x4a6   :  { %30957 = vmatprep.subr.bf16.mxu1 %v34469_v0  ;;  %v34906_v23 = vand.u32 4294901760, %v20893_v59 }
 0x4a8   :  { %37137 = vst [vmem:[#allocation38_spill] sm:$0xff] %v34906_v23  ;;  %v34924_v49 = vsub.f32 %v20893_v59, %v34906_v23 }
 0x4ac   :  { %29166 = vmatmul.mubr.f32.vlgmr.msra.gmra.mrb[32].mxu1 %v37131_v55  ;;  %v32437_v55 = vld [vmem:[#allocation2 + $0x18] sm:$0xff] }
 0x4ad   :  { %30959 = vmatpush3.bf16.msra.mxu1 %v34469_v0  ;;  %29172 = vmatprep.mubr.f32.mxu1 %v37124_v30  ;;  %v20879_v0 = vmul.f32 %v32438_v45, %v32437_v55  ;;  %v20899_v55 = vsel %vm123_vm0, %v20878_v52, 0  ;;  %v37144_v45 = vld [vmem:[#allocation119_spill] sm:$0xff] }
 0x4ae   :  { %30961 = vmatprep.subr.bf16.mxu1 %v37120_v46 }
 0x4af   :  { %v20902_v52 = vsel %vm123_vm0, %v20879_v0, 0 }
 0x4b3   :  { %v28803_v58 = vpop.f32.mrb[22].mxu1 }
 0x4b4   :  { %v34908_v37 = vmul.f32 %v28803_v58, %v28803_v58  ;;  %v34911_v29 = vmul.f32 %v28803_v58, %v37133_v13  ;;  %v8490_v10 = vpop.f32.mrb[23].mxu1  ;;  %29173 = vmatmul.mubr.f32.vlgmr.msra.gmra.mrb[32].mxu1 %v37126_v7  ;;  %v34926_v58 = vand.u32 4294901760, %v20899_v55 }
 0x4b5   :  { %v34916_v38 = vmul.f32 %v8490_v10, %v8490_v10  ;;  %v34919_v16 = vmul.f32 %v8490_v10, %v37135_v26  ;;  %30963 = vmatpush3.bf16.msra.mxu1 %v37120_v46  ;;  %29179 = vmatprep.mubr.f32.mxu1 %v37124_v30  ;;  %v36607_v46 = vand.u32 4294901760, %v34924_v49  ;;  %v37146_v10 = vand.u32 4294901760, %v34896_v11  ;;  %v32440_v30 = vld [vmem:[#allocation5 + $0x20] sm:$0xff] }
 0x4b6   :  { %37138 = vst [vmem:[#allocation91_spill] sm:$0xff] %v34908_v37  ;;  %37139 = vst [vmem:[#allocation92_spill] sm:$0xff] %v34911_v29  ;;  %v34930_v13 = vadd.f32 %v34908_v37, %v34900_v42  ;;  %30965 = vmatprep.subr.bf16.mxu1 %v37144_v45  ;;  %v34945_v29 = vand.u32 4294901760, %v20902_v52  ;;  %v32439_v42 = vld [vmem:[#allocation2 + $0x20] sm:$0xff] }
 0x4b7   :  { %37140 = vst [vmem:[#allocation107_spill] sm:$0xff] %v34916_v38  ;;  %37141 = vst [vmem:[#allocation108_spill] sm:$0xff] %v34919_v16  ;;  %v34936_v26 = vadd.f32 %v34916_v38, %v34904_v6  ;;  %v21020_v59 = vsub.f32 %v34896_v11, %v37146_v10  ;;  %v34943_v16 = vsub.f32 %v20899_v55, %v34926_v58  ;;  %v37148_v6 = vld [vmem:[#allocation46_spill] sm:$0xff] }
 0x4b8   :  { %37142 = vst [vmem:[#allocation117_spill] sm:$0xff] %v34926_v58  ;;  %37143 = vst [vmem:[#allocation129_spill] sm:$0xff] %v34930_v13  ;;  %v21010_v13 = vsub.f32 %v34924_v49, %v36607_v46  ;;  %v34952_v38 = vsub.f32 %v20902_v52, %v34945_v29  ;;  %v20880_v14 = vmul.f32 %v32440_v30, %v32439_v42  ;;  %v32441_v52 = vld [vmem:[#allocation2 + $0x28] sm:$0xff]  ;;  %v37149_v30 = vld [vmem:[#allocation50_spill] sm:$0xff] }
 0x4b9   :  { %37145 = vst [vmem:[#allocation15_spill] sm:$0xff] %v34936_v26  ;;  %37147 = vst [vmem:[#allocation109_spill] sm:$0xff] %v34945_v29  ;;  %v36614_v0 = vand.u32 4294901760, %v34943_v16  ;;  %v21021_v37 = vand.u32 4294901760, %v21020_v59  ;;  %v32443_v59 = vld [vmem:[#allocation2 + $0x30] sm:$0xff] }
 0x4ba   :  { %v21011_v26 = vand.u32 4294901760, %v21010_v13  ;;  %v36616_v55 = vand.u32 4294901760, %v34952_v38  ;;  %v20881_v13 = vmul.f32 %v32442_v17, %v32441_v52  ;;  %v20882_v9 = vmul.f32 %v32444_v15, %v32443_v59 }
 0x4bb   :  { %v21030_v10 = vsub.f32 %v34943_v16, %v36614_v0 }
 0x4bc   :  { %29180 = vmatmul.mubr.f32.vlgmr.msra.gmra.mrb[32].mxu1 %v37126_v7  ;;  %29984 = vmatprep.mubr.f32.mxu0 %v21011_v26  ;;  %v21040_v0 = vsub.f32 %v34952_v38, %v36616_v55  ;;  %v32445_v7 = vld [vmem:[#allocation2 + $0x38] sm:$0xff]  ;;  %v20908_v42 = vsel %vm123_vm0, %v20881_v13, 0  ;;  %v20911_v17 = vsel %vm123_vm0, %v20882_v9, 0  ;;  %v32448_v13 = vld [vmem:[#allocation5 + $0x40] sm:$0xff] }
 0x4bd   :  { %30967 = vmatpush3.bf16.msra.mxu1 %v37144_v45  ;;  %29186 = vmatprep.mubr.f32.mxu1 %v37148_v6  ;;  %v21031_v46 = vand.u32 4294901760, %v21030_v10  ;;  %v20883_v6 = vmul.f32 %v32446_v27, %v32445_v7  ;;  %v20905_v10 = vsel %vm123_vm0, %v20880_v14, 0  ;;  %v34971_v26 = vand.u32 4294901760, %v20908_v42  ;;  %v37153_v27 = vld [vmem:[#allocation27_spill] sm:$0xff] }
 0x4be   :  { %30969 = vmatprep.subr.bf16.mxu1 %v34493_v57  ;;  %29985 = vmatmul.mubr.f32.vlgmr.msra.gmra.mrb[64].mxu0 %v21021_v37  ;;  %v21041_v15 = vand.u32 4294901760, %v21040_v0  ;;  %v34969_v52 = vand.u32 4294901760, %v20905_v10  ;;  %v34973_v59 = vand.u32 4294901760, %v20911_v17  ;;  %v37154_v7 = vld [vmem:[#allocation131_spill] sm:$0xff] }
 0x4bf   :  { %29987 = vmatprep.mubr.f32.mxu0 %v21031_v46  ;;  %37151 = vst [vmem:[#allocation119_spill] sm:$0xff] %v34971_v26  ;;  %v20914_v14 = vsel %vm123_vm0, %v20883_v6, 0  ;;  %v34983_v37 = vsub.f32 %v20908_v42, %v34971_v26  ;;  %31355 = vmatpush3.bf16.msra.mxu0 %v37055_v34  ;;  %v32449_v6 = vld [vmem:[#allocation2 + $0x48] sm:$0xff] }
 0x4c0   :  { %29187 = vmatmul.mubr.f32.vlgmr.msra.gmra.mrb[34].mxu1 %v37149_v30  ;;  %37150 = vst [vmem:[#allocation111_spill] sm:$0xff] %v34969_v52  ;;  %37152 = vst [vmem:[#allocation141_spill] sm:$0xff] %v34973_v59  ;;  %v34980_v9 = vsub.f32 %v20905_v10, %v34969_v52  ;;  %v34986_v46 = vsub.f32 %v20911_v17, %v34973_v59  ;;  %v34988_v0 = vand.u32 4294901760, %v20914_v14  ;;  %v32450_v30 = vld [vmem:[#allocation5 + $0x48] sm:$0xff]  ;;  %31357 = vmatprep.subr.bf16.mxu0 %v37156_v43 }
 0x4c1   :  { %30971 = vmatpush3.bf16.msra.mxu1 %v34493_v57  ;;  %29193 = vmatprep.mubr.f32.mxu1 %v37153_v27  ;;  %v32447_v57 = vld [vmem:[#allocation2 + $0x40] sm:$0xff]  ;;  %v20885_v4 = vmul.f32 %v32450_v30, %v32449_v6  ;;  %v36623_v42 = vand.u32 4294901760, %v34983_v37 }
 0x4c2   :  { %30973 = vmatprep.subr.bf16.mxu1 %v37154_v7  ;;  %37155 = vst [vmem:[#allocation131_spill] sm:$0xff] %v34988_v0  ;;  %29988 = vmatmul.mubr.f32.gmra.mrb[66].mxu0 %v21041_v15  ;;  %v20884_v55 = vmul.f32 %v32448_v13, %v32447_v57  ;;  %v36620_v10 = vand.u32 4294901760, %v34980_v9  ;;  %v36624_v17 = vand.u32 4294901760, %v34986_v46  ;;  %v34996_v31 = vsub.f32 %v20914_v14, %v34988_v0 }
 0x4c3   :  { %v20920_v15 = vsel %vm123_vm0, %v20885_v4, 0  ;;  %v21060_v30 = vsub.f32 %v34983_v37, %v36623_v42  ;;  %v32452_v4 = vld [vmem:[#allocation5 + $0x50] sm:$0xff] }
 0x4c4   :  { %v20917_v34 = vsel %vm123_vm0, %v20884_v55, 0  ;;  %v21050_v57 = vsub.f32 %v34980_v9, %v36620_v10  ;;  %v21070_v13 = vsub.f32 %v34986_v46, %v36624_v17  ;;  %v36626_v6 = vand.u32 4294901760, %v34996_v31  ;;  %v32451_v55 = vld [vmem:[#allocation2 + $0x50] sm:$0xff] }
 0x4c5   :  { %v35010_v14 = vand.u32 4294901760, %v20917_v34  ;;  %v35012_v18 = vand.u32 4294901760, %v20920_v15  ;;  %v20886_v47 = vmul.f32 %v32452_v4, %v32451_v55  ;;  %v20887_v10 = vmul.f32 %v32454_v54, %v32453_v39 }
 0x4c6   :  { %v21051_v53 = vand.u32 4294901760, %v21050_v57  ;;  %v21061_v42 = vand.u32 4294901760, %v21060_v30  ;;  %v21071_v1 = vand.u32 4294901760, %v21070_v13  ;;  %v21080_v17 = vsub.f32 %v34996_v31, %v36626_v6  ;;  %v32456_v13 = vld [vmem:[#allocation5 + $0x60] sm:$0xff] }
 0x4c7   :  { %37157 = vst [vmem:[#allocation17_spill] sm:$0xff] %v35010_v14  ;;  %v35021_v20 = vsub.f32 %v20917_v34, %v35010_v14  ;;  %v35024_v55 = vsub.f32 %v20920_v15, %v35012_v18  ;;  %v20923_v54 = vsel %vm123_vm0, %v20886_v47, 0  ;;  %v20926_v39 = vsel %vm123_vm0, %v20887_v10, 0  ;;  %v32458_v47 = vld [vmem:[#allocation5 + $0x68] sm:$0xff] }
 0x4c8   :  { %29194 = vmatmul.mubr.f32.vlgmr.msra.gmra.mrb[34].mxu1 %v37158_v35  ;;  %29990 = vmatprep.mubr.f32.mxu0 %v21051_v53  ;;  %v35029_v57 = vand.u32 4294901760, %v20923_v54  ;;  %v35031_v30 = vand.u32 4294901760, %v20926_v39  ;;  %v21081_v34 = vand.u32 4294901760, %v21080_v17 }
 0x4c9   :  { %30975 = vmatpush3.bf16.msra.mxu1 %v37154_v7  ;;  %29200 = vmatprep.mubr.f32.mxu1 %v37159_v25  ;;  %v32455_v7 = vld [vmem:[#allocation2 + $0x60] sm:$0xff]  ;;  %v36629_v6 = vand.u32 4294901760, %v35021_v20  ;;  %v36631_v15 = vand.u32 4294901760, %v35024_v55  ;;  %v32457_v25 = vld [vmem:[#allocation2 + $0x68] sm:$0xff] }
 0x4ca   :  { %30977 = vmatprep.subr.bf16.mxu1 %v37144_v45  ;;  %v20888_v4 = vmul.f32 %v32456_v13, %v32455_v7  ;;  %29991 = vmatmul.mubr.f32.gmra.mrb[68].mxu0 %v21061_v42  ;;  %v20889_v36 = vmul.f32 %v32458_v47, %v32457_v25  ;;  %v35036_v10 = vsub.f32 %v20923_v54, %v35029_v57  ;;  %v32459_v13 = vld [vmem:[#allocation2 + $0x70] sm:$0xff] }
 0x4cb   :  { %29993 = vmatprep.mubr.f32.mxu0 %v21071_v1  ;;  %v35039_v53 = vsub.f32 %v20926_v39, %v35031_v30  ;;  %v21090_v42 = vsub.f32 %v35021_v20, %v36629_v6  ;;  %v21100_v17 = vsub.f32 %v35024_v55, %v36631_v15  ;;  %v32461_v15 = vld [vmem:[#allocation2 + $0x78] sm:$0xff] }
 0x4cc   :  { %v20929_v61 = vsel %vm123_vm0, %v20888_v4, 0  ;;  %v20932_v25 = vsel %vm123_vm0, %v20889_v36, 0  ;;  %v36634_v1 = vand.u32 4294901760, %v35036_v10  ;;  %v32460_v4 = vld [vmem:[#allocation5 + $0x70] sm:$0xff]  ;;  %v20891_v41 = vmul.f32 %v32462_v63, %v32461_v15 }
 0x4cd   :  { %37160 = vst [vmem:[#allocation142_spill] sm:$0xff] %v35039_v53  ;;  %v35048_v7 = vand.u32 4294901760, %v20929_v61  ;;  %v36633_v54 = vand.u32 4294901760, %v35039_v53  ;;  %v35053_v39 = vand.u32 4294901760, %v20932_v25  ;;  %v20890_v47 = vmul.f32 %v32460_v4, %v32459_v13  ;;  %v37165_v13 = vld [vmem:[#allocation51_spill] sm:$0xff] }
 0x4ce   :  { %29994 = vmatmul.mubr.f32.gmra.mrb[70].mxu0 %v21081_v34  ;;  %v21091_v56 = vand.u32 4294901760, %v21090_v42  ;;  %v21101_v6 = vand.u32 4294901760, %v21100_v17  ;;  %v21110_v36 = vsub.f32 %v35036_v10, %v36634_v1  ;;  %v20938_v17 = vsel %vm123_vm0, %v20891_v41, 0 }
 0x4cf   :  { %v35056_v33 = vsub.f32 %v20929_v61, %v35048_v7  ;;  %v21120_v19 = vsub.f32 %v35039_v53, %v36633_v54  ;;  %v35066_v34 = vsub.f32 %v20932_v25, %v35053_v39  ;;  %v20935_v42 = vsel %vm123_vm0, %v20890_v47, 0  ;;  %v37164_v61 = vld [vmem:[#allocation39_spill] sm:$0xff] }
 0x4d0   :  { %29201 = vmatmul.mubr.f32.vlgmr.msra.gmra.mrb[34].mxu1 %v37162_v22  ;;  %v35072_v15 = vand.u32 4294901760, %v20935_v42  ;;  %29996 = vmatprep.mubr.f32.mxu0 %v21091_v56  ;;  %v21111_v4 = vand.u32 4294901760, %v21110_v36  ;;  %v35077_v25 = vand.u32 4294901760, %v20938_v17 }
 0x4d1   :  { %37161 = vst [vmem:[#allocation143_spill] sm:$0xff] %v35056_v33  ;;  %37163 = vst [vmem:[#allocation144_spill] sm:$0xff] %v35066_v34  ;;  %30979 = vmatpush3.bf16.msra.mxu1 %v37144_v45  ;;  %29207 = vmatprep.mubr.f32.mxu1 %v37164_v61  ;;  %v36635_v63 = vand.u32 4294901760, %v35056_v33  ;;  %v36636_v54 = vand.u32 4294901760, %v35066_v34  ;;  %v21121_v47 = vand.u32 4294901760, %v21120_v19 }
 0x4d2   :  { %30981 = vmatprep.subr.bf16.mxu1 %v37165_v13  ;;  %29997 = vmatmul.mubr.f32.gmra.mrb[72].mxu0 %v21101_v6  ;;  %v35083_v61 = vsub.f32 %v20935_v42, %v35072_v15  ;;  %v35089_v56 = vsub.f32 %v20938_v17, %v35077_v25 }
 0x4d3   :  { %v21130_v1 = vsub.f32 %v35056_v33, %v36635_v63  ;;  %29999 = vmatprep.mubr.f32.mxu0 %v21111_v4  ;;  %v21140_v41 = vsub.f32 %v35066_v34, %v36636_v54  ;;  %v37168_v63 = vld [vmem:[#allocation42_spill] sm:$0xff] }
 0x4d4   :  { %37166 = vst [vmem:[#allocation51_spill] sm:$0xff] %v35083_v61  ;;  %37167 = vst [vmem:[#allocation145_spill] sm:$0xff] %v35089_v56  ;;  %v36637_v22 = vand.u32 4294901760, %v35083_v61  ;;  %v36640_v19 = vand.u32 4294901760, %v35089_v56 }
 0x4d5   :  { %v21131_v36 = vand.u32 4294901760, %v21130_v1  ;;  %v21141_v6 = vand.u32 4294901760, %v21140_v41  ;;  %v29622_v1 = vpop.f32.mrb[48].mxu0 }
 0x4d6   :  { %30000 = vmatmul.mubr.f32.gmra.mrb[74].mxu0 %v21121_v47  ;;  %v21150_v42 = vsub.f32 %v35083_v61, %v36637_v22  ;;  %v21160_v4 = vsub.f32 %v35089_v56, %v36640_v19  ;;  %v16864_v47 = vand.u32 4294901760, %v29622_v1  ;;  %v16766_v41 = vpop.f32.mrb[49].mxu0 }
 0x4d7   :  { %30002 = vmatprep.mubr.f32.mxu0 %v21131_v36  ;;  %v16861_v54 = vand.u32 4294901760, %v16766_v41 }
 0x4d8   :  { %29208 = vmatmul.mubr.f32.vlgmr.msra.gmra.mrb[34].mxu1 %v37168_v63  ;;  %v21151_v17 = vand.u32 4294901760, %v21150_v42  ;;  %v21161_v22 = vand.u32 4294901760, %v21160_v4  ;;  %v35107_v19 = vsub.f32 %v29622_v1, %v16864_v47  ;;  %v37170_v42 = vld [vmem:[#allocation125_spill] sm:$0xff] }
 0x4d9   :  { %30983 = vmatpush3.bf16.msra.mxu1 %v37165_v13  ;;  %29214 = vmatprep.mubr.f32.mxu1 %v37153_v27  ;;  %v35103_v63 = vpack.c.bf16 %v16864_v47, %v16861_v54  ;;  %v35105_v36 = vsub.f32 %v16766_v41, %v16861_v54  ;;  %v29625_v61 = vpop.f32.mrb[50].mxu0  ;;  %v35111_v33 = vmul.f32 %v37170_v42, %v37170_v42  ;;  %v37174_v54 = vld [vmem:[#allocation126_spill] sm:$0xff] }
 0x4da   :  { %30985 = vmatprep.subr.bf16.mxu1 %v37144_v45  ;;  %30003 = vmatmul.mubr.f32.gmra.mrb[76].mxu0 %v21141_v6  ;;  %v16778_v13 = vpop.f32.mrb[51].mxu0  ;;  %v17366_v34 = vand.u32 4294901760, %v29625_v61  ;;  %v35121_v1 = vmul.f32 %v37174_v54, %v37174_v54 }
 0x4db   :  { %30005 = vmatprep.mubr.f32.mxu0 %v21151_v17  ;;  %37169 = vst [vmem:[#allocation146_spill] sm:$0xff] %v35103_v63  ;;  %v17363_v40 = vand.u32 4294901760, %v16778_v13  ;;  %37171 = vst [vmem:[#allocation125_spill] sm:$0xff] %v35111_v33  ;;  %v16950_v47 = vand.u32 4294901760, %v35105_v36 }
 0x4dc   :  { %37175 = vst [vmem:[#allocation126_spill] sm:$0xff] %v35121_v1 }
 0x4dd   :  { %v35137_v63 = vpack.c.bf16 %v17366_v34, %v17363_v40 }
 0x4de   :  { %30006 = vmatmul.mubr.f32.gmra.mrb[78].mxu0 %v21161_v22 }
 0x4df   :  { %v28845_v56 = vpop.f32.mrb[24].mxu1  ;;  %30012 = vmatprep.mubr.f32.mxu0 %v34906_v23  ;;  %v37187_v23 = vld [vmem:[#allocation58_spill] sm:$0xff] }
 0x4e0   :  { %v35113_v3 = vmul.f32 %v28845_v56, %v28845_v56  ;;  %v35116_v6 = vmul.f32 %v28845_v56, %v37170_v42  ;;  %v8992_v4 = vpop.f32.mrb[25].mxu1  ;;  %29215 = vmatmul.mubr.f32.vlgmr.msra.gmra.mrb[34].mxu1 %v37158_v35  ;;  %v29628_v56 = vpop.f32.mrb[52].mxu0  ;;  %v37179_v42 = vld [vmem:[#allocation120_spill] sm:$0xff] }
 0x4e1   :  { %v35123_v17 = vmul.f32 %v8992_v4, %v8992_v4  ;;  %v35126_v22 = vmul.f32 %v8992_v4, %v37174_v54  ;;  %30987 = vmatpush3.bf16.msra.mxu1 %v37144_v45  ;;  %29221 = vmatprep.mubr.f32.mxu1 %v37153_v27  ;;  %37180 = vst [vmem:[#allocation120_spill] sm:$0xff] %v35137_v63  ;;  %v16790_v53 = vpop.f32.mrb[53].mxu0 }
 0x4e2   :  { %37172 = vst [vmem:[#allocation147_spill] sm:$0xff] %v35113_v3  ;;  %37173 = vst [vmem:[#allocation148_spill] sm:$0xff] %v35116_v6  ;;  %v35133_v41 = vadd.f32 %v35113_v3, %v35111_v33  ;;  %30989 = vmatprep.subr.bf16.mxu1 %v37179_v42  ;;  %v16957_v6 = vand.u32 4294901760, %v35107_v19  ;;  %v35144_v4 = vsub.f32 %v29625_v61, %v17366_v34  ;;  %30013 = vmatmul.mubr.f32.vlgmr.msra.gmra.mrb[64].mxu0 %v34891_v44  ;;  %v29631_v27 = vpop.f32.mrb[54].mxu0 }
 0x4e3   :  { %37176 = vst [vmem:[#allocation149_spill] sm:$0xff] %v35123_v17  ;;  %37177 = vst [vmem:[#allocation150_spill] sm:$0xff] %v35126_v22  ;;  %v35142_v45 = vadd.f32 %v35123_v17, %v35121_v1  ;;  %v17451_v54 = vsub.f32 %v16778_v13, %v17363_v40  ;;  %v17868_v22 = vand.u32 4294901760, %v29628_v56  ;;  %30015 = vmatprep.mubr.f32.mxu0 %v34926_v58  ;;  %31359 = vmatpush3.bf16.msra.mxu0 %v37156_v43  ;;  %v16802_v61 = vpop.f32.mrb[55].mxu0 }
 0x4e4   :  { %37178 = vst [vmem:[#allocation151_spill] sm:$0xff] %v35133_v41  ;;  %v17865_v41 = vand.u32 4294901760, %v16790_v53  ;;  %v16951_v3 = vsub.f32 %v35105_v36, %v16950_v47  ;;  %31361 = vmatprep.subr.bf16.mxu0 %v32699_v12  ;;  %v18370_v40 = vand.u32 4294901760, %v29631_v27  ;;  %v16958_v13 = vsub.f32 %v35107_v19, %v16957_v6 }
 0x4e5   :  { %37181 = vst [vmem:[#allocation152_spill] sm:$0xff] %v35142_v45  ;;  %v35150_v33 = vsub.f32 %v29628_v56, %v17868_v22  ;;  %v17452_v17 = vand.u32 4294901760, %v17451_v54  ;;  %v17459_v1 = vand.u32 4294901760, %v35144_v4  ;;  %v18367_v63 = vand.u32 4294901760, %v16802_v61 }
 0x4e6   :  { %v35153_v45 = vpack.c.bf16 %v17868_v22, %v17865_v41  ;;  %v35155_v34 = vsub.f32 %v16790_v53, %v17865_v41  ;;  %30016 = vmatmul.mubr.f32.gmra.mrb[66].mxu0 %v34945_v29  ;;  %v35161_v43 = vsub.f32 %v29631_v27, %v18370_v40  ;;  %v35166_v22 = vpack.c.bf16 %v35107_v19, %v35105_v36  ;;  %v37184_v53 = vld [vmem:[#allocation57_spill] sm:$0xff]  ;;  %v29634_v27 = vpop.f32.mrb[56].mxu0 }
 0x4e7   :  { %30018 = vmatprep.mubr.f32.mxu0 %v34969_v52  ;;  %v17961_v56 = vand.u32 4294901760, %v35150_v33  ;;  %v35174_v29 = vsub.f32 %v16802_v61, %v18367_v63  ;;  %v18872_v52 = vand.u32 4294901760, %v29634_v27  ;;  %v16814_v58 = vpop.f32.mrb[57].mxu0  ;;  %v16952_v19 = vand.u32 4294901760, %v16951_v3 }
 0x4e8   :  { %37182 = vst [vmem:[#allocation153_spill] sm:$0xff] %v35153_v45  ;;  %29222 = vmatmul.mubr.f32.vlgmr.msra.gmra.mrb[34].mxu1 %v37158_v35  ;;  %37183 = vst [vmem:[#allocation154_spill] sm:$0xff] %v35166_v22  ;;  %v17954_v41 = vand.u32 4294901760, %v35155_v34  ;;  %v35172_v45 = vpack.c.bf16 %v18370_v40, %v18367_v63  ;;  %v17453_v35 = vsub.f32 %v17451_v54, %v17452_v17  ;;  %v18869_v22 = vand.u32 4294901760, %v16814_v58 }
 0x4e9   :  { %30991 = vmatpush3.bf16.msra.mxu1 %v37179_v42  ;;  %29228 = vmatprep.mubr.f32.mxu1 %v37184_v53  ;;  %v17460_v36 = vsub.f32 %v35144_v4, %v17459_v1  ;;  %v16959_v53 = vand.u32 4294901760, %v16958_v13  ;;  %v35179_v44 = vpack.c.bf16 %v16957_v6, %v16950_v47  ;;  %v18463_v63 = vand.u32 4294901760, %v35161_v43 }
 0x4ea   :  { %37185 = vst [vmem:[#allocation155_spill] sm:$0xff] %v35172_v45  ;;  %30993 = vmatprep.subr.bf16.mxu1 %v34506_v21  ;;  %30019 = vmatmul.mubr.f32.gmra.mrb[68].mxu0 %v34971_v26  ;;  %v35183_v40 = vsub.f32 %v29634_v27, %v18872_v52  ;;  %v35187_v61 = vpack.c.bf16 %v35144_v4, %v17451_v54  ;;  %v18456_v47 = vand.u32 4294901760, %v35174_v29  ;;  %v29637_v45 = vpop.f32.mrb[58].mxu0  ;;  %v17454_v54 = vand.u32 4294901760, %v17453_v35 }
 0x4eb   :  { %37186 = vst [vmem:[#allocation156_spill] sm:$0xff] %v35179_v44  ;;  %30021 = vmatprep.mubr.f32.mxu0 %v34973_v59  ;;  %v17962_v3 = vsub.f32 %v35150_v33, %v17961_v56  ;;  %v17955_v6 = vsub.f32 %v35155_v34, %v17954_v41  ;;  %v35194_v13 = vpack.c.bf16 %v18872_v52, %v18869_v22  ;;  %v16826_v44 = vpop.f32.mrb[59].mxu0 }
 0x4ec   :  { %29229 = vmatmul.mubr.f32.vlgmr.msra.gmra.mrb[36].mxu1 %v37187_v23  ;;  %37188 = vst [vmem:[#allocation157_spill] sm:$0xff] %v35187_v61  ;;  %v18957_v27 = vsub.f32 %v16814_v58, %v18869_v22  ;;  %v19374_v23 = vand.u32 4294901760, %v29637_v45  ;;  %v35197_v4 = vpack.c.bf16 %v16959_v53, %v16952_v19  ;;  %v17461_v61 = vand.u32 4294901760, %v17460_v36 }
 0x4ed   :  { %30995 = vmatpush3.bf16.msra.mxu1 %v34506_v21  ;;  %29235 = vmatprep.mubr.f32.mxu1 %v36970_v60  ;;  %37189 = vst [vmem:[#allocation158_spill] sm:$0xff] %v35194_v13  ;;  %v19371_v21 = vand.u32 4294901760, %v16826_v44  ;;  %v35200_v59 = vpack.c.bf16 %v17459_v1, %v17452_v17  ;;  %v18464_v26 = vsub.f32 %v35161_v43, %v18463_v63  ;;  %v18965_v52 = vand.u32 4294901760, %v35183_v40  ;;  %v29640_v19 = vpop.f32.mrb[60].mxu0 }
 0x4ee   :  { %30997 = vmatprep.subr.bf16.mxu1 %v34496_v51  ;;  %37190 = vst [vmem:[#allocation159_spill] sm:$0xff] %v35197_v4  ;;  %30022 = vmatmul.mubr.f32.gmra.mrb[70].mxu0 %v34988_v0  ;;  %v35204_v13 = vsub.f32 %v29637_v45, %v19374_v23  ;;  %v35209_v58 = vpack.c.bf16 %v35150_v33, %v35155_v34  ;;  %v18958_v17 = vand.u32 4294901760, %v18957_v27  ;;  %v19876_v36 = vand.u32 4294901760, %v29640_v19 }
 0x4ef   :  { %37191 = vst [vmem:[#allocation160_spill] sm:$0xff] %v35200_v59  ;;  %30024 = vmatprep.mubr.f32.mxu0 %v35010_v14  ;;  %v18457_v35 = vsub.f32 %v35174_v29, %v18456_v47  ;;  %v35212_v22 = vpack.c.bf16 %v19374_v23, %v19371_v21  ;;  %v19459_v53 = vsub.f32 %v16826_v44, %v19371_v21  ;;  %v16838_v59 = vpop.f32.mrb[61].mxu0  ;;  %v17956_v4 = vand.u32 4294901760, %v17955_v6 }
 0x4f0   :  { %37192 = vst [vmem:[#allocation161_spill] sm:$0xff] %v35209_v58  ;;  %v35214_v1 = vpack.c.bf16 %v17461_v61, %v17454_v54  ;;  %v17963_v45 = vand.u32 4294901760, %v17962_v3  ;;  %v19873_v0 = vand.u32 4294901760, %v16838_v59  ;;  %v35217_v14 = vpack.c.bf16 %v17961_v56, %v17954_v41  ;;  %v37196_v61 = vld [vmem:[#allocation53_spill] sm:$0xff] }
 0x4f1   :  { %37193 = vst [vmem:[#allocation162_spill] sm:$0xff] %v35212_v22  ;;  %v18966_v33 = vsub.f32 %v35183_v40, %v18965_v52  ;;  %v19467_v23 = vand.u32 4294901760, %v35204_v13  ;;  %v19460_v44 = vand.u32 4294901760, %v19459_v53  ;;  %v19968_v3 = vsub.f32 %v29640_v19, %v19876_v36  ;;  %v29643_v41 = vpop.f32.mrb[62].mxu0 }
 0x4f2   :  { %37194 = vst [vmem:[#allocation163_spill] sm:$0xff] %v35214_v1  ;;  %30025 = vmatmul.mubr.f32.gmra.mrb[72].mxu0 %v35012_v18  ;;  %37195 = vst [vmem:[#allocation164_spill] sm:$0xff] %v35217_v14  ;;  %v35223_v34 = vpack.c.bf16 %v17963_v45, %v17956_v4  ;;  %v35227_v6 = vpack.c.bf16 %v19876_v36, %v19873_v0  ;;  %v19961_v56 = vsub.f32 %v16838_v59, %v19873_v0  ;;  %v16850_v22 = vpop.f32.mrb[63].mxu0 }
 0x4f3   :  { %30027 = vmatprep.mubr.f32.mxu0 %v35029_v57  ;;  %v18959_v54 = vsub.f32 %v18957_v27, %v18958_v17  ;;  %v20378_v21 = vand.u32 4294901760, %v29643_v41  ;;  %v18458_v14 = vand.u32 4294901760, %v18457_v35  ;;  %v18465_v58 = vand.u32 4294901760, %v18464_v26 }
 0x4f4   :  { %29236 = vmatmul.mubr.f32.vlgmr.msra.gmra.mrb[36].mxu1 %v36978_v62  ;;  %37197 = vst [vmem:[#allocation165_spill] sm:$0xff] %v35227_v6  ;;  %v20375_v1 = vand.u32 4294901760, %v16850_v22  ;;  %v35235_v4 = vpack.c.bf16 %v18463_v63, %v18456_v47  ;;  %v19468_v19 = vsub.f32 %v35204_v13, %v19467_v23  ;;  %v19461_v59 = vsub.f32 %v19459_v53, %v19460_v44 }
 0x4f5   :  { %30999 = vmatpush3.bf16.msra.mxu1 %v34496_v51  ;;  %29242 = vmatprep.mubr.f32.mxu1 %v37196_v61  ;;  %v35233_v51 = vpack.c.bf16 %v35161_v43, %v35174_v29  ;;  %v35239_v0 = vpack.c.bf16 %v18465_v58, %v18458_v14  ;;  %v35242_v36 = vpack.c.bf16 %v35183_v40, %v18957_v27  ;;  %v19969_v26 = vand.u32 4294901760, %v19968_v3 }
 0x4f6   :  { %31001 = vmatprep.subr.bf16.mxu1 %v37179_v42  ;;  %30028 = vmatmul.mubr.f32.gmra.mrb[74].mxu0 %v35031_v30  ;;  %v19962_v35 = vand.u32 4294901760, %v19961_v56  ;;  %v20470_v45 = vsub.f32 %v29643_v41, %v20378_v21  ;;  %v35244_v6 = vpack.c.bf16 %v20378_v21, %v20375_v1  ;;  %v20463_v61 = vsub.f32 %v16850_v22, %v20375_v1 }
 0x4f7   :  { %30030 = vmatprep.mubr.f32.mxu0 %v35048_v7  ;;  %v18960_v29 = vand.u32 4294901760, %v18959_v54  ;;  %v18967_v43 = vand.u32 4294901760, %v18966_v33  ;;  %v35246_v63 = vpack.c.bf16 %v18965_v52, %v18958_v17  ;;  %v35254_v40 = vpack.c.bf16 %v35204_v13, %v19459_v53  ;;  %v37201_v52 = vld [vmem:[#allocation32_spill] sm:$0xff] }
 0x4f8   :  { %37198 = vst [vmem:[#allocation166_spill] sm:$0xff] %v35244_v6  ;;  %v19970_v47 = vsub.f32 %v19968_v3, %v19969_v26  ;;  %v19963_v27 = vsub.f32 %v19961_v56, %v19962_v35  ;;  %v20471_v58 = vand.u32 4294901760, %v20470_v45  ;;  %v20464_v22 = vand.u32 4294901760, %v20463_v61  ;;  %v37321_v6 = vld [vmem:[#allocation106_spill] sm:$0xff] }
 0x4f9   :  { %37199 = vst [vmem:[#allocation167_spill] sm:$0xff] %v35246_v63  ;;  %v35251_v14 = vpack.c.bf16 %v18967_v43, %v18960_v29  ;;  %37200 = vst [vmem:[#allocation168_spill] sm:$0xff] %v35254_v40  ;;  %v19462_v1 = vand.u32 4294901760, %v19461_v59  ;;  %v19469_v17 = vand.u32 4294901760, %v19468_v19  ;;  %v35259_v33 = vpack.c.bf16 %v19467_v23, %v19460_v44 }
 0x4fa   :  { %30031 = vmatmul.mubr.f32.gmra.mrb[76].mxu0 %v35053_v39  ;;  %v35265_v53 = vpack.c.bf16 %v19968_v3, %v19961_v56  ;;  %v20472_v41 = vsub.f32 %v20470_v45, %v20471_v58  ;;  %v20465_v54 = vsub.f32 %v20463_v61, %v20464_v22  ;;  %v19964_v21 = vand.u32 4294901760, %v19963_v27 }
 0x4fb   :  { %30033 = vmatprep.mubr.f32.mxu0 %v35072_v15  ;;  %37202 = vst [vmem:[#allocation32_spill] sm:$0xff] %v35259_v33  ;;  %v35263_v13 = vpack.c.bf16 %v19469_v17, %v19462_v1  ;;  %v19971_v29 = vand.u32 4294901760, %v19970_v47  ;;  %v35267_v43 = vpack.c.bf16 %v19969_v26, %v19962_v35  ;;  %v35274_v44 = vpack.c.bf16 %v20470_v45, %v20463_v61  ;;  %v37219_v17 = vld [vmem:[#allocation143_spill] sm:$0xff] }
 0x4fc   :  { %29243 = vmatmul.mubr.f32.vlgmr.msra.gmra.mrb[36].mxu1 %v36988_v2  ;;  %37204 = vst [vmem:[#allocation170_spill] sm:$0xff] %v35265_v53  ;;  %v20466_v3 = vand.u32 4294901760, %v20465_v54  ;;  %v20473_v56 = vand.u32 4294901760, %v20472_v41  ;;  %v35280_v19 = vpack.c.bf16 %v20471_v58, %v20464_v22  ;;  %v35290_v26 = vmul.f32 %v34574_v32, %v34574_v32  ;;  %v37215_v22 = vld [vmem:[#allocation123_spill] sm:$0xff]  ;;  %v37221_v54 = vld [vmem:[#allocation52_spill] sm:$0xff]  ;;  %v37339_v53 = vld [vmem:[#allocation154_spill] sm:$0xff] }
 0x4fd   :  { %31003 = vmatpush3.bf16.msra.mxu1 %v37179_v42  ;;  %29249 = vmatprep.mubr.f32.mxu1 %v36991_v8  ;;  %37203 = vst [vmem:[#allocation169_spill] sm:$0xff] %v35263_v13  ;;  %37205 = vst [vmem:[#allocation171_spill] sm:$0xff] %v35267_v43  ;;  %v35272_v23 = vpack.c.bf16 %v19971_v29, %v19964_v21  ;;  %v35301_v27 = vmul.f32 %v34577_v48, %v34577_v48  ;;  %v37220_v41 = vld [vmem:[#allocation59_spill] sm:$0xff]  ;;  %v37222_v21 = vld [vmem:[#allocation144_spill] sm:$0xff] }
 0x4fe   :  { %31005 = vmatprep.subr.bf16.mxu1 %v37201_v52  ;;  %30034 = vmatmul.mubr.f32.gmra.mrb[78].mxu0 %v35077_v25  ;;  %37207 = vst [vmem:[#allocation173_spill] sm:$0xff] %v35274_v44  ;;  %37208 = vst [vmem:[#allocation174_spill] sm:$0xff] %v35280_v19  ;;  %v35285_v61 = vpack.c.bf16 %v20473_v56, %v20466_v3  ;;  %v37223_v29 = vld [vmem:[#allocation51_spill] sm:$0xff]  ;;  %v37224_v3 = vld [vmem:[#allocation145_spill] sm:$0xff] }
 0x4ff   :  { %30040 = vmatprep.mubr.f32.mxu0 %v34924_v49  ;;  %37206 = vst [vmem:[#allocation172_spill] sm:$0xff] %v35272_v23  ;;  %v37225_v56 = vld [vmem:[#allocation60_spill] sm:$0xff]  ;;  %v37280_v44 = vld [vmem:[#allocation115_spill] sm:$0xff]  ;;  %v37320_v43 = vld [vmem:[#allocation18_spill] sm:$0xff] }
 0x500   :  { %37209 = vst [vmem:[#allocation175_spill] sm:$0xff] %v35285_v61 }
 0x502   :  { %30041 = vmatmul.mubr.f32.vlgmr.msra.gmra.mrb[64].mxu0 %v34896_v11 }
 0x503   :  { %30043 = vmatprep.mubr.f32.mxu0 %v34943_v16  ;;  %31363 = vmatpush3.bf16.msra.mxu0 %v32699_v12 }
 0x504   :  { %29250 = vmatmul.mubr.f32.vlgmr.msra.gmra.mrb[36].mxu1 %v36996_v5  ;;  %31365 = vmatprep.subr.bf16.mxu0 %v37000_v50 }
 0x505   :  { %31007 = vmatpush3.bf16.msra.mxu1 %v37201_v52  ;;  %29256 = vmatprep.mubr.f32.mxu1 %v36970_v60 }
 0x506   :  { %31009 = vmatprep.subr.bf16.mxu1 %v37179_v42  ;;  %30044 = vmatmul.mubr.f32.gmra.mrb[66].mxu0 %v34952_v38 }
 0x507   :  { %30046 = vmatprep.mubr.f32.mxu0 %v34980_v9 }
 0x50a   :  { %30047 = vmatmul.mubr.f32.gmra.mrb[68].mxu0 %v34983_v37 }
 0x50b   :  { %v28887_v59 = vpop.f32.mrb[26].mxu1  ;;  %30049 = vmatprep.mubr.f32.mxu0 %v34986_v46 }
 0x50c   :  { %v35292_v35 = vmul.f32 %v28887_v59, %v28887_v59  ;;  %v35295_v45 = vmul.f32 %v28887_v59, %v34574_v32  ;;  %v9494_v47 = vpop.f32.mrb[27].mxu1  ;;  %29257 = vmatmul.mubr.f32.vlgmr.msra.gmra.mrb[36].mxu1 %v36978_v62  ;;  %v37226_v59 = vand.u32 4294901760, %v34924_v49  ;;  %v37231_v49 = vld [vmem:[#allocation62_spill] sm:$0xff] }
 0x50d   :  { %v35303_v58 = vmul.f32 %v9494_v47, %v9494_v47  ;;  %v35306_v52 = vmul.f32 %v9494_v47, %v34577_v48  ;;  %31011 = vmatpush3.bf16.msra.mxu1 %v37179_v42  ;;  %29263 = vmatprep.mubr.f32.mxu1 %v36970_v60  ;;  %v37217_v48 = vld [vmem:[#allocation142_spill] sm:$0xff]  ;;  %v37227_v47 = vld [vmem:[#allocation61_spill] sm:$0xff] }
 0x50e   :  { %37210 = vst [vmem:[#allocation176_spill] sm:$0xff] %v35292_v35  ;;  %37211 = vst [vmem:[#allocation177_spill] sm:$0xff] %v35295_v45  ;;  %v35312_v32 = vadd.f32 %v35292_v35, %v35290_v26  ;;  %31013 = vmatprep.subr.bf16.mxu1 %v37215_v22  ;;  %30050 = vmatmul.mubr.f32.gmra.mrb[70].mxu0 %v34996_v31  ;;  %v37218_v42 = vld [vmem:[#allocation66_spill] sm:$0xff]  ;;  %v37230_v45 = vand.u32 4294901760, %v34952_v38  ;;  %v37237_v38 = vand.u32 4294901760, %v34996_v31  ;;  %v37242_v31 = vand.u32 4294901760, %v37217_v48 }
 0x50f   :  { %37212 = vst [vmem:[#allocation178_spill] sm:$0xff] %v35303_v58  ;;  %37213 = vst [vmem:[#allocation179_spill] sm:$0xff] %v35306_v52  ;;  %v35317_v1 = vadd.f32 %v35303_v58, %v35301_v27  ;;  %30052 = vmatprep.mubr.f32.mxu0 %v35021_v20  ;;  %v37229_v52 = vand.u32 4294901760, %v34943_v16  ;;  %v37235_v16 = vand.u32 4294901760, %v34983_v37  ;;  %v37240_v37 = vand.u32 4294901760, %v35024_v55 }
 0x510   :  { %37214 = vst [vmem:[#allocation180_spill] sm:$0xff] %v35312_v32  ;;  %v37276_v32 = vld [vmem:[#allocation73_spill] sm:$0xff] }
 0x511   :  { %37216 = vst [vmem:[#allocation123_spill] sm:$0xff] %v35317_v1  ;;  %v35453_v58 = vmul.f32 %v37276_v32, %v37276_v32 }
 0x512   :  { %30053 = vmatmul.mubr.f32.gmra.mrb[72].mxu0 %v35024_v55  ;;  %v37246_v55 = vand.u32 4294901760, %v37219_v17 }
 0x513   :  { %30055 = vmatprep.mubr.f32.mxu0 %v35036_v10  ;;  %37277 = vst [vmem:[#allocation51_spill] sm:$0xff] %v35453_v58 }
 0x514   :  { %29264 = vmatmul.mubr.f32.vlgmr.msra.gmra.mrb[36].mxu1 %v36978_v62 }
 0x515   :  { %31015 = vmatpush3.bf16.msra.mxu1 %v37215_v22  ;;  %29270 = vmatprep.mubr.f32.mxu1 %v37003_v28 }
 0x516   :  { %31017 = vmatprep.subr.bf16.mxu1 %v34523_v24  ;;  %30056 = vmatmul.mubr.f32.gmra.mrb[74].mxu0 %v37217_v48 }
 0x517   :  { %30058 = vmatprep.mubr.f32.mxu0 %v37219_v17 }
 0x518   :  { %29271 = vmatmul.mubr.f32.vlgmr.msra.gmra.mrb[38].mxu1 %v37218_v42 }
 0x519   :  { %31019 = vmatpush3.bf16.msra.mxu1 %v34523_v24  ;;  %29277 = vmatprep.mubr.f32.mxu1 %v37220_v41  ;;  %v37228_v24 = vand.u32 4294901760, %v34896_v11  ;;  %v37234_v11 = vld [vmem:[#allocation132_spill] sm:$0xff] }
 0x51a   :  { %31021 = vmatprep.subr.bf16.mxu1 %v37221_v54  ;;  %30059 = vmatmul.mubr.f32.gmra.mrb[76].mxu0 %v37222_v21 }
 0x51b   :  { %30061 = vmatprep.mubr.f32.mxu0 %v37223_v29 }
 0x51e   :  { %30062 = vmatmul.mubr.f32.gmra.mrb[78].mxu0 %v37224_v3 }
 0x51f   :  { %30068 = vmatprep.mubr.f32.mxu0 %v37226_v59  ;;  %v37233_v59 = vld [vmem:[#allocation63_spill] sm:$0xff] }
 0x520   :  { %29278 = vmatmul.mubr.f32.vlgmr.msra.gmra.mrb[38].mxu1 %v37225_v56 }
 0x521   :  { %31023 = vmatpush3.bf16.msra.mxu1 %v37221_v54  ;;  %29284 = vmatprep.mubr.f32.mxu1 %v37227_v47  ;;  %v37232_v54 = vand.u32 4294901760, %v34980_v9  ;;  %v37239_v9 = vand.u32 4294901760, %v35021_v20 }
 0x522   :  { %31025 = vmatprep.subr.bf16.mxu1 %v37215_v22  ;;  %30069 = vmatmul.mubr.f32.vlgmr.msra.gmra.mrb[64].mxu0 %v37228_v24  ;;  %v37243_v24 = vld [vmem:[#allocation72_spill] sm:$0xff] }
 0x523   :  { %30071 = vmatprep.mubr.f32.mxu0 %v37229_v52  ;;  %31367 = vmatpush3.bf16.msra.mxu0 %v37000_v50  ;;  %v37236_v50 = vand.u32 4294901760, %v34986_v46  ;;  %v37241_v46 = vand.u32 4294901760, %v35036_v10  ;;  %v35376_v20 = vmul.f32 %v37243_v24, %v37243_v24  ;;  %v37247_v10 = vld [vmem:[#allocation65_spill] sm:$0xff] }
 0x524   :  { %31369 = vmatprep.subr.bf16.mxu0 %v32699_v12 }
 0x526   :  { %30072 = vmatmul.mubr.f32.gmra.mrb[66].mxu0 %v37230_v45  ;;  %v37238_v45 = vld [vmem:[#allocation64_spill] sm:$0xff] }
 0x527   :  { %30074 = vmatprep.mubr.f32.mxu0 %v37232_v54 }
 0x528   :  { %29285 = vmatmul.mubr.f32.vlgmr.msra.gmra.mrb[38].mxu1 %v37231_v49 }
 0x529   :  { %31027 = vmatpush3.bf16.msra.mxu1 %v37215_v22  ;;  %29291 = vmatprep.mubr.f32.mxu1 %v37233_v59 }
 0x52a   :  { %31029 = vmatprep.subr.bf16.mxu1 %v37234_v11  ;;  %30075 = vmatmul.mubr.f32.gmra.mrb[68].mxu0 %v37235_v16 }
 0x52b   :  { %30077 = vmatprep.mubr.f32.mxu0 %v37236_v50  ;;  %v35388_v50 = vmul.f32 %v37247_v10, %v37247_v10 }
 0x52e   :  { %30078 = vmatmul.mubr.f32.gmra.mrb[70].mxu0 %v37237_v38 }
 0x52f   :  { %30080 = vmatprep.mubr.f32.mxu0 %v37239_v9 }
 0x530   :  { %29292 = vmatmul.mubr.f32.vlgmr.msra.gmra.mrb[38].mxu1 %v37238_v45 }
 0x531   :  { %31031 = vmatpush3.bf16.msra.mxu1 %v37234_v11  ;;  %29298 = vmatprep.mubr.f32.mxu1 %v37220_v41 }
 0x532   :  { %31033 = vmatprep.subr.bf16.mxu1 %v37215_v22  ;;  %30081 = vmatmul.mubr.f32.gmra.mrb[72].mxu0 %v37240_v37  ;;  %v37251_v37 = vld [vmem:[#allocation124_spill] sm:$0xff] }
 0x533   :  { %30083 = vmatprep.mubr.f32.mxu0 %v37241_v46  ;;  %v37253_v46 = vand.u32 4294901760, %v37222_v21  ;;  %v37260_v21 = vld [vmem:[#allocation70_spill] sm:$0xff] }
 0x536   :  { %30084 = vmatmul.mubr.f32.gmra.mrb[74].mxu0 %v37242_v31  ;;  %v37256_v31 = vld [vmem:[#allocation38_spill] sm:$0xff] }
 0x537   :  { %v28929_v52 = vpop.f32.mrb[28].mxu1  ;;  %30086 = vmatprep.mubr.f32.mxu0 %v37246_v55  ;;  %v37259_v55 = vld [vmem:[#allocation103_spill] sm:$0xff] }
 0x538   :  { %v35378_v54 = vmul.f32 %v28929_v52, %v28929_v52  ;;  %v35381_v11 = vmul.f32 %v28929_v52, %v37243_v24  ;;  %v9996_v16 = vpop.f32.mrb[29].mxu1  ;;  %29299 = vmatmul.mubr.f32.vlgmr.msra.gmra.mrb[38].mxu1 %v37225_v56  ;;  %v37254_v52 = vand.u32 4294901760, %v37223_v29  ;;  %v37257_v24 = vld [vmem:[#allocation30_spill] sm:$0xff]  ;;  %v37262_v29 = vld [vmem:[#allocation36_spill] sm:$0xff] }
 0x539   :  { %v35390_v48 = vmul.f32 %v9996_v16, %v9996_v16  ;;  %v35393_v38 = vmul.f32 %v9996_v16, %v37247_v10  ;;  %31035 = vmatpush3.bf16.msra.mxu1 %v37215_v22  ;;  %29305 = vmatprep.mubr.f32.mxu1 %v37220_v41  ;;  %v37255_v22 = vand.u32 4294901760, %v37224_v3  ;;  %v37258_v16 = vld [vmem:[#allocation54_spill] sm:$0xff]  ;;  %v37261_v10 = vld [vmem:[#allocation117_spill] sm:$0xff] }
 0x53a   :  { %37244 = vst [vmem:[#allocation142_spill] sm:$0xff] %v35378_v54  ;;  %37245 = vst [vmem:[#allocation66_spill] sm:$0xff] %v35381_v11  ;;  %v35399_v9 = vadd.f32 %v35378_v54, %v35376_v20  ;;  %31037 = vmatprep.subr.bf16.mxu1 %v37251_v37  ;;  %30087 = vmatmul.mubr.f32.gmra.mrb[76].mxu0 %v37253_v46  ;;  %v37263_v3 = vld [vmem:[#allocation133_spill] sm:$0xff]  ;;  %v37274_v54 = vld [vmem:[#allocation134_spill] sm:$0xff] }
 0x53b   :  { %37248 = vst [vmem:[#allocation143_spill] sm:$0xff] %v35390_v48  ;;  %37249 = vst [vmem:[#allocation59_spill] sm:$0xff] %v35393_v38  ;;  %v35404_v17 = vadd.f32 %v35390_v48, %v35388_v50  ;;  %30089 = vmatprep.mubr.f32.mxu0 %v37254_v52  ;;  %v37264_v46 = vld [vmem:[#allocation109_spill] sm:$0xff]  ;;  %v37265_v52 = vld [vmem:[#allocation111_spill] sm:$0xff] }
 0x53c   :  { %37250 = vst [vmem:[#allocation52_spill] sm:$0xff] %v35399_v9  ;;  %v37267_v38 = vld [vmem:[#allocation29_spill] sm:$0xff]  ;;  %v37273_v48 = vld [vmem:[#allocation68_spill] sm:$0xff] }
 0x53d   :  { %37252 = vst [vmem:[#allocation144_spill] sm:$0xff] %v35404_v17  ;;  %v37268_v11 = vld [vmem:[#allocation141_spill] sm:$0xff]  ;;  %v37269_v17 = vld [vmem:[#allocation31_spill] sm:$0xff] }
 0x53e   :  { %30090 = vmatmul.mubr.f32.gmra.mrb[78].mxu0 %v37255_v22  ;;  %v37266_v22 = vld [vmem:[#allocation119_spill] sm:$0xff]  ;;  %v37271_v9 = vld [vmem:[#allocation17_spill] sm:$0xff] }
 0x53f   :  { %30096 = vmatprep.mubr.f32.mxu0 %v37256_v31 }
 0x540   :  { %29306 = vmatmul.mubr.f32.vlgmr.msra.gmra.mrb[38].mxu1 %v37225_v56 }
 0x541   :  { %31039 = vmatpush3.bf16.msra.mxu1 %v37251_v37  ;;  %29312 = vmatprep.mubr.f32.mxu1 %v37257_v24 }
 0x542   :  { %31041 = vmatprep.subr.bf16.mxu1 %v37258_v16  ;;  %30097 = vmatmul.mubr.f32.vlgmr.msra.gmra.mrb[64].mxu0 %v37259_v55 }
 0x543   :  { %30099 = vmatprep.mubr.f32.mxu0 %v37261_v10  ;;  %31371 = vmatpush3.bf16.msra.mxu0 %v32699_v12  ;;  %v37272_v12 = vld [vmem:[#allocation67_spill] sm:$0xff] }
 0x544   :  { %29313 = vmatmul.mubr.f32.vlgmr.msra.gmra.mrb[40].mxu1 %v37260_v21 }
 0x545   :  { %31043 = vmatpush3.bf16.msra.mxu1 %v37258_v16  ;;  %29319 = vmatprep.mubr.f32.mxu1 %v37262_v29  ;;  %v37270_v16 = vld [vmem:[#allocation131_spill] sm:$0xff] }
 0x546   :  { %31045 = vmatprep.subr.bf16.mxu1 %v37263_v3  ;;  %30100 = vmatmul.mubr.f32.gmra.mrb[66].mxu0 %v37264_v46 }
 0x547   :  { %30102 = vmatprep.mubr.f32.mxu0 %v37265_v52 }
 0x54a   :  { %30103 = vmatmul.mubr.f32.gmra.mrb[68].mxu0 %v37266_v22 }
 0x54b   :  { %30105 = vmatprep.mubr.f32.mxu0 %v37268_v11 }
 0x54c   :  { %29320 = vmatmul.mubr.f32.vlgmr.msra.gmra.mrb[40].mxu1 %v37267_v38 }
 0x54d   :  { %31047 = vmatpush3.bf16.msra.mxu1 %v37263_v3  ;;  %29326 = vmatprep.mubr.f32.mxu1 %v37269_v17  ;;  %v37275_v3 = vld [vmem:[#allocation69_spill] sm:$0xff] }
 0x54e   :  { %31049 = vmatprep.subr.bf16.mxu1 %v37251_v37  ;;  %30106 = vmatmul.mubr.f32.gmra.mrb[70].mxu0 %v37270_v16 }
 0x54f   :  { %30108 = vmatprep.mubr.f32.mxu0 %v37271_v9 }
 0x552   :  { %30109 = vmatmul.mubr.f32.gmra.mrb[72].mxu0 %v35012_v18 }
 0x553   :  { %30111 = vmatprep.mubr.f32.mxu0 %v35029_v57 }
 0x554   :  { %29327 = vmatmul.mubr.f32.vlgmr.msra.gmra.mrb[40].mxu1 %v37272_v12 }
 0x555   :  { %31051 = vmatpush3.bf16.msra.mxu1 %v37251_v37  ;;  %29333 = vmatprep.mubr.f32.mxu1 %v37273_v48 }
 0x556   :  { %31053 = vmatprep.subr.bf16.mxu1 %v37274_v54  ;;  %30112 = vmatmul.mubr.f32.gmra.mrb[74].mxu0 %v35031_v30 }
 0x557   :  { %30114 = vmatprep.mubr.f32.mxu0 %v35048_v7 }
 0x55a   :  { %30115 = vmatmul.mubr.f32.gmra.mrb[76].mxu0 %v35053_v39 }
 0x55b   :  { %30117 = vmatprep.mubr.f32.mxu0 %v35072_v15 }
 0x55c   :  { %29334 = vmatmul.mubr.f32.vlgmr.msra.gmra.mrb[40].mxu1 %v37275_v3  ;;  %v37375_v3 = vld [vmem:[#allocation58_spill] sm:$0xff] }
 0x55d   :  { %31055 = vmatpush3.bf16.msra.mxu1 %v37274_v54  ;;  %29340 = vmatprep.mubr.f32.mxu1 %v37262_v29 }
 0x55e   :  { %31057 = vmatprep.subr.bf16.mxu1 %v37251_v37  ;;  %30118 = vmatmul.mubr.f32.gmra.mrb[78].mxu0 %v35077_v25 }
 0x55f   :  { %30124 = vmatprep.mubr.f32.mxu0 %v37256_v31  ;;  %v35464_v31 = vmul.f32 %v37280_v44, %v37280_v44 }
 0x561   :  { %37281 = vst [vmem:[#allocation61_spill] sm:$0xff] %v35464_v31 }
 0x562   :  { %30125 = vmatmul.mubr.f32.vlgmr.msra.gmra.mrb[64].mxu0 %v37259_v55 }
 0x563   :  { %v28971_v1 = vpop.f32.mrb[30].mxu1  ;;  %30127 = vmatprep.mubr.f32.mxu0 %v37261_v10 }
 0x564   :  { %v35455_v35 = vmul.f32 %v28971_v1, %v28971_v1  ;;  %v35458_v19 = vmul.f32 %v28971_v1, %v37276_v32  ;;  %v10498_v54 = vpop.f32.mrb[31].mxu1  ;;  %29341 = vmatmul.mubr.f32.vlgmr.msra.gmra.mrb[40].mxu1 %v37267_v38  ;;  %v37285_v1 = vld [vmem:[#allocation127_spill] sm:$0xff] }
 0x565   :  { %v35466_v61 = vmul.f32 %v10498_v54, %v10498_v54  ;;  %v35469_v55 = vmul.f32 %v10498_v54, %v37280_v44  ;;  %31059 = vmatpush3.bf16.msra.mxu1 %v37251_v37  ;;  %29347 = vmatprep.mubr.f32.mxu1 %v37262_v29  ;;  %v37287_v44 = vld [vmem:[#allocation86_spill] sm:$0xff]  ;;  %v37288_v37 = vld [vmem:[#allocation136_spill] sm:$0xff] }
 0x566   :  { %37278 = vst [vmem:[#allocation145_spill] sm:$0xff] %v35455_v35  ;;  %37279 = vst [vmem:[#allocation60_spill] sm:$0xff] %v35458_v19  ;;  %v35475_v32 = vadd.f32 %v35455_v35, %v35453_v58  ;;  %31061 = vmatprep.subr.bf16.mxu1 %v37285_v1  ;;  %30128 = vmatmul.mubr.f32.gmra.mrb[66].mxu0 %v37264_v46  ;;  %v37289_v54 = vld [vmem:[#allocation90_spill] sm:$0xff]  ;;  %v37290_v46 = vld [vmem:[#allocation41_spill] sm:$0xff] }
 0x567   :  { %37282 = vst [vmem:[#allocation62_spill] sm:$0xff] %v35466_v61  ;;  %37283 = vst [vmem:[#allocation63_spill] sm:$0xff] %v35469_v55  ;;  %v35480_v10 = vadd.f32 %v35466_v61, %v35464_v31  ;;  %30130 = vmatprep.mubr.f32.mxu0 %v37265_v52  ;;  %v37291_v52 = vld [vmem:[#allocation135_spill] sm:$0xff]  ;;  %v37305_v55 = vld [vmem:[#allocation100_spill] sm:$0xff] }
 0x568   :  { %37284 = vst [vmem:[#allocation132_spill] sm:$0xff] %v35475_v32  ;;  %v37306_v19 = vld [vmem:[#allocation43_spill] sm:$0xff]  ;;  %v37311_v61 = vld [vmem:[#allocation96_spill] sm:$0xff]  ;;  %v37312_v35 = vld [vmem:[#allocation138_spill] sm:$0xff] }
 0x569   :  { %37286 = vst [vmem:[#allocation64_spill] sm:$0xff] %v35480_v10  ;;  %v37309_v10 = vld [vmem:[#allocation94_spill] sm:$0xff]  ;;  %v37310_v32 = vld [vmem:[#allocation95_spill] sm:$0xff] }
 0x56a   :  { %30131 = vmatmul.mubr.f32.gmra.mrb[68].mxu0 %v37266_v22  ;;  %v37293_v22 = vld [vmem:[#allocation37_spill] sm:$0xff] }
 0x56b   :  { %30133 = vmatprep.mubr.f32.mxu0 %v37268_v11  ;;  %v37292_v11 = vld [vmem:[#allocation71_spill] sm:$0xff] }
 0x56c   :  { %29348 = vmatmul.mubr.f32.vlgmr.msra.gmra.mrb[40].mxu1 %v37267_v38 }
 0x56d   :  { %31063 = vmatpush3.bf16.msra.mxu1 %v37285_v1  ;;  %29354 = vmatprep.mubr.f32.mxu1 %v37287_v44 }
 0x56e   :  { %31065 = vmatprep.subr.bf16.mxu1 %v37288_v37  ;;  %30134 = vmatmul.mubr.f32.gmra.mrb[70].mxu0 %v37270_v16 }
 0x56f   :  { %30136 = vmatprep.mubr.f32.mxu0 %v37271_v9 }
 0x570   :  { %29355 = vmatmul.mubr.f32.vlgmr.msra.gmra.mrb[42].mxu1 %v37289_v54 }
 0x571   :  { %31067 = vmatpush3.bf16.msra.mxu1 %v37288_v37  ;;  %29361 = vmatprep.mubr.f32.mxu1 %v37290_v46  ;;  %v37307_v37 = vld [vmem:[#allocation137_spill] sm:$0xff] }
 0x572   :  { %31069 = vmatprep.subr.bf16.mxu1 %v37291_v52  ;;  %30137 = vmatmul.mubr.f32.gmra.mrb[72].mxu0 %v35012_v18  ;;  %v37294_v18 = vld [vmem:[#allocation75_spill] sm:$0xff] }
 0x573   :  { %30139 = vmatprep.mubr.f32.mxu0 %v35029_v57  ;;  %v37295_v57 = vld [vmem:[#allocation74_spill] sm:$0xff] }
 0x576   :  { %30140 = vmatmul.mubr.f32.gmra.mrb[74].mxu0 %v35031_v30  ;;  %v37296_v30 = vld [vmem:[#allocation55_spill] sm:$0xff] }
 0x577   :  { %30142 = vmatprep.mubr.f32.mxu0 %v35048_v7  ;;  %v37297_v7 = vld [vmem:[#allocation79_spill] sm:$0xff] }
 0x578   :  { %29362 = vmatmul.mubr.f32.vlgmr.msra.gmra.mrb[42].mxu1 %v37292_v11 }
 0x579   :  { %31071 = vmatpush3.bf16.msra.mxu1 %v37291_v52  ;;  %29368 = vmatprep.mubr.f32.mxu1 %v37293_v22  ;;  %v37302_v52 = vld [vmem:[#allocation128_spill] sm:$0xff] }
 0x57a   :  { %31073 = vmatprep.subr.bf16.mxu1 %v37285_v1  ;;  %30143 = vmatmul.mubr.f32.gmra.mrb[76].mxu0 %v35053_v39 }
 0x57b   :  { %30145 = vmatprep.mubr.f32.mxu0 %v35072_v15 }
 0x57e   :  { %30146 = vmatmul.mubr.f32.gmra.mrb[78].mxu0 %v35077_v25  ;;  %v37304_v25 = vld [vmem:[#allocation56_spill] sm:$0xff] }
 0x580   :  { %29369 = vmatmul.mubr.f32.vlgmr.msra.gmra.mrb[42].mxu1 %v37294_v18 }
 0x581   :  { %31075 = vmatpush3.bf16.msra.mxu1 %v37285_v1  ;;  %29375 = vmatprep.mubr.f32.mxu1 %v37295_v57 }
 0x582   :  { %31077 = vmatprep.subr.bf16.mxu1 %v37296_v30 }
 0x588   :  { %29376 = vmatmul.mubr.f32.vlgmr.msra.gmra.mrb[42].mxu1 %v37297_v7 }
 0x589   :  { %31079 = vmatpush3.bf16.msra.mxu1 %v37296_v30  ;;  %29382 = vmatprep.mubr.f32.mxu1 %v37290_v46  ;;  %v37303_v30 = vld [vmem:[#allocation40_spill] sm:$0xff] }
 0x58a   :  { %31081 = vmatprep.subr.bf16.mxu1 %v37285_v1 }
 0x58f   :  { %v35515_v39 = vpop.f32.mrb[32].mxu1 }
 0x590   :  { %37298 = vst [vmem:[#allocation72_spill] sm:$0xff] %v35515_v39  ;;  %v35519_v9 = vpop.f32.mrb[33].mxu1  ;;  %29383 = vmatmul.mubr.f32.vlgmr.msra.gmra.mrb[42].mxu1 %v37292_v11 }
 0x591   :  { %37300 = vst [vmem:[#allocation65_spill] sm:$0xff] %v35519_v9  ;;  %31083 = vmatpush3.bf16.msra.mxu1 %v37285_v1  ;;  %29389 = vmatprep.mubr.f32.mxu1 %v37290_v46  ;;  %v37308_v1 = vld [vmem:[#allocation93_spill] sm:$0xff] }
 0x592   :  { %31085 = vmatprep.subr.bf16.mxu1 %v37302_v52 }
 0x598   :  { %29390 = vmatmul.mubr.f32.vlgmr.msra.gmra.mrb[42].mxu1 %v37292_v11 }
 0x599   :  { %31087 = vmatpush3.bf16.msra.mxu1 %v37302_v52  ;;  %29396 = vmatprep.mubr.f32.mxu1 %v37303_v30 }
 0x59a   :  { %31089 = vmatprep.subr.bf16.mxu1 %v37304_v25 }
 0x59c   :  { %29397 = vmatmul.mubr.f32.vlgmr.msra.gmra.mrb[44].mxu1 %v37305_v55 }
 0x59d   :  { %31091 = vmatpush3.bf16.msra.mxu1 %v37304_v25  ;;  %29403 = vmatprep.mubr.f32.mxu1 %v37306_v19  ;;  %v37313_v25 = vld [vmem:[#allocation99_spill] sm:$0xff] }
 0x59e   :  { %31093 = vmatprep.subr.bf16.mxu1 %v37307_v37 }
 0x5a4   :  { %29404 = vmatmul.mubr.f32.vlgmr.msra.gmra.mrb[44].mxu1 %v37308_v1 }
 0x5a5   :  { %31095 = vmatpush3.bf16.msra.mxu1 %v37307_v37  ;;  %29410 = vmatprep.mubr.f32.mxu1 %v37309_v10  ;;  %v37323_v10 = vld [vmem:[#allocation139_spill] sm:$0xff] }
 0x5a6   :  { %31097 = vmatprep.subr.bf16.mxu1 %v37302_v52 }
 0x5ac   :  { %29411 = vmatmul.mubr.f32.vlgmr.msra.gmra.mrb[44].mxu1 %v37310_v32 }
 0x5ad   :  { %31099 = vmatpush3.bf16.msra.mxu1 %v37302_v52  ;;  %29417 = vmatprep.mubr.f32.mxu1 %v37311_v61  ;;  %v37325_v61 = vld [vmem:[#allocation49_spill] sm:$0xff] }
 0x5ae   :  { %31101 = vmatprep.subr.bf16.mxu1 %v37312_v35 }
 0x5b4   :  { %29418 = vmatmul.mubr.f32.vlgmr.msra.gmra.mrb[44].mxu1 %v37313_v25  ;;  %v37319_v25 = vld [vmem:[#allocation44_spill] sm:$0xff] }
 0x5b5   :  { %31103 = vmatpush3.bf16.msra.mxu1 %v37312_v35  ;;  %29424 = vmatprep.mubr.f32.mxu1 %v37306_v19  ;;  %v37318_v35 = vld [vmem:[#allocation130_spill] sm:$0xff] }
 0x5b6   :  { %31105 = vmatprep.subr.bf16.mxu1 %v37302_v52 }
 0x5bb   :  { %v35547_v37 = vpop.f32.mrb[34].mxu1 }
 0x5bc   :  { %37314 = vst [vmem:[#allocation124_spill] sm:$0xff] %v35547_v37  ;;  %v35551_v32 = vpop.f32.mrb[35].mxu1  ;;  %29425 = vmatmul.mubr.f32.vlgmr.msra.gmra.mrb[44].mxu1 %v37308_v1  ;;  %v37322_v37 = vld [vmem:[#allocation47_spill] sm:$0xff] }
 0x5bd   :  { %37316 = vst [vmem:[#allocation38_spill] sm:$0xff] %v35551_v32  ;;  %31107 = vmatpush3.bf16.msra.mxu1 %v37302_v52  ;;  %29431 = vmatprep.mubr.f32.mxu1 %v37306_v19  ;;  %v37324_v52 = vld [vmem:[#allocation48_spill] sm:$0xff]  ;;  %v37326_v32 = vld [vmem:[#allocation101_spill] sm:$0xff] }
 0x5be   :  { %31109 = vmatprep.subr.bf16.mxu1 %v37318_v35 }
 0x5c4   :  { %29432 = vmatmul.mubr.f32.vlgmr.msra.gmra.mrb[44].mxu1 %v37308_v1  ;;  %v37336_v1 = vld [vmem:[#allocation159_spill] sm:$0xff] }
 0x5c5   :  { %31111 = vmatpush3.bf16.msra.mxu1 %v37318_v35  ;;  %29438 = vmatprep.mubr.f32.mxu1 %v37319_v25  ;;  %v37327_v25 = vld [vmem:[#allocation102_spill] sm:$0xff] }
 0x5c6   :  { %31113 = vmatprep.subr.bf16.mxu1 %v37320_v43 }
 0x5c8   :  { %29439 = vmatmul.mubr.f32.vlgmr.msra.gmra.mrb[46].mxu1 %v37321_v6  ;;  %v37328_v6 = vld [vmem:[#allocation140_spill] sm:$0xff] }
 0x5c9   :  { %31115 = vmatpush3.bf16.msra.mxu1 %v37320_v43  ;;  %29445 = vmatprep.mubr.f32.mxu1 %v37322_v37  ;;  %v37329_v43 = vld [vmem:[#allocation105_spill] sm:$0xff] }
 0x5ca   :  { %31117 = vmatprep.subr.bf16.mxu1 %v37323_v10 }
 0x5d0   :  { %29446 = vmatmul.mubr.f32.vlgmr.msra.gmra.mrb[46].mxu1 %v37324_v52 }
 0x5d1   :  { %31119 = vmatpush3.bf16.msra.mxu1 %v37323_v10  ;;  %29452 = vmatprep.mubr.f32.mxu1 %v37325_v61  ;;  %v37337_v61 = vld [vmem:[#allocation26_spill] sm:$0xff] }
 0x5d2   :  { %31121 = vmatprep.subr.bf16.mxu1 %v37318_v35 }
 0x5d8   :  { %29453 = vmatmul.mubr.f32.vlgmr.msra.gmra.mrb[46].mxu1 %v37326_v32 }
 0x5d9   :  { %31123 = vmatpush3.bf16.msra.mxu1 %v37318_v35  ;;  %29459 = vmatprep.mubr.f32.mxu1 %v37327_v25  ;;  %v37341_v25 = vld [vmem:[#allocation20_spill] sm:$0xff] }
 0x5da   :  { %31125 = vmatprep.subr.bf16.mxu1 %v37328_v6 }
 0x5e0   :  { %29460 = vmatmul.mubr.f32.vlgmr.msra.gmra.mrb[46].mxu1 %v37329_v43  ;;  %v37335_v43 = vld [vmem:[#allocation22_spill] sm:$0xff] }
 0x5e1   :  { %31127 = vmatpush3.bf16.msra.mxu1 %v37328_v6  ;;  %29466 = vmatprep.mubr.f32.mxu1 %v37322_v37  ;;  %v37334_v6 = vld [vmem:[#allocation146_spill] sm:$0xff] }
 0x5e2   :  { %31129 = vmatprep.subr.bf16.mxu1 %v37318_v35 }
 0x5e7   :  { %v35579_v10 = vpop.f32.mrb[36].mxu1 }
 0x5e8   :  { %37330 = vst [vmem:[#allocation30_spill] sm:$0xff] %v35579_v10  ;;  %v35583_v32 = vpop.f32.mrb[37].mxu1  ;;  %29467 = vmatmul.mubr.f32.vlgmr.msra.gmra.mrb[46].mxu1 %v37324_v52  ;;  %v37338_v10 = vld [vmem:[#allocation19_spill] sm:$0xff] }
 0x5e9   :  { %37332 = vst [vmem:[#allocation54_spill] sm:$0xff] %v35583_v32  ;;  %31131 = vmatpush3.bf16.msra.mxu1 %v37318_v35  ;;  %29473 = vmatprep.mubr.f32.mxu1 %v37322_v37  ;;  %v37340_v35 = vld [vmem:[#allocation23_spill] sm:$0xff]  ;;  %v37342_v32 = vld [vmem:[#allocation24_spill] sm:$0xff]  ;;  %v37355_v37 = vld [vmem:[#allocation157_spill] sm:$0xff] }
 0x5ea   :  { %31157 = vmatprep.subr.bf16.mxu1 %v37334_v6 }
 0x5f0   :  { %29474 = vmatmul.mubr.f32.vlgmr.msra.gmra.mrb[46].mxu1 %v37324_v52  ;;  %v37352_v52 = vld [vmem:[#allocation163_spill] sm:$0xff] }
 0x5f1   :  { %31159 = vmatpush3.bf16.msra.mxu1 %v37334_v6  ;;  %29648 = vmatprep.mubr.f32.mxu1 %v37335_v43  ;;  %v37343_v43 = vld [vmem:[#allocation21_spill] sm:$0xff] }
 0x5f2   :  { %31161 = vmatprep.subr.bf16.mxu1 %v37336_v1 }
 0x5f4   :  { %29649 = vmatmul.mubr.f32.vlgmr.msra.gmra.mrb[48].mxu1 %v37337_v61  ;;  %v37344_v61 = vld [vmem:[#allocation156_spill] sm:$0xff] }
 0x5f5   :  { %31163 = vmatpush3.bf16.msra.mxu1 %v37336_v1  ;;  %29655 = vmatprep.mubr.f32.mxu1 %v37338_v10  ;;  %v37345_v1 = vld [vmem:[#allocation25_spill] sm:$0xff] }
 0x5f6   :  { %31165 = vmatprep.subr.bf16.mxu1 %v37339_v53 }
 0x5fc   :  { %29656 = vmatmul.mubr.f32.vlgmr.msra.gmra.mrb[48].mxu1 %v37340_v35 }
 0x5fd   :  { %31167 = vmatpush3.bf16.msra.mxu1 %v37339_v53  ;;  %29662 = vmatprep.mubr.f32.mxu1 %v37341_v25  ;;  %v37353_v25 = vld [vmem:[#allocation50_spill] sm:$0xff] }
 0x5fe   :  { %31169 = vmatprep.subr.bf16.mxu1 %v37334_v6 }
 0x604   :  { %29663 = vmatmul.mubr.f32.vlgmr.msra.gmra.mrb[48].mxu1 %v37342_v32 }
 0x605   :  { %31171 = vmatpush3.bf16.msra.mxu1 %v37334_v6  ;;  %29669 = vmatprep.mubr.f32.mxu1 %v37343_v43  ;;  %v37357_v43 = vld [vmem:[#allocation33_spill] sm:$0xff] }
 0x606   :  { %31173 = vmatprep.subr.bf16.mxu1 %v37344_v61 }
 0x60c   :  { %29670 = vmatmul.mubr.f32.vlgmr.msra.gmra.mrb[48].mxu1 %v37345_v1  ;;  %v37351_v1 = vld [vmem:[#allocation46_spill] sm:$0xff] }
 0x60d   :  { %31175 = vmatpush3.bf16.msra.mxu1 %v37344_v61  ;;  %29676 = vmatprep.mubr.f32.mxu1 %v37338_v10  ;;  %v37350_v61 = vld [vmem:[#allocation120_spill] sm:$0xff] }
 0x60e   :  { %31177 = vmatprep.subr.bf16.mxu1 %v37334_v6 }
 0x613   :  { %v35611_v53 = vpop.f32.mrb[38].mxu1 }
 0x614   :  { %37346 = vst [vmem:[#allocation103_spill] sm:$0xff] %v35611_v53  ;;  %v35615_v32 = vpop.f32.mrb[39].mxu1  ;;  %29677 = vmatmul.mubr.f32.vlgmr.msra.gmra.mrb[48].mxu1 %v37340_v35  ;;  %v37354_v53 = vld [vmem:[#allocation27_spill] sm:$0xff] }
 0x615   :  { %37348 = vst [vmem:[#allocation70_spill] sm:$0xff] %v35615_v32  ;;  %31179 = vmatpush3.bf16.msra.mxu1 %v37334_v6  ;;  %29683 = vmatprep.mubr.f32.mxu1 %v37338_v10  ;;  %v37356_v6 = vld [vmem:[#allocation28_spill] sm:$0xff]  ;;  %v37358_v32 = vld [vmem:[#allocation34_spill] sm:$0xff] }
 0x616   :  { %31181 = vmatprep.subr.bf16.mxu1 %v37350_v61  ;;  %v37361_v10 = vld [vmem:[#allocation42_spill] sm:$0xff] }
 0x61c   :  { %29684 = vmatmul.mubr.f32.vlgmr.msra.gmra.mrb[48].mxu1 %v37340_v35 }
 0x61d   :  { %31183 = vmatpush3.bf16.msra.mxu1 %v37350_v61  ;;  %29690 = vmatprep.mubr.f32.mxu1 %v37351_v1  ;;  %v37359_v1 = vld [vmem:[#allocation39_spill] sm:$0xff] }
 0x61e   :  { %31185 = vmatprep.subr.bf16.mxu1 %v37352_v52 }
 0x620   :  { %29691 = vmatmul.mubr.f32.vlgmr.msra.gmra.mrb[50].mxu1 %v37353_v25  ;;  %v37360_v25 = vld [vmem:[#allocation160_spill] sm:$0xff] }
 0x621   :  { %31187 = vmatpush3.bf16.msra.mxu1 %v37352_v52  ;;  %29697 = vmatprep.mubr.f32.mxu1 %v37354_v53 }
 0x622   :  { %31189 = vmatprep.subr.bf16.mxu1 %v37355_v37 }
 0x628   :  { %29698 = vmatmul.mubr.f32.vlgmr.msra.gmra.mrb[50].mxu1 %v37356_v6 }
 0x629   :  { %31191 = vmatpush3.bf16.msra.mxu1 %v37355_v37  ;;  %29704 = vmatprep.mubr.f32.mxu1 %v37357_v43 }
 0x62a   :  { %31193 = vmatprep.subr.bf16.mxu1 %v37350_v61 }
 0x630   :  { %29705 = vmatmul.mubr.f32.vlgmr.msra.gmra.mrb[50].mxu1 %v37358_v32 }
 0x631   :  { %31195 = vmatpush3.bf16.msra.mxu1 %v37350_v61  ;;  %29711 = vmatprep.mubr.f32.mxu1 %v37359_v1 }
 0x632   :  { %31197 = vmatprep.subr.bf16.mxu1 %v37360_v25 }
 0x635   :  { %v30126_v52 = vpop.f32.mrb[64].mxu0 }
 0x636   :  { %v21950_v35 = vpop.f32.mrb[65].mxu0  ;;  %v22048_v19 = vand.u32 4294901760, %v30126_v52 }
 0x637   :  { %v22045_v55 = vand.u32 4294901760, %v21950_v35 }
 0x638   :  { %29712 = vmatmul.mubr.f32.vlgmr.msra.gmra.mrb[50].mxu1 %v37361_v10  ;;  %v22140_v10 = vsub.f32 %v30126_v52, %v22048_v19 }
 0x639   :  { %31199 = vmatpush3.bf16.msra.mxu1 %v37360_v25  ;;  %29718 = vmatprep.mubr.f32.mxu1 %v37354_v53  ;;  %v35643_v37 = vpack.c.bf16 %v22048_v19, %v22045_v55  ;;  %v30129_v32 = vpop.f32.mrb[66].mxu0  ;;  %v22133_v30 = vsub.f32 %v21950_v35, %v22045_v55  ;;  %v37368_v55 = vld [vmem:[#allocation153_spill] sm:$0xff] }
 0x63a   :  { %31201 = vmatprep.subr.bf16.mxu1 %v37350_v61  ;;  %v21962_v43 = vpop.f32.mrb[67].mxu0  ;;  %v22550_v23 = vand.u32 4294901760, %v30129_v32  ;;  %v22141_v7 = vand.u32 4294901760, %v22140_v10 }
 0x63b   :  { %37362 = vst [vmem:[#allocation117_spill] sm:$0xff] %v35643_v37  ;;  %v22547_v1 = vand.u32 4294901760, %v21962_v43  ;;  %v22134_v19 = vand.u32 4294901760, %v22133_v30 }
 0x63c   :  { %v22642_v35 = vsub.f32 %v30129_v32, %v22550_v23 }
 0x63d   :  { %v35645_v16 = vpack.c.bf16 %v22550_v23, %v22547_v1  ;;  %v30132_v9 = vpop.f32.mrb[68].mxu0  ;;  %v22635_v52 = vsub.f32 %v21962_v43, %v22547_v1  ;;  %v22135_v54 = vsub.f32 %v22133_v30, %v22134_v19  ;;  %v35666_v43 = vpack.c.bf16 %v22140_v10, %v22133_v30  ;;  %v37372_v1 = vld [vmem:[#allocation57_spill] sm:$0xff] }
 0x63e   :  { %v21974_v39 = vpop.f32.mrb[69].mxu0  ;;  %v23052_v37 = vand.u32 4294901760, %v30132_v9  ;;  %v22643_v22 = vand.u32 4294901760, %v22642_v35 }
 0x63f   :  { %37363 = vst [vmem:[#allocation36_spill] sm:$0xff] %v35645_v16  ;;  %v35647_v15 = vpop.f32.mrb[40].mxu1  ;;  %v23049_v57 = vand.u32 4294901760, %v21974_v39  ;;  %v22636_v18 = vand.u32 4294901760, %v22635_v52  ;;  %37371 = vst [vmem:[#allocation29_spill] sm:$0xff] %v35666_v43  ;;  %v35676_v43 = vpack.c.bf16 %v22141_v7, %v22134_v19 }
 0x640   :  { %37364 = vst [vmem:[#allocation133_spill] sm:$0xff] %v35647_v15  ;;  %v35651_v33 = vpop.f32.mrb[41].mxu1  ;;  %29719 = vmatmul.mubr.f32.vlgmr.msra.gmra.mrb[50].mxu1 %v37356_v6  ;;  %v23144_v13 = vsub.f32 %v30132_v9, %v23052_v37 }
 0x641   :  { %37366 = vst [vmem:[#allocation109_spill] sm:$0xff] %v35651_v33  ;;  %31203 = vmatpush3.bf16.msra.mxu1 %v37350_v61  ;;  %29725 = vmatprep.mubr.f32.mxu1 %v37354_v53  ;;  %v35659_v16 = vpack.c.bf16 %v23052_v37, %v23049_v57  ;;  %v30135_v25 = vpop.f32.mrb[70].mxu0  ;;  %v35661_v46 = vsub.f32 %v21974_v39, %v23049_v57  ;;  %37374 = vst [vmem:[#allocation131_spill] sm:$0xff] %v35676_v43 }
 0x642   :  { %31205 = vmatprep.subr.bf16.mxu1 %v37368_v55  ;;  %v21986_v15 = vpop.f32.mrb[71].mxu0  ;;  %v23554_v11 = vand.u32 4294901760, %v30135_v25  ;;  %v22142_v53 = vsub.f32 %v22140_v10, %v22141_v7  ;;  %v23145_v31 = vand.u32 4294901760, %v23144_v13  ;;  %v35690_v43 = vpack.c.bf16 %v22643_v22, %v22636_v18 }
 0x643   :  { %37369 = vst [vmem:[#allocation111_spill] sm:$0xff] %v35659_v16  ;;  %v23551_v40 = vand.u32 4294901760, %v21986_v15  ;;  %v23138_v57 = vand.u32 4294901760, %v35661_v46  ;;  %v22637_v16 = vsub.f32 %v22635_v52, %v22636_v18 }
 0x644   :  { %v23646_v58 = vsub.f32 %v30135_v25, %v23554_v11  ;;  %v22143_v10 = vand.u32 4294901760, %v22142_v53  ;;  %37380 = vst [vmem:[#allocation115_spill] sm:$0xff] %v35690_v43 }
 0x645   :  { %v35663_v61 = vpack.c.bf16 %v23554_v11, %v23551_v40  ;;  %v30138_v33 = vpop.f32.mrb[72].mxu0  ;;  %v35671_v39 = vsub.f32 %v21986_v15, %v23551_v40  ;;  %v35679_v40 = vpack.c.bf16 %v22642_v35, %v22635_v52  ;;  %v23139_v15 = vsub.f32 %v35661_v46, %v23138_v57  ;;  %v37378_v11 = vld [vmem:[#allocation161_spill] sm:$0xff] }
 0x646   :  { %v21998_v44 = vpop.f32.mrb[73].mxu0  ;;  %v24056_v23 = vand.u32 4294901760, %v30138_v33  ;;  %v23647_v52 = vand.u32 4294901760, %v23646_v58 }
 0x647   :  { %37370 = vst [vmem:[#allocation119_spill] sm:$0xff] %v35663_v61  ;;  %v24053_v32 = vand.u32 4294901760, %v21998_v44  ;;  %v22644_v61 = vsub.f32 %v22642_v35, %v22643_v22  ;;  %37376 = vst [vmem:[#allocation17_spill] sm:$0xff] %v35679_v40  ;;  %v23146_v35 = vsub.f32 %v23144_v13, %v23145_v31 }
 0x648   :  { %29726 = vmatmul.mubr.f32.vlgmr.msra.gmra.mrb[50].mxu1 %v37356_v6  ;;  %v22136_v6 = vand.u32 4294901760, %v22135_v54  ;;  %v23640_v54 = vand.u32 4294901760, %v35671_v39  ;;  %v24148_v7 = vsub.f32 %v30138_v33, %v24056_v23 }
 0x649   :  { %31207 = vmatpush3.bf16.msra.mxu1 %v37368_v55  ;;  %29732 = vmatprep.mubr.f32.mxu1 %v37372_v1  ;;  %v35674_v9 = vpack.c.bf16 %v24056_v23, %v24053_v32  ;;  %v30141_v37 = vpop.f32.mrb[74].mxu0  ;;  %v24141_v53 = vsub.f32 %v21998_v44, %v24053_v32  ;;  %v23147_v18 = vand.u32 4294901760, %v23146_v35 }
 0x64a   :  { %31209 = vmatprep.subr.bf16.mxu1 %v35223_v34  ;;  %v22010_v30 = vpop.f32.mrb[75].mxu0  ;;  %v24558_v1 = vand.u32 4294901760, %v30141_v37  ;;  %v24149_v23 = vand.u32 4294901760, %v24148_v7  ;;  %v35713_v43 = vpack.c.bf16 %v23647_v52, %v23640_v54 }
 0x64b   :  { %37373 = vst [vmem:[#allocation141_spill] sm:$0xff] %v35674_v9  ;;  %v24555_v63 = vand.u32 4294901760, %v22010_v30  ;;  %v35685_v9 = vpack.c.bf16 %v22143_v10, %v22136_v6  ;;  %v35693_v6 = vpack.c.bf16 %v23144_v13, %v35661_v46  ;;  %v23641_v10 = vsub.f32 %v35671_v39, %v23640_v54 }
 0x64c   :  { %29733 = vmatmul.mubr.f32.vlgmr.msra.gmra.mrb[52].mxu1 %v37375_v3  ;;  %v22638_v3 = vand.u32 4294901760, %v22637_v16  ;;  %v24650_v48 = vsub.f32 %v30141_v37, %v24558_v1  ;;  %v24142_v32 = vand.u32 4294901760, %v24141_v53 }
 0x64d   :  { %31211 = vmatpush3.bf16.msra.mxu1 %v35223_v34  ;;  %29739 = vmatprep.mubr.f32.mxu1 %v36970_v60  ;;  %37377 = vst [vmem:[#allocation134_spill] sm:$0xff] %v35685_v9  ;;  %v35688_v25 = vpack.c.bf16 %v24558_v1, %v24555_v63  ;;  %v30144_v19 = vpop.f32.mrb[76].mxu0  ;;  %v22645_v34 = vand.u32 4294901760, %v22644_v61  ;;  %37381 = vst [vmem:[#allocation127_spill] sm:$0xff] %v35693_v6  ;;  %v24643_v33 = vsub.f32 %v22010_v30, %v24555_v63 }
 0x64e   :  { %31213 = vmatprep.subr.bf16.mxu1 %v37378_v11  ;;  %v22022_v40 = vpop.f32.mrb[77].mxu0  ;;  %v25060_v12 = vand.u32 4294901760, %v30144_v19  ;;  %v23140_v9 = vand.u32 4294901760, %v23139_v15  ;;  %v23648_v61 = vsub.f32 %v23646_v58, %v23647_v52  ;;  %v35700_v1 = vpack.c.bf16 %v23145_v31, %v23138_v57  ;;  %v37388_v52 = vld [vmem:[#allocation164_spill] sm:$0xff] }
 0x64f   :  { %37379 = vst [vmem:[#allocation73_spill] sm:$0xff] %v35688_v25  ;;  %v25057_v17 = vand.u32 4294901760, %v22022_v40  ;;  %v35696_v44 = vpack.c.bf16 %v22645_v34, %v22638_v3  ;;  %v24651_v13 = vand.u32 4294901760, %v24650_v48  ;;  %v35704_v63 = vpack.c.bf16 %v23646_v58, %v35671_v39  ;;  %v37385_v3 = vld [vmem:[#allocation53_spill] sm:$0xff] }
 0x650   :  { %37383 = vst [vmem:[#allocation135_spill] sm:$0xff] %v35700_v1  ;;  %v24644_v30 = vand.u32 4294901760, %v24643_v33  ;;  %v25152_v34 = vsub.f32 %v30144_v19, %v25060_v12  ;;  %v24150_v31 = vsub.f32 %v24148_v7, %v24149_v23  ;;  %v24143_v57 = vsub.f32 %v24141_v53, %v24142_v32 }
 0x651   :  { %v35698_v16 = vpack.c.bf16 %v25060_v12, %v25057_v17  ;;  %v30147_v25 = vpop.f32.mrb[78].mxu0  ;;  %37384 = vst [vmem:[#allocation55_spill] sm:$0xff] %v35704_v63  ;;  %v25145_v15 = vsub.f32 %v22022_v40, %v25057_v17  ;;  %v23642_v1 = vand.u32 4294901760, %v23641_v10  ;;  %v23649_v6 = vand.u32 4294901760, %v23648_v61 }
 0x652   :  { %v22034_v22 = vpop.f32.mrb[79].mxu0  ;;  %v25562_v46 = vand.u32 4294901760, %v30147_v25  ;;  %v24652_v58 = vsub.f32 %v24650_v48, %v24651_v13  ;;  %v24645_v63 = vsub.f32 %v24643_v33, %v24644_v30  ;;  %v24144_v40 = vand.u32 4294901760, %v24143_v57 }
 0x653   :  { %37382 = vst [vmem:[#allocation136_spill] sm:$0xff] %v35698_v16  ;;  %v25559_v37 = vand.u32 4294901760, %v22034_v22  ;;  %v35708_v16 = vpack.c.bf16 %v23147_v18, %v23140_v9  ;;  %v25146_v12 = vand.u32 4294901760, %v25145_v15  ;;  %v35717_v17 = vpack.c.bf16 %v23649_v6, %v23642_v1 }
 0x654   :  { %29740 = vmatmul.mubr.f32.vlgmr.msra.gmra.mrb[52].mxu1 %v36978_v62  ;;  %v25654_v9 = vsub.f32 %v30147_v25, %v25562_v46  ;;  %v24151_v19 = vand.u32 4294901760, %v24150_v31  ;;  %v35719_v18 = vpack.c.bf16 %v24149_v23, %v24142_v32  ;;  %v35724_v54 = vpack.c.bf16 %v24650_v48, %v24643_v33 }
 0x655   :  { %31215 = vmatpush3.bf16.msra.mxu1 %v37378_v11  ;;  %29746 = vmatprep.mubr.f32.mxu1 %v37385_v3  ;;  %v35711_v35 = vpack.c.bf16 %v25562_v46, %v25559_v37  ;;  %v25647_v39 = vsub.f32 %v22034_v22, %v25559_v37  ;;  %v35715_v11 = vpack.c.bf16 %v24148_v7, %v24141_v53  ;;  %v25153_v3 = vand.u32 4294901760, %v25152_v34 }
 0x656   :  { %31217 = vmatprep.subr.bf16.mxu1 %v37368_v55  ;;  %v35722_v61 = vpack.c.bf16 %v24151_v19, %v24144_v40  ;;  %37387 = vst [vmem:[#allocation56_spill] sm:$0xff] %v35724_v54  ;;  %v25147_v53 = vsub.f32 %v25145_v15, %v25146_v12  ;;  %v25655_v25 = vand.u32 4294901760, %v25654_v9  ;;  %v24646_v6 = vand.u32 4294901760, %v24645_v63 }
 0x657   :  { %37386 = vst [vmem:[#allocation128_spill] sm:$0xff] %v35711_v35  ;;  %v25648_v10 = vand.u32 4294901760, %v25647_v39  ;;  %v25154_v7 = vsub.f32 %v25152_v34, %v25153_v3  ;;  %v24653_v22 = vand.u32 4294901760, %v24652_v58  ;;  %v35729_v23 = vpack.c.bf16 %v24651_v13, %v24644_v30  ;;  %v37420_v35 = vld [vmem:[#allocation116_spill] sm:$0xff] }
 0x658   :  { %v35733_v46 = vpack.c.bf16 %v25152_v34, %v25145_v15  ;;  %v25656_v48 = vsub.f32 %v25654_v9, %v25655_v25  ;;  %v25148_v33 = vand.u32 4294901760, %v25147_v53  ;;  %v35735_v31 = vpack.c.bf16 %v25153_v3, %v25146_v12  ;;  %v37401_v53 = vld [vmem:[#allocation167_spill] sm:$0xff]  ;;  %v37415_v12 = vld [vmem:[#allocation32_spill] sm:$0xff] }
 0x659   :  { %37389 = vst [vmem:[#allocation137_spill] sm:$0xff] %v35729_v23  ;;  %v25649_v32 = vsub.f32 %v25647_v39, %v25648_v10  ;;  %v35731_v1 = vpack.c.bf16 %v24653_v22, %v24646_v6  ;;  %v25155_v37 = vand.u32 4294901760, %v25154_v7  ;;  %v35740_v19 = vpack.c.bf16 %v25654_v9, %v25647_v39  ;;  %v37396_v39 = vld [vmem:[#allocation155_spill] sm:$0xff]  ;;  %v37400_v7 = vld [vmem:[#allocation68_spill] sm:$0xff]  ;;  %v37404_v22 = vld [vmem:[#allocation61_spill] sm:$0xff] }
 0x65a   :  { %37390 = vst [vmem:[#allocation138_spill] sm:$0xff] %v35733_v46  ;;  %37391 = vst [vmem:[#allocation130_spill] sm:$0xff] %v35735_v31  ;;  %v25657_v13 = vand.u32 4294901760, %v25656_v48  ;;  %v35745_v63 = vpack.c.bf16 %v25655_v25, %v25648_v10  ;;  %v37398_v9 = vld [vmem:[#allocation31_spill] sm:$0xff]  ;;  %v37405_v48 = vld [vmem:[#allocation162_spill] sm:$0xff] }
 0x65b   :  { %v25650_v57 = vand.u32 4294901760, %v25649_v32  ;;  %v35738_v40 = vpack.c.bf16 %v25155_v37, %v25148_v33  ;;  %37393 = vst [vmem:[#allocation139_spill] sm:$0xff] %v35740_v19  ;;  %v37399_v10 = vld [vmem:[#allocation67_spill] sm:$0xff]  ;;  %v37406_v33 = vld [vmem:[#allocation86_spill] sm:$0xff]  ;;  %v37407_v37 = vld [vmem:[#allocation169_spill] sm:$0xff] }
 0x65c   :  { %29747 = vmatmul.mubr.f32.vlgmr.msra.gmra.mrb[52].mxu1 %v36988_v2  ;;  %37394 = vst [vmem:[#allocation140_spill] sm:$0xff] %v35745_v63  ;;  %v37413_v32 = vld [vmem:[#allocation75_spill] sm:$0xff]  ;;  %v37414_v25 = vld [vmem:[#allocation74_spill] sm:$0xff]  ;;  %v37418_v63 = vld [vmem:[#allocation77_spill] sm:$0xff] }
 0x65d   :  { %31219 = vmatpush3.bf16.msra.mxu1 %v37368_v55  ;;  %29753 = vmatprep.mubr.f32.mxu1 %v36991_v8  ;;  %37392 = vst [vmem:[#allocation18_spill] sm:$0xff] %v35738_v40  ;;  %v35747_v30 = vpack.c.bf16 %v25657_v13, %v25650_v57  ;;  %v37408_v57 = vld [vmem:[#allocation90_spill] sm:$0xff]  ;;  %v37409_v13 = vld [vmem:[#allocation41_spill] sm:$0xff] }
 0x65e   :  { %31221 = vmatprep.subr.bf16.mxu1 %v37388_v52  ;;  %v37422_v46 = vld [vmem:[#allocation165_spill] sm:$0xff] }
 0x65f   :  { %37395 = vst [vmem:[#allocation146_spill] sm:$0xff] %v35747_v30  ;;  %v37419_v30 = vld [vmem:[#allocation72_spill] sm:$0xff]  ;;  %v37423_v40 = vld [vmem:[#allocation65_spill] sm:$0xff] }
 0x660   :  { %v37421_v31 = vsub.f32 %v37419_v30, %v37420_v35  ;;  %v37430_v35 = vld [vmem:[#allocation40_spill] sm:$0xff]  ;;  %v37435_v30 = vld [vmem:[#allocation93_spill] sm:$0xff] }
 0x664   :  { %29754 = vmatmul.mubr.f32.vlgmr.msra.gmra.mrb[52].mxu1 %v36996_v5 }
 0x665   :  { %31223 = vmatpush3.bf16.msra.mxu1 %v37388_v52  ;;  %29760 = vmatprep.mubr.f32.mxu1 %v36970_v60  ;;  %v37403_v52 = vld [vmem:[#allocation51_spill] sm:$0xff] }
 0x666   :  { %31225 = vmatprep.subr.bf16.mxu1 %v37368_v55 }
 0x66b   :  { %v35749_v3 = vpop.f32.mrb[42].mxu1 }
 0x66c   :  { %v35753_v15 = vpop.f32.mrb[43].mxu1  ;;  %29761 = vmatmul.mubr.f32.vlgmr.msra.gmra.mrb[52].mxu1 %v36978_v62 }
 0x66d   :  { %31227 = vmatpush3.bf16.msra.mxu1 %v37368_v55  ;;  %29767 = vmatprep.mubr.f32.mxu1 %v36970_v60 }
 0x66e   :  { %31229 = vmatprep.subr.bf16.mxu1 %v37396_v39 }
 0x674   :  { %29768 = vmatmul.mubr.f32.vlgmr.msra.gmra.mrb[52].mxu1 %v36978_v62 }
 0x675   :  { %31231 = vmatpush3.bf16.msra.mxu1 %v37396_v39  ;;  %29774 = vmatprep.mubr.f32.mxu1 %v37003_v28 }
 0x676   :  { %31233 = vmatprep.subr.bf16.mxu1 %v35239_v0 }
 0x678   :  { %29775 = vmatmul.mubr.f32.vlgmr.msra.gmra.mrb[54].mxu1 %v37218_v42 }
 0x679   :  { %31235 = vmatpush3.bf16.msra.mxu1 %v35239_v0  ;;  %29781 = vmatprep.mubr.f32.mxu1 %v37220_v41  ;;  %v37417_v0 = vld [vmem:[#allocation118_spill] sm:$0xff] }
 0x67a   :  { %31237 = vmatprep.subr.bf16.mxu1 %v35233_v51 }
 0x680   :  { %29782 = vmatmul.mubr.f32.vlgmr.msra.gmra.mrb[54].mxu1 %v37225_v56 }
 0x681   :  { %31239 = vmatpush3.bf16.msra.mxu1 %v35233_v51  ;;  %29788 = vmatprep.mubr.f32.mxu1 %v37227_v47 }
 0x682   :  { %31241 = vmatprep.subr.bf16.mxu1 %v37396_v39 }
 0x688   :  { %29789 = vmatmul.mubr.f32.vlgmr.msra.gmra.mrb[54].mxu1 %v37231_v49 }
 0x689   :  { %31243 = vmatpush3.bf16.msra.mxu1 %v37396_v39  ;;  %29795 = vmatprep.mubr.f32.mxu1 %v37233_v59 }
 0x68a   :  { %31245 = vmatprep.subr.bf16.mxu1 %v35235_v4 }
 0x690   :  { %29796 = vmatmul.mubr.f32.vlgmr.msra.gmra.mrb[54].mxu1 %v37238_v45 }
 0x691   :  { %31247 = vmatpush3.bf16.msra.mxu1 %v35235_v4  ;;  %29802 = vmatprep.mubr.f32.mxu1 %v37220_v41  ;;  %v37397_v4 = vld [vmem:[#allocation158_spill] sm:$0xff] }
 0x692   :  { %31249 = vmatprep.subr.bf16.mxu1 %v37396_v39 }
 0x697   :  { %v35781_v51 = vpop.f32.mrb[44].mxu1 }
 0x698   :  { %v35785_v55 = vpop.f32.mrb[45].mxu1  ;;  %29803 = vmatmul.mubr.f32.vlgmr.msra.gmra.mrb[54].mxu1 %v37225_v56 }
 0x699   :  { %31251 = vmatpush3.bf16.msra.mxu1 %v37396_v39  ;;  %29809 = vmatprep.mubr.f32.mxu1 %v37220_v41  ;;  %v37410_v39 = vld [vmem:[#allocation168_spill] sm:$0xff] }
 0x69a   :  { %31253 = vmatprep.subr.bf16.mxu1 %v37397_v4 }
 0x6a0   :  { %29810 = vmatmul.mubr.f32.vlgmr.msra.gmra.mrb[54].mxu1 %v37225_v56 }
 0x6a1   :  { %31255 = vmatpush3.bf16.msra.mxu1 %v37397_v4  ;;  %29816 = vmatprep.mubr.f32.mxu1 %v37257_v24 }
 0x6a2   :  { %31257 = vmatprep.subr.bf16.mxu1 %v35251_v14 }
 0x6a4   :  { %29817 = vmatmul.mubr.f32.vlgmr.msra.gmra.mrb[56].mxu1 %v37260_v21 }
 0x6a5   :  { %31259 = vmatpush3.bf16.msra.mxu1 %v35251_v14  ;;  %29823 = vmatprep.mubr.f32.mxu1 %v37262_v29  ;;  %v37402_v14 = vld [vmem:[#allocation69_spill] sm:$0xff] }
 0x6a6   :  { %31261 = vmatprep.subr.bf16.mxu1 %v35242_v36 }
 0x6ac   :  { %29824 = vmatmul.mubr.f32.vlgmr.msra.gmra.mrb[56].mxu1 %v37267_v38 }
 0x6ad   :  { %31263 = vmatpush3.bf16.msra.mxu1 %v35242_v36  ;;  %29830 = vmatprep.mubr.f32.mxu1 %v37398_v9 }
 0x6ae   :  { %31265 = vmatprep.subr.bf16.mxu1 %v37397_v4 }
 0x6b4   :  { %29831 = vmatmul.mubr.f32.vlgmr.msra.gmra.mrb[56].mxu1 %v37399_v10 }
 0x6b5   :  { %31267 = vmatpush3.bf16.msra.mxu1 %v37397_v4  ;;  %29837 = vmatprep.mubr.f32.mxu1 %v37400_v7 }
 0x6b6   :  { %31269 = vmatprep.subr.bf16.mxu1 %v37401_v53 }
 0x6bc   :  { %29838 = vmatmul.mubr.f32.vlgmr.msra.gmra.mrb[56].mxu1 %v37402_v14 }
 0x6bd   :  { %31271 = vmatpush3.bf16.msra.mxu1 %v37401_v53  ;;  %29844 = vmatprep.mubr.f32.mxu1 %v37262_v29  ;;  %v37412_v53 = vld [vmem:[#allocation37_spill] sm:$0xff] }
 0x6be   :  { %31273 = vmatprep.subr.bf16.mxu1 %v37397_v4 }
 0x6c3   :  { %v35813_v36 = vpop.f32.mrb[46].mxu1 }
 0x6c4   :  { %v35817_v6 = vpop.f32.mrb[47].mxu1  ;;  %29845 = vmatmul.mubr.f32.vlgmr.msra.gmra.mrb[56].mxu1 %v37267_v38 }
 0x6c5   :  { %31275 = vmatpush3.bf16.msra.mxu1 %v37397_v4  ;;  %29851 = vmatprep.mubr.f32.mxu1 %v37262_v29  ;;  %v37411_v4 = vld [vmem:[#allocation71_spill] sm:$0xff] }
 0x6c6   :  { %31277 = vmatprep.subr.bf16.mxu1 %v37405_v48 }
 0x6cc   :  { %29852 = vmatmul.mubr.f32.vlgmr.msra.gmra.mrb[56].mxu1 %v37267_v38 }
 0x6cd   :  { %31279 = vmatpush3.bf16.msra.mxu1 %v37405_v48  ;;  %29858 = vmatprep.mubr.f32.mxu1 %v37406_v33 }
 0x6ce   :  { %31281 = vmatprep.subr.bf16.mxu1 %v37407_v37 }
 0x6d0   :  { %29859 = vmatmul.mubr.f32.vlgmr.msra.gmra.mrb[58].mxu1 %v37408_v57 }
 0x6d1   :  { %31283 = vmatpush3.bf16.msra.mxu1 %v37407_v37  ;;  %29865 = vmatprep.mubr.f32.mxu1 %v37409_v13  ;;  %v37416_v37 = vld [vmem:[#allocation79_spill] sm:$0xff] }
 0x6d2   :  { %31285 = vmatprep.subr.bf16.mxu1 %v37410_v39 }
 0x6d8   :  { %29866 = vmatmul.mubr.f32.vlgmr.msra.gmra.mrb[58].mxu1 %v37411_v4 }
 0x6d9   :  { %31287 = vmatpush3.bf16.msra.mxu1 %v37410_v39  ;;  %29872 = vmatprep.mubr.f32.mxu1 %v37412_v53  ;;  %v37427_v53 = vld [vmem:[#allocation112_spill] sm:$0xff] }
 0x6da   :  { %31289 = vmatprep.subr.bf16.mxu1 %v37405_v48  ;;  %v26252_v54 = vadd.f32 0.0001, %v37427_v53  ;;  %v37440_v53 = vld [vmem:[#allocation99_spill] sm:$0xff] }
 0x6e0   :  { %29873 = vmatmul.mubr.f32.vlgmr.msra.gmra.mrb[58].mxu1 %v37413_v32 }
 0x6e1   :  { %31291 = vmatpush3.bf16.msra.mxu1 %v37405_v48  ;;  %29879 = vmatprep.mubr.f32.mxu1 %v37414_v25 }
 0x6e2   :  { %31293 = vmatprep.subr.bf16.mxu1 %v37415_v12 }
 0x6e8   :  { %29880 = vmatmul.mubr.f32.vlgmr.msra.gmra.mrb[58].mxu1 %v37416_v37  ;;  %v37424_v37 = vld [vmem:[#allocation122_spill] sm:$0xff] }
 0x6e9   :  { %31295 = vmatpush3.bf16.msra.mxu1 %v37415_v12  ;;  %29886 = vmatprep.mubr.f32.mxu1 %v37409_v13  ;;  %v37425_v23 = vsub.f32 %v37423_v40, %v37424_v37  ;;  %v37432_v40 = vld [vmem:[#allocation100_spill] sm:$0xff] }
 0x6ea   :  { %31297 = vmatprep.subr.bf16.mxu1 %v37405_v48 }
 0x6ef   :  { %v29685_v39 = vpop.f32.mrb[48].mxu1 }
 0x6f0   :  { %v26125_v58 = vsub.f32 %v29685_v39, %v37417_v0  ;;  %v17352_v34 = vpop.f32.mrb[49].mxu1  ;;  %29887 = vmatmul.mubr.f32.vlgmr.msra.gmra.mrb[58].mxu1 %v37411_v4  ;;  %v37426_v0 = vld [vmem:[#allocation35_spill] sm:$0xff] }
 0x6f1   :  { %v26124_v19 = vsub.f32 %v17352_v34, %v37418_v63  ;;  %31299 = vmatpush3.bf16.msra.mxu1 %v37405_v48  ;;  %29893 = vmatprep.mubr.f32.mxu1 %v37409_v13  ;;  %v26253_v39 = vadd.f32 0.0001, %v37426_v0 }
 0x6f2   :  { %v26269_v12 = vadd.f32 %v26125_v58, %v37421_v31  ;;  %31301 = vmatprep.subr.bf16.mxu1 %v37422_v46  ;;  %v37431_v31 = vld [vmem:[#allocation172_spill] sm:$0xff]  ;;  %v37437_v58 = vld [vmem:[#allocation95_spill] sm:$0xff] }
 0x6f3   :  { %v26268_v25 = vadd.f32 %v26124_v19, %v37425_v23  ;;  %v37433_v23 = vld [vmem:[#allocation43_spill] sm:$0xff]  ;;  %v37434_v19 = vld [vmem:[#allocation170_spill] sm:$0xff] }
 0x6f4   :  { %v26285_v32 = vadd.f32 0.0009, %v26269_v12  ;;  %v37441_v12 = vld [vmem:[#allocation110_spill] sm:$0xff] }
 0x6f5   :  { %v26284_v63 = vadd.f32 0.0009, %v26268_v25  ;;  %v37438_v25 = vld [vmem:[#allocation96_spill] sm:$0xff] }
 0x6f6   :  { %v35859_v34 = vmul.f32 %v26285_v32, %v26253_v39  ;;  %v37439_v32 = vld [vmem:[#allocation171_spill] sm:$0xff] }
 0x6f7   :  { %v35861_v48 = vmul.f32 %v26284_v63, %v26252_v54  ;;  %v37436_v54 = vld [vmem:[#allocation94_spill] sm:$0xff]  ;;  %v37442_v63 = vld [vmem:[#allocation81_spill] sm:$0xff] }
 0x6f8   :  { %37428 = vst [vmem:[#allocation159_spill] sm:$0xff] %v35859_v34  ;;  %29894 = vmatmul.mubr.f32.vlgmr.msra.gmra.mrb[58].mxu1 %v37411_v4  ;;  %v37451_v4 = vld [vmem:[#allocation88_spill] sm:$0xff] }
 0x6f9   :  { %37429 = vst [vmem:[#allocation154_spill] sm:$0xff] %v35861_v48  ;;  %31303 = vmatpush3.bf16.msra.mxu1 %v37422_v46  ;;  %29900 = vmatprep.mubr.f32.mxu1 %v37430_v35  ;;  %v26254_v13 = vadd.f32 0.0001, %v37451_v4  ;;  %v37458_v4 = vld [vmem:[#allocation173_spill] sm:$0xff] }
 0x6fa   :  { %31305 = vmatprep.subr.bf16.mxu1 %v37431_v31 }
 0x6fc   :  { %29901 = vmatmul.mubr.f32.vlgmr.msra.gmra.mrb[60].mxu1 %v37432_v40  ;;  %v37448_v40 = vld [vmem:[#allocation114_spill] sm:$0xff] }
 0x6fd   :  { %31307 = vmatpush3.bf16.msra.mxu1 %v37431_v31  ;;  %29907 = vmatprep.mubr.f32.mxu1 %v37433_v23 }
 0x6fe   :  { %31309 = vmatprep.subr.bf16.mxu1 %v37434_v19 }
 0x704   :  { %29908 = vmatmul.mubr.f32.vlgmr.msra.gmra.mrb[60].mxu1 %v37435_v30 }
 0x705   :  { %31311 = vmatpush3.bf16.msra.mxu1 %v37434_v19  ;;  %29914 = vmatprep.mubr.f32.mxu1 %v37436_v54  ;;  %v37443_v19 = vld [vmem:[#allocation124_spill] sm:$0xff]  ;;  %v37447_v54 = vld [vmem:[#allocation38_spill] sm:$0xff] }
 0x706   :  { %31313 = vmatprep.subr.bf16.mxu1 %v37422_v46  ;;  %v37449_v35 = vsub.f32 %v37447_v54, %v37448_v40  ;;  %v37456_v40 = vld [vmem:[#allocation106_spill] sm:$0xff] }
 0x707   :  { %v37462_v54 = vld [vmem:[#allocation102_spill] sm:$0xff] }
 0x70c   :  { %29915 = vmatmul.mubr.f32.vlgmr.msra.gmra.mrb[60].mxu1 %v37437_v58  ;;  %v37446_v58 = vld [vmem:[#allocation166_spill] sm:$0xff] }
 0x70d   :  { %31315 = vmatpush3.bf16.msra.mxu1 %v37422_v46  ;;  %29921 = vmatprep.mubr.f32.mxu1 %v37438_v25 }
 0x70e   :  { %31317 = vmatprep.subr.bf16.mxu1 %v37439_v32 }
 0x714   :  { %29922 = vmatmul.mubr.f32.vlgmr.msra.gmra.mrb[60].mxu1 %v37440_v53  ;;  %v37444_v53 = vld [vmem:[#allocation78_spill] sm:$0xff] }
 0x715   :  { %31319 = vmatpush3.bf16.msra.mxu1 %v37439_v32  ;;  %29928 = vmatprep.mubr.f32.mxu1 %v37433_v23  ;;  %v37445_v25 = vsub.f32 %v37443_v19, %v37444_v53  ;;  %v37455_v53 = vld [vmem:[#allocation175_spill] sm:$0xff] }
 0x716   :  { %31321 = vmatprep.subr.bf16.mxu1 %v37422_v46 }
 0x71b   :  { %v29727_v37 = vpop.f32.mrb[50].mxu1 }
 0x71c   :  { %v26127_v0 = vsub.f32 %v29727_v37, %v37441_v12  ;;  %v17854_v39 = vpop.f32.mrb[51].mxu1  ;;  %29929 = vmatmul.mubr.f32.vlgmr.msra.gmra.mrb[60].mxu1 %v37435_v30  ;;  %v37450_v37 = vld [vmem:[#allocation16_spill] sm:$0xff] }
 0x71d   :  { %v26126_v31 = vsub.f32 %v17854_v39, %v37442_v63  ;;  %31323 = vmatpush3.bf16.msra.mxu1 %v37422_v46  ;;  %29935 = vmatprep.mubr.f32.mxu1 %v37433_v23  ;;  %v26255_v12 = vadd.f32 0.0001, %v37450_v37 }
 0x71e   :  { %v26271_v32 = vadd.f32 %v26127_v0, %v37445_v25  ;;  %31325 = vmatprep.subr.bf16.mxu1 %v37446_v58  ;;  %v37454_v25 = vld [vmem:[#allocation44_spill] sm:$0xff]  ;;  %v37463_v0 = vld [vmem:[#allocation174_spill] sm:$0xff] }
 0x71f   :  { %v26270_v48 = vadd.f32 %v26126_v31, %v37449_v35  ;;  %v37457_v35 = vld [vmem:[#allocation47_spill] sm:$0xff]  ;;  %v37464_v31 = vld [vmem:[#allocation105_spill] sm:$0xff] }
 0x720   :  { %v26287_v34 = vadd.f32 0.0009, %v26271_v32  ;;  %v37465_v32 = vld [vmem:[#allocation84_spill] sm:$0xff] }
 0x721   :  { %v26286_v39 = vadd.f32 0.0009, %v26270_v48  ;;  %v37461_v48 = vld [vmem:[#allocation101_spill] sm:$0xff] }
 0x722   :  { %v35897_v63 = vmul.f32 %v26287_v34, %v26255_v12  ;;  %v37459_v34 = vld [vmem:[#allocation48_spill] sm:$0xff] }
 0x723   :  { %v35899_v46 = vmul.f32 %v26286_v39, %v26254_v13  ;;  %v37460_v13 = vld [vmem:[#allocation49_spill] sm:$0xff]  ;;  %v37466_v39 = vld [vmem:[#allocation83_spill] sm:$0xff] }
 0x724   :  { %37452 = vst [vmem:[#allocation156_spill] sm:$0xff] %v35897_v63  ;;  %29936 = vmatmul.mubr.f32.vlgmr.msra.gmra.mrb[60].mxu1 %v37435_v30  ;;  %v37475_v30 = vld [vmem:[#allocation89_spill] sm:$0xff] }
 0x725   :  { %37453 = vst [vmem:[#allocation120_spill] sm:$0xff] %v35899_v46  ;;  %31327 = vmatpush3.bf16.msra.mxu1 %v37446_v58  ;;  %29942 = vmatprep.mubr.f32.mxu1 %v37454_v25  ;;  %v26256_v23 = vadd.f32 0.0001, %v37475_v30  ;;  %v37482_v30 = vld [vmem:[#allocation29_spill] sm:$0xff] }
 0x726   :  { %31329 = vmatprep.subr.bf16.mxu1 %v37455_v53 }
 0x728   :  { %29943 = vmatmul.mubr.f32.vlgmr.msra.gmra.mrb[62].mxu1 %v37456_v40  ;;  %v37472_v40 = vld [vmem:[#allocation98_spill] sm:$0xff] }
 0x729   :  { %31331 = vmatpush3.bf16.msra.mxu1 %v37455_v53  ;;  %29949 = vmatprep.mubr.f32.mxu1 %v37457_v35 }
 0x72a   :  { %31333 = vmatprep.subr.bf16.mxu1 %v37458_v4 }
 0x730   :  { %29950 = vmatmul.mubr.f32.vlgmr.msra.gmra.mrb[62].mxu1 %v37459_v34 }
 0x731   :  { %31335 = vmatpush3.bf16.msra.mxu1 %v37458_v4  ;;  %29956 = vmatprep.mubr.f32.mxu1 %v37460_v13  ;;  %v37467_v4 = vld [vmem:[#allocation30_spill] sm:$0xff] }
 0x732   :  { %31337 = vmatprep.subr.bf16.mxu1 %v37446_v58  ;;  %v37471_v13 = vld [vmem:[#allocation54_spill] sm:$0xff] }
 0x733   :  { %v37473_v25 = vsub.f32 %v37471_v13, %v37472_v40  ;;  %v37480_v40 = vld [vmem:[#allocation26_spill] sm:$0xff]  ;;  %v37486_v13 = vld [vmem:[#allocation21_spill] sm:$0xff] }
 0x738   :  { %29957 = vmatmul.mubr.f32.vlgmr.msra.gmra.mrb[62].mxu1 %v37461_v48  ;;  %v37470_v48 = vld [vmem:[#allocation117_spill] sm:$0xff] }
 0x739   :  { %31339 = vmatpush3.bf16.msra.mxu1 %v37446_v58  ;;  %29963 = vmatprep.mubr.f32.mxu1 %v37462_v54 }
 0x73a   :  { %31341 = vmatprep.subr.bf16.mxu1 %v37463_v0 }
 0x740   :  { %29964 = vmatmul.mubr.f32.vlgmr.msra.gmra.mrb[62].mxu1 %v37464_v31  ;;  %v37468_v31 = vld [vmem:[#allocation82_spill] sm:$0xff] }
 0x741   :  { %31343 = vmatpush3.bf16.msra.mxu1 %v37463_v0  ;;  %29970 = vmatprep.mubr.f32.mxu1 %v37457_v35  ;;  %v37469_v54 = vsub.f32 %v37467_v4, %v37468_v31  ;;  %v37479_v31 = vld [vmem:[#allocation134_spill] sm:$0xff] }
 0x742   :  { %31345 = vmatprep.subr.bf16.mxu1 %v37446_v58 }
 0x747   :  { %v29769_v19 = vpop.f32.mrb[52].mxu1 }
 0x748   :  { %v26129_v37 = vsub.f32 %v29769_v19, %v37465_v32  ;;  %v18356_v12 = vpop.f32.mrb[53].mxu1  ;;  %29971 = vmatmul.mubr.f32.vlgmr.msra.gmra.mrb[62].mxu1 %v37459_v34  ;;  %v37474_v19 = vld [vmem:[#allocation85_spill] sm:$0xff] }
 0x749   :  { %v26128_v53 = vsub.f32 %v18356_v12, %v37466_v39  ;;  %31347 = vmatpush3.bf16.msra.mxu1 %v37446_v58  ;;  %29977 = vmatprep.mubr.f32.mxu1 %v37457_v35  ;;  %v26257_v32 = vadd.f32 0.0001, %v37474_v19 }
 0x74a   :  { %v26273_v0 = vadd.f32 %v26129_v37, %v37469_v54  ;;  %31373 = vmatprep.subr.bf16.mxu1 %v37470_v48  ;;  %v37478_v54 = vld [vmem:[#allocation22_spill] sm:$0xff]  ;;  %v37487_v37 = vld [vmem:[#allocation131_spill] sm:$0xff] }
 0x74b   :  { %v26272_v46 = vadd.f32 %v26128_v53, %v37473_v25  ;;  %v37481_v25 = vld [vmem:[#allocation19_spill] sm:$0xff]  ;;  %v37488_v53 = vld [vmem:[#allocation25_spill] sm:$0xff] }
 0x74c   :  { %v26289_v63 = vadd.f32 0.0009, %v26273_v0  ;;  %v37489_v0 = vld [vmem:[#allocation91_spill] sm:$0xff] }
 0x74d   :  { %v26288_v12 = vadd.f32 0.0009, %v26272_v46  ;;  %v37485_v46 = vld [vmem:[#allocation24_spill] sm:$0xff] }
 0x74e   :  { %v35935_v39 = vmul.f32 %v26289_v63, %v26257_v32  ;;  %v37483_v63 = vld [vmem:[#allocation23_spill] sm:$0xff] }
 0x74f   :  { %v35937_v58 = vmul.f32 %v26288_v12, %v26256_v23  ;;  %v37484_v23 = vld [vmem:[#allocation20_spill] sm:$0xff]  ;;  %v37490_v12 = vld [vmem:[#allocation107_spill] sm:$0xff] }
 0x750   :  { %37476 = vst [vmem:[#allocation163_spill] sm:$0xff] %v35935_v39  ;;  %29978 = vmatmul.mubr.f32.vlgmr.msra.gmra.mrb[62].mxu1 %v37459_v34  ;;  %v37499_v34 = vld [vmem:[#allocation15_spill] sm:$0xff] }
 0x751   :  { %37477 = vst [vmem:[#allocation157_spill] sm:$0xff] %v35937_v58  ;;  %31375 = vmatpush3.bf16.msra.mxu1 %v37470_v48  ;;  %30152 = vmatprep.mubr.f32.mxu1 %v37478_v54  ;;  %v26258_v35 = vadd.f32 0.0001, %v37499_v34  ;;  %v37504_v34 = vld [vmem:[#allocation17_spill] sm:$0xff] }
 0x752   :  { %31377 = vmatprep.subr.bf16.mxu1 %v37479_v31 }
 0x754   :  { %30153 = vmatmul.mubr.f32.vlgmr.msra.gmra.mrb[64].mxu1 %v37480_v40  ;;  %v37492_v40 = vld [vmem:[#allocation104_spill] sm:$0xff] }
 0x755   :  { %31379 = vmatpush3.bf16.msra.mxu1 %v37479_v31  ;;  %30159 = vmatprep.mubr.f32.mxu1 %v37481_v25  ;;  %v37491_v31 = vld [vmem:[#allocation103_spill] sm:$0xff] }
 0x756   :  { %31381 = vmatprep.subr.bf16.mxu1 %v37482_v30 }
 0x75c   :  { %30160 = vmatmul.mubr.f32.vlgmr.msra.gmra.mrb[64].mxu1 %v37483_v63 }
 0x75d   :  { %31383 = vmatpush3.bf16.msra.mxu1 %v37482_v30  ;;  %30166 = vmatprep.mubr.f32.mxu1 %v37484_v23  ;;  %v37493_v30 = vsub.f32 %v37491_v31, %v37492_v40  ;;  %v37509_v31 = vld [vmem:[#allocation115_spill] sm:$0xff] }
 0x75e   :  { %31385 = vmatprep.subr.bf16.mxu1 %v37470_v48 }
 0x764   :  { %30167 = vmatmul.mubr.f32.vlgmr.msra.gmra.mrb[64].mxu1 %v37485_v46  ;;  %v37494_v46 = vld [vmem:[#allocation36_spill] sm:$0xff] }
 0x765   :  { %31387 = vmatpush3.bf16.msra.mxu1 %v37470_v48  ;;  %30173 = vmatprep.mubr.f32.mxu1 %v37486_v13  ;;  %v37495_v13 = vld [vmem:[#allocation70_spill] sm:$0xff] }
 0x766   :  { %31389 = vmatprep.subr.bf16.mxu1 %v37487_v37 }
 0x76c   :  { %30174 = vmatmul.mubr.f32.vlgmr.msra.gmra.mrb[64].mxu1 %v37488_v53 }
 0x76d   :  { %31391 = vmatpush3.bf16.msra.mxu1 %v37487_v37  ;;  %30180 = vmatprep.mubr.f32.mxu1 %v37481_v25  ;;  %v37496_v37 = vld [vmem:[#allocation87_spill] sm:$0xff] }
 0x76e   :  { %31393 = vmatprep.subr.bf16.mxu1 %v37470_v48  ;;  %v37497_v53 = vsub.f32 %v37495_v13, %v37496_v37  ;;  %v37512_v37 = vld [vmem:[#allocation149_spill] sm:$0xff] }
 0x773   :  { %v29811_v4 = vpop.f32.mrb[54].mxu1 }
 0x774   :  { %v26131_v19 = vsub.f32 %v29811_v4, %v37489_v0  ;;  %v18858_v32 = vpop.f32.mrb[55].mxu1  ;;  %30181 = vmatmul.mubr.f32.vlgmr.msra.gmra.mrb[64].mxu1 %v37483_v63  ;;  %v37498_v4 = vld [vmem:[#allocation129_spill] sm:$0xff] }
 0x775   :  { %v26130_v54 = vsub.f32 %v18858_v32, %v37490_v12  ;;  %31395 = vmatpush3.bf16.msra.mxu1 %v37470_v48  ;;  %30187 = vmatprep.mubr.f32.mxu1 %v37481_v25  ;;  %v26259_v0 = vadd.f32 0.0001, %v37498_v4  ;;  %v37501_v25 = vld [vmem:[#allocation46_spill] sm:$0xff]  ;;  %v37513_v4 = vld [vmem:[#allocation133_spill] sm:$0xff] }
 0x776   :  { %v26275_v23 = vadd.f32 %v26131_v19, %v37493_v30  ;;  %31397 = vmatprep.subr.bf16.mxu1 %v37494_v46  ;;  %v37502_v19 = vld [vmem:[#allocation50_spill] sm:$0xff]  ;;  %v37511_v30 = vld [vmem:[#allocation147_spill] sm:$0xff] }
 0x777   :  { %v26274_v58 = vadd.f32 %v26130_v54, %v37497_v53  ;;  %v37503_v54 = vld [vmem:[#allocation27_spill] sm:$0xff] }
 0x778   :  { %v26291_v39 = vadd.f32 0.0009, %v26275_v23 }
 0x779   :  { %v26290_v32 = vadd.f32 0.0009, %v26274_v58  ;;  %v37507_v58 = vld [vmem:[#allocation34_spill] sm:$0xff] }
 0x77a   :  { %v35973_v12 = vmul.f32 %v26291_v39, %v26259_v0  ;;  %v37505_v39 = vld [vmem:[#allocation28_spill] sm:$0xff]  ;;  %v37514_v0 = vld [vmem:[#allocation125_spill] sm:$0xff] }
 0x77b   :  { %v35975_v48 = vmul.f32 %v26290_v32, %v26258_v35  ;;  %v37506_v35 = vld [vmem:[#allocation33_spill] sm:$0xff]  ;;  %v37515_v32 = vsub.f32 %v37513_v4, %v37514_v0  ;;  %v37527_v4 = vld [vmem:[#allocation176_spill] sm:$0xff] }
 0x77c   :  { %30188 = vmatmul.mubr.f32.vlgmr.msra.gmra.mrb[64].mxu1 %v37483_v63  ;;  %v37508_v63 = vld [vmem:[#allocation39_spill] sm:$0xff] }
 0x77d   :  { %37500 = vst [vmem:[#allocation160_spill] sm:$0xff] %v35975_v48  ;;  %31399 = vmatpush3.bf16.msra.mxu1 %v37494_v46  ;;  %30194 = vmatprep.mubr.f32.mxu1 %v37501_v25 }
 0x77e   :  { %31401 = vmatprep.subr.bf16.mxu1 %v35696_v44 }
 0x780   :  { %30195 = vmatmul.mubr.f32.vlgmr.msra.gmra.mrb[66].mxu1 %v37502_v19  ;;  %v37516_v19 = vld [vmem:[#allocation111_spill] sm:$0xff] }
 0x781   :  { %31403 = vmatpush3.bf16.msra.mxu1 %v35696_v44  ;;  %30201 = vmatprep.mubr.f32.mxu1 %v37503_v54  ;;  %v37510_v44 = vld [vmem:[#allocation42_spill] sm:$0xff] }
 0x782   :  { %31405 = vmatprep.subr.bf16.mxu1 %v37504_v34 }
 0x788   :  { %30202 = vmatmul.mubr.f32.vlgmr.msra.gmra.mrb[66].mxu1 %v37505_v39 }
 0x789   :  { %31407 = vmatpush3.bf16.msra.mxu1 %v37504_v34  ;;  %30208 = vmatprep.mubr.f32.mxu1 %v37506_v35  ;;  %v37517_v34 = vld [vmem:[#allocation109_spill] sm:$0xff]  ;;  %v37518_v35 = vld [vmem:[#allocation126_spill] sm:$0xff] }
 0x78a   :  { %31409 = vmatprep.subr.bf16.mxu1 %v37494_v46 }
 0x790   :  { %30209 = vmatmul.mubr.f32.vlgmr.msra.gmra.mrb[66].mxu1 %v37507_v58  ;;  %v37519_v58 = vsub.f32 %v37517_v34, %v37518_v35  ;;  %v37530_v34 = vld [vmem:[#allocation119_spill] sm:$0xff]  ;;  %v37531_v35 = vsub.f32 %v35753_v15, %v35301_v27 }
 0x791   :  { %31411 = vmatpush3.bf16.msra.mxu1 %v37494_v46  ;;  %30215 = vmatprep.mubr.f32.mxu1 %v37508_v63 }
 0x792   :  { %31413 = vmatprep.subr.bf16.mxu1 %v37509_v31 }
 0x798   :  { %30216 = vmatmul.mubr.f32.vlgmr.msra.gmra.mrb[66].mxu1 %v37510_v44 }
 0x799   :  { %31415 = vmatpush3.bf16.msra.mxu1 %v37509_v31  ;;  %30222 = vmatprep.mubr.f32.mxu1 %v37503_v54  ;;  %v37520_v31 = vld [vmem:[#allocation151_spill] sm:$0xff] }
 0x79a   :  { %31417 = vmatprep.subr.bf16.mxu1 %v37494_v46  ;;  %v26261_v44 = vadd.f32 0.0001, %v37520_v31 }
 0x79f   :  { %v29853_v40 = vpop.f32.mrb[56].mxu1 }
 0x7a0   :  { %v26133_v23 = vsub.f32 %v29853_v40, %v37511_v30  ;;  %v19360_v13 = vpop.f32.mrb[57].mxu1  ;;  %30223 = vmatmul.mubr.f32.vlgmr.msra.gmra.mrb[66].mxu1 %v37505_v39  ;;  %v37521_v30 = vld [vmem:[#allocation152_spill] sm:$0xff] }
 0x7a1   :  { %v26132_v53 = vsub.f32 %v19360_v13, %v37512_v37  ;;  %31419 = vmatpush3.bf16.msra.mxu1 %v37494_v46  ;;  %30229 = vmatprep.mubr.f32.mxu1 %v37503_v54  ;;  %v26260_v48 = vadd.f32 0.0001, %v37521_v30  ;;  %v37522_v54 = vld [vmem:[#allocation57_spill] sm:$0xff] }
 0x7a2   :  { %v26277_v25 = vadd.f32 %v26133_v23, %v37515_v32  ;;  %31421 = vmatprep.subr.bf16.mxu1 %v37516_v19  ;;  %v37523_v23 = vld [vmem:[#allocation58_spill] sm:$0xff] }
 0x7a3   :  { %v26276_v63 = vadd.f32 %v26132_v53, %v37519_v58  ;;  %v37524_v53 = vld [vmem:[#allocation127_spill] sm:$0xff] }
 0x7a4   :  { %v26293_v40 = vadd.f32 0.0009, %v26277_v25 }
 0x7a5   :  { %v26292_v13 = vadd.f32 0.0009, %v26276_v63  ;;  %v37532_v63 = vld [vmem:[#allocation180_spill] sm:$0xff] }
 0x7a6   :  { %v36011_v37 = vmul.f32 %v26293_v40, %v26261_v44  ;;  %v26263_v31 = vadd.f32 0.0001, %v37532_v63  ;;  %v37533_v40 = vld [vmem:[#allocation123_spill] sm:$0xff] }
 0x7a7   :  { %v36013_v46 = vmul.f32 %v26292_v13, %v26260_v48  ;;  %v37525_v48 = vld [vmem:[#allocation53_spill] sm:$0xff]  ;;  %v26262_v30 = vadd.f32 0.0001, %v37533_v40 }
 0x7a8   :  { %30230 = vmatmul.mubr.f32.vlgmr.msra.gmra.mrb[66].mxu1 %v37505_v39  ;;  %v37526_v39 = vld [vmem:[#allocation135_spill] sm:$0xff] }
 0x7a9   :  { %31423 = vmatpush3.bf16.msra.mxu1 %v37516_v19  ;;  %30236 = vmatprep.mubr.f32.mxu1 %v37522_v54 }
 0x7aa   :  { %31425 = vmatprep.subr.bf16.mxu1 %v35708_v16 }
 0x7ac   :  { %30237 = vmatmul.mubr.f32.vlgmr.msra.gmra.mrb[68].mxu1 %v37523_v23 }
 0x7ad   :  { %31427 = vmatpush3.bf16.msra.mxu1 %v35708_v16  ;;  %30243 = vmatprep.mubr.f32.mxu1 %v36970_v60 }
 0x7ae   :  { %31429 = vmatprep.subr.bf16.mxu1 %v37524_v53 }
 0x7b4   :  { %30244 = vmatmul.mubr.f32.vlgmr.msra.gmra.mrb[68].mxu1 %v36978_v62 }
 0x7b5   :  { %31431 = vmatpush3.bf16.msra.mxu1 %v37524_v53  ;;  %30250 = vmatprep.mubr.f32.mxu1 %v37525_v48  ;;  %v37541_v53 = vld [vmem:[#allocation144_spill] sm:$0xff] }
 0x7b6   :  { %31433 = vmatprep.subr.bf16.mxu1 %v37516_v19  ;;  %v26264_v48 = vadd.f32 0.0001, %v37541_v53  ;;  %v37563_v53 = vld [vmem:[#allocation18_spill] sm:$0xff] }
 0x7bc   :  { %30251 = vmatmul.mubr.f32.vlgmr.msra.gmra.mrb[68].mxu1 %v36988_v2  ;;  %v37528_v2 = vld [vmem:[#allocation178_spill] sm:$0xff] }
 0x7bd   :  { %31435 = vmatpush3.bf16.msra.mxu1 %v37516_v19  ;;  %30257 = vmatprep.mubr.f32.mxu1 %v36991_v8  ;;  %v37529_v8 = vsub.f32 %v35749_v3, %v35290_v26  ;;  %v37540_v3 = vld [vmem:[#allocation52_spill] sm:$0xff] }
 0x7be   :  { %31437 = vmatprep.subr.bf16.mxu1 %v37526_v39  ;;  %v26265_v15 = vadd.f32 0.0001, %v37540_v3 }
 0x7c4   :  { %30258 = vmatmul.mubr.f32.vlgmr.msra.gmra.mrb[68].mxu1 %v36996_v5 }
 0x7c5   :  { %31439 = vmatpush3.bf16.msra.mxu1 %v37526_v39  ;;  %30264 = vmatprep.mubr.f32.mxu1 %v36970_v60 }
 0x7c6   :  { %31441 = vmatprep.subr.bf16.mxu1 %v37516_v19 }
 0x7cb   :  { %v29895_v16 = vpop.f32.mrb[58].mxu1 }
 0x7cc   :  { %v26135_v0 = vsub.f32 %v29895_v16, %v37527_v4  ;;  %v19862_v32 = vpop.f32.mrb[59].mxu1  ;;  %30265 = vmatmul.mubr.f32.vlgmr.msra.gmra.mrb[68].mxu1 %v36978_v62 }
 0x7cd   :  { %v26134_v25 = vsub.f32 %v19862_v32, %v37528_v2  ;;  %31443 = vmatpush3.bf16.msra.mxu1 %v37516_v19  ;;  %30271 = vmatprep.mubr.f32.mxu1 %v36970_v60  ;;  %v37534_v60 = vld [vmem:[#allocation55_spill] sm:$0xff] }
 0x7ce   :  { %v26279_v5 = vadd.f32 %v26135_v0, %v37529_v8  ;;  %31445 = vmatprep.subr.bf16.mxu1 %v37530_v34  ;;  %v37558_v8 = vld [vmem:[#allocation154_spill] sm:$0xff] }
 0x7cf   :  { %v26278_v58 = vadd.f32 %v26134_v25, %v37531_v35  ;;  %v37559_v35 = vld [vmem:[#allocation121_spill] sm:$0xff] }
 0x7d0   :  { %v26295_v44 = vadd.f32 0.0009, %v26279_v5 }
 0x7d1   :  { %v26294_v13 = vadd.f32 0.0009, %v26278_v58  ;;  %v26157_v58 = vmul.f32 2.0, %v37559_v35 }
 0x7d2   :  { %v36049_v54 = vmul.f32 %v26295_v44, %v26263_v31  ;;  %v37560_v44 = vld [vmem:[#allocation76_spill] sm:$0xff] }
 0x7d3   :  { %v36051_v19 = vmul.f32 %v26294_v13, %v26262_v30  ;;  %v26156_v40 = vmul.f32 2.0, %v37560_v44 }
 0x7d4   :  { %30272 = vmatmul.mubr.f32.vlgmr.msra.gmra.mrb[68].mxu1 %v36978_v62 }
 0x7d5   :  { %31447 = vmatpush3.bf16.msra.mxu1 %v37530_v34  ;;  %30278 = vmatprep.mubr.f32.mxu1 %v37003_v28  ;;  %v37535_v28 = vld [vmem:[#allocation142_spill] sm:$0xff] }
 0x7d6   :  { %31449 = vmatprep.subr.bf16.mxu1 %v35717_v17 }
 0x7d8   :  { %30279 = vmatmul.mubr.f32.vlgmr.msra.gmra.mrb[70].mxu1 %v37218_v42  ;;  %v37536_v42 = vld [vmem:[#allocation143_spill] sm:$0xff] }
 0x7d9   :  { %31451 = vmatpush3.bf16.msra.mxu1 %v35717_v17  ;;  %30285 = vmatprep.mubr.f32.mxu1 %v37220_v41 }
 0x7da   :  { %31453 = vmatprep.subr.bf16.mxu1 %v37534_v60 }
 0x7e0   :  { %30286 = vmatmul.mubr.f32.vlgmr.msra.gmra.mrb[70].mxu1 %v37225_v56 }
 0x7e1   :  { %31455 = vmatpush3.bf16.msra.mxu1 %v37534_v60  ;;  %30292 = vmatprep.mubr.f32.mxu1 %v37227_v47  ;;  %v37561_v60 = vld [vmem:[#allocation136_spill] sm:$0xff] }
 0x7e2   :  { %31457 = vmatprep.subr.bf16.mxu1 %v37530_v34 }
 0x7e8   :  { %30293 = vmatmul.mubr.f32.vlgmr.msra.gmra.mrb[70].mxu1 %v37231_v49  ;;  %v37537_v49 = vsub.f32 %v35781_v51, %v35376_v20  ;;  %v37546_v51 = vsub.f32 %v35817_v6, %v37404_v22  ;;  %v37552_v6 = vld [vmem:[#allocation37_spill] sm:$0xff]  ;;  %v37554_v22 = vld [vmem:[#allocation74_spill] sm:$0xff] }
 0x7e9   :  { %31459 = vmatpush3.bf16.msra.mxu1 %v37530_v34  ;;  %30299 = vmatprep.mubr.f32.mxu1 %v37233_v59 }
 0x7ea   :  { %31461 = vmatprep.subr.bf16.mxu1 %v35713_v43 }
 0x7f0   :  { %30300 = vmatmul.mubr.f32.vlgmr.msra.gmra.mrb[70].mxu1 %v37238_v45  ;;  %v37538_v45 = vld [vmem:[#allocation141_spill] sm:$0xff] }
 0x7f1   :  { %31463 = vmatpush3.bf16.msra.mxu1 %v35713_v43  ;;  %30306 = vmatprep.mubr.f32.mxu1 %v37220_v41  ;;  %v37539_v43 = vsub.f32 %v35785_v55, %v35388_v50 }
 0x7f2   :  { %31465 = vmatprep.subr.bf16.mxu1 %v37530_v34 }
 0x7f7   :  { %v29937_v62 = vpop.f32.mrb[60].mxu1 }
 0x7f8   :  { %v26137_v26 = vsub.f32 %v29937_v62, %v37535_v28  ;;  %v20364_v27 = vpop.f32.mrb[61].mxu1  ;;  %30307 = vmatmul.mubr.f32.vlgmr.msra.gmra.mrb[70].mxu1 %v37225_v56 }
 0x7f9   :  { %v26136_v47 = vsub.f32 %v20364_v27, %v37536_v42  ;;  %31467 = vmatpush3.bf16.msra.mxu1 %v37530_v34  ;;  %30313 = vmatprep.mubr.f32.mxu1 %v37220_v41  ;;  %v26348_v34 = vlaneseq  ;;  %v26172_v42 = vadd.f32 0.0001, %v26156_v40  ;;  %v37578_v40 = vld [vmem:[#allocation44_spill] sm:$0xff] }
 0x7fa   :  { %v26281_v59 = vadd.f32 %v26137_v26, %v37537_v49  ;;  %31469 = vmatprep.subr.bf16.mxu1 %v37538_v45  ;;  %v26173_v26 = vadd.f32 0.0001, %v26157_v58 }
 0x7fb   :  { %v26280_v17 = vadd.f32 %v26136_v47, %v37539_v43  ;;  %v36159_v62 = vand.u32 127, %v26348_v34 }
 0x7fc   :  { %v26297_v23 = vadd.f32 0.0009, %v26281_v59 }
 0x7fd   :  { %v26296_v39 = vadd.f32 0.0009, %v26280_v17  ;;  %vm26350_vm1 = vcmp.lt.s32.totalorder %v36159_v62, 16 }
 0x7fe   :  { %v36087_v16 = vmul.f32 %v26297_v23, %v26265_v15  ;;  %v37562_v15 = vld [vmem:[#allocation40_spill] sm:$0xff] }
 0x7ff   :  { %v36089_v4 = vmul.f32 %v26296_v39, %v26264_v48 }
 0x800   :  { %30314 = vmatmul.mubr.f32.vlgmr.msra.gmra.mrb[70].mxu1 %v37225_v56  ;;  %v37542_v56 = vld [vmem:[#allocation145_spill] sm:$0xff] }
 0x801   :  { %31471 = vmatpush3.bf16.msra.mxu1 %v37538_v45  ;;  %30320 = vmatprep.mubr.f32.mxu1 %v37257_v24  ;;  %v37543_v24 = vld [vmem:[#allocation62_spill] sm:$0xff] }
 0x802   :  { %31473 = vmatprep.subr.bf16.mxu1 %v35722_v61 }
 0x804   :  { %30321 = vmatmul.mubr.f32.vlgmr.msra.gmra.mrb[72].mxu1 %v37260_v21 }
 0x805   :  { %31475 = vmatpush3.bf16.msra.mxu1 %v35722_v61  ;;  %30327 = vmatprep.mubr.f32.mxu1 %v37262_v29  ;;  %v37545_v61 = vld [vmem:[#allocation73_spill] sm:$0xff] }
 0x806   :  { %31477 = vmatprep.subr.bf16.mxu1 %v35715_v11 }
 0x80c   :  { %30328 = vmatmul.mubr.f32.vlgmr.msra.gmra.mrb[72].mxu1 %v37267_v38 }
 0x80d   :  { %31479 = vmatpush3.bf16.msra.mxu1 %v35715_v11  ;;  %30334 = vmatprep.mubr.f32.mxu1 %v37398_v9  ;;  %v37544_v11 = vsub.f32 %v35813_v36, %v37403_v52  ;;  %v37547_v9 = vld [vmem:[#allocation132_spill] sm:$0xff]  ;;  %v37551_v52 = vld [vmem:[#allocation71_spill] sm:$0xff] }
 0x80e   :  { %31481 = vmatprep.subr.bf16.mxu1 %v37538_v45  ;;  %v37550_v36 = vld [vmem:[#allocation56_spill] sm:$0xff] }
 0x814   :  { %30335 = vmatmul.mubr.f32.vlgmr.msra.gmra.mrb[72].mxu1 %v37399_v10  ;;  %v26267_v10 = vadd.f32 0.0001, %v37547_v9 }
 0x815   :  { %31483 = vmatpush3.bf16.msra.mxu1 %v37538_v45  ;;  %30341 = vmatprep.mubr.f32.mxu1 %v37400_v7 }
 0x816   :  { %31485 = vmatprep.subr.bf16.mxu1 %v35719_v18 }
 0x81c   :  { %30342 = vmatmul.mubr.f32.vlgmr.msra.gmra.mrb[72].mxu1 %v37402_v14  ;;  %v37548_v14 = vld [vmem:[#allocation64_spill] sm:$0xff] }
 0x81d   :  { %31487 = vmatpush3.bf16.msra.mxu1 %v35719_v18  ;;  %30348 = vmatprep.mubr.f32.mxu1 %v37262_v29  ;;  %v26266_v0 = vadd.f32 0.0001, %v37548_v14 }
 0x81e   :  { %31489 = vmatprep.subr.bf16.mxu1 %v37538_v45 }
 0x823   :  { %v29979_v41 = vpop.f32.mrb[62].mxu1 }
 0x824   :  { %v26139_v20 = vsub.f32 %v29979_v41, %v37542_v56  ;;  %v20866_v50 = vpop.f32.mrb[63].mxu1  ;;  %30349 = vmatmul.mubr.f32.vlgmr.msra.gmra.mrb[72].mxu1 %v37267_v38  ;;  %v37564_v41 = vld [vmem:[#allocation100_spill] sm:$0xff]  ;;  %v37565_v56 = vld [vmem:[#allocation43_spill] sm:$0xff] }
 0x825   :  { %v26138_v21 = vsub.f32 %v20866_v50, %v37543_v24  ;;  %31491 = vmatpush3.bf16.msra.mxu1 %v37538_v45  ;;  %30355 = vmatprep.mubr.f32.mxu1 %v37262_v29  ;;  %v37549_v29 = vld [vmem:[#allocation41_spill] sm:$0xff]  ;;  %v37568_v24 = vld [vmem:[#allocation94_spill] sm:$0xff] }
 0x826   :  { %v26283_v18 = vadd.f32 %v26139_v20, %v37544_v11  ;;  %31493 = vmatprep.subr.bf16.mxu1 %v37545_v61  ;;  %v37566_v20 = vld [vmem:[#allocation138_spill] sm:$0xff]  ;;  %v37567_v50 = vld [vmem:[#allocation93_spill] sm:$0xff]  ;;  %v37570_v11 = vld [vmem:[#allocation96_spill] sm:$0xff] }
 0x827   :  { %v26282_v55 = vadd.f32 %v26138_v21, %v37546_v51  ;;  %v37569_v21 = vld [vmem:[#allocation95_spill] sm:$0xff]  ;;  %v37573_v51 = vld [vmem:[#allocation156_spill] sm:$0xff] }
 0x828   :  { %v26299_v7 = vadd.f32 0.0009, %v26283_v18  ;;  %v37571_v18 = vld [vmem:[#allocation130_spill] sm:$0xff] }
 0x829   :  { %v26298_v32 = vadd.f32 0.0009, %v26282_v55  ;;  %v37574_v55 = vld [vmem:[#allocation120_spill] sm:$0xff] }
 0x82a   :  { %v36125_v2 = vmul.f32 %v26299_v7, %v26267_v10  ;;  %v37575_v10 = vld [vmem:[#allocation113_spill] sm:$0xff] }
 0x82b   :  { %v36127_v25 = vmul.f32 %v26298_v32, %v26266_v0  ;;  %v26159_v7 = vmul.f32 2.0, %v37575_v10  ;;  %v37576_v32 = vld [vmem:[#allocation80_spill] sm:$0xff] }
 0x82c   :  { %30356 = vmatmul.mubr.f32.vlgmr.msra.gmra.mrb[72].mxu1 %v37267_v38  ;;  %v37553_v38 = vld [vmem:[#allocation75_spill] sm:$0xff] }
 0x82d   :  { %31495 = vmatpush3.bf16.msra.mxu1 %v37545_v61  ;;  %30362 = vmatprep.mubr.f32.mxu1 %v37406_v33  ;;  %v37555_v33 = vld [vmem:[#allocation137_spill] sm:$0xff] }
 0x82e   :  { %31497 = vmatprep.subr.bf16.mxu1 %v35731_v1 }
 0x830   :  { %30363 = vmatmul.mubr.f32.vlgmr.msra.gmra.mrb[74].mxu1 %v37408_v57  ;;  %v37557_v57 = vld [vmem:[#allocation159_spill] sm:$0xff] }
 0x831   :  { %31499 = vmatpush3.bf16.msra.mxu1 %v35731_v1  ;;  %30369 = vmatprep.mubr.f32.mxu1 %v37549_v29  ;;  %v37556_v1 = vld [vmem:[#allocation79_spill] sm:$0xff]  ;;  %32371 = vrcp.f32 %v37557_v57 }
 0x832   :  { %31501 = vmatprep.subr.bf16.mxu1 %v37550_v36  ;;  %32373 = vrcp.f32 %v37558_v8 }
 0x833   :  { %32375 = vrcp.f32 %v37573_v51 }
 0x834   :  { %32377 = vrcp.f32 %v37574_v55 }
 0x838   :  { %30370 = vmatmul.mubr.f32.vlgmr.msra.gmra.mrb[74].mxu1 %v37551_v52 }
 0x839   :  { %31503 = vmatpush3.bf16.msra.mxu1 %v37550_v36  ;;  %30376 = vmatprep.mubr.f32.mxu1 %v37552_v6  ;;  %v37577_v6 = vld [vmem:[#allocation128_spill] sm:$0xff] }
 0x83a   :  { %31505 = vmatprep.subr.bf16.mxu1 %v37545_v61 }
 0x83b   :  { %v32372_v59 = vpop.eup %32371 }
 0x83c   :  { %v32374_v43 = vpop.eup %32373 }
 0x83d   :  { %v32376_v34 = vpop.eup %32375 }
 0x83e   :  { %v32378_v58 = vpop.eup %32377 }
 0x840   :  { %30377 = vmatmul.mubr.f32.vlgmr.msra.gmra.mrb[74].mxu1 %v37553_v38 }
 0x841   :  { %31507 = vmatpush3.bf16.msra.mxu1 %v37545_v61  ;;  %30383 = vmatprep.mubr.f32.mxu1 %v37554_v22  ;;  %v26175_v22 = vadd.f32 0.0001, %v26159_v7 }
 0x842   :  { %31509 = vmatprep.subr.bf16.mxu1 %v37555_v33 }
 0x848   :  { %30384 = vmatmul.mubr.f32.vlgmr.msra.gmra.mrb[74].mxu1 %v37556_v1 }
 0x849   :  { %31511 = vmatpush3.bf16.msra.mxu1 %v37555_v33  ;;  %30390 = vmatprep.mubr.f32.mxu1 %v37549_v29 }
 0x84a   :  { %31513 = vmatprep.subr.bf16.mxu1 %v37545_v61 }
 0x84f   :  { %v30189_v5 = vpop.f32.mrb[64].mxu1 }
 0x850   :  { %v26141_v63 = vsub.f32 %v30189_v5, %v37559_v35  ;;  %v22536_v31 = vpop.f32.mrb[65].mxu1  ;;  %30391 = vmatmul.mubr.f32.vlgmr.msra.gmra.mrb[74].mxu1 %v37551_v52 }
 0x851   :  { %v26140_v30 = vsub.f32 %v22536_v31, %v37560_v44  ;;  %31515 = vmatpush3.bf16.msra.mxu1 %v37545_v61  ;;  %30397 = vmatprep.mubr.f32.mxu1 %v37549_v29  ;;  %v37572_v61 = vld [vmem:[#allocation99_spill] sm:$0xff]  ;;  %v26158_v29 = vmul.f32 2.0, %v37576_v32 }
 0x852   :  { %v26189_v13 = vmul.f32 2.0, %v26141_v63  ;;  %31517 = vmatprep.subr.bf16.mxu1 %v37561_v60 }
 0x853   :  { %v26188_v28 = vmul.f32 2.0, %v26140_v30  ;;  %v26174_v57 = vadd.f32 0.0001, %v26158_v29 }
 0x854   :  { %v26205_v27 = vadd.f32 0.0009, %v26189_v13  ;;  %v37579_v13 = vld [vmem:[#allocation146_spill] sm:$0xff] }
 0x855   :  { %v26204_v47 = vadd.f32 0.0009, %v26188_v28 }
 0x856   :  { %v26221_v49 = vmul.f32 %v26205_v27, %v26173_v26  ;;  %v37580_v27 = vld [vmem:[#allocation106_spill] sm:$0xff] }
 0x857   :  { %v26220_v45 = vmul.f32 %v26204_v47, %v26172_v42  ;;  %v37581_v42 = vld [vmem:[#allocation47_spill] sm:$0xff] }
 0x858   :  { %v26333_v17 = vmul.f32 %v32372_v59, %v26221_v49  ;;  %30398 = vmatmul.mubr.f32.vlgmr.msra.gmra.mrb[74].mxu1 %v37551_v52  ;;  %v37582_v49 = vld [vmem:[#allocation139_spill] sm:$0xff] }
 0x859   :  { %v26332_v3 = vmul.f32 %v32374_v43, %v26220_v45  ;;  %31519 = vmatpush3.bf16.msra.mxu1 %v37561_v60  ;;  %30404 = vmatprep.mubr.f32.mxu1 %v37562_v15  ;;  %v37583_v15 = vld [vmem:[#allocation48_spill] sm:$0xff] }
 0x85a   :  { %v26352_v23 = vsel %vm26350_vm1, %v26333_v17, 0.0  ;;  %31521 = vmatprep.subr.bf16.mxu1 %v37563_v53 }
 0x85b   :  { %v26351_v48 = vsel %vm26350_vm1, %v26332_v3, 0.0 }
 0x85c   :  { %v26367_v39 = vadd.f32 %v26352_v23, %v26351_v48  ;;  %30405 = vmatmul.mubr.f32.vlgmr.msra.gmra.mrb[76].mxu1 %v37564_v41  ;;  %v37584_v23 = vld [vmem:[#allocation49_spill] sm:$0xff] }
 0x85d   :  { %31523 = vmatpush3.bf16.msra.mxu1 %v37563_v53  ;;  %30411 = vmatprep.mubr.f32.mxu1 %v37565_v56 }
 0x85e   :  { %31525 = vmatprep.subr.bf16.mxu1 %v37566_v20  ;;  %v26368_v33 = vrot.slane %v26367_v39, 4 }
 0x860   :  { %v26369_v63 = vadd.f32 %v26368_v33, %v26367_v39 }
 0x862   :  { %v26370_v28 = vrot.slane %v26369_v63, 2 }
 0x864   :  { %30412 = vmatmul.mubr.f32.vlgmr.msra.gmra.mrb[76].mxu1 %v37567_v50  ;;  %v26371_v59 = vadd.f32 %v26370_v28, %v26369_v63 }
 0x865   :  { %31527 = vmatpush3.bf16.msra.mxu1 %v37566_v20  ;;  %30418 = vmatprep.mubr.f32.mxu1 %v37568_v24  ;;  %v37586_v20 = vld [vmem:[#allocation102_spill] sm:$0xff]  ;;  %v37588_v24 = vld [vmem:[#allocation105_spill] sm:$0xff] }
 0x866   :  { %31529 = vmatprep.subr.bf16.mxu1 %v37561_v60  ;;  %v26372_v17 = vrot.slane %v26371_v59, 1 }
 0x868   :  { %v26373_v48 = vadd.f32 %v26372_v17, %v26371_v59 }
 0x86c   :  { %30419 = vmatmul.mubr.f32.vlgmr.msra.gmra.mrb[76].mxu1 %v37569_v21  ;;  %v37589_v21 = vld [vmem:[#allocation163_spill] sm:$0xff] }
 0x86d   :  { %31531 = vmatpush3.bf16.msra.mxu1 %v37561_v60  ;;  %30425 = vmatprep.mubr.f32.mxu1 %v37570_v11  ;;  %32379 = vrcp.f32 %v37589_v21  ;;  %v37590_v11 = vld [vmem:[#allocation157_spill] sm:$0xff] }
 0x86e   :  { %31533 = vmatprep.subr.bf16.mxu1 %v37571_v18  ;;  %32381 = vrcp.f32 %v37590_v11 }
 0x86f   :  { %32383 = vrcp.f32 %v35973_v12 }
 0x874   :  { %30426 = vmatmul.mubr.f32.vlgmr.msra.gmra.mrb[76].mxu1 %v37572_v61  ;;  %v37591_v61 = vld [vmem:[#allocation97_spill] sm:$0xff] }
 0x875   :  { %31535 = vmatpush3.bf16.msra.mxu1 %v37571_v18  ;;  %30432 = vmatprep.mubr.f32.mxu1 %v37565_v56  ;;  %v26161_v51 = vmul.f32 2.0, %v37591_v61 }
 0x876   :  { %31537 = vmatprep.subr.bf16.mxu1 %v37561_v60 }
 0x877   :  { %v26177_v29 = vadd.f32 0.0001, %v26161_v51  ;;  %v32380_v33 = vpop.eup %32379 }
 0x87b   :  { %v30231_v9 = vpop.f32.mrb[66].mxu1 }
 0x87c   :  { %v26143_v14 = vsub.f32 %v30231_v9, %v37575_v10  ;;  %v23038_v0 = vpop.f32.mrb[67].mxu1  ;;  %30433 = vmatmul.mubr.f32.vlgmr.msra.gmra.mrb[76].mxu1 %v37567_v50  ;;  %v37592_v10 = vld [vmem:[#allocation45_spill] sm:$0xff] }
 0x87d   :  { %v26142_v36 = vsub.f32 %v23038_v0, %v37576_v32  ;;  %31539 = vmatpush3.bf16.msra.mxu1 %v37561_v60  ;;  %30439 = vmatprep.mubr.f32.mxu1 %v37565_v56  ;;  %v37585_v56 = vld [vmem:[#allocation101_spill] sm:$0xff]  ;;  %v26160_v7 = vmul.f32 2.0, %v37592_v10 }
 0x87e   :  { %v26191_v52 = vmul.f32 2.0, %v26143_v14  ;;  %31541 = vmatprep.subr.bf16.mxu1 %v37577_v6 }
 0x87f   :  { %v26190_v38 = vmul.f32 2.0, %v26142_v36 }
 0x880   :  { %v26207_v1 = vadd.f32 0.0009, %v26191_v52  ;;  %v26176_v52 = vadd.f32 0.0001, %v26160_v7 }
 0x881   :  { %v26206_v8 = vadd.f32 0.0009, %v26190_v38 }
 0x882   :  { %v26223_v5 = vmul.f32 %v26207_v1, %v26175_v22 }
 0x883   :  { %v26222_v35 = vmul.f32 %v26206_v8, %v26174_v57  ;;  %v32382_v57 = vpop.eup %32381 }
 0x884   :  { %v26335_v31 = vmul.f32 %v32376_v34, %v26223_v5  ;;  %30440 = vmatmul.mubr.f32.vlgmr.msra.gmra.mrb[76].mxu1 %v37567_v50  ;;  %v37587_v50 = vld [vmem:[#allocation140_spill] sm:$0xff]  ;;  %v32384_v12 = vpop.eup %32383 }
 0x885   :  { %v26334_v44 = vmul.f32 %v32378_v58, %v26222_v35  ;;  %31543 = vmatpush3.bf16.msra.mxu1 %v37577_v6  ;;  %30446 = vmatprep.mubr.f32.mxu1 %v37578_v40 }
 0x886   :  { %v26354_v30 = vsel %vm26350_vm1, %v26335_v31, 0.0  ;;  %31545 = vmatprep.subr.bf16.mxu1 %v37579_v13 }
 0x887   :  { %v26353_v60 = vsel %vm26350_vm1, %v26334_v44, 0.0 }
 0x888   :  { %v26374_v26 = vadd.f32 %v26354_v30, %v26353_v60  ;;  %30447 = vmatmul.mubr.f32.vlgmr.msra.gmra.mrb[78].mxu1 %v37580_v27  ;;  %v37593_v60 = vld [vmem:[#allocation160_spill] sm:$0xff] }
 0x889   :  { %31547 = vmatpush3.bf16.msra.mxu1 %v37579_v13  ;;  %30453 = vmatprep.mubr.f32.mxu1 %v37581_v42  ;;  %32385 = vrcp.f32 %v37593_v60 }
 0x88a   :  { %v26375_v47 = vrot.slane %v26374_v26, 4  ;;  %31549 = vmatprep.subr.bf16.mxu1 %v37582_v49  ;;  %32387 = vrcp.f32 %v36011_v37 }
 0x88b   :  { %32389 = vrcp.f32 %v36013_v46 }
 0x88c   :  { %v26376_v45 = vadd.f32 %v26375_v47, %v26374_v26  ;;  %v37594_v26 = vld [vmem:[#allocation92_spill] sm:$0xff]  ;;  %32391 = vrcp.f32 %v36049_v54 }
 0x88d   :  { %v26163_v27 = vmul.f32 2.0, %v37594_v26  ;;  %32393 = vrcp.f32 %v36051_v19 }
 0x88e   :  { %v26377_v43 = vrot.slane %v26376_v45, 2  ;;  %32395 = vrcp.f32 %v36087_v16 }
 0x88f   :  { %32397 = vrcp.f32 %v36089_v4 }
 0x890   :  { %v26378_v3 = vadd.f32 %v26377_v43, %v26376_v45  ;;  %30454 = vmatmul.mubr.f32.vlgmr.msra.gmra.mrb[78].mxu1 %v37583_v15  ;;  %32399 = vrcp.f32 %v36125_v2 }
 0x891   :  { %31551 = vmatpush3.bf16.msra.mxu1 %v37582_v49  ;;  %30460 = vmatprep.mubr.f32.mxu1 %v37584_v23  ;;  %v37595_v49 = vld [vmem:[#allocation108_spill] sm:$0xff]  ;;  %32401 = vrcp.f32 %v36127_v25 }
 0x892   :  { %v26379_v53 = vrot.slane %v26378_v3, 1  ;;  %31553 = vmatprep.subr.bf16.mxu1 %v37577_v6  ;;  %v26162_v59 = vmul.f32 2.0, %v37595_v49 }
 0x894   :  { %v26380_v39 = vadd.f32 %v26379_v53, %v26378_v3  ;;  %v26179_v3 = vadd.f32 0.0001, %v26163_v27  ;;  %v26178_v23 = vadd.f32 0.0001, %v26162_v59 }
 0x896   :  { %v26432_v41 = vsel %vm26431_vm2, %v26380_v39, %v26373_v48 }
 0x898   :  { %30461 = vmatmul.mubr.f32.vlgmr.msra.gmra.mrb[78].mxu1 %v37585_v56 }
 0x899   :  { %31555 = vmatpush3.bf16.msra.mxu1 %v37577_v6  ;;  %30467 = vmatprep.mubr.f32.mxu1 %v37586_v20 }
 0x89a   :  { %31557 = vmatprep.subr.bf16.mxu1 %v37587_v50 }
 0x8a0   :  { %30468 = vmatmul.mubr.f32.vlgmr.msra.gmra.mrb[78].mxu1 %v37588_v24 }
 0x8a1   :  { %31559 = vmatpush3.bf16.msra.mxu1 %v37587_v50  ;;  %30474 = vmatprep.mubr.f32.mxu1 %v37581_v42 }
 0x8a2   :  { %31561 = vmatprep.subr.bf16.mxu1 %v37577_v6 }
 0x8a7   :  { %v30273_v18 = vpop.f32.mrb[68].mxu1 }
 0x8a8   :  { %v26145_v55 = vsub.f32 %v30273_v18, %v37591_v61  ;;  %v23540_v9 = vpop.f32.mrb[69].mxu1  ;;  %30475 = vmatmul.mubr.f32.vlgmr.msra.gmra.mrb[78].mxu1 %v37583_v15 }
 0x8a9   :  { %v26144_v14 = vsub.f32 %v23540_v9, %v37592_v10  ;;  %31563 = vmatpush3.bf16.msra.mxu1 %v37577_v6  ;;  %30481 = vmatprep.mubr.f32.mxu1 %v37581_v42 }
 0x8aa   :  { %v26193_v0 = vmul.f32 2.0, %v26145_v55 }
 0x8ab   :  { %v26192_v32 = vmul.f32 2.0, %v26144_v14  ;;  %v37596_v14 = vld [vmem:[#allocation148_spill] sm:$0xff] }
 0x8ac   :  { %v26209_v36 = vadd.f32 0.0009, %v26193_v0  ;;  %v26165_v0 = vmul.f32 2.0, %v37596_v14 }
 0x8ad   :  { %v26208_v38 = vadd.f32 0.0009, %v26192_v32 }
 0x8ae   :  { %v26225_v22 = vmul.f32 %v26209_v36, %v26177_v29  ;;  %v37597_v36 = vld [vmem:[#allocation150_spill] sm:$0xff] }
 0x8af   :  { %v26224_v1 = vmul.f32 %v26208_v38, %v26176_v52  ;;  %v26164_v52 = vmul.f32 2.0, %v37597_v36 }
 0x8b0   :  { %v26337_v8 = vmul.f32 %v32380_v33, %v26225_v22  ;;  %30482 = vmatmul.mubr.f32.vlgmr.msra.gmra.mrb[78].mxu1 %v37583_v15 }
 0x8b1   :  { %v26336_v5 = vmul.f32 %v32382_v57, %v26224_v1  ;;  %v26181_v1 = vadd.f32 0.0001, %v26165_v0  ;;  %v37600_v0 = vld [vmem:[#allocation66_spill] sm:$0xff] }
 0x8b2   :  { %v26356_v34 = vsel %vm26350_vm1, %v26337_v8, 0.0  ;;  %v26180_v8 = vadd.f32 0.0001, %v26164_v52  ;;  %v37601_v52 = vld [vmem:[#allocation59_spill] sm:$0xff] }
 0x8b3   :  { %v26355_v6 = vsel %vm26350_vm1, %v26336_v5, 0.0 }
 0x8b4   :  { %v26381_v35 = vadd.f32 %v26356_v34, %v26355_v6 }
 0x8b6   :  { %v26382_v58 = vrot.slane %v26381_v35, 4 }
 0x8b8   :  { %v26383_v63 = vadd.f32 %v26382_v58, %v26381_v35 }
 0x8ba   :  { %v26384_v31 = vrot.slane %v26383_v63, 2 }
 0x8bc   :  { %v26385_v44 = vadd.f32 %v26384_v31, %v26383_v63 }
 0x8be   :  { %v26386_v40 = vrot.slane %v26385_v44, 1 }
 0x8c0   :  { %v26387_v30 = vadd.f32 %v26386_v40, %v26385_v44 }
 0x8c2   :  { %v26434_v13 = vsel %vm26433_vm3, %v26387_v30, %v26432_v41  ;;  %v32386_v41 = vpop.eup %32385 }
 0x8c3   :  { %v32388_v37 = vpop.eup %32387 }
 0x8c4   :  { %v32390_v46 = vpop.eup %32389 }
 0x8c5   :  { %v32392_v54 = vpop.eup %32391 }
 0x8c6   :  { %v32394_v19 = vpop.eup %32393 }
 0x8c7   :  { %v32396_v16 = vpop.eup %32395 }
 0x8c8   :  { %v32398_v4 = vpop.eup %32397 }
 0x8c9   :  { %v32400_v2 = vpop.eup %32399 }
 0x8ca   :  { %v32402_v25 = vpop.eup %32401 }
 0x8d3   :  { %v30315_v28 = vpop.f32.mrb[70].mxu1 }
 0x8d4   :  { %v26147_v42 = vsub.f32 %v30315_v28, %v37594_v26  ;;  %v24042_v47 = vpop.f32.mrb[71].mxu1 }
 0x8d5   :  { %v26146_v45 = vsub.f32 %v24042_v47, %v37595_v49  ;;  %v37598_v47 = vld [vmem:[#allocation177_spill] sm:$0xff] }
 0x8d6   :  { %v26195_v43 = vmul.f32 2.0, %v26147_v42  ;;  %v26167_v49 = vmul.f32 2.0, %v37598_v47 }
 0x8d7   :  { %v26194_v17 = vmul.f32 2.0, %v26146_v45 }
 0x8d8   :  { %v26211_v15 = vadd.f32 0.0009, %v26195_v43  ;;  %v37599_v43 = vld [vmem:[#allocation179_spill] sm:$0xff] }
 0x8d9   :  { %v26210_v53 = vadd.f32 0.0009, %v26194_v17  ;;  %v26166_v17 = vmul.f32 2.0, %v37599_v43 }
 0x8da   :  { %v26227_v48 = vmul.f32 %v26211_v15, %v26179_v3 }
 0x8db   :  { %v26226_v39 = vmul.f32 %v26210_v53, %v26178_v23  ;;  %v26183_v53 = vadd.f32 0.0001, %v26167_v49 }
 0x8dc   :  { %v26339_v56 = vmul.f32 %v32384_v12, %v26227_v48  ;;  %v26182_v12 = vadd.f32 0.0001, %v26166_v17 }
 0x8dd   :  { %v26338_v20 = vmul.f32 %v32386_v41, %v26226_v39 }
 0x8de   :  { %v26358_v50 = vsel %vm26350_vm1, %v26339_v56, 0.0 }
 0x8df   :  { %v26357_v24 = vsel %vm26350_vm1, %v26338_v20, 0.0 }
 0x8e0   :  { %v26388_v21 = vadd.f32 %v26358_v50, %v26357_v24 }
 0x8e2   :  { %v26389_v11 = vrot.slane %v26388_v21, 4 }
 0x8e4   :  { %v26390_v18 = vadd.f32 %v26389_v11, %v26388_v21 }
 0x8e6   :  { %v26391_v61 = vrot.slane %v26390_v18, 2 }
 0x8e8   :  { %v26392_v51 = vadd.f32 %v26391_v61, %v26390_v18 }
 0x8ea   :  { %v26393_v55 = vrot.slane %v26392_v51, 1 }
 0x8ec   :  { %v26394_v9 = vadd.f32 %v26393_v55, %v26392_v51 }
 0x8ee   :  { %v26436_v10 = vsel %vm26435_vm4, %v26394_v9, %v26434_v13 }
 0x8ff   :  { %v30357_v7 = vpop.f32.mrb[72].mxu1 }
 0x900   :  { %v26149_v32 = vsub.f32 %v30357_v7, %v37596_v14  ;;  %v24544_v29 = vpop.f32.mrb[73].mxu1 }
 0x901   :  { %v26148_v38 = vsub.f32 %v24544_v29, %v37597_v36 }
 0x902   :  { %v26197_v22 = vmul.f32 2.0, %v26149_v32  ;;  %v26169_v32 = vmul.f32 2.0, %v37600_v0 }
 0x903   :  { %v26196_v33 = vmul.f32 2.0, %v26148_v38  ;;  %v26168_v38 = vmul.f32 2.0, %v37601_v52 }
 0x904   :  { %v26213_v57 = vadd.f32 0.0009, %v26197_v22 }
 0x905   :  { %v26212_v5 = vadd.f32 0.0009, %v26196_v33 }
 0x906   :  { %v26229_v34 = vmul.f32 %v26213_v57, %v26181_v1  ;;  %v26185_v57 = vadd.f32 0.0001, %v26169_v32 }
 0x907   :  { %v26228_v6 = vmul.f32 %v26212_v5, %v26180_v8  ;;  %v26184_v5 = vadd.f32 0.0001, %v26168_v38 }
 0x908   :  { %v26341_v35 = vmul.f32 %v32388_v37, %v26229_v34 }
 0x909   :  { %v26340_v58 = vmul.f32 %v32390_v46, %v26228_v6 }
 0x90a   :  { %v26360_v63 = vsel %vm26350_vm1, %v26341_v35, 0.0 }
 0x90b   :  { %v26359_v31 = vsel %vm26350_vm1, %v26340_v58, 0.0 }
 0x90c   :  { %v26395_v44 = vadd.f32 %v26360_v63, %v26359_v31 }
 0x90e   :  { %v26396_v40 = vrot.slane %v26395_v44, 4 }
 0x910   :  { %v26397_v30 = vadd.f32 %v26396_v40, %v26395_v44 }
 0x912   :  { %v26398_v13 = vrot.slane %v26397_v30, 2 }
 0x914   :  { %v26399_v60 = vadd.f32 %v26398_v13, %v26397_v30 }
 0x916   :  { %v26400_v28 = vrot.slane %v26399_v60, 1 }
 0x918   :  { %v26401_v26 = vadd.f32 %v26400_v28, %v26399_v60 }
 0x91a   :  { %v26438_v27 = vsel %vm26437_vm5, %v26401_v26, %v26436_v10 }
 0x92b   :  { %v30399_v42 = vpop.f32.mrb[74].mxu1 }
 0x92c   :  { %v26151_v59 = vsub.f32 %v30399_v42, %v37598_v47  ;;  %v25046_v45 = vpop.f32.mrb[75].mxu1  ;;  %v37602_v42 = vld [vmem:[#allocation60_spill] sm:$0xff] }
 0x92d   :  { %v26150_v3 = vsub.f32 %v25046_v45, %v37599_v43  ;;  %v26171_v47 = vmul.f32 2.0, %v37602_v42  ;;  %v37603_v45 = vld [vmem:[#allocation63_spill] sm:$0xff] }
 0x92e   :  { %v26199_v15 = vmul.f32 2.0, %v26151_v59  ;;  %v26170_v43 = vmul.f32 2.0, %v37603_v45 }
 0x92f   :  { %v26198_v23 = vmul.f32 2.0, %v26150_v3 }
 0x930   :  { %v26215_v48 = vadd.f32 0.0009, %v26199_v15 }
 0x931   :  { %v26214_v39 = vadd.f32 0.0009, %v26198_v23  ;;  %v26187_v23 = vadd.f32 0.0001, %v26171_v47 }
 0x932   :  { %v26231_v41 = vmul.f32 %v26215_v48, %v26183_v53  ;;  %v26186_v48 = vadd.f32 0.0001, %v26170_v43 }
 0x933   :  { %v26230_v56 = vmul.f32 %v26214_v39, %v26182_v12 }
 0x934   :  { %v26343_v20 = vmul.f32 %v32392_v54, %v26231_v41 }
 0x935   :  { %v26342_v50 = vmul.f32 %v32394_v19, %v26230_v56 }
 0x936   :  { %v26362_v24 = vsel %vm26350_vm1, %v26343_v20, 0.0 }
 0x937   :  { %v26361_v21 = vsel %vm26350_vm1, %v26342_v50, 0.0 }
 0x938   :  { %v26402_v11 = vadd.f32 %v26362_v24, %v26361_v21 }
 0x93a   :  { %v26403_v18 = vrot.slane %v26402_v11, 4 }
 0x93c   :  { %v26404_v61 = vadd.f32 %v26403_v18, %v26402_v11 }
 0x93e   :  { %v26405_v51 = vrot.slane %v26404_v61, 2 }
 0x940   :  { %v26406_v55 = vadd.f32 %v26405_v51, %v26404_v61 }
 0x942   :  { %v26407_v9 = vrot.slane %v26406_v55, 1 }
 0x944   :  { %v26408_v10 = vadd.f32 %v26407_v9, %v26406_v55 }
 0x946   :  { %v26440_v7 = vsel %vm26439_vm6, %v26408_v10, %v26438_v27 }
 0x957   :  { %v30441_v14 = vpop.f32.mrb[76].mxu1 }
 0x958   :  { %v26153_v29 = vsub.f32 %v30441_v14, %v37600_v0  ;;  %v25548_v36 = vpop.f32.mrb[77].mxu1 }
 0x959   :  { %v26152_v22 = vsub.f32 %v25548_v36, %v37601_v52 }
 0x95a   :  { %v26201_v33 = vmul.f32 2.0, %v26153_v29 }
 0x95b   :  { %v26200_v1 = vmul.f32 2.0, %v26152_v22 }
 0x95c   :  { %v26217_v8 = vadd.f32 0.0009, %v26201_v33 }
 0x95d   :  { %v26216_v34 = vadd.f32 0.0009, %v26200_v1 }
 0x95e   :  { %v26233_v37 = vmul.f32 %v26217_v8, %v26185_v57 }
 0x95f   :  { %v26232_v6 = vmul.f32 %v26216_v34, %v26184_v5 }
 0x960   :  { %v26345_v46 = vmul.f32 %v32396_v16, %v26233_v37 }
 0x961   :  { %v26344_v35 = vmul.f32 %v32398_v4, %v26232_v6 }
 0x962   :  { %v26364_v58 = vsel %vm26350_vm1, %v26345_v46, 0.0 }
 0x963   :  { %v26363_v63 = vsel %vm26350_vm1, %v26344_v35, 0.0 }
 0x964   :  { %v26409_v31 = vadd.f32 %v26364_v58, %v26363_v63 }
 0x966   :  { %v26410_v44 = vrot.slane %v26409_v31, 4 }
 0x968   :  { %v26411_v40 = vadd.f32 %v26410_v44, %v26409_v31 }
 0x96a   :  { %v26412_v30 = vrot.slane %v26411_v40, 2 }
 0x96c   :  { %v26413_v13 = vadd.f32 %v26412_v30, %v26411_v40 }
 0x96e   :  { %v26414_v60 = vrot.slane %v26413_v13, 1 }
 0x970   :  { %v26415_v28 = vadd.f32 %v26414_v60, %v26413_v13 }
 0x972   :  { %v26442_v26 = vsel %vm26441_vm7, %v26415_v28, %v26440_v7 }
 0x983   :  { %v30483_v27 = vpop.f32.mrb[78].mxu1 }
 0x984   :  { %v26155_v49 = vsub.f32 %v30483_v27, %v37602_v42  ;;  %v26050_v59 = vpop.f32.mrb[79].mxu1 }
 0x985   :  { %v26154_v17 = vsub.f32 %v26050_v59, %v37603_v45 }
 0x986   :  { %v26203_v3 = vmul.f32 2.0, %v26155_v49 }
 0x987   :  { %v26202_v15 = vmul.f32 2.0, %v26154_v17 }
 0x988   :  { %v26219_v53 = vadd.f32 0.0009, %v26203_v3 }
 0x989   :  { %v26218_v12 = vadd.f32 0.0009, %v26202_v15 }
 0x98a   :  { %v26235_v39 = vmul.f32 %v26219_v53, %v26187_v23 }
 0x98b   :  { %v26234_v41 = vmul.f32 %v26218_v12, %v26186_v48 }
 0x98c   :  { %v26347_v54 = vmul.f32 %v32400_v2, %v26235_v39 }
 0x98d   :  { %v26346_v56 = vmul.f32 %v32402_v25, %v26234_v41 }
 0x98e   :  { %v26366_v19 = vsel %vm26350_vm1, %v26347_v54, 0.0 }
 0x98f   :  { %v26365_v20 = vsel %vm26350_vm1, %v26346_v56, 0.0 }
 0x990   :  { %v26416_v50 = vadd.f32 %v26366_v19, %v26365_v20 }
 0x992   :  { %v26417_v24 = vrot.slane %v26416_v50, 4 }
 0x994   :  { %v26418_v21 = vadd.f32 %v26417_v24, %v26416_v50 }
 0x996   :  { %v26419_v11 = vrot.slane %v26418_v21, 2 }
 0x998   :  { %v26420_v18 = vadd.f32 %v26419_v11, %v26418_v21 }
 0x99a   :  { %v26421_v61 = vrot.slane %v26420_v18, 1 }
 0x99c   :  { %v26422_v51 = vadd.f32 %v26421_v61, %v26420_v18 }
 0x99e   :  { %v26444_v55 = vsel %vm26443_vm8, %v26422_v51, %v26442_v26 }
 0x99f   :  { %26446 = vst [vmem:[#allocation10] sm:$0xff] %v26444_v55 }
 0x9a0   :  { %32562 = shalt.err (!%p32559_p8)
}
 0x9a1   :  { %s32563_s13 = scalar_lea.hbm %s36300_s4, 128 }
 0x9a2   :  { %p32564_p9 = scmp.ne.s32.totalorder %s36300_s4, %s32563_s13  ;;  %p32567_p10 = scmp.lt.u32.totalorder %s32563_s13, %s36300_s4 }
 0x9a4   :  { %p32569_p11 = pnand %p32567_p10, %p32564_p9 }
 0x9a6   :  { %32572 = shalt.err (!%p32569_p11)
}
 0x9a7   :  { %26456 = dma.vmem_to_hbm [thread:$0]  %s26454_s27, 128, %s36300_s4, [#allocation4]  }
 0x9a8   :  { %32579 = dma.done.wait [#allocation4], 128  }
 0x9a9   :  { %32580 = vsyncadd [#allocation4], 4294967168 }
 0x9aa   :  { %26460 = vsyncpa [#allocation3], 1 }
 0x9ab   :  { %26461 = vsyncpa [#allocation6], 1 }
 0x9ac   :  { %26462 = vsyncpa [#allocation9], 1 }
 0x9ad   :  { %26463 = vsyncpa [#allocation4], 1 }

</bundles_post_ra>
